<compile_context>
chip_gen: v7x
topology: tpu7x:2x2x1
jax: 0.10.0
libtpu: 0.0.40
codegen_flags: <defaults>
</compile_context>

<pallas_src>
import functools

import jax
import jax.numpy as jnp
from jax import lax
from jax.experimental import pallas as pl
from jax.experimental.pallas import tpu as pltpu

_NEG_SLOPE = 0.1   # nn.LeakyReLU(negative_slope=0.1) in Triple
_BN_EPS = 1e-5     # nn.BatchNorm2d default eps


def _triple_kernel(x_ref,
                   w1_ref, s1_ref, b1_ref,
                   w2_ref, s2_ref, b2_ref,
                   w3t_ref, s3_ref, b3_ref,
                   o_ref,
                   p0_ref, p1_ref):
    # x_ref  : (1, H, W, Cin)        one batch element (NHWC)
    # w1/w2  : (9*Cin_k, Cout_k)     im2col weights, (ky,kx,ci) major->minor in K
    # w3t    : (Cout, 9*Cmid)        final-layer weights, pre-transposed
    # s1/b1, s2/b2 : (1, C)          folded BN scale / bias (eval mode)
    # s3/b3  : (Cout, 1)             folded BN scale / bias for transposed layer
    # o_ref  : (1, Cout, H*W)        lane-dense output block (full 128-lane rows)
    # p0/p1  : (H+2, W+2, C) VMEM    zero-padded activation scratch
    _, h, w, _ = x_ref.shape

    def store_padded(dst_ref, val_hwc, zero_halo=True):
        # In-kernel "same"-padding: zero ONLY the 1-element halo, then write
        # the interior.  Unconditional per grid step (megacore-safe).
        c = dst_ref.shape[-1]
        if zero_halo:
            zrow = jnp.zeros((1, w + 2, c), jnp.float32)
            zcol = jnp.zeros((h + 2, 1, c), jnp.float32)
            dst_ref[0:1, :, :] = zrow
            dst_ref[h + 1:h + 2, :, :] = zrow
            dst_ref[:, 0:1, :] = zcol
            dst_ref[:, w + 1:w + 2, :] = zcol
        dst_ref[1:h + 1, 1:w + 1, :] = val_hwc

    def im2col(xp_ref):
        # One (H*W, 9*Cin) slab per layer -> a single MXU matmul.
        c_in = xp_ref.shape[-1]
        taps = []
        for ky in range(3):
            rows = xp_ref[ky:ky + h, :, :]               # (h, W+2, c_in)
            for kx in range(3):
                taps.append(rows[:, kx:kx + w, :])       # (h, w, c_in)
        return jnp.concatenate(taps, axis=-1).reshape(h * w, 9 * c_in)

    def lrelu(y):
        return jnp.where(y >= 0, y, _NEG_SLOPE * y)

    cmid = p1_ref.shape[-1]

    # ---- layer 1 ----------------------------------------------------------
    store_padded(p0_ref, x_ref[0])
    slab = im2col(p0_ref)
    y1 = jnp.dot(slab.astype(w1_ref.dtype), w1_ref[...],
                 preferred_element_type=jnp.float32)          # (h*w, cmid) f32
    y1 = lrelu(y1 * s1_ref[0, :] + b1_ref[0, :])

    # ---- layer 2 ----------------------------------------------------------
    store_padded(p1_ref, y1.reshape(h, w, cmid))
    slab = im2col(p1_ref)
    y2 = jnp.dot(slab.astype(w2_ref.dtype), w2_ref[...],
                 preferred_element_type=jnp.float32)          # (h*w, cmid) f32
    y2 = lrelu(y2 * s2_ref[0, :] + b2_ref[0, :])

    # ---- layer 3 (reuse p1: y2 is a materialized value, halo already 0) ----
    store_padded(p1_ref, y2.reshape(h, w, cmid), zero_halo=False)
    slab = im2col(p1_ref)
    # Transposed-output matmul: (Cout, K) x (H*W, K) contracted on K
    # -> (Cout, H*W).  MXU-native (same dimension numbers as q @ k.T).
    y3t = lax.dot_general(w3t_ref[...], slab.astype(w3t_ref.dtype),
                          (((1,), (1,)), ((), ())),
                          preferred_element_type=jnp.float32)  # (cout, h*w) f32
    y3t = lrelu(y3t * s3_ref[...] + b3_ref[...])
    # Lane-dense store: (cout, h*w) = (8, 256) -> unmasked full-lane rows.
    o_ref[0, :, :] = y3t.astype(o_ref.dtype)


def _full_spec(shape):
    # Whole-array block, broadcast across the batch grid axis.
    return pl.BlockSpec(shape, lambda *_: (0,) * len(shape))


def triple_pallas_nhwc(x_nhwc, params, *, mxu_dtype=jnp.bfloat16):
    """x_nhwc: (N, H, W, Cin) f32; params: 3 x (w_hwio, bn_scale, bn_bias).

    Returns (N, Cout, H*W) f32 (NCHW modulo a trivial reshape)."""
    n, h, w, cin = x_nhwc.shape
    (w1, s1, b1), (w2, s2, b2), (w3, s3, b3) = params
    cmid = w1.shape[-1]
    cout = w3.shape[-1]

    def wmat(w_hwio):     # (3,3,Ci,Co) -> (9*Ci, Co), (ky,kx,ci) major->minor
        kh, kw, ci, co = w_hwio.shape
        return w_hwio.reshape(kh * kw * ci, co).astype(mxu_dtype)

    def wmat_t(w_hwio):   # (3,3,Ci,Co) -> (Co, 9*Ci) for the transposed dot
        kh, kw, ci, co = w_hwio.shape
        return jnp.transpose(w_hwio.reshape(kh * kw * ci, co)).astype(mxu_dtype)

    def vrow(v):          # (C,) -> (1, C)
        return v.reshape(1, -1).astype(jnp.float32)

    def vcol(v):          # (C,) -> (C, 1)
        return v.reshape(-1, 1).astype(jnp.float32)

    args = (x_nhwc.astype(jnp.float32),
            wmat(w1), vrow(s1), vrow(b1),
            wmat(w2), vrow(s2), vrow(b2),
            wmat_t(w3), vcol(s3), vcol(b3))

    in_specs = [pl.BlockSpec((1, h, w, cin), lambda i: (i, 0, 0, 0))]
    in_specs += [_full_spec(a.shape) for a in args[1:]]

    y = pl.pallas_call(
        _triple_kernel,
        out_shape=jax.ShapeDtypeStruct((n, cout, h * w), jnp.float32),
        grid=(n,),
        in_specs=in_specs,
        out_specs=pl.BlockSpec((1, cout, h * w), lambda i: (i, 0, 0)),
        scratch_shapes=[
            pltpu.VMEM((h + 2, w + 2, cin), jnp.float32),
            pltpu.VMEM((h + 2, w + 2, cmid), jnp.float32),
        ],
        compiler_params=pltpu.CompilerParams(
            dimension_semantics=("parallel",)),
    )(*args)
    return y


def triple_forward(x_nchw, params, *, mxu_dtype=jnp.bfloat16):
    # NCHW in / NCHW out (PyTorch convention); NHWC inside the kernel.
    n, _, h, w = x_nchw.shape
    x = jnp.transpose(x_nchw, (0, 2, 3, 1))
    y = triple_pallas_nhwc(x, params, mxu_dtype=mxu_dtype)   # (n, cout, h*w)
    return y.reshape(n, y.shape[1], h, w)


def _fold_bn(gamma, beta, running_mean, running_var, eps=_BN_EPS):
    scale = gamma / jnp.sqrt(running_var + eps)
    bias = beta - running_mean * scale
    return scale, bias


def make_triple_params(key, in_channels, out_channels):
    """Deterministic synthetic parameters matching Triple.__init__ shapes."""
    mid_channels = (in_channels + out_channels) // 2
    chans = [(in_channels, mid_channels),
             (mid_channels, mid_channels),
             (mid_channels, out_channels)]
    params = []
    for (cin, cout) in chans:
        key, kw, kg, kb = jax.random.split(key, 4)
        # Conv2d weight: PyTorch (Cout, Cin, 3, 3) would need a (2,3,1,0)
        # transpose; synthetic weights are generated directly in HWIO.
        w = (jax.random.normal(kw, (3, 3, cin, cout), jnp.float32)
             * (1.0 / jnp.sqrt(9.0 * cin)))
        gamma = 1.0 + 0.1 * jax.random.normal(kg, (cout,), jnp.float32)
        beta = 0.1 * jax.random.normal(kb, (cout,), jnp.float32)
        # BN eval-mode running stats (PyTorch defaults).
        running_mean = jnp.zeros((cout,), jnp.float32)
        running_var = jnp.ones((cout,), jnp.float32)
        scale, bias = _fold_bn(gamma, beta, running_mean, running_var)
        params.append((w, scale, bias))
    return params


def _triple_reference(x_nchw, params):
    # Pure-XLA reference (same folded eval-mode BN) for correctness checking.
    x = jnp.transpose(x_nchw, (0, 2, 3, 1))
    for (w_hwio, scale, bias) in params:
        x = lax.conv_general_dilated(
            x, w_hwio, window_strides=(1, 1), padding="SAME",
            dimension_numbers=("NHWC", "HWIO", "NHWC"),
            precision=lax.Precision.HIGHEST)
        x = x * scale + bias
        x = jnp.where(x >= 0, x, _NEG_SLOPE * x)
    return jnp.transpose(x, (0, 3, 1, 2))


if __name__ == "__main__":
    key = jax.random.PRNGKey(0)
    kx, kp = jax.random.split(key)

    N, Cin, Cout, H, W = 2, 4, 8, 16, 16
    x = jax.random.normal(kx, (N, Cin, H, W), jnp.float32)
    params = make_triple_params(kp, Cin, Cout)

    ref = jax.block_until_ready(_triple_reference(x, params))

    # Default path: bf16 MXU operands (f32 accumulate + f32 epilogue).
    out = jax.block_until_ready(jax.jit(triple_forward)(x, params))
    assert out.shape == (N, Cout, H, W), out.shape
    assert bool(jnp.all(jnp.isfinite(out)))
    err_bf16 = float(jnp.max(jnp.abs(out - ref)))
    assert err_bf16 < 5e-2, f"bf16-MXU max abs error vs XLA reference: {err_bf16}"

    # f32-MXU path: tight correctness check of the kernel structure.
    out_f32 = jax.block_until_ready(
        jax.jit(functools.partial(triple_forward, mxu_dtype=jnp.float32))(
            x, params))
    err_f32 = float(jnp.max(jnp.abs(out_f32 - ref)))
    assert err_f32 < 1e-3, f"f32-MXU max abs error vs XLA reference: {err_f32}"

    print("KERNEL_OK")
</pallas_src>

<mosaic_0001>
module attributes {stable_mosaic.version = 11 : i64} {
  func.func @_triple_kernel(%arg0: i32, %arg1: memref<1x16x16x4xf32, #tpu.memory_space<vmem>>, %arg2: memref<36x6xbf16, #tpu.memory_space<vmem>>, %arg3: memref<1x6xf32, #tpu.memory_space<vmem>>, %arg4: memref<1x6xf32, #tpu.memory_space<vmem>>, %arg5: memref<54x6xbf16, #tpu.memory_space<vmem>>, %arg6: memref<1x6xf32, #tpu.memory_space<vmem>>, %arg7: memref<1x6xf32, #tpu.memory_space<vmem>>, %arg8: memref<8x54xbf16, #tpu.memory_space<vmem>>, %arg9: memref<8x1xf32, #tpu.memory_space<vmem>>, %arg10: memref<8x1xf32, #tpu.memory_space<vmem>>, %arg11: memref<1x8x256xf32, #tpu.memory_space<vmem>>, %arg12: memref<18x18x4xf32, #tpu.memory_space<vmem>>, %arg13: memref<18x18x6xf32, #tpu.memory_space<vmem>>) attributes {dimension_semantics = [#tpu.dimension_semantics<parallel>], iteration_bounds = array<i64: 2>, scalar_prefetch = 0 : i64, scratch_operands = 2 : i64, tpu.core_type = #tpu.core_type<tc>, window_params = [{transform_indices = @transform_0, window_bounds = array<i64: 1, 16, 16, 4>}, {pipeline_mode = #tpu.pipeline_mode<synchronous>, transform_indices = @transform_1, window_bounds = array<i64: 36, 6>}, {pipeline_mode = #tpu.pipeline_mode<synchronous>, transform_indices = @transform_2, window_bounds = array<i64: 1, 6>}, {pipeline_mode = #tpu.pipeline_mode<synchronous>, transform_indices = @transform_3, window_bounds = array<i64: 1, 6>}, {pipeline_mode = #tpu.pipeline_mode<synchronous>, transform_indices = @transform_4, window_bounds = array<i64: 54, 6>}, {pipeline_mode = #tpu.pipeline_mode<synchronous>, transform_indices = @transform_5, window_bounds = array<i64: 1, 6>}, {pipeline_mode = #tpu.pipeline_mode<synchronous>, transform_indices = @transform_6, window_bounds = array<i64: 1, 6>}, {pipeline_mode = #tpu.pipeline_mode<synchronous>, transform_indices = @transform_7, window_bounds = array<i64: 8, 54>}, {pipeline_mode = #tpu.pipeline_mode<synchronous>, transform_indices = @transform_8, window_bounds = array<i64: 8, 1>}, {pipeline_mode = #tpu.pipeline_mode<synchronous>, transform_indices = @transform_9, window_bounds = array<i64: 8, 1>}, {transform_indices = @transform_10, window_bounds = array<i64: 1, 8, 256>}]} {
    %c0 = arith.constant 0 : index
    %c0_0 = arith.constant 0 : index
    %c0_1 = arith.constant 0 : index
    %c0_2 = arith.constant 0 : index
    %0 = vector.load %arg1[%c0, %c0_0, %c0_1, %c0_2] : memref<1x16x16x4xf32, #tpu.memory_space<vmem>>, vector<1x16x16x4xf32>
    %1 = vector.shape_cast %0 : vector<1x16x16x4xf32> to vector<16x16x4xf32>
    %cst = arith.constant 0.000000e+00 : f32
    %2 = vector.broadcast %cst : f32 to vector<1x18x4xf32>
    %cst_3 = arith.constant 0.000000e+00 : f32
    %3 = vector.broadcast %cst_3 : f32 to vector<18x1x4xf32>
    %c0_4 = arith.constant 0 : index
    %c0_5 = arith.constant 0 : index
    %c0_6 = arith.constant 0 : index
    %4 = vector.load %arg12[%c0_4, %c0_5, %c0_6] : memref<18x18x4xf32, #tpu.memory_space<vmem>>, vector<1x18x4xf32>
    tpu.vector_store %arg12[%c0_4, %c0_5, %c0_6], %2 {strides = array<i32>} : memref<18x18x4xf32, #tpu.memory_space<vmem>>, vector<1x18x4xf32>,
    %c17 = arith.constant 17 : index
    %c0_7 = arith.constant 0 : index
    %c0_8 = arith.constant 0 : index
    %5 = vector.load %arg12[%c17, %c0_7, %c0_8] : memref<18x18x4xf32, #tpu.memory_space<vmem>>, vector<1x18x4xf32>
    tpu.vector_store %arg12[%c17, %c0_7, %c0_8], %2 {strides = array<i32>} : memref<18x18x4xf32, #tpu.memory_space<vmem>>, vector<1x18x4xf32>,
    %c0_9 = arith.constant 0 : index
    %c0_10 = arith.constant 0 : index
    %c0_11 = arith.constant 0 : index
    %6 = vector.load %arg12[%c0_9, %c0_10, %c0_11] : memref<18x18x4xf32, #tpu.memory_space<vmem>>, vector<18x1x4xf32>
    tpu.vector_store %arg12[%c0_9, %c0_10, %c0_11], %3 {strides = array<i32>} : memref<18x18x4xf32, #tpu.memory_space<vmem>>, vector<18x1x4xf32>,
    %c0_12 = arith.constant 0 : index
    %c17_13 = arith.constant 17 : index
    %c0_14 = arith.constant 0 : index
    %7 = vector.load %arg12[%c0_12, %c17_13, %c0_14] : memref<18x18x4xf32, #tpu.memory_space<vmem>>, vector<18x1x4xf32>
    tpu.vector_store %arg12[%c0_12, %c17_13, %c0_14], %3 {strides = array<i32>} : memref<18x18x4xf32, #tpu.memory_space<vmem>>, vector<18x1x4xf32>,
    %c1 = arith.constant 1 : index
    %c1_15 = arith.constant 1 : index
    %c0_16 = arith.constant 0 : index
    %8 = vector.load %arg12[%c1, %c1_15, %c0_16] : memref<18x18x4xf32, #tpu.memory_space<vmem>>, vector<16x16x4xf32>
    tpu.vector_store %arg12[%c1, %c1_15, %c0_16], %1 {strides = array<i32>} : memref<18x18x4xf32, #tpu.memory_space<vmem>>, vector<16x16x4xf32>,
    %c0_17 = arith.constant 0 : index
    %c0_18 = arith.constant 0 : index
    %c0_19 = arith.constant 0 : index
    %9 = vector.load %arg12[%c0_17, %c0_18, %c0_19] : memref<18x18x4xf32, #tpu.memory_space<vmem>>, vector<16x18x4xf32>
    %10 = vector.extract_strided_slice %9 {offsets = [0, 0, 0], sizes = [16, 16, 4], strides = [1, 1, 1]} : vector<16x18x4xf32> to vector<16x16x4xf32>
    %11 = vector.extract_strided_slice %9 {offsets = [0, 1, 0], sizes = [16, 16, 4], strides = [1, 1, 1]} : vector<16x18x4xf32> to vector<16x16x4xf32>
    %12 = vector.extract_strided_slice %9 {offsets = [0, 2, 0], sizes = [16, 16, 4], strides = [1, 1, 1]} : vector<16x18x4xf32> to vector<16x16x4xf32>
    %c1_20 = arith.constant 1 : index
    %c0_21 = arith.constant 0 : index
    %c0_22 = arith.constant 0 : index
    %13 = vector.load %arg12[%c1_20, %c0_21, %c0_22] : memref<18x18x4xf32, #tpu.memory_space<vmem>>, vector<16x18x4xf32>
    %14 = vector.extract_strided_slice %13 {offsets = [0, 0, 0], sizes = [16, 16, 4], strides = [1, 1, 1]} : vector<16x18x4xf32> to vector<16x16x4xf32>
    %15 = vector.extract_strided_slice %13 {offsets = [0, 1, 0], sizes = [16, 16, 4], strides = [1, 1, 1]} : vector<16x18x4xf32> to vector<16x16x4xf32>
    %16 = vector.extract_strided_slice %13 {offsets = [0, 2, 0], sizes = [16, 16, 4], strides = [1, 1, 1]} : vector<16x18x4xf32> to vector<16x16x4xf32>
    %c2 = arith.constant 2 : index
    %c0_23 = arith.constant 0 : index
    %c0_24 = arith.constant 0 : index
    %17 = vector.load %arg12[%c2, %c0_23, %c0_24] : memref<18x18x4xf32, #tpu.memory_space<vmem>>, vector<16x18x4xf32>
    %18 = vector.extract_strided_slice %17 {offsets = [0, 0, 0], sizes = [16, 16, 4], strides = [1, 1, 1]} : vector<16x18x4xf32> to vector<16x16x4xf32>
    %19 = vector.extract_strided_slice %17 {offsets = [0, 1, 0], sizes = [16, 16, 4], strides = [1, 1, 1]} : vector<16x18x4xf32> to vector<16x16x4xf32>
    %20 = vector.extract_strided_slice %17 {offsets = [0, 2, 0], sizes = [16, 16, 4], strides = [1, 1, 1]} : vector<16x18x4xf32> to vector<16x16x4xf32>
    %21 = tpu.concatenate %10, %11, %12, %14, %15, %16, %18, %19, %20 in 2 : vector<16x16x4xf32>, vector<16x16x4xf32>, vector<16x16x4xf32>, vector<16x16x4xf32>, vector<16x16x4xf32>, vector<16x16x4xf32>, vector<16x16x4xf32>, vector<16x16x4xf32>, vector<16x16x4xf32> -> vector<16x16x36xf32>
    %22 = vector.shape_cast %21 : vector<16x16x36xf32> to vector<256x36xf32>
    %23 = arith.truncf %22 : vector<256x36xf32> to vector<256x36xbf16>
    %c0_25 = arith.constant 0 : index
    %c0_26 = arith.constant 0 : index
    %24 = vector.load %arg2[%c0_25, %c0_26] : memref<36x6xbf16, #tpu.memory_space<vmem>>, vector<36x6xbf16>
    %cst_27 = arith.constant dense<0.000000e+00> : vector<256x6xf32>
    %25 = tpu.matmul %23, %24, %cst_27 {dimension_numbers = #tpu.dot_dimension_numbers<[1], [0], [0], [1], [0, 0, 1, 1], [], []>} : vector<256x36xbf16>, vector<36x6xbf16>, vector<256x6xf32> -> vector<256x6xf32>
    %c0_28 = arith.constant 0 : index
    %c0_29 = arith.constant 0 : index
    %26 = vector.load %arg3[%c0_28, %c0_29] : memref<1x6xf32, #tpu.memory_space<vmem>>, vector<1x6xf32>
    %27 = vector.shape_cast %26 : vector<1x6xf32> to vector<6xf32>
    %28 = vector.shape_cast %27 : vector<6xf32> to vector<1x6xf32>
    %29 = vector.broadcast %28 : vector<1x6xf32> to vector<256x6xf32>
    %30 = arith.mulf %25, %29 : vector<256x6xf32>
    %c0_30 = arith.constant 0 : index
    %c0_31 = arith.constant 0 : index
    %31 = vector.load %arg4[%c0_30, %c0_31] : memref<1x6xf32, #tpu.memory_space<vmem>>, vector<1x6xf32>
    %32 = vector.shape_cast %31 : vector<1x6xf32> to vector<6xf32>
    %33 = vector.shape_cast %32 : vector<6xf32> to vector<1x6xf32>
    %34 = vector.broadcast %33 : vector<1x6xf32> to vector<256x6xf32>
    %35 = arith.addf %30, %34 : vector<256x6xf32>
    %cst_32 = arith.constant 0.000000e+00 : f32
    %36 = vector.broadcast %cst_32 : f32 to vector<256x6xf32>
    %37 = arith.cmpf oge, %35, %36 : vector<256x6xf32>
    %cst_33 = arith.constant 1.000000e-01 : f32
    %38 = vector.broadcast %cst_33 : f32 to vector<256x6xf32>
    %39 = arith.mulf %38, %35 : vector<256x6xf32>
    %40 = arith.select %37, %35, %39 : vector<256x6xi1>, vector<256x6xf32>
    %41 = vector.shape_cast %40 : vector<256x6xf32> to vector<16x16x6xf32>
    %cst_34 = arith.constant 0.000000e+00 : f32
    %42 = vector.broadcast %cst_34 : f32 to vector<1x18x6xf32>
    %cst_35 = arith.constant 0.000000e+00 : f32
    %43 = vector.broadcast %cst_35 : f32 to vector<18x1x6xf32>
    %c0_36 = arith.constant 0 : index
    %c0_37 = arith.constant 0 : index
    %c0_38 = arith.constant 0 : index
    %44 = vector.load %arg13[%c0_36, %c0_37, %c0_38] : memref<18x18x6xf32, #tpu.memory_space<vmem>>, vector<1x18x6xf32>
    tpu.vector_store %arg13[%c0_36, %c0_37, %c0_38], %42 {strides = array<i32>} : memref<18x18x6xf32, #tpu.memory_space<vmem>>, vector<1x18x6xf32>,
    %c17_39 = arith.constant 17 : index
    %c0_40 = arith.constant 0 : index
    %c0_41 = arith.constant 0 : index
    %45 = vector.load %arg13[%c17_39, %c0_40, %c0_41] : memref<18x18x6xf32, #tpu.memory_space<vmem>>, vector<1x18x6xf32>
    tpu.vector_store %arg13[%c17_39, %c0_40, %c0_41], %42 {strides = array<i32>} : memref<18x18x6xf32, #tpu.memory_space<vmem>>, vector<1x18x6xf32>,
    %c0_42 = arith.constant 0 : index
    %c0_43 = arith.constant 0 : index
    %c0_44 = arith.constant 0 : index
    %46 = vector.load %arg13[%c0_42, %c0_43, %c0_44] : memref<18x18x6xf32, #tpu.memory_space<vmem>>, vector<18x1x6xf32>
    tpu.vector_store %arg13[%c0_42, %c0_43, %c0_44], %43 {strides = array<i32>} : memref<18x18x6xf32, #tpu.memory_space<vmem>>, vector<18x1x6xf32>,
    %c0_45 = arith.constant 0 : index
    %c17_46 = arith.constant 17 : index
    %c0_47 = arith.constant 0 : index
    %47 = vector.load %arg13[%c0_45, %c17_46, %c0_47] : memref<18x18x6xf32, #tpu.memory_space<vmem>>, vector<18x1x6xf32>
    tpu.vector_store %arg13[%c0_45, %c17_46, %c0_47], %43 {strides = array<i32>} : memref<18x18x6xf32, #tpu.memory_space<vmem>>, vector<18x1x6xf32>,
    %c1_48 = arith.constant 1 : index
    %c1_49 = arith.constant 1 : index
    %c0_50 = arith.constant 0 : index
    %48 = vector.load %arg13[%c1_48, %c1_49, %c0_50] : memref<18x18x6xf32, #tpu.memory_space<vmem>>, vector<16x16x6xf32>
    tpu.vector_store %arg13[%c1_48, %c1_49, %c0_50], %41 {strides = array<i32>} : memref<18x18x6xf32, #tpu.memory_space<vmem>>, vector<16x16x6xf32>,
    %c0_51 = arith.constant 0 : index
    %c0_52 = arith.constant 0 : index
    %c0_53 = arith.constant 0 : index
    %49 = vector.load %arg13[%c0_51, %c0_52, %c0_53] : memref<18x18x6xf32, #tpu.memory_space<vmem>>, vector<16x18x6xf32>
    %50 = vector.extract_strided_slice %49 {offsets = [0, 0, 0], sizes = [16, 16, 6], strides = [1, 1, 1]} : vector<16x18x6xf32> to vector<16x16x6xf32>
    %51 = vector.extract_strided_slice %49 {offsets = [0, 1, 0], sizes = [16, 16, 6], strides = [1, 1, 1]} : vector<16x18x6xf32> to vector<16x16x6xf32>
    %52 = vector.extract_strided_slice %49 {offsets = [0, 2, 0], sizes = [16, 16, 6], strides = [1, 1, 1]} : vector<16x18x6xf32> to vector<16x16x6xf32>
    %c1_54 = arith.constant 1 : index
    %c0_55 = arith.constant 0 : index
    %c0_56 = arith.constant 0 : index
    %53 = vector.load %arg13[%c1_54, %c0_55, %c0_56] : memref<18x18x6xf32, #tpu.memory_space<vmem>>, vector<16x18x6xf32>
    %54 = vector.extract_strided_slice %53 {offsets = [0, 0, 0], sizes = [16, 16, 6], strides = [1, 1, 1]} : vector<16x18x6xf32> to vector<16x16x6xf32>
    %55 = vector.extract_strided_slice %53 {offsets = [0, 1, 0], sizes = [16, 16, 6], strides = [1, 1, 1]} : vector<16x18x6xf32> to vector<16x16x6xf32>
    %56 = vector.extract_strided_slice %53 {offsets = [0, 2, 0], sizes = [16, 16, 6], strides = [1, 1, 1]} : vector<16x18x6xf32> to vector<16x16x6xf32>
    %c2_57 = arith.constant 2 : index
    %c0_58 = arith.constant 0 : index
    %c0_59 = arith.constant 0 : index
    %57 = vector.load %arg13[%c2_57, %c0_58, %c0_59] : memref<18x18x6xf32, #tpu.memory_space<vmem>>, vector<16x18x6xf32>
    %58 = vector.extract_strided_slice %57 {offsets = [0, 0, 0], sizes = [16, 16, 6], strides = [1, 1, 1]} : vector<16x18x6xf32> to vector<16x16x6xf32>
    %59 = vector.extract_strided_slice %57 {offsets = [0, 1, 0], sizes = [16, 16, 6], strides = [1, 1, 1]} : vector<16x18x6xf32> to vector<16x16x6xf32>
    %60 = vector.extract_strided_slice %57 {offsets = [0, 2, 0], sizes = [16, 16, 6], strides = [1, 1, 1]} : vector<16x18x6xf32> to vector<16x16x6xf32>
    %61 = tpu.concatenate %50, %51, %52, %54, %55, %56, %58, %59, %60 in 2 : vector<16x16x6xf32>, vector<16x16x6xf32>, vector<16x16x6xf32>, vector<16x16x6xf32>, vector<16x16x6xf32>, vector<16x16x6xf32>, vector<16x16x6xf32>, vector<16x16x6xf32>, vector<16x16x6xf32> -> vector<16x16x54xf32>
    %62 = vector.shape_cast %61 : vector<16x16x54xf32> to vector<256x54xf32>
    %63 = arith.truncf %62 : vector<256x54xf32> to vector<256x54xbf16>
    %c0_60 = arith.constant 0 : index
    %c0_61 = arith.constant 0 : index
    %64 = vector.load %arg5[%c0_60, %c0_61] : memref<54x6xbf16, #tpu.memory_space<vmem>>, vector<54x6xbf16>
    %cst_62 = arith.constant dense<0.000000e+00> : vector<256x6xf32>
    %65 = tpu.matmul %63, %64, %cst_62 {dimension_numbers = #tpu.dot_dimension_numbers<[1], [0], [0], [1], [0, 0, 1, 1], [], []>} : vector<256x54xbf16>, vector<54x6xbf16>, vector<256x6xf32> -> vector<256x6xf32>
    %c0_63 = arith.constant 0 : index
    %c0_64 = arith.constant 0 : index
    %66 = vector.load %arg6[%c0_63, %c0_64] : memref<1x6xf32, #tpu.memory_space<vmem>>, vector<1x6xf32>
    %67 = vector.shape_cast %66 : vector<1x6xf32> to vector<6xf32>
    %68 = vector.shape_cast %67 : vector<6xf32> to vector<1x6xf32>
    %69 = vector.broadcast %68 : vector<1x6xf32> to vector<256x6xf32>
    %70 = arith.mulf %65, %69 : vector<256x6xf32>
    %c0_65 = arith.constant 0 : index
    %c0_66 = arith.constant 0 : index
    %71 = vector.load %arg7[%c0_65, %c0_66] : memref<1x6xf32, #tpu.memory_space<vmem>>, vector<1x6xf32>
    %72 = vector.shape_cast %71 : vector<1x6xf32> to vector<6xf32>
    %73 = vector.shape_cast %72 : vector<6xf32> to vector<1x6xf32>
    %74 = vector.broadcast %73 : vector<1x6xf32> to vector<256x6xf32>
    %75 = arith.addf %70, %74 : vector<256x6xf32>
    %cst_67 = arith.constant 0.000000e+00 : f32
    %76 = vector.broadcast %cst_67 : f32 to vector<256x6xf32>
    %77 = arith.cmpf oge, %75, %76 : vector<256x6xf32>
    %cst_68 = arith.constant 1.000000e-01 : f32
    %78 = vector.broadcast %cst_68 : f32 to vector<256x6xf32>
    %79 = arith.mulf %78, %75 : vector<256x6xf32>
    %80 = arith.select %77, %75, %79 : vector<256x6xi1>, vector<256x6xf32>
    %81 = vector.shape_cast %80 : vector<256x6xf32> to vector<16x16x6xf32>
    %c1_69 = arith.constant 1 : index
    %c1_70 = arith.constant 1 : index
    %c0_71 = arith.constant 0 : index
    %82 = vector.load %arg13[%c1_69, %c1_70, %c0_71] : memref<18x18x6xf32, #tpu.memory_space<vmem>>, vector<16x16x6xf32>
    tpu.vector_store %arg13[%c1_69, %c1_70, %c0_71], %81 {strides = array<i32>} : memref<18x18x6xf32, #tpu.memory_space<vmem>>, vector<16x16x6xf32>,
    %c0_72 = arith.constant 0 : index
    %c0_73 = arith.constant 0 : index
    %c0_74 = arith.constant 0 : index
    %83 = vector.load %arg13[%c0_72, %c0_73, %c0_74] : memref<18x18x6xf32, #tpu.memory_space<vmem>>, vector<16x18x6xf32>
    %84 = vector.extract_strided_slice %83 {offsets = [0, 0, 0], sizes = [16, 16, 6], strides = [1, 1, 1]} : vector<16x18x6xf32> to vector<16x16x6xf32>
    %85 = vector.extract_strided_slice %83 {offsets = [0, 1, 0], sizes = [16, 16, 6], strides = [1, 1, 1]} : vector<16x18x6xf32> to vector<16x16x6xf32>
    %86 = vector.extract_strided_slice %83 {offsets = [0, 2, 0], sizes = [16, 16, 6], strides = [1, 1, 1]} : vector<16x18x6xf32> to vector<16x16x6xf32>
    %c1_75 = arith.constant 1 : index
    %c0_76 = arith.constant 0 : index
    %c0_77 = arith.constant 0 : index
    %87 = vector.load %arg13[%c1_75, %c0_76, %c0_77] : memref<18x18x6xf32, #tpu.memory_space<vmem>>, vector<16x18x6xf32>
    %88 = vector.extract_strided_slice %87 {offsets = [0, 0, 0], sizes = [16, 16, 6], strides = [1, 1, 1]} : vector<16x18x6xf32> to vector<16x16x6xf32>
    %89 = vector.extract_strided_slice %87 {offsets = [0, 1, 0], sizes = [16, 16, 6], strides = [1, 1, 1]} : vector<16x18x6xf32> to vector<16x16x6xf32>
    %90 = vector.extract_strided_slice %87 {offsets = [0, 2, 0], sizes = [16, 16, 6], strides = [1, 1, 1]} : vector<16x18x6xf32> to vector<16x16x6xf32>
    %c2_78 = arith.constant 2 : index
    %c0_79 = arith.constant 0 : index
    %c0_80 = arith.constant 0 : index
    %91 = vector.load %arg13[%c2_78, %c0_79, %c0_80] : memref<18x18x6xf32, #tpu.memory_space<vmem>>, vector<16x18x6xf32>
    %92 = vector.extract_strided_slice %91 {offsets = [0, 0, 0], sizes = [16, 16, 6], strides = [1, 1, 1]} : vector<16x18x6xf32> to vector<16x16x6xf32>
    %93 = vector.extract_strided_slice %91 {offsets = [0, 1, 0], sizes = [16, 16, 6], strides = [1, 1, 1]} : vector<16x18x6xf32> to vector<16x16x6xf32>
    %94 = vector.extract_strided_slice %91 {offsets = [0, 2, 0], sizes = [16, 16, 6], strides = [1, 1, 1]} : vector<16x18x6xf32> to vector<16x16x6xf32>
    %95 = tpu.concatenate %84, %85, %86, %88, %89, %90, %92, %93, %94 in 2 : vector<16x16x6xf32>, vector<16x16x6xf32>, vector<16x16x6xf32>, vector<16x16x6xf32>, vector<16x16x6xf32>, vector<16x16x6xf32>, vector<16x16x6xf32>, vector<16x16x6xf32>, vector<16x16x6xf32> -> vector<16x16x54xf32>
    %96 = vector.shape_cast %95 : vector<16x16x54xf32> to vector<256x54xf32>
    %c0_81 = arith.constant 0 : index
    %c0_82 = arith.constant 0 : index
    %97 = vector.load %arg8[%c0_81, %c0_82] : memref<8x54xbf16, #tpu.memory_space<vmem>>, vector<8x54xbf16>
    %98 = arith.truncf %96 : vector<256x54xf32> to vector<256x54xbf16>
    %cst_83 = arith.constant dense<0.000000e+00> : vector<8x256xf32>
    %99 = tpu.matmul %97, %98, %cst_83 {dimension_numbers = #tpu.dot_dimension_numbers<[1], [1], [0], [0], [0, 0, 1, 0], [], []>} : vector<8x54xbf16>, vector<256x54xbf16>, vector<8x256xf32> -> vector<8x256xf32>
    %c0_84 = arith.constant 0 : index
    %c0_85 = arith.constant 0 : index
    %100 = vector.load %arg9[%c0_84, %c0_85] : memref<8x1xf32, #tpu.memory_space<vmem>>, vector<8x1xf32>
    %101 = vector.broadcast %100 : vector<8x1xf32> to vector<8x256xf32>
    %102 = arith.mulf %99, %101 : vector<8x256xf32>
    %c0_86 = arith.constant 0 : index
    %c0_87 = arith.constant 0 : index
    %103 = vector.load %arg10[%c0_86, %c0_87] : memref<8x1xf32, #tpu.memory_space<vmem>>, vector<8x1xf32>
    %104 = vector.broadcast %103 : vector<8x1xf32> to vector<8x256xf32>
    %105 = arith.addf %102, %104 : vector<8x256xf32>
    %cst_88 = arith.constant 0.000000e+00 : f32
    %106 = vector.broadcast %cst_88 : f32 to vector<8x256xf32>
    %107 = arith.cmpf oge, %105, %106 : vector<8x256xf32>
    %cst_89 = arith.constant 1.000000e-01 : f32
    %108 = vector.broadcast %cst_89 : f32 to vector<8x256xf32>
    %109 = arith.mulf %108, %105 : vector<8x256xf32>
    %110 = arith.select %107, %105, %109 : vector<8x256xi1>, vector<8x256xf32>
    %c0_90 = arith.constant 0 : index
    %c0_91 = arith.constant 0 : index
    %c0_92 = arith.constant 0 : index
    %111 = vector.load %arg11[%c0_90, %c0_91, %c0_92] : memref<1x8x256xf32, #tpu.memory_space<vmem>>, vector<1x8x256xf32>
    %112 = vector.shape_cast %111 : vector<1x8x256xf32> to vector<8x256xf32>
    %113 = vector.shape_cast %110 : vector<8x256xf32> to vector<1x8x256xf32>
    tpu.vector_store %arg11[%c0_90, %c0_91, %c0_92], %113 {strides = array<i32>} : memref<1x8x256xf32, #tpu.memory_space<vmem>>, vector<1x8x256xf32>,
    return
  }
  func.func @transform_0(%arg0: i32) -> (i32, i32, i32, i32) {
    %c0_i32 = arith.constant 0 : i32
    %c0_i32_0 = arith.constant 0 : i32
    %c0_i32_1 = arith.constant 0 : i32
    %c0_i32_2 = arith.constant 0 : i32
    return %arg0, %c0_i32, %c0_i32_0, %c0_i32_1 : i32, i32, i32, i32
  }
  func.func @transform_1(%arg0: i32) -> (i32, i32) {
    %c0_i32 = arith.constant 0 : i32
    %c0_i32_0 = arith.constant 0 : i32
    %c0_i32_1 = arith.constant 0 : i32
    return %c0_i32, %c0_i32_0 : i32, i32
  }
  func.func @transform_2(%arg0: i32) -> (i32, i32) {
    %c0_i32 = arith.constant 0 : i32
    %c0_i32_0 = arith.constant 0 : i32
    %c0_i32_1 = arith.constant 0 : i32
    return %c0_i32, %c0_i32_0 : i32, i32
  }
  func.func @transform_3(%arg0: i32) -> (i32, i32) {
    %c0_i32 = arith.constant 0 : i32
    %c0_i32_0 = arith.constant 0 : i32
    %c0_i32_1 = arith.constant 0 : i32
    return %c0_i32, %c0_i32_0 : i32, i32
  }
  func.func @transform_4(%arg0: i32) -> (i32, i32) {
    %c0_i32 = arith.constant 0 : i32
    %c0_i32_0 = arith.constant 0 : i32
    %c0_i32_1 = arith.constant 0 : i32
    return %c0_i32, %c0_i32_0 : i32, i32
  }
  func.func @transform_5(%arg0: i32) -> (i32, i32) {
    %c0_i32 = arith.constant 0 : i32
    %c0_i32_0 = arith.constant 0 : i32
    %c0_i32_1 = arith.constant 0 : i32
    return %c0_i32, %c0_i32_0 : i32, i32
  }
  func.func @transform_6(%arg0: i32) -> (i32, i32) {
    %c0_i32 = arith.constant 0 : i32
    %c0_i32_0 = arith.constant 0 : i32
    %c0_i32_1 = arith.constant 0 : i32
    return %c0_i32, %c0_i32_0 : i32, i32
  }
  func.func @transform_7(%arg0: i32) -> (i32, i32) {
    %c0_i32 = arith.constant 0 : i32
    %c0_i32_0 = arith.constant 0 : i32
    %c0_i32_1 = arith.constant 0 : i32
    return %c0_i32, %c0_i32_0 : i32, i32
  }
  func.func @transform_8(%arg0: i32) -> (i32, i32) {
    %c0_i32 = arith.constant 0 : i32
    %c0_i32_0 = arith.constant 0 : i32
    %c0_i32_1 = arith.constant 0 : i32
    return %c0_i32, %c0_i32_0 : i32, i32
  }
  func.func @transform_9(%arg0: i32) -> (i32, i32) {
    %c0_i32 = arith.constant 0 : i32
    %c0_i32_0 = arith.constant 0 : i32
    %c0_i32_1 = arith.constant 0 : i32
    return %c0_i32, %c0_i32_0 : i32, i32
  }
  func.func @transform_10(%arg0: i32) -> (i32, i32, i32) {
    %c0_i32 = arith.constant 0 : i32
    %c0_i32_0 = arith.constant 0 : i32
    %c0_i32_1 = arith.constant 0 : i32
    return %arg0, %c0_i32, %c0_i32_0 : i32, i32, i32
  }
}

</mosaic_0001>

<bundles_post_ra>
// kernel: triple_forward.1
= control target key start
LH: loop header
LB: loop body
LE: loop exit
PB: predicated region body
PF: predicated region fallthrough
CT: control target
= control target key end

     0   :  { %s9349_s13 = smov 0   ;;  %s15300_s0 = inlined_call_operand.vmem [shape: f32[2,16,16,4], index: 0, kind: input, shape index: {}]   ;;  %s15301_s1 = inlined_call_operand.vmem [shape: bf16[36,6], index: 1, kind: input, shape index: {}]   ;;  %s15302_s2 = inlined_call_operand.vmem [shape: f32[1,6], index: 2, kind: input, shape index: {}]   ;;  %s15303_s3 = inlined_call_operand.vmem [shape: f32[1,6], index: 3, kind: input, shape index: {}]   ;;  %s15304_s4 = inlined_call_operand.vmem [shape: bf16[54,6], index: 4, kind: input, shape index: {}]   ;;  %s15305_s5 = inlined_call_operand.vmem [shape: f32[1,6], index: 5, kind: input, shape index: {}]   ;;  %s15306_s6 = inlined_call_operand.vmem [shape: f32[1,6], index: 6, kind: input, shape index: {}]   ;;  %s15307_s7 = inlined_call_operand.vmem [shape: bf16[8,54], index: 7, kind: input, shape index: {}]   ;;  %s15308_s8 = inlined_call_operand.vmem [shape: f32[8,1], index: 8, kind: input, shape index: {}]   ;;  %s15309_s9 = inlined_call_operand.vmem [shape: f32[8,1], index: 9, kind: input, shape index: {}]   ;;  %s15310_s10 = inlined_call_operand.vmem [shape: f32[2,8,256], index: 10, kind: output, shape index: {}]  }
   0x1 LB: > { %s7018_s14 = sadd.s32 4294967295, %s9276_s13   ;;  %p7022_p0 = scmp.ge.s32.totalorder %s9276_s13, 1  ;;  %s9276_s13 = sphi %s9349_s13, %s20_s13  }
   0x2   : > { %p312_p1 = scmp.lt.s32.totalorder %s9276_s13, 3 }
   0x4   : > { %p313_p2 = pnand %p7022_p0, %p312_p1 }
   0x6   : > { %316 = sbr.rel (%p313_p2) target bundleno = 1775 (0x6ef), region = 60 }
   0xd   : > { %vm393_vm0 = vcmask 31744   ;;  %vm396_vm1 = vcmask 25600   ;;  %vm402_vm2 = vcmask 24576   ;;  %p9359_p3 = scmp.lt.s32.totalorder %s7018_s14, 1  ;;  %v15311_v0 = vmov 0.0   ;;  %s9279_s20 = smov 4  }
   0xe   : > { %394 = vst.msk [vmem:[#allocation2] sm:$0xff] %vm393_vm0, %v15311_v0  ;;  %395 = vst.msk [vmem:[#allocation2 + $0x8] sm:$0xff] %vm393_vm0, %v15311_v0  ;;  %vm665_vm3 = vcmask 1046528   ;;  %vm842_vm4 = vcmask 1045504   ;;  %s9280_s21 = smov 8   ;;  %s9281_s22 = smov 12  }
   0xf   : > { %397 = vst.msk [vmem:[#allocation2 + $0x10] sm:$0x3] %vm396_vm1, %v15311_v0  ;;  %401 = vst.msk [vmem:[#allocation2 + $0x1a8] sm:$0x3] %vm396_vm1, %v15311_v0  ;;  %s16178_s14 = smov (!%p9359_p3, %s7018_s14), 1  ;;  %s9282_s23 = smov 16  }
  0x10   : > { %399 = vst.msk [vmem:[#allocation2 + $0x198] sm:$0xff] %vm393_vm0, %v15311_v0  ;;  %400 = vst.msk [vmem:[#allocation2 + $0x1a0] sm:$0xff] %vm393_vm0, %v15311_v0  ;;  %s7073_s16 = sshll.u32 %s16178_s14, 8  ;;  %s9283_s24 = smov 20   ;;  %vm2359_vm5 = vcmask 1041408   ;;  %vm2043_vm6 = vcmask 64512  }
  0x11   : > { %404 = vst.msk [vmem:[#allocation2 + $0x18] sm:$0x1] %vm402_vm2, %v15311_v0  ;;  %405 = vst.msk [vmem:[#allocation2 + $0x30] sm:$0x1] %vm402_vm2, %v15311_v0  ;;  %s9455_s19 = scalar_lea.vmem %s15300_s0, %s7073_s16  ;;  %s9284_s25 = smov 24   ;;  %vm2076_vm7 = vcmask 97280  }
  0x12   : > { %406 = vst.msk [vmem:[#allocation2 + $0x48] sm:$0x1] %vm402_vm2, %v15311_v0  ;;  %407 = vst.msk [vmem:[#allocation2 + $0x60] sm:$0x1] %vm402_vm2, %v15311_v0  ;;  %v363_v1 = vld [vmem:[%s9455_s19 + $0x10] sm:$0xff]  ;;  %v364_v2 = vld [vmem:[%s9455_s19 + $0x18] sm:$0xff] }
  0x13   : > { %408 = vst.msk [vmem:[#allocation2 + $0x78] sm:$0x1] %vm402_vm2, %v15311_v0  ;;  %409 = vst.msk [vmem:[#allocation2 + $0x90] sm:$0x1] %vm402_vm2, %v15311_v0  ;;  %v361_v3 = vld [vmem:[%s9455_s19] sm:$0xff]  ;;  %v362_v4 = vld [vmem:[%s9455_s19 + $0x8] sm:$0xff] }
  0x14   : > { %410 = vst.msk [vmem:[#allocation2 + $0xa8] sm:$0x1] %vm402_vm2, %v15311_v0  ;;  %411 = vst.msk [vmem:[#allocation2 + $0xc0] sm:$0x1] %vm402_vm2, %v15311_v0  ;;  %v365_v5 = vld [vmem:[%s9455_s19 + $0x20] sm:$0xff]  ;;  %v366_v6 = vld [vmem:[%s9455_s19 + $0x28] sm:$0xff] }
  0x15   : > { %412 = vst.msk [vmem:[#allocation2 + $0xd8] sm:$0x1] %vm402_vm2, %v15311_v0  ;;  %413 = vst.msk [vmem:[#allocation2 + $0xf0] sm:$0x1] %vm402_vm2, %v15311_v0  ;;  %v9466_v7 = vld [vmem:[#allocation2 + $0x8] sm:$0xff]  ;;  %v367_v8 = vld [vmem:[%s9455_s19 + $0x30] sm:$0xff] }
  0x16   : > { %414 = vst.msk [vmem:[#allocation2 + $0x108] sm:$0x1] %vm402_vm2, %v15311_v0  ;;  %415 = vst.msk [vmem:[#allocation2 + $0x120] sm:$0x1] %vm402_vm2, %v15311_v0  ;;  %v368_v9 = vld [vmem:[%s9455_s19 + $0x38] sm:$0xff]  ;;  %v667_v12 = vrot.slane %v9466_v7, 1 }
  0x17   : > { %416 = vst.msk [vmem:[#allocation2 + $0x138] sm:$0x1] %vm402_vm2, %v15311_v0  ;;  %417 = vst.msk [vmem:[#allocation2 + $0x150] sm:$0x1] %vm402_vm2, %v15311_v0  ;;  %v369_v13 = vld [vmem:[%s9455_s19 + $0x40] sm:$0xff]  ;;  %v370_v16 = vld [vmem:[%s9455_s19 + $0x48] sm:$0xff] }
  0x18   : > { %418 = vst.msk [vmem:[#allocation2 + $0x168] sm:$0x1] %vm402_vm2, %v15311_v0  ;;  %419 = vst.msk [vmem:[#allocation2 + $0x180] sm:$0x1] %vm402_vm2, %v15311_v0  ;;  %v371_v17 = vld [vmem:[%s9455_s19 + $0x50] sm:$0xff]  ;;  %v372_v18 = vld [vmem:[%s9455_s19 + $0x58] sm:$0xff] }
  0x19   : > { %422 = vst.msk [vmem:[#allocation2 + $0x29] sm:$0x1] %vm402_vm2, %v15311_v0  ;;  %423 = vst.msk [vmem:[#allocation2 + $0x41] sm:$0x1] %vm402_vm2, %v15311_v0  ;;  %v373_v19 = vld [vmem:[%s9455_s19 + $0x60] sm:$0xff]  ;;  %v374_v20 = vld [vmem:[%s9455_s19 + $0x68] sm:$0xff] }
  0x1a   : > { %424 = vst.msk [vmem:[#allocation2 + $0x59] sm:$0x1] %vm402_vm2, %v15311_v0  ;;  %425 = vst.msk [vmem:[#allocation2 + $0x71] sm:$0x1] %vm402_vm2, %v15311_v0  ;;  %v375_v21 = vld [vmem:[%s9455_s19 + $0x70] sm:$0xff]  ;;  %v376_v24 = vld [vmem:[%s9455_s19 + $0x78] sm:$0xff] }
  0x1b   : > { %426 = vst.msk [vmem:[#allocation2 + $0x89] sm:$0x1] %vm402_vm2, %v15311_v0  ;;  %427 = vst.msk [vmem:[#allocation2 + $0xa1] sm:$0x1] %vm402_vm2, %v15311_v0  ;;  %v377_v25 = vld [vmem:[%s9455_s19 + $0x80] sm:$0xff]  ;;  %v378_v26 = vld [vmem:[%s9455_s19 + $0x88] sm:$0xff] }
  0x1c   : > { %428 = vst.msk [vmem:[#allocation2 + $0xb9] sm:$0x1] %vm402_vm2, %v15311_v0  ;;  %429 = vst.msk [vmem:[#allocation2 + $0xd1] sm:$0x1] %vm402_vm2, %v15311_v0  ;;  %v379_v28 = vld [vmem:[%s9455_s19 + $0x90] sm:$0xff]  ;;  %v380_v29 = vld [vmem:[%s9455_s19 + $0x98] sm:$0xff] }
  0x1d   : > { %430 = vst.msk [vmem:[#allocation2 + $0xe9] sm:$0x1] %vm402_vm2, %v15311_v0  ;;  %431 = vst.msk [vmem:[#allocation2 + $0x101] sm:$0x1] %vm402_vm2, %v15311_v0  ;;  %v381_v30 = vld [vmem:[%s9455_s19 + $0xa0] sm:$0xff]  ;;  %s9285_s26 = smov 28  }
  0x1e   : > { %432 = vst.msk [vmem:[#allocation2 + $0x119] sm:$0x1] %vm402_vm2, %v15311_v0  ;;  %433 = vst.msk [vmem:[#allocation2 + $0x131] sm:$0x1] %vm402_vm2, %v15311_v0  ;;  %v389_v35 = vld [vmem:[%s9455_s19 + $0xe0] sm:$0xff]  ;;  %s9286_s15 = smov 32  }
  0x1f   : > { %434 = vst.msk [vmem:[#allocation2 + $0x149] sm:$0x1] %vm402_vm2, %v15311_v0  ;;  %435 = vst.msk [vmem:[#allocation2 + $0x161] sm:$0x1] %vm402_vm2, %v15311_v0  ;;  %vm2109_vm8 = vcmask 130048   ;;  %vm2142_vm9 = vcmask 162816  }
  0x20   : > { %436 = vst.msk [vmem:[#allocation2 + $0x179] sm:$0x1] %vm402_vm2, %v15311_v0  ;;  %437 = vst.msk [vmem:[#allocation2 + $0x191] sm:$0x1] %vm402_vm2, %v15311_v0  ;;  %vm2175_vm10 = vcmask 195584   ;;  %vm2208_vm11 = vcmask 228352  }
  0x21   : > { %403 = vst.msk [vmem:[#allocation2] sm:$0x1] %vm402_vm2, %v15311_v0  ;;  %421 = vst.msk [vmem:[#allocation2 + $0x11] sm:$0x1] %vm402_vm2, %v15311_v0  ;;  %vm2241_vm12 = vcmask 261120   ;;  %vm2310_vm13 = vcmask 293888  }
  0x22   : > { %438 = vst.msk [vmem:[#allocation2 + $0x1a9] sm:$0x1] %vm402_vm2, %v15311_v0  ;;  %420 = vst.msk [vmem:[#allocation2 + $0x198] sm:$0x1] %vm402_vm2, %v15311_v0  ;;  %v386_v0 = vld [vmem:[%s9455_s19 + $0xc8] sm:$0xff]  ;;  %vm2698_vm14 = vcmask 48128  }
  0x23   : > { %442 = vst.msk [vmem:[#allocation2 + $0x31] sm:$0xff] %vm393_vm0, %v363_v1  ;;  %443 = vst.msk [vmem:[#allocation2 + $0x39] sm:$0xff] %vm393_vm0, %v364_v2  ;;  %vm2701_vm15 = vcmask 41984   ;;  %s9287_s16 = smov 6   ;;  %s9292_s18 = smov 48  }
  0x24   : > { %440 = vst.msk [vmem:[#allocation2 + $0x19] sm:$0xff] %vm393_vm0, %v361_v3  ;;  %441 = vst.msk [vmem:[#allocation2 + $0x21] sm:$0xff] %vm393_vm0, %v362_v4 }
  0x25   : > { %444 = vst.msk [vmem:[#allocation2 + $0x49] sm:$0xff] %vm393_vm0, %v365_v5  ;;  %445 = vst.msk [vmem:[#allocation2 + $0x51] sm:$0xff] %vm393_vm0, %v366_v6 }
  0x26   : > { %446 = vst.msk [vmem:[#allocation2 + $0x61] sm:$0xff] %vm393_vm0, %v367_v8  ;;  %447 = vst.msk [vmem:[#allocation2 + $0x69] sm:$0xff] %vm393_vm0, %v368_v9 }
  0x27   : > { %448 = vst.msk [vmem:[#allocation2 + $0x79] sm:$0xff] %vm393_vm0, %v369_v13  ;;  %449 = vst.msk [vmem:[#allocation2 + $0x81] sm:$0xff] %vm393_vm0, %v370_v16 }
  0x28   : > { %v9473_v10 = vld [vmem:[#allocation2] sm:$0xff]  ;;  %v9475_v11 = vld [vmem:[#allocation2 + $0x10] sm:$0x3]  ;;  %450 = vst.msk [vmem:[#allocation2 + $0x91] sm:$0xff] %vm393_vm0, %v371_v17  ;;  %451 = vst.msk [vmem:[#allocation2 + $0x99] sm:$0xff] %vm393_vm0, %v372_v18 }
  0x29   : > { %v666_v14 = vrot.slane %v9473_v10, 1  ;;  %v669_v15 = vrot.slane %v9475_v11, 1  ;;  %452 = vst.msk [vmem:[#allocation2 + $0xa9] sm:$0xff] %vm393_vm0, %v373_v19  ;;  %453 = vst.msk [vmem:[#allocation2 + $0xb1] sm:$0xff] %vm393_vm0, %v374_v20 }
  0x2a   : > { %454 = vst.msk [vmem:[#allocation2 + $0xc1] sm:$0xff] %vm393_vm0, %v375_v21  ;;  %455 = vst.msk [vmem:[#allocation2 + $0xc9] sm:$0xff] %vm393_vm0, %v376_v24  ;;  %v9507_v31 = vld [vmem:[#allocation2 + $0x30] sm:$0xff]  ;;  %v9509_v32 = vld [vmem:[#allocation2 + $0x38] sm:$0xff] }
  0x2b   : > { %v668_v22 = vsel %vm665_vm3, %v666_v14, %v667_v12  ;;  %v670_v23 = vsel %vm665_vm3, %v667_v12, %v669_v15  ;;  %456 = vst.msk [vmem:[#allocation2 + $0xd9] sm:$0xff] %vm393_vm0, %v377_v25  ;;  %457 = vst.msk [vmem:[#allocation2 + $0xe1] sm:$0xff] %vm393_vm0, %v378_v26  ;;  %v9511_v33 = vld [vmem:[#allocation2 + $0x40] sm:$0x3]  ;;  %v676_v36 = vrot.slane %v9507_v31, 1  ;;  %v9521_v37 = vrot.slane %v9509_v32, 1 }
  0x2c   : > { %v7244_v27 = vpack.i.bf16 %v670_v23, %v668_v22  ;;  %458 = vst.msk [vmem:[#allocation2 + $0xf1] sm:$0xff] %vm393_vm0, %v379_v28  ;;  %459 = vst.msk [vmem:[#allocation2 + $0xf9] sm:$0xff] %vm393_vm0, %v380_v29  ;;  %v679_v38 = vrot.slane %v9511_v33, 1  ;;  %v9524_v39 = vld [vmem:[#allocation2 + $0x18] sm:$0xff]  ;;  %v9526_v40 = vld [vmem:[#allocation2 + $0x20] sm:$0xff] }
  0x2d   : > { %460 = vst.msk [vmem:[#allocation2 + $0x109] sm:$0xff] %vm393_vm0, %v381_v30  ;;  %15574 = vst [vmem:[#allocation4_spill] sm:$0xff] %v9521_v37  ;;  %v9528_v41 = vld [vmem:[#allocation2 + $0x28] sm:$0x3]  ;;  %v671_v42 = vrot.slane %v9524_v39, 1  ;;  %v9532_v43 = vrot.slane %v9526_v40, 1  ;;  %v9540_v46 = vsel %vm665_vm3, %v676_v36, %v9521_v37 }
  0x2e   : > { %7245 = vrot.lane.b32.xlu0 %v7244_v27, %s9279_s20  ;;  %15575 = vst [vmem:[#allocation5_spill] sm:$0xff] %v9526_v40  ;;  %v9534_v44 = vld [vmem:[#allocation2 + $0x48] sm:$0xff]  ;;  %v9536_v45 = vld [vmem:[#allocation2 + $0x50] sm:$0xff]  ;;  %15579 = vst [vmem:[#allocation9_spill] sm:$0xff] %v9540_v46  ;;  %v680_v47 = vsel %vm665_vm3, %v9521_v37, %v679_v38  ;;  %v674_v48 = vrot.slane %v9528_v41, 1  ;;  %v856_v37 = vrot.slane %v9511_v33, 2 }
  0x2f   : > { %15576 = vst [vmem:[#allocation6_spill] sm:$0xff] %v9532_v43  ;;  %15577 = vst [vmem:[#allocation7_spill] sm:$0xff] %v9534_v44  ;;  %v9545_v49 = vld [vmem:[#allocation2 + $0x58] sm:$0x3]  ;;  %v681_v50 = vrot.slane %v9534_v44, 1  ;;  %v9548_v51 = vld [vmem:[#allocation2 + $0x60] sm:$0xff]  ;;  %v7254_v53 = vpack.i.bf16 %v680_v47, %v9540_v46  ;;  %v9555_v54 = vsel %vm665_vm3, %v671_v42, %v9532_v43 }
  0x30   : > { %15578 = vst [vmem:[#allocation8_spill] sm:$0xff] %v9536_v45  ;;  %v9550_v52 = vld [vmem:[#allocation2 + $0x68] sm:$0xff]  ;;  %15580 = vst [vmem:[#allocation10_spill] sm:$0xff] %v9555_v54  ;;  %v9558_v55 = vrot.slane %v9536_v45, 1  ;;  %v684_v56 = vrot.slane %v9545_v49, 1  ;;  %v9563_v58 = vld [vmem:[#allocation2 + $0x78] sm:$0xff]  ;;  %v675_v60 = vsel %vm665_vm3, %v9532_v43, %v674_v48 }
  0x31   : > { %v9561_v57 = vld [vmem:[#allocation2 + $0x70] sm:$0x3]  ;;  %v9565_v59 = vld [vmem:[#allocation2 + $0x80] sm:$0xff]  ;;  %v686_v61 = vrot.slane %v9548_v51, 1  ;;  %v9571_v62 = vrot.slane %v9550_v52, 1  ;;  %7255 = vrot.lane.b32.xlu1 %v7254_v53, %s9279_s20  ;;  %v7249_v3 = vpack.i.bf16 %v675_v60, %v9555_v54  ;;  %v691_v6 = vrot.slane %v9563_v58, 1 }
  0x32   : > { %15581 = vst [vmem:[#allocation11_spill] sm:$0xff] %v9558_v55  ;;  %15582 = vst [vmem:[#allocation12_spill] sm:$0xff] %v9565_v59  ;;  %v689_v63 = vrot.slane %v9561_v57, 1  ;;  %v9574_v1 = vld [vmem:[#allocation2 + $0x88] sm:$0x3]  ;;  %v9576_v2 = vld [vmem:[#allocation2 + $0x90] sm:$0xff]  ;;  %v9582_v4 = vsel %vm665_vm3, %v681_v50, %v9558_v55  ;;  %v685_v5 = vsel %vm665_vm3, %v9558_v55, %v684_v56 }
  0x33   : > { %15583 = vst [vmem:[#allocation13_spill] sm:$0xff] %v9571_v62  ;;  %15584 = vst [vmem:[#allocation14_spill] sm:$0xff] %v9576_v2  ;;  %v9587_v8 = vld [vmem:[#allocation2 + $0x98] sm:$0xff]  ;;  %v9589_v9 = vld [vmem:[#allocation2 + $0xa0] sm:$0x3]  ;;  %v7259_v13 = vpack.i.bf16 %v685_v5, %v9582_v4  ;;  %v9596_v14 = vsel %vm665_vm3, %v686_v61, %v9571_v62  ;;  %v9601_v16 = vrot.slane %v9565_v59, 1  ;;  %7250 = vrot.lane.b32.xlu0 %v7249_v3, %s9279_s20 }
  0x34   : > { %15585 = vst [vmem:[#allocation15_spill] sm:$0xff] %v9582_v4  ;;  %15586 = vst [vmem:[#allocation16_spill] sm:$0xff] %v9587_v8  ;;  %v9591_v12 = vld [vmem:[#allocation2 + $0xa8] sm:$0xff]  ;;  %v690_v15 = vsel %vm665_vm3, %v9571_v62, %v689_v63  ;;  %v9603_v17 = vld [vmem:[#allocation2 + $0xb0] sm:$0xff]  ;;  %v694_v21 = vrot.slane %v9574_v1, 1  ;;  %v696_v22 = vrot.slane %v9576_v2, 1 }
  0x35   : > { %15587 = vst [vmem:[#allocation17_spill] sm:$0xff] %v9591_v12  ;;  %15588 = vst [vmem:[#allocation18_spill] sm:$0xff] %v9596_v14  ;;  %v9605_v18 = vld [vmem:[#allocation2 + $0xb8] sm:$0x3]  ;;  %v9607_v19 = vld [vmem:[#allocation2 + $0xc0] sm:$0xff]  ;;  %v7264_v20 = vpack.i.bf16 %v690_v15, %v9596_v14  ;;  %v9614_v23 = vrot.slane %v9587_v8, 1  ;;  %v9622_v26 = vsel %vm665_vm3, %v691_v6, %v9601_v16  ;;  %7260 = vrot.lane.b32.xlu1 %v7259_v13, %s9279_s20 }
  0x36   : > { %15589 = vst [vmem:[#allocation19_spill] sm:$0xff] %v9601_v16  ;;  %15590 = vst [vmem:[#allocation20_spill] sm:$0xff] %v9603_v17  ;;  %v9616_v24 = vld [vmem:[#allocation2 + $0xc8] sm:$0xff]  ;;  %v9618_v25 = vld [vmem:[#allocation2 + $0xd0] sm:$0x3]  ;;  %v699_v27 = vrot.slane %v9589_v9, 1  ;;  %v695_v38 = vsel %vm665_vm3, %v9601_v16, %v694_v21 }
  0x37   : > { %15591 = vst [vmem:[#allocation21_spill] sm:$0xff] %v9607_v19  ;;  %15592 = vst [vmem:[#allocation22_spill] sm:$0xff] %v9614_v23  ;;  %v701_v28 = vrot.slane %v9591_v12, 1  ;;  %v9627_v29 = vrot.slane %v9603_v17, 1  ;;  %v9629_v30 = vld [vmem:[#allocation2 + $0xd8] sm:$0xff]  ;;  %v9631_v36 = vld [vmem:[#allocation2 + $0xe0] sm:$0xff]  ;;  %v9638_v42 = vsel %vm665_vm3, %v696_v22, %v9614_v23  ;;  %v7269_v60 = vpack.i.bf16 %v695_v38, %v9622_v26  ;;  %7265 = vrot.lane.b32.xlu0 %v7264_v20, %s9279_s20 }
  0x38   : > { %15593 = vst [vmem:[#allocation23_spill] sm:$0xff] %v9616_v24  ;;  %15594 = vst [vmem:[#allocation24_spill] sm:$0xff] %v9622_v26  ;;  %v704_v47 = vrot.slane %v9605_v18, 1  ;;  %v706_v48 = vrot.slane %v9607_v19, 1  ;;  %v9642_v50 = vld [vmem:[#allocation2 + $0xe8] sm:$0x3]  ;;  %v700_v61 = vsel %vm665_vm3, %v9614_v23, %v699_v27 }
  0x39   : > { %15595 = vst [vmem:[#allocation25_spill] sm:$0xff] %v9627_v29  ;;  %15596 = vst [vmem:[#allocation26_spill] sm:$0xff] %v9629_v30  ;;  %v9644_v53 = vld [vmem:[#allocation2 + $0xf0] sm:$0xff]  ;;  %v382_v56 = vld [vmem:[%s9455_s19 + $0xa8] sm:$0xff]  ;;  %v9652_v63 = vsel %vm665_vm3, %v701_v28, %v9627_v29  ;;  %v9655_v3 = vrot.slane %v9616_v24, 1  ;;  %v7274_v15 = vpack.i.bf16 %v700_v61, %v9638_v42  ;;  %v709_v22 = vrot.slane %v9618_v25, 1  ;;  %7270 = vrot.lane.b32.xlu1 %v7269_v60, %s9279_s20 }
  0x3a   : > { %15597 = vst [vmem:[#allocation27_spill] sm:$0xff] %v9631_v36  ;;  %15598 = vst [vmem:[#allocation28_spill] sm:$0xff] %v9638_v42  ;;  %v9657_v5 = vld [vmem:[#allocation2 + $0xf8] sm:$0xff]  ;;  %v9659_v6 = vld [vmem:[#allocation2 + $0x100] sm:$0x3]  ;;  %v705_v21 = vsel %vm665_vm3, %v9627_v29, %v704_v47  ;;  %v711_v27 = vrot.slane %v9629_v30, 1 }
  0x3b   : > { %15599 = vst [vmem:[#allocation29_spill] sm:$0xff] %v9644_v53  ;;  %15600 = vst [vmem:[#allocation30_spill] sm:$0xff] %v9652_v63  ;;  %v383_v13 = vld [vmem:[%s9455_s19 + $0xb0] sm:$0xff]  ;;  %v9669_v28 = vld [vmem:[#allocation2 + $0x108] sm:$0xff]  ;;  %v7279_v20 = vpack.i.bf16 %v705_v21, %v9652_v63  ;;  %v9678_v61 = vsel %vm665_vm3, %v706_v48, %v9655_v3  ;;  %v9681_v47 = vrot.slane %v9631_v36, 1  ;;  %v714_v34 = vrot.slane %v9642_v50, 1  ;;  %7275 = vrot.lane.b32.xlu0 %v7274_v15, %s9279_s20 }
  0x3c   : > { %15601 = vst [vmem:[#allocation31_spill] sm:$0xff] %v9655_v3  ;;  %15602 = vst [vmem:[#allocation32_spill] sm:$0xff] %v9657_v5  ;;  %v384_v38 = vld [vmem:[%s9455_s19 + $0xb8] sm:$0xff]  ;;  %v710_v48 = vsel %vm665_vm3, %v9655_v3, %v709_v22  ;;  %v716_v63 = vrot.slane %v9644_v53, 1  ;;  %v9695_v42 = vrot.slane %v9657_v5, 1  ;;  %v851_v29 = vrot.slane %v9528_v41, 2 }
  0x3d   : > { %461 = vst.msk [vmem:[#allocation2 + $0x111] sm:$0xff] %vm393_vm0, %v382_v56  ;;  %15603 = vst [vmem:[#allocation33_spill] sm:$0xff] %v9669_v28  ;;  %v385_v56 = vld [vmem:[%s9455_s19 + $0xc0] sm:$0xff]  ;;  %v388_v21 = vld [vmem:[%s9455_s19 + $0xd8] sm:$0xff]  ;;  %v9706_v60 = vsel %vm665_vm3, %v711_v27, %v9681_v47  ;;  %v715_v22 = vsel %vm665_vm3, %v9681_v47, %v714_v34  ;;  %7280 = vrot.lane.b32.xlu1 %v7279_v20, %s9279_s20  ;;  %v848_v20 = vrot.slane %v9524_v39, 2  ;;  %v853_v33 = vrot.slane %v9507_v31, 2 }
  0x3e   : > { %462 = vst.msk [vmem:[#allocation2 + $0x121] sm:$0xff] %vm393_vm0, %v383_v13  ;;  %15604 = vst [vmem:[#allocation34_spill] sm:$0xff] %v9678_v61  ;;  %v387_v13 = vld [vmem:[%s9455_s19 + $0xd0] sm:$0xff]  ;;  %v392_v26 = vld [vmem:[%s9455_s19 + $0xf8] sm:$0xff]  ;;  %v9718_v27 = vsel %vm665_vm3, %v716_v63, %v9695_v42 }
  0x3f   : > { %15605 = vst [vmem:[#allocation35_spill] sm:$0xff] %v9681_v47  ;;  %463 = vst.msk [vmem:[#allocation2 + $0x129] sm:$0xff] %vm393_vm0, %v384_v38  ;;  %v719_v38 = vrot.slane %v9659_v6, 1 }
  0x40   : > { %464 = vst.msk [vmem:[#allocation2 + $0x139] sm:$0xff] %vm393_vm0, %v385_v56  ;;  %465 = vst.msk [vmem:[#allocation2 + $0x141] sm:$0xff] %vm393_vm0, %v386_v0  ;;  %v390_v0 = vld [vmem:[%s9455_s19 + $0xe8] sm:$0xff]  ;;  %v391_v56 = vld [vmem:[%s9455_s19 + $0xf0] sm:$0xff] }
  0x41   : > { %15606 = vst [vmem:[#allocation36_spill] sm:$0xff] %v9695_v42  ;;  %466 = vst.msk [vmem:[#allocation2 + $0x151] sm:$0xff] %vm393_vm0, %v387_v13  ;;  %v843_v13 = vrot.slane %v9473_v10, 2  ;;  %v720_v34 = vsel %vm665_vm3, %v9695_v42, %v719_v38  ;;  %v15611_v10 = vrot.slane %v9466_v7, 2 }
  0x42   : > { %467 = vst.msk [vmem:[#allocation2 + $0x159] sm:$0xff] %vm393_vm0, %v388_v21  ;;  %468 = vst.msk [vmem:[#allocation2 + $0x169] sm:$0xff] %vm393_vm0, %v389_v35  ;;  %v7284_v35 = vpack.i.bf16 %v710_v48, %v9678_v61  ;;  %v721_v21 = vrot.slane %v9669_v28, 1  ;;  %v15610_v48 = vrot.slane %v9475_v11, 2  ;;  %v7294_v11 = vpack.i.bf16 %v720_v34, %v9718_v27 }
  0x43   : > { %15607 = vst [vmem:[#allocation37_spill] sm:$0xff] %v9706_v60  ;;  %469 = vst.msk [vmem:[#allocation2 + $0x171] sm:$0xff] %vm393_vm0, %v390_v0  ;;  %v7289_v0 = vpack.i.bf16 %v715_v22, %v9706_v60  ;;  %v9744_v22 = vrot.slane %v9526_v40, 2  ;;  %v15617_v61 = vrot.slane %v9466_v7, 2 }
  0x44   : > { %470 = vst.msk [vmem:[#allocation2 + $0x181] sm:$0xff] %vm393_vm0, %v391_v56  ;;  %471 = vst.msk [vmem:[#allocation2 + $0x189] sm:$0xff] %vm393_vm0, %v392_v26  ;;  %v9725_v26 = vld [vmem:[#allocation2 + $0x110] sm:$0xff]  ;;  %v9727_v15 = vld [vmem:[#allocation2 + $0x118] sm:$0x3]  ;;  %v9734_v63 = vsel %vm842_vm4, %v15611_v10, %v15610_v48  ;;  %7285 = vrot.lane.b32.xlu0 %v7284_v35, %s9279_s20 }
  0x45   : > { %15608 = vst [vmem:[#allocation38_spill] sm:$0xff] %v9718_v27  ;;  %15609 = vst [vmem:[#allocation39_spill] sm:$0xff] %v9725_v26  ;;  %v9737_v56 = vrot.slane %v9725_v26, 1  ;;  %v724_v38 = vrot.slane %v9727_v15, 1  ;;  %v9740_v42 = vld [vmem:[#allocation2 + $0x120] sm:$0xff]  ;;  %v9758_v3 = vsel %vm842_vm4, %v843_v13, %v15617_v61  ;;  %7290 = vrot.lane.b32.xlu1 %v7289_v0, %s9279_s20 }
  0x46   : > { %15613 = vst [vmem:[#allocation41_spill] sm:$0xff] %v9740_v42  ;;  %15614 = vst [vmem:[#allocation42_spill] sm:$0xff] %v9744_v22  ;;  %v9748_v60 = vld [vmem:[#allocation2 + $0x128] sm:$0xff]  ;;  %v9750_v48 = vld [vmem:[#allocation2 + $0x130] sm:$0x3]  ;;  %v726_v10 = vrot.slane %v9740_v42, 1 }
  0x47   : > { %15612 = vst [vmem:[#allocation40_spill] sm:$0xff] %v9737_v56  ;;  %15615 = vst [vmem:[#allocation43_spill] sm:$0xff] %v9748_v60  ;;  %v9753_v47 = vld [vmem:[#allocation2 + $0x138] sm:$0xff]  ;;  %v9763_v35 = vsel %vm665_vm3, %v721_v21, %v9737_v56  ;;  %v725_v34 = vsel %vm665_vm3, %v9737_v56, %v724_v38  ;;  %v9768_v27 = vrot.slane %v9748_v60, 1  ;;  %v729_v23 = vrot.slane %v9750_v48, 1  ;;  %v9771_v16 = vld [vmem:[#allocation2 + $0x140] sm:$0xff] }
  0x48   : > { %15616 = vst [vmem:[#allocation44_spill] sm:$0xff] %v9753_v47  ;;  %15618 = vst [vmem:[#allocation45_spill] sm:$0xff] %v9763_v35  ;;  %v9773_v7 = vld [vmem:[#allocation2 + $0x148] sm:$0x3]  ;;  %v9775_v61 = vld [vmem:[#allocation2 + $0x150] sm:$0xff]  ;;  %v7299_v41 = vpack.i.bf16 %v725_v34, %v9763_v35  ;;  %v731_v13 = vrot.slane %v9753_v47, 1  ;;  %7295 = vrot.lane.b32.xlu0 %v7294_v11, %s9279_s20 }
  0x49   : > { %15619 = vst [vmem:[#allocation46_spill] sm:$0xff] %v9768_v27  ;;  %15620 = vst [vmem:[#allocation47_spill] sm:$0xff] %v9771_v16  ;;  %v9781_v21 = vrot.slane %v9771_v16, 1  ;;  %v734_v38 = vrot.slane %v9773_v7, 1  ;;  %v9784_v56 = vld [vmem:[#allocation2 + $0x158] sm:$0xff]  ;;  %v9790_v4 = vsel %vm665_vm3, %v726_v10, %v9768_v27  ;;  %v730_v0 = vsel %vm665_vm3, %v9768_v27, %v729_v23  ;;  %v9798_v46 = vld [vmem:[#allocation2 + $0x168] sm:$0xff] }
  0x4a   : > { %15621 = vst [vmem:[#allocation48_spill] sm:$0xff] %v9775_v61  ;;  %15623 = vst [vmem:[#allocation50_spill] sm:$0xff] %v9784_v56  ;;  %v9786_v14 = vld [vmem:[#allocation2 + $0x160] sm:$0x3]  ;;  %v736_v34 = vrot.slane %v9775_v61, 1  ;;  %v9796_v35 = vrot.slane %v9784_v56, 1  ;;  %v7304_v55 = vpack.i.bf16 %v730_v0, %v9790_v4  ;;  %7300 = vrot.lane.b32.xlu1 %v7299_v41, %s9279_s20 }
  0x4b   : > { %15622 = vst [vmem:[#allocation49_spill] sm:$0xff] %v9781_v21  ;;  %15624 = vst [vmem:[#allocation51_spill] sm:$0xff] %v9790_v4  ;;  %v9800_v54 = vld [vmem:[#allocation2 + $0x170] sm:$0xff]  ;;  %v9802_v62 = vld [vmem:[#allocation2 + $0x178] sm:$0x3]  ;;  %v9808_v10 = vsel %vm665_vm3, %v731_v13, %v9781_v21  ;;  %v735_v23 = vsel %vm665_vm3, %v9781_v21, %v734_v38  ;;  %v739_v27 = vrot.slane %v9786_v14, 1 }
  0x4c   : > { %15625 = vst [vmem:[#allocation52_spill] sm:$0xff] %v9796_v35  ;;  %15626 = vst [vmem:[#allocation53_spill] sm:$0xff] %v9798_v46  ;;  %v9816_v43 = vsel %vm665_vm3, %v736_v34, %v9796_v35  ;;  %v741_v40 = vrot.slane %v9798_v46, 1  ;;  %v9820_v11 = vrot.slane %v9800_v54, 1  ;;  %v7309_v13 = vpack.i.bf16 %v735_v23, %v9808_v10  ;;  %7305 = vrot.lane.b32.xlu0 %v7304_v55, %s9279_s20 }
  0x4d   : > { %15627 = vst [vmem:[#allocation54_spill] sm:$0xff] %v9800_v54  ;;  %15628 = vst [vmem:[#allocation55_spill] sm:$0xff] %v9808_v10  ;;  %v740_v38 = vsel %vm665_vm3, %v9796_v35, %v739_v27  ;;  %v744_v0 = vrot.slane %v9802_v62, 1  ;;  %v9833_v21 = vrot.slane %v9509_v32, 2  ;;  %v858_v4 = vrot.slane %v9534_v44, 2 }
  0x4e   : > { %v9830_v34 = vsel %vm665_vm3, %v741_v40, %v9820_v11  ;;  %v9837_v41 = vrot.slane %v9536_v45, 2  ;;  %v7314_v27 = vpack.i.bf16 %v740_v38, %v9816_v43  ;;  %v9845_v10 = vsel %vm842_vm4, %v848_v20, %v9744_v22  ;;  %7310 = vrot.lane.b32.xlu1 %v7309_v13, %s9279_s20 }
  0x4f   : > { %v745_v23 = vsel %vm665_vm3, %v9820_v11, %v744_v0  ;;  %v852_v40 = vsel %vm842_vm4, %v9744_v22, %v851_v29  ;;  %v861_v35 = vrot.slane %v9545_v49, 2  ;;  %v863_v44 = vrot.slane %v9548_v51, 2 }
  0x50   : > { %v9852_v45 = vrot.slane %v9550_v52, 2  ;;  %v866_v55 = vrot.slane %v9561_v57, 2  ;;  %v7319_v38 = vpack.i.bf16 %v745_v23, %v9830_v34  ;;  %v868_v0 = vrot.slane %v9563_v58, 2  ;;  %7315 = vrot.lane.b32.xlu0 %v7314_v27, %s9279_s20 }
  0x51   : > { %v9859_v20 = vrot.slane %v9565_v59, 2  ;;  %v7324_v29 = vpack.i.bf16 %v9734_v63, %v9758_v3  ;;  %v7329_v49 = vpack.i.bf16 %v852_v40, %v9845_v10  ;;  %v871_v22 = vrot.slane %v9574_v1, 2 }
  0x52   : > { %v9868_v57 = vsel %vm842_vm4, %v853_v33, %v9833_v21  ;;  %v873_v13 = vrot.slane %v9576_v2, 2  ;;  %v9872_v23 = vrot.slane %v9587_v8, 2  ;;  %v876_v59 = vrot.slane %v9589_v9, 2  ;;  %7320 = vrot.lane.b32.xlu1 %v7319_v38, %s9279_s20  ;;  %v15644_v8 = vld [vmem:[#allocation4_spill] sm:$0xff] }
  0x53   : > { %v857_v3 = vsel %vm842_vm4, %v9833_v21, %v856_v37  ;;  %v9879_v63 = vsel %vm842_vm4, %v858_v4, %v9837_v41  ;;  %v862_v1 = vsel %vm842_vm4, %v9837_v41, %v861_v35  ;;  %v9885_v33 = vsel %vm842_vm4, %v863_v44, %v9852_v45 }
  0x54   : > { %v867_v27 = vsel %vm842_vm4, %v9852_v45, %v866_v55  ;;  %v9892_v9 = vsel %vm842_vm4, %v868_v0, %v9859_v20  ;;  %v878_v37 = vrot.slane %v9591_v12, 2  ;;  %v9896_v4 = vrot.slane %v9603_v17, 2  ;;  %7325 = vrot.lane.b32.xlu0 %v7324_v29, %s9280_s21 }
  0x55   : > { %v872_v35 = vsel %vm842_vm4, %v9859_v20, %v871_v22  ;;  %v881_v44 = vrot.slane %v9605_v18, 2  ;;  %v883_v40 = vrot.slane %v9607_v19, 2  ;;  %v9903_v38 = vrot.slane %v9616_v24, 2 }
  0x56   : > { %v7334_v55 = vpack.i.bf16 %v857_v3, %v9868_v57  ;;  %v9909_v0 = vsel %vm842_vm4, %v873_v13, %v9872_v23  ;;  %v877_v17 = vsel %vm842_vm4, %v9872_v23, %v876_v59  ;;  %v7339_v22 = vpack.i.bf16 %v862_v1, %v9879_v63  ;;  %7330 = vrot.lane.b32.xlu1 %v7329_v49, %s9280_s21 }
  0x57   : > { %v7344_v18 = vpack.i.bf16 %v867_v27, %v9885_v33  ;;  %v7349_v24 = vpack.i.bf16 %v872_v35, %v9892_v9  ;;  %v9919_v29 = vsel %vm842_vm4, %v878_v37, %v9896_v4  ;;  %v886_v3 = vrot.slane %v9618_v25, 2 }
  0x58   : > { %v888_v13 = vrot.slane %v9629_v30, 2  ;;  %v7354_v19 = vpack.i.bf16 %v877_v17, %v9909_v0  ;;  %v882_v59 = vsel %vm842_vm4, %v9896_v4, %v881_v44  ;;  %v9928_v1 = vsel %vm842_vm4, %v883_v40, %v9903_v38  ;;  %7335 = vrot.lane.b32.xlu0 %v7334_v55, %s9280_s21 }
  0x59   : > { %v9931_v49 = vrot.slane %v9631_v36, 2  ;;  %v891_v27 = vrot.slane %v9642_v50, 2  ;;  %v893_v25 = vrot.slane %v9644_v53, 2  ;;  %v9937_v37 = vrot.slane %v9657_v5, 2  ;;  %v10038_v53 = vld [vmem:[#allocation2 + $0xb8] sm:$0x3] }
  0x5a   : > { %v896_v17 = vrot.slane %v9659_v6, 2  ;;  %v898_v35 = vrot.slane %v9669_v28, 2  ;;  %v9942_v44 = vrot.slane %v9725_v26, 2  ;;  %v901_v40 = vrot.slane %v9727_v15, 2  ;;  %7340 = vrot.lane.b32.xlu1 %v7339_v22, %s9280_s21 }
  0x5b   : > { %15629 = vst [vmem:[#allocation56_spill] sm:$0xff] %v9931_v49  ;;  %15630 = vst [vmem:[#allocation57_spill] sm:$0xff] %v9937_v37  ;;  %v903_v36 = vrot.slane %v9740_v42, 2  ;;  %v9948_v50 = vrot.slane %v9748_v60, 2  ;;  %v906_v55 = vrot.slane %v9750_v48, 2  ;;  %v908_v5 = vrot.slane %v9753_v47, 2 }
  0x5c   : > { %15631 = vst [vmem:[#allocation58_spill] sm:$0xff] %v9942_v44  ;;  %v9953_v6 = vrot.slane %v9771_v16, 2  ;;  %v911_v28 = vrot.slane %v9773_v7, 2  ;;  %v913_v26 = vrot.slane %v9775_v61, 2  ;;  %v9958_v15 = vrot.slane %v9784_v56, 2  ;;  %7345 = vrot.lane.b32.xlu0 %v7344_v18, %s9280_s21 }
  0x5d   : > { %15632 = vst [vmem:[#allocation59_spill] sm:$0xff] %v9948_v50  ;;  %v916_v42 = vrot.slane %v9786_v14, 2  ;;  %v7359_v22 = vpack.i.bf16 %v882_v59, %v9919_v29  ;;  %v887_v48 = vsel %vm842_vm4, %v9903_v38, %v886_v3  ;;  %v9967_v16 = vsel %vm842_vm4, %v888_v13, %v9931_v49  ;;  %v10026_v61 = vld [vmem:[#allocation2 + $0x70] sm:$0x3] }
  0x5e   : > { %15633 = vst [vmem:[#allocation60_spill] sm:$0xff] %v9953_v6  ;;  %15634 = vst [vmem:[#allocation61_spill] sm:$0xff] %v9958_v15  ;;  %v892_v7 = vsel %vm842_vm4, %v9931_v49, %v891_v27  ;;  %v9973_v56 = vsel %vm842_vm4, %v893_v25, %v9937_v37  ;;  %v897_v14 = vsel %vm842_vm4, %v9937_v37, %v896_v17  ;;  %7350 = vrot.lane.b32.xlu1 %v7349_v24, %s9280_s21  ;;  %v15654_v49 = vld [vmem:[#allocation19_spill] sm:$0xff]  ;;  %v10110_v37 = vld [vmem:[#allocation2 + $0x148] sm:$0x3] }
  0x5f   : > { %15635 = vst [vmem:[#allocation62_spill] sm:$0xff] %v9967_v16  ;;  %15636 = vst [vmem:[#allocation63_spill] sm:$0xff] %v9973_v56  ;;  %v9979_v18 = vsel %vm842_vm4, %v898_v35, %v9942_v44  ;;  %v9983_v3 = vsel %vm842_vm4, %v9942_v44, %v901_v40  ;;  %v9988_v13 = vsel %vm842_vm4, %v903_v36, %v9948_v50  ;;  %v918_v27 = vrot.slane %v9798_v46, 2  ;;  %v10014_v40 = vld [vmem:[#allocation2 + $0x28] sm:$0x3] }
  0x60   : > { %15637 = vst [vmem:[#allocation64_spill] sm:$0xff] %v9979_v18  ;;  %15638 = vst [vmem:[#allocation65_spill] sm:$0xff] %v9988_v13  ;;  %v9992_v59 = vsel %vm842_vm4, %v9948_v50, %v906_v55  ;;  %v9996_v25 = vrot.slane %v9800_v54, 2  ;;  %v10000_v17 = vsel %vm842_vm4, %v908_v5, %v9953_v6  ;;  %v10004_v24 = vsel %vm842_vm4, %v9953_v6, %v911_v28  ;;  %v10016_v55 = vld [vmem:[#allocation2 + $0x40] sm:$0x3]  ;;  %v15641_v54 = vld [vmem:[#allocation5_spill] sm:$0xff] }
  0x61   : > { %15640 = vst [vmem:[#allocation67_spill] sm:$0xff] %v10000_v17  ;;  %v10008_v36 = vsel %vm842_vm4, %v913_v26, %v9958_v15  ;;  %v10012_v35 = vsel %vm842_vm4, %v9958_v15, %v916_v42  ;;  %7355 = vrot.lane.b32.xlu0 %v7354_v19, %s9280_s21  ;;  %v7364_v5 = vpack.i.bf16 %v887_v48, %v9928_v1  ;;  %v10024_v26 = vld [vmem:[#allocation2 + $0x58] sm:$0x3]  ;;  %v10028_v42 = vld [vmem:[#allocation2 + $0x88] sm:$0x3]  ;;  %v1171_v12 = vrot.slane %v10016_v55, 1 }
  0x62   : > { %15639 = vst [vmem:[#allocation66_spill] sm:$0xff] %v9996_v25  ;;  %v7369_v47 = vpack.i.bf16 %v892_v7, %v9967_v16  ;;  %v7374_v60 = vpack.i.bf16 %v897_v14, %v9973_v56  ;;  %v7379_v19 = vpack.i.bf16 %v9983_v3, %v9979_v18  ;;  %v7384_v48 = vpack.i.bf16 %v9992_v59, %v9988_v13  ;;  %v10036_v28 = vld [vmem:[#allocation2 + $0xa0] sm:$0x3]  ;;  %v10040_v46 = vld [vmem:[#allocation2 + $0xd0] sm:$0x3]  ;;  %v15646_v13 = vld [vmem:[#allocation11_spill] sm:$0xff] }
  0x63   : > { %7360 = vrot.lane.b32.xlu1 %v7359_v22, %s9280_s21  ;;  %v7389_v30 = vpack.i.bf16 %v10004_v24, %v10000_v17  ;;  %v10049_v14 = vsel %vm842_vm4, %v918_v27, %v9996_v25  ;;  %v921_v3 = vrot.slane %v9802_v62, 2  ;;  %v1166_v59 = vrot.slane %v10014_v40, 1  ;;  %v15642_v6 = vld [vmem:[#allocation6_spill] sm:$0xff]  ;;  %v10077_v44 = vld [vmem:[#allocation2 + $0xe8] sm:$0x3] }
  0x64   : > { %v1176_v15 = vrot.slane %v10024_v26, 1  ;;  %v1181_v22 = vrot.slane %v10026_v61, 1  ;;  %v1186_v24 = vrot.slane %v10028_v42, 1  ;;  %v1191_v7 = vrot.slane %v10036_v28, 1  ;;  %v15658_v16 = vld [vmem:[#allocation25_spill] sm:$0xff] }
  0x65   : > { %7365 = vrot.lane.b32.xlu0 %v7364_v5, %s9280_s21  ;;  %v1196_v17 = vrot.slane %v10038_v53, 1  ;;  %v1201_v27 = vrot.slane %v10040_v46, 1  ;;  %v10063_v62 = vsel %vm665_vm3, %v15642_v6, %v1166_v59  ;;  %v10067_v2 = vsel %vm665_vm3, %v15644_v8, %v1171_v12  ;;  %v15648_v5 = vld [vmem:[#allocation13_spill] sm:$0xff]  ;;  %v15656_v6 = vld [vmem:[#allocation22_spill] sm:$0xff]  ;;  %v15660_v8 = vld [vmem:[#allocation31_spill] sm:$0xff] }
  0x66   : > { %15643 = vst [vmem:[#allocation5_spill] sm:$0xff] %v10063_v62  ;;  %15645 = vst [vmem:[#allocation6_spill] sm:$0xff] %v10067_v2  ;;  %v10071_v18 = vsel %vm665_vm3, %v15646_v13, %v1176_v15  ;;  %v10075_v50 = vsel %vm665_vm3, %v15648_v5, %v1181_v22  ;;  %v10088_v13 = vld [vmem:[#allocation2 + $0x100] sm:$0x3]  ;;  %v10090_v22 = vld [vmem:[#allocation2 + $0x118] sm:$0x3]  ;;  %v10100_v56 = vsel %vm665_vm3, %v15656_v6, %v1191_v7 }
  0x67   : > { %15647 = vst [vmem:[#allocation4_spill] sm:$0xff] %v10071_v18  ;;  %15649 = vst [vmem:[#allocation11_spill] sm:$0xff] %v10075_v50  ;;  %7370 = vrot.lane.b32.xlu1 %v7369_v47, %s9280_s21  ;;  %v10092_v5 = vld [vmem:[#allocation2 + $0x130] sm:$0x3]  ;;  %v10096_v47 = vsel %vm665_vm3, %v15654_v49, %v1186_v24  ;;  %v10104_v12 = vsel %vm665_vm3, %v15658_v16, %v1196_v17  ;;  %v10108_v15 = vsel %vm665_vm3, %v15660_v8, %v1201_v27  ;;  %v10112_v50 = vld [vmem:[#allocation2 + $0x160] sm:$0x3] }
  0x68   : > { %15655 = vst [vmem:[#allocation13_spill] sm:$0xff] %v10096_v47  ;;  %15657 = vst [vmem:[#allocation19_spill] sm:$0xff] %v10100_v56  ;;  %v10114_v18 = vld [vmem:[#allocation2 + $0x178] sm:$0x3]  ;;  %v1206_v8 = vrot.slane %v10077_v44, 1  ;;  %v1211_v2 = vrot.slane %v10088_v13, 1  ;;  %v922_v7 = vsel %vm842_vm4, %v9996_v25, %v921_v3 }
  0x69   : > { %15659 = vst [vmem:[#allocation22_spill] sm:$0xff] %v10104_v12  ;;  %15661 = vst [vmem:[#allocation25_spill] sm:$0xff] %v10108_v15  ;;  %7375 = vrot.lane.b32.xlu0 %v7374_v60, %s9280_s21  ;;  %v1216_v62 = vrot.slane %v10090_v22, 1  ;;  %v1221_v60 = vrot.slane %v10092_v5, 1  ;;  %v1226_v6 = vrot.slane %v10110_v37, 1  ;;  %v1231_v17 = vrot.slane %v10112_v50, 1 }
  0x6a   : > { %15662 = vst [vmem:[#allocation31_spill] sm:$0xff] %v10114_v18  ;;  %v1236_v16 = vrot.slane %v10114_v18, 1  ;;  %v15667_v27 = vld [vmem:[#allocation35_spill] sm:$0xff]  ;;  %v15668_v15 = vld [vmem:[#allocation36_spill] sm:$0xff]  ;;  %v15670_v56 = vld [vmem:[#allocation46_spill] sm:$0xff] }
  0x6b   : > { %7380 = vrot.lane.b32.xlu1 %v7379_v19, %s9280_s21  ;;  %v10137_v59 = vsel %vm665_vm3, %v15667_v27, %v1206_v8  ;;  %v10141_v12 = vsel %vm665_vm3, %v15668_v15, %v1211_v2  ;;  %v15669_v24 = vld [vmem:[#allocation40_spill] sm:$0xff]  ;;  %v10149_v3 = vsel %vm665_vm3, %v15670_v56, %v1221_v60  ;;  %v15671_v49 = vld [vmem:[#allocation37_spill] sm:$0xff]  ;;  %v15672_v25 = vld [vmem:[#allocation38_spill] sm:$0xff]  ;;  %v1347_v15 = vrot.slane %v10016_v55, 2 }
  0x6c   : > { %v10145_v19 = vsel %vm665_vm3, %v15669_v24, %v1216_v62  ;;  %v15673_v8 = vld [vmem:[#allocation45_spill] sm:$0xff]  ;;  %v7399_v62 = vpack.i.bf16 %v922_v7, %v10049_v14  ;;  %v15676_v60 = vld [vmem:[#allocation52_spill] sm:$0xff]  ;;  %v10171_v47 = vsel %vm665_vm3, %v9820_v11, %v1236_v16  ;;  %v15677_v2 = vld [vmem:[#allocation55_spill] sm:$0xff]  ;;  %v1352_v11 = vrot.slane %v10024_v26, 2 }
  0x6d   : > { %7385 = vrot.lane.b32.xlu0 %v7384_v48, %s9280_s21  ;;  %v15675_v24 = vld [vmem:[#allocation49_spill] sm:$0xff]  ;;  %v10167_v48 = vsel %vm665_vm3, %v15676_v60, %v1231_v17  ;;  %v15678_v18 = vld [vmem:[#allocation7_spill] sm:$0xff]  ;;  %v15679_v17 = vld [vmem:[#allocation8_spill] sm:$0xff]  ;;  %v15680_v16 = vpack.i.bf16 %v10012_v35, %v10008_v36  ;;  %v7419_v7 = vpack.i.bf16 %v9550_v52, %v9548_v51  ;;  %v1367_v55 = vrot.slane %v10036_v28, 2 }
  0x6e   : > { %v10163_v56 = vsel %vm665_vm3, %v15675_v24, %v1226_v6  ;;  %v1342_v24 = vrot.slane %v10014_v40, 2  ;;  %v7414_v60 = vpack.i.bf16 %v15679_v17, %v15678_v18  ;;  %v15681_v6 = vld [vmem:[#allocation42_spill] sm:$0xff]  ;;  %v1362_v18 = vrot.slane %v10028_v42, 2  ;;  %v15711_v17 = vld [vmem:[#allocation43_spill] sm:$0xff] }
  0x6f   : > { %7390 = vrot.lane.b32.xlu1 %v7389_v30, %s9280_s21  ;;  %v7544_v27 = vpack.i.bf16 %v10163_v56, %v15677_v2  ;;  %v1357_v30 = vrot.slane %v10026_v61, 2  ;;  %v10202_v61 = vsel %vm842_vm4, %v9833_v21, %v1347_v15  ;;  %v10206_v35 = vsel %vm842_vm4, %v9837_v41, %v1352_v11  ;;  %v15728_v41 = vld [vmem:[#allocation18_spill] sm:$0xff] }
  0x70   : > { %v10194_v40 = vsel %vm842_vm4, %v15681_v6, %v1342_v24  ;;  %v7569_v52 = vpack.i.bf16 %v10202_v61, %v9868_v57  ;;  %v10221_v42 = vsel %vm842_vm4, %v9859_v20, %v1362_v18  ;;  %v1372_v15 = vrot.slane %v10038_v53, 2  ;;  %v15683_v20 = vld [vmem:[#allocation12_spill] sm:$0xff]  ;;  %v15688_v18 = vld [vmem:[#allocation63_spill] sm:$0xff]  ;;  %v613_v28 = vld [vmem:[#allocation2 + $0x190] sm:$0x3] }
  0x71   : > { %7395 = vrot.lane.b32.xlu0 %v15680_v16, %s9280_s21  ;;  %v7564_v26 = vpack.i.bf16 %v10194_v40, %v9845_v10  ;;  %v10210_v51 = vsel %vm842_vm4, %v9852_v45, %v1357_v30  ;;  %v10227_v45 = vsel %vm842_vm4, %v9872_v23, %v1367_v55  ;;  %v15682_v6 = vpack.i.bf16 %v15641_v54, %v9524_v39  ;;  %v15697_v16 = vld [vmem:[#allocation61_spill] sm:$0xff] }
  0x72   : > { %v7424_v24 = vpack.i.bf16 %v15683_v20, %v9563_v58  ;;  %v1382_v11 = vrot.slane %v10077_v44, 2  ;;  %v1387_v23 = vrot.slane %v10088_v13, 2  ;;  %v10243_v53 = vsel %vm842_vm4, %v9896_v4, %v1372_v15  ;;  %v15685_v13 = vld [vmem:[#allocation56_spill] sm:$0xff]  ;;  %v15690_v15 = vld [vmem:[#allocation59_spill] sm:$0xff] }
  0x73   : > { %7400 = vrot.lane.b32.xlu1 %v7399_v62, %s9280_s21  ;;  %v1377_v62 = vrot.slane %v10040_v46, 2  ;;  %v1392_v39 = vrot.slane %v10090_v22, 2  ;;  %v1397_v54 = vrot.slane %v10092_v5, 2  ;;  %v15684_v58 = vpack.i.bf16 %v9509_v32, %v9507_v31  ;;  %v15687_v5 = vld [vmem:[#allocation62_spill] sm:$0xff]  ;;  %v15705_v4 = vld [vmem:[#allocation27_spill] sm:$0xff]  ;;  %s9288_s21 = smov 36  }
  0x74   : > { %v10261_v30 = vsel %vm842_vm4, %v15685_v13, %v1382_v11  ;;  %v15689_v32 = vld [vmem:[#allocation58_spill] sm:$0xff]  ;;  %v15692_v11 = vld [vmem:[#allocation65_spill] sm:$0xff]  ;;  %v1407_v13 = vrot.slane %v10112_v50, 2  ;;  %v15760_v10 = vpack.i.bf16 %v10206_v35, %v9879_v63  ;;  %v15764_v57 = vpack.i.bf16 %v10221_v42, %v9892_v9 }
  0x75   : > { %7405 = vrot.lane.b32.xlu0 %v15682_v6, %s9281_s22  ;;  %v10247_v46 = vsel %vm842_vm4, %v9903_v38, %v1377_v62  ;;  %v15686_v38 = vld [vmem:[#allocation57_spill] sm:$0xff]  ;;  %v10273_v55 = vsel %vm842_vm4, %v15689_v32, %v1392_v39  ;;  %v10277_v62 = vsel %vm842_vm4, %v15690_v15, %v1397_v54  ;;  %v15691_v6 = vld [vmem:[#allocation64_spill] sm:$0xff]  ;;  %v15694_v39 = vld [vmem:[#allocation14_spill] sm:$0xff]  ;;  %v15767_v63 = vpack.i.bf16 %v10227_v45, %v9909_v0 }
  0x76   : > { %v10265_v22 = vsel %vm842_vm4, %v15686_v38, %v1387_v23  ;;  %v15693_v38 = vld [vmem:[#allocation31_spill] sm:$0xff]  ;;  %v15695_v32 = vld [vmem:[#allocation16_spill] sm:$0xff]  ;;  %v10296_v20 = vsel %vm842_vm4, %v15697_v16, %v1407_v13  ;;  %v15702_v16 = vld [vmem:[#allocation21_spill] sm:$0xff]  ;;  %v15768_v35 = vpack.i.bf16 %v10243_v53, %v9919_v29  ;;  %v15771_v9 = vpack.i.bf16 %v10247_v46, %v9928_v1 }
  0x77   : > { %7410 = vrot.lane.b32.xlu1 %v15684_v58, %s9281_s22  ;;  %v1402_v58 = vrot.slane %v10110_v37, 2  ;;  %v1412_v31 = vrot.slane %v15693_v38, 2  ;;  %v7429_v54 = vpack.i.bf16 %v15695_v32, %v15694_v39  ;;  %v15696_v15 = vld [vmem:[#allocation60_spill] sm:$0xff]  ;;  %v15698_v23 = vld [vmem:[#allocation67_spill] sm:$0xff]  ;;  %v15699_v38 = vld [vmem:[#allocation66_spill] sm:$0xff]  ;;  %v15772_v42 = vpack.i.bf16 %v10261_v30, %v15687_v5 }
  0x78   : > { %v15700_v39 = vld [vmem:[#allocation17_spill] sm:$0xff]  ;;  %v15701_v32 = vld [vmem:[#allocation20_spill] sm:$0xff]  ;;  %v15703_v13 = vld [vmem:[#allocation23_spill] sm:$0xff]  ;;  %v15775_v29 = vpack.i.bf16 %v10265_v22, %v15688_v18  ;;  %v15776_v1 = vpack.i.bf16 %v10273_v55, %v15691_v6  ;;  %v15779_v30 = vpack.i.bf16 %v10277_v62, %v15692_v11  ;;  %v15783_v62 = vpack.i.bf16 %v10296_v20, %v10008_v36 }
  0x79   : > { %7415 = vrot.lane.b32.xlu0 %v7414_v60, %s9281_s22  ;;  %v10292_v60 = vsel %vm842_vm4, %v15696_v15, %v1402_v58  ;;  %v7434_v58 = vpack.i.bf16 %v15701_v32, %v15700_v39  ;;  %v7439_v37 = vpack.i.bf16 %v15703_v13, %v15702_v16  ;;  %v15704_v50 = vld [vmem:[#allocation26_spill] sm:$0xff]  ;;  %v15708_v39 = vld [vmem:[#allocation33_spill] sm:$0xff]  ;;  %v15709_v32 = vld [vmem:[#allocation39_spill] sm:$0xff] }
  0x7a   : > { %v7444_v44 = vpack.i.bf16 %v15705_v4, %v15704_v50  ;;  %v7454_v15 = vpack.i.bf16 %v15709_v32, %v15708_v39  ;;  %v15713_v13 = vld [vmem:[#allocation47_spill] sm:$0xff]  ;;  %v15715_v50 = vld [vmem:[#allocation50_spill] sm:$0xff]  ;;  %v15716_v39 = vld [vmem:[#allocation53_spill] sm:$0xff]  ;;  %v15780_v22 = vpack.i.bf16 %v10292_v60, %v15698_v23 }
  0x7b   : > { %7420 = vrot.lane.b32.xlu1 %v7419_v7, %s9281_s22  ;;  %v10304_v7 = vsel %vm842_vm4, %v15699_v38, %v1412_v31  ;;  %v15706_v31 = vld [vmem:[#allocation29_spill] sm:$0xff]  ;;  %v15717_v32 = vld [vmem:[#allocation54_spill] sm:$0xff]  ;;  %v10515_v6 = vld [vmem:[#allocation2 + $0x38] sm:$0xff] }
  0x7c   : > { %v10513_v55 = vld [vmem:[#allocation2 + $0x30] sm:$0xff]  ;;  %v15784_v23 = vpack.i.bf16 %v10304_v7, %v10049_v14  ;;  %v10538_v36 = vld [vmem:[#allocation2 + $0x68] sm:$0xff]  ;;  %v10547_v14 = vld [vmem:[#allocation2 + $0x80] sm:$0xff] }
  0x7d   : > { %7425 = vrot.lane.b32.xlu0 %v7424_v24, %s9281_s22  ;;  %v15707_v24 = vld [vmem:[#allocation32_spill] sm:$0xff] }
  0x7e   : > { %v7449_v38 = vpack.i.bf16 %v15707_v24, %v15706_v31  ;;  %v565_v24 = vld [vmem:[#allocation2 + $0x180] sm:$0xff] }
  0x7f   : > { %7430 = vrot.lane.b32.xlu1 %v7429_v54, %s9281_s22  ;;  %v15710_v54 = vld [vmem:[#allocation41_spill] sm:$0xff] }
  0x80   : > { %v7459_v16 = vpack.i.bf16 %v15711_v17, %v15710_v54  ;;  %v15719_v54 = vld [vmem:[#allocation10_spill] sm:$0xff] }
  0x81   : > { %7435 = vrot.lane.b32.xlu0 %v7434_v58, %s9281_s22  ;;  %v15712_v58 = vld [vmem:[#allocation44_spill] sm:$0xff] }
  0x82   : > { %v7464_v4 = vpack.i.bf16 %v15713_v13, %v15712_v58  ;;  %v15721_v58 = vld [vmem:[#allocation6_spill] sm:$0xff]  ;;  %v15722_v13 = vld [vmem:[#allocation9_spill] sm:$0xff] }
  0x83   : > { %7440 = vrot.lane.b32.xlu1 %v7439_v37, %s9281_s22  ;;  %v15714_v37 = vld [vmem:[#allocation48_spill] sm:$0xff] }
  0x84   : > { %v7469_v31 = vpack.i.bf16 %v15715_v50, %v15714_v37  ;;  %v15724_v37 = vld [vmem:[#allocation4_spill] sm:$0xff]  ;;  %v15725_v50 = vld [vmem:[#allocation15_spill] sm:$0xff] }
  0x85   : > { %7445 = vrot.lane.b32.xlu0 %v7444_v44, %s9281_s22  ;;  %v566_v44 = vld [vmem:[#allocation2 + $0x188] sm:$0xff] }
  0x86   : > { %v10336_v17 = vpack.i.bf16 %v566_v44, %v565_v24 }
  0x87   : > { %7450 = vrot.lane.b32.xlu1 %v7449_v38, %s9281_s22  ;;  %v7474_v38 = vpack.i.bf16 %v15717_v32, %v15716_v39  ;;  %v1239_v39 = vrot.slane %v566_v44, 1  ;;  %v1238_v32 = vrot.slane %v565_v24, 1 }
  0x89   : > { %7455 = vrot.lane.b32.xlu0 %v7454_v15, %s9281_s22  ;;  %v15718_v15 = vld [vmem:[#allocation5_spill] sm:$0xff] }
  0x8b   : > { %7460 = vrot.lane.b32.xlu1 %v7459_v16, %s9281_s22  ;;  %v15720_v16 = vpack.i.bf16 %v15718_v15, %v15719_v54  ;;  %v15730_v15 = vld [vmem:[#allocation13_spill] sm:$0xff]  ;;  %v15731_v54 = vld [vmem:[#allocation24_spill] sm:$0xff] }
  0x8d   : > { %7465 = vrot.lane.b32.xlu0 %v7464_v4, %s9281_s22  ;;  %v15723_v4 = vpack.i.bf16 %v15721_v58, %v15722_v13  ;;  %v10362_v58 = vsel %vm665_vm3, %v1238_v32, %v1239_v39  ;;  %v1732_v13 = vrot.slane %v613_v28, 1  ;;  %v15739_v32 = vld [vmem:[#allocation25_spill] sm:$0xff] }
  0x8f   : > { %7470 = vrot.lane.b32.xlu1 %v7469_v31, %s9281_s22  ;;  %v15726_v31 = vpack.i.bf16 %v15724_v37, %v15725_v50  ;;  %v15734_v37 = vld [vmem:[#allocation28_spill] sm:$0xff] }
  0x91   : > { %7475 = vrot.lane.b32.xlu0 %v7474_v38, %s9281_s22  ;;  %v15727_v38 = vld [vmem:[#allocation11_spill] sm:$0xff] }
  0x92   : > { %v15729_v21 = vpack.i.bf16 %v15727_v38, %v15728_v41  ;;  %v15737_v41 = vld [vmem:[#allocation30_spill] sm:$0xff] }
  0x93   : > { %7480 = vrot.lane.b32.xlu1 %v10336_v17, %s9281_s22 }
  0x95   : > { %7485 = vrot.lane.b32.xlu0 %v15720_v16, %s9282_s23  ;;  %v15732_v16 = vpack.i.bf16 %v15730_v15, %v15731_v54  ;;  %v15740_v54 = vld [vmem:[#allocation34_spill] sm:$0xff]  ;;  %v10619_v15 = vld [vmem:[#allocation2 + $0x140] sm:$0xff] }
  0x96   : > { %15797 = vst [vmem:[#allocation29_spill] sm:$0xff] %v10619_v15 }
  0x97   : > { %7490 = vrot.lane.b32.xlu1 %v15723_v4, %s9282_s23  ;;  %v15733_v4 = vld [vmem:[#allocation19_spill] sm:$0xff] }
  0x98   : > { %v15735_v50 = vpack.i.bf16 %v15733_v4, %v15734_v37  ;;  %v15742_v4 = vpack.i.bf16 %v10137_v59, %v15671_v49  ;;  %v567_v37 = vld [vmem:[#allocation2 + $0x190] sm:$0x3]  ;;  %v15748_v59 = vld [vmem:[#allocation51_spill] sm:$0xff] }
  0x99   : > { %7495 = vrot.lane.b32.xlu0 %v15726_v31, %s9282_s23  ;;  %v10369_v31 = vsel %vm665_vm3, %v1239_v39, %v1732_v13  ;;  %v15749_v49 = vpack.i.bf16 %v10149_v3, %v15748_v59  ;;  %v1415_v3 = vrot.slane %v566_v44, 2  ;;  %v1417_v53 = vrot.slane %v567_v37, 2 }
  0x9b   : > { %7500 = vrot.lane.b32.xlu1 %v15729_v21, %s9282_s23  ;;  %v15736_v21 = vld [vmem:[#allocation22_spill] sm:$0xff]  ;;  %v1418_v5 = vsel %vm842_vm4, %v1415_v3, %v1417_v53 }
  0x9c   : > { %v15738_v38 = vpack.i.bf16 %v15736_v21, %v15737_v41  ;;  %v1241_v21 = vrot.slane %v567_v37, 1  ;;  %v15745_v41 = vpack.i.bf16 %v10145_v19, %v15673_v8  ;;  %v15752_v19 = vpack.i.bf16 %v10167_v48, %v9816_v43  ;;  %v10524_v37 = vld [vmem:[#allocation2 + $0x48] sm:$0xff] }
  0x9d   : > { %7505 = vrot.lane.b32.xlu0 %v15732_v16, %s9282_s23  ;;  %v15741_v16 = vpack.i.bf16 %v15739_v32, %v15740_v54  ;;  %v1908_v43 = vrot.slane %v613_v28, 2  ;;  %v10617_v28 = vld [vmem:[#allocation2 + $0x138] sm:$0xff] }
  0x9e   : > { %v1242_v54 = vsel %vm665_vm3, %v1239_v39, %v1241_v21  ;;  %v15753_v39 = vpack.i.bf16 %v10171_v47, %v9830_v34  ;;  %v7644_v21 = vpack.i.bf16 %v10515_v6, %v10513_v55 }
  0x9f   : > { %7510 = vrot.lane.b32.xlu1 %v15735_v50, %s9282_s23  ;;  %v15744_v50 = vpack.i.bf16 %v10141_v12, %v15672_v25  ;;  %v7559_v8 = vpack.i.bf16 %v1242_v54, %v10362_v58  ;;  %v10436_v34 = vsel %vm842_vm4, %v1415_v3, %v1908_v43  ;;  %v10565_v43 = vld [vmem:[#allocation2 + $0xb0] sm:$0xff] }
  0xa0   : > { %v10385_v13 = vpop.permute.xlu0 %7245  ;;  %15758 = vst [vmem:[#allocation55_spill] sm:$0xff] %v10436_v34  ;;  %v10742_v34 = vld [vmem:[#allocation2 + $0x130] sm:$0x3] }
  0xa1   : > { %7515 = vrot.lane.b32.xlu0 %v15738_v38, %s9282_s23  ;;  %15743 = vst [vmem:[#allocation35_spill] sm:$0xff] %v10385_v13  ;;  %v10722_v13 = vld [vmem:[#allocation2 + $0x100] sm:$0x3] }
  0xa3   : > { %7520 = vrot.lane.b32.xlu1 %v15741_v16, %s9282_s23  ;;  %v10395_v38 = vpop.permute.xlu1 %7255  ;;  %v1414_v16 = vrot.slane %v565_v24, 2  ;;  %v15763_v24 = vpack.i.bf16 %v10210_v51, %v9885_v33 }
  0xa4   : > { %15746 = vst [vmem:[#allocation36_spill] sm:$0xff] %v10395_v38 }
  0xa5   : > { %7525 = vrot.lane.b32.xlu0 %v15742_v4, %s9282_s23  ;;  %v10397_v32 = vpop.permute.xlu0 %7250  ;;  %v10427_v56 = vsel %vm842_vm4, %v1414_v16, %v1415_v3 }
  0xa6   : > { %15747 = vst [vmem:[#allocation40_spill] sm:$0xff] %v10397_v32  ;;  %15756 = vst [vmem:[#allocation49_spill] sm:$0xff] %v10427_v56  ;;  %v7639_v11 = vpack.i.bf16 %v1418_v5, %v10427_v56  ;;  %v10592_v5 = vld [vmem:[#allocation2 + $0xf8] sm:$0xff]  ;;  %v10702_v32 = vld [vmem:[#allocation2 + $0xd0] sm:$0x3] }
  0xa7   : > { %7530 = vrot.lane.b32.xlu1 %v15744_v50, %s9282_s23  ;;  %v10408_v25 = vpop.permute.xlu1 %7260  ;;  %v10526_v50 = vld [vmem:[#allocation2 + $0x50] sm:$0xff]  ;;  %v10732_v56 = vld [vmem:[#allocation2 + $0x118] sm:$0x3] }
  0xa8   : > { %15750 = vst [vmem:[#allocation46_spill] sm:$0xff] %v10408_v25  ;;  %v7649_v59 = vpack.i.bf16 %v10526_v50, %v10524_v37 }
  0xa9   : > { %7535 = vrot.lane.b32.xlu0 %v15745_v41, %s9282_s23  ;;  %v10410_v12 = vpop.permute.xlu0 %7265  ;;  %v10536_v41 = vld [vmem:[#allocation2 + $0x60] sm:$0xff] }
  0xaa   : > { %15751 = vst [vmem:[#allocation37_spill] sm:$0xff] %v10410_v12  ;;  %v7654_v54 = vpack.i.bf16 %v10538_v36, %v10536_v41 }
  0xab   : > { %7540 = vrot.lane.b32.xlu1 %v15749_v49, %s9282_s23  ;;  %v10421_v2 = vpop.permute.xlu1 %7270  ;;  %v10545_v49 = vld [vmem:[#allocation2 + $0x78] sm:$0xff] }
  0xac   : > { %15754 = vst [vmem:[#allocation38_spill] sm:$0xff] %v10421_v2  ;;  %v7659_v16 = vpack.i.bf16 %v10547_v14, %v10545_v49 }
  0xad   : > { %7545 = vrot.lane.b32.xlu0 %v7544_v27, %s9282_s23  ;;  %v10423_v27 = vpop.permute.xlu0 %7275 }
  0xae   : > { %15755 = vst [vmem:[#allocation45_spill] sm:$0xff] %v10423_v27  ;;  %v10692_v27 = vld [vmem:[#allocation2 + $0xb8] sm:$0x3] }
  0xaf   : > { %7550 = vrot.lane.b32.xlu1 %v15752_v19, %s9282_s23  ;;  %v10433_v48 = vpop.permute.xlu1 %7280  ;;  %v10554_v19 = vld [vmem:[#allocation2 + $0x90] sm:$0xff] }
  0xb0   : > { %15757 = vst [vmem:[#allocation52_spill] sm:$0xff] %v10433_v48  ;;  %v1679_v2 = vrot.slane %v10554_v19, 1 }
  0xb1   : > { %7555 = vrot.lane.b32.xlu0 %v15753_v39, %s9282_s23  ;;  %v10563_v39 = vld [vmem:[#allocation2 + $0xa8] sm:$0xff] }
  0xb3   : > { %7560 = vrot.lane.b32.xlu1 %v7559_v8, %s9282_s23  ;;  %v10556_v8 = vld [vmem:[#allocation2 + $0x98] sm:$0xff]  ;;  %s9289_s23 = smov 18  }
  0xb5   : > { %7565 = vrot.lane.b32.xlu0 %v7564_v26, %s9283_s24 }
  0xb6   : > { %v10438_v47 = vpop.permute.xlu0 %7285 }
  0xb7   : > { %15759 = vst [vmem:[#allocation7_spill] sm:$0xff] %v10438_v47  ;;  %7570 = vrot.lane.b32.xlu1 %v7569_v52, %s9283_s24  ;;  %v10450_v40 = vpop.permute.xlu1 %7290  ;;  %v1674_v47 = vrot.slane %v10545_v49, 1 }
  0xb8   : > { %15761 = vst [vmem:[#allocation8_spill] sm:$0xff] %v10450_v40 }
  0xb9   : > { %7575 = vrot.lane.b32.xlu0 %v15760_v10, %s9283_s24 }
  0xba   : > { %v10452_v26 = vpop.permute.xlu0 %7295 }
  0xbb   : > { %15762 = vst [vmem:[#allocation42_spill] sm:$0xff] %v10452_v26  ;;  %7580 = vrot.lane.b32.xlu1 %v15763_v24, %s9283_s24  ;;  %v7664_v24 = vpack.i.bf16 %v10556_v8, %v10554_v19  ;;  %v1675_v26 = vrot.slane %v10547_v14, 1 }
  0xbc   : > { %v10462_v61 = vpop.permute.xlu1 %7300 }
  0xbd   : > { %7585 = vrot.lane.b32.xlu0 %v15764_v57, %s9283_s24  ;;  %15765 = vst [vmem:[#allocation12_spill] sm:$0xff] %v10462_v61  ;;  %v10572_v57 = vld [vmem:[#allocation2 + $0xc0] sm:$0xff] }
  0xbe   : > { %v10464_v52 = vpop.permute.xlu0 %7305 }
  0xbf   : > { %15766 = vst [vmem:[#allocation56_spill] sm:$0xff] %v10464_v52  ;;  %7590 = vrot.lane.b32.xlu1 %v15767_v63, %s9283_s24  ;;  %v10574_v63 = vld [vmem:[#allocation2 + $0xc8] sm:$0xff] }
  0xc0   : > { %v10474_v33 = vpop.permute.xlu1 %7310 }
  0xc1   : > { %7595 = vrot.lane.b32.xlu0 %v15768_v35, %s9283_s24  ;;  %15769 = vst [vmem:[#allocation57_spill] sm:$0xff] %v10474_v33 }
  0xc2   : > { %v10476_v51 = vpop.permute.xlu0 %7315 }
  0xc3   : > { %15770 = vst [vmem:[#allocation62_spill] sm:$0xff] %v10476_v51  ;;  %7600 = vrot.lane.b32.xlu1 %v15771_v9, %s9283_s24  ;;  %v7669_v9 = vpack.i.bf16 %v10565_v43, %v10563_v39  ;;  %v1669_v51 = vrot.slane %v10536_v41, 1 }
  0xc4   : > { %v10486_v0 = vpop.permute.xlu1 %7320 }
  0xc5   : > { %7605 = vrot.lane.b32.xlu0 %v15772_v42, %s9283_s24  ;;  %15773 = vst [vmem:[#allocation63_spill] sm:$0xff] %v10486_v0  ;;  %v10581_v42 = vld [vmem:[#allocation2 + $0xd8] sm:$0xff]  ;;  %v1670_v0 = vrot.slane %v10538_v36, 1 }
  0xc6   : > { %v10488_v45 = vpop.permute.xlu0 %7325 }
  0xc7   : > { %15774 = vst [vmem:[#allocation58_spill] sm:$0xff] %v10488_v45  ;;  %7610 = vrot.lane.b32.xlu1 %v15775_v29, %s9283_s24  ;;  %v10583_v29 = vld [vmem:[#allocation2 + $0xe0] sm:$0xff]  ;;  %v1671_v12 = vsel %vm665_vm3, %v1669_v51, %v1670_v0  ;;  %v1687_v51 = vrot.slane %v10692_v27, 1 }
  0xc8   : > { %v10498_v46 = vpop.permute.xlu1 %7330 }
  0xc9   : > { %7615 = vrot.lane.b32.xlu0 %v15776_v1, %s9283_s24  ;;  %15777 = vst [vmem:[#allocation59_spill] sm:$0xff] %v10498_v46  ;;  %v7674_v1 = vpack.i.bf16 %v10574_v63, %v10572_v57  ;;  %v10662_v46 = vld [vmem:[#allocation2 + $0x1a0] sm:$0xff] }
  0xca   : > { %v10500_v44 = vpop.permute.xlu0 %7335 }
  0xcb   : > { %15778 = vst [vmem:[#allocation64_spill] sm:$0xff] %v10500_v44  ;;  %7620 = vrot.lane.b32.xlu1 %v15779_v30, %s9283_s24  ;;  %v10590_v30 = vld [vmem:[#allocation2 + $0xf0] sm:$0xff]  ;;  %v10660_v44 = vld [vmem:[#allocation2 + $0x198] sm:$0xff] }
  0xcc   : > { %v10511_v18 = vpop.permute.xlu1 %7340 }
  0xcd   : > { %7625 = vrot.lane.b32.xlu0 %v15780_v22, %s9283_s24  ;;  %15781 = vst [vmem:[#allocation65_spill] sm:$0xff] %v10511_v18  ;;  %v1664_v18 = vrot.slane %v10524_v37, 1 }
  0xce   : > { %v10517_v4 = vpop.permute.xlu0 %7345 }
  0xcf   : > { %15782 = vst [vmem:[#allocation31_spill] sm:$0xff] %v10517_v4  ;;  %7630 = vrot.lane.b32.xlu1 %v15783_v62, %s9283_s24  ;;  %v7679_v62 = vpack.i.bf16 %v10583_v29, %v10581_v42  ;;  %v10656_v4 = vld [vmem:[#allocation2 + $0x70] sm:$0x3] }
  0xd0   : > { %v10532_v60 = vpop.permute.xlu1 %7350  ;;  %v1672_v61 = vrot.slane %v10656_v4, 1 }
  0xd1   : > { %7635 = vrot.lane.b32.xlu0 %v15784_v23, %s9283_s24  ;;  %15785 = vst [vmem:[#allocation14_spill] sm:$0xff] %v10532_v60  ;;  %v10601_v23 = vld [vmem:[#allocation2 + $0x110] sm:$0xff] }
  0xd2   : > { %15793 = vst [vmem:[#allocation21_spill] sm:$0xff] %v10601_v23 }
  0xd3   : > { %v10540_v20 = vpop.permute.xlu0 %7355  ;;  %7640 = vrot.lane.b32.xlu1 %v7639_v11, %s9283_s24  ;;  %v10599_v11 = vld [vmem:[#allocation2 + $0x108] sm:$0xff]  ;;  %s9290_s24 = smov 30  }
  0xd4   : > { %15786 = vst [vmem:[#allocation16_spill] sm:$0xff] %v10540_v20 }
  0xd5   : > { %7645 = vrot.lane.b32.xlu0 %v7644_v21, %s9284_s25  ;;  %v10550_v7 = vpop.permute.xlu1 %7360 }
  0xd6   : > { %15787 = vst [vmem:[#allocation60_spill] sm:$0xff] %v10550_v7  ;;  %v10646_v7 = vld [vmem:[#allocation2 + $0x58] sm:$0x3] }
  0xd7   : > { %v10558_v3 = vpop.permute.xlu0 %7365  ;;  %7650 = vrot.lane.b32.xlu1 %v7649_v59, %s9284_s25  ;;  %v7684_v59 = vpack.i.bf16 %v10592_v5, %v10590_v30  ;;  %v1667_v45 = vrot.slane %v10646_v7, 1 }
  0xd8   : > { %15788 = vst [vmem:[#allocation61_spill] sm:$0xff] %v10558_v3 }
  0xd9   : > { %7655 = vrot.lane.b32.xlu0 %v7654_v54, %s9284_s25  ;;  %v10568_v10 = vpop.permute.xlu1 %7370  ;;  %v10608_v54 = vld [vmem:[#allocation2 + $0x120] sm:$0xff] }
  0xda   : > { %15789 = vst [vmem:[#allocation67_spill] sm:$0xff] %v10568_v10  ;;  %v10637_v10 = vld [vmem:[#allocation2 + $0x168] sm:$0xff] }
  0xdb   : > { %v10576_v35 = vpop.permute.xlu0 %7375  ;;  %7660 = vrot.lane.b32.xlu1 %v7659_v16, %s9284_s25  ;;  %v10610_v16 = vld [vmem:[#allocation2 + $0x128] sm:$0xff] }
  0xdc   : > { %15790 = vst [vmem:[#allocation66_spill] sm:$0xff] %v10576_v35  ;;  %15795 = vst [vmem:[#allocation26_spill] sm:$0xff] %v10610_v16  ;;  %v10635_v35 = vld [vmem:[#allocation2 + $0x40] sm:$0x3] }
  0xdd   : > { %7665 = vrot.lane.b32.xlu0 %v7664_v24, %s9284_s25  ;;  %v10586_v53 = vpop.permute.xlu1 %7380  ;;  %v1662_v20 = vrot.slane %v10635_v35, 1 }
  0xde   : > { %15791 = vst [vmem:[#allocation17_spill] sm:$0xff] %v10586_v53  ;;  %v10628_v53 = vld [vmem:[#allocation2 + $0x158] sm:$0xff] }
  0xdf   : > { %v10594_v22 = vpop.permute.xlu0 %7385  ;;  %7670 = vrot.lane.b32.xlu1 %v7669_v9, %s9284_s25  ;;  %v7689_v9 = vpack.i.bf16 %v10601_v23, %v10599_v11 }
  0xe0   : > { %15792 = vst [vmem:[#allocation20_spill] sm:$0xff] %v10594_v22  ;;  %v10626_v22 = vld [vmem:[#allocation2 + $0x150] sm:$0xff] }
  0xe1   : > { %7675 = vrot.lane.b32.xlu0 %v7674_v1, %s9284_s25  ;;  %v10604_v21 = vpop.permute.xlu1 %7390  ;;  %v7704_v3 = vpack.i.bf16 %v10628_v53, %v10626_v22 }
  0xe2   : > { %15794 = vst [vmem:[#allocation23_spill] sm:$0xff] %v10604_v21  ;;  %v7694_v21 = vpack.i.bf16 %v10610_v16, %v10608_v54 }
  0xe3   : > { %v10612_v24 = vpop.permute.xlu0 %7395  ;;  %7680 = vrot.lane.b32.xlu1 %v7679_v62, %s9284_s25  ;;  %v7699_v62 = vpack.i.bf16 %v10619_v15, %v10617_v28 }
  0xe4   : > { %15796 = vst [vmem:[#allocation27_spill] sm:$0xff] %v10612_v24 }
  0xe5   : > { %7685 = vrot.lane.b32.xlu0 %v7684_v59, %s9284_s25  ;;  %v10622_v1 = vpop.permute.xlu1 %7400  ;;  %v10639_v59 = vld [vmem:[#allocation2 + $0x170] sm:$0xff] }
  0xe6   : > { %15798 = vst [vmem:[#allocation32_spill] sm:$0xff] %v10622_v1  ;;  %15800 = vst [vmem:[#allocation39_spill] sm:$0xff] %v10639_v59 }
  0xe7   : > { %v10630_v24 = vpop.permute.xlu0 %7405  ;;  %7690 = vrot.lane.b32.xlu1 %v7689_v9, %s9284_s25  ;;  %v1660_v9 = vrot.slane %v10515_v6, 1 }
  0xe8   : > { %15799 = vst [vmem:[#allocation33_spill] sm:$0xff] %v10630_v24  ;;  %v1659_v24 = vrot.slane %v10513_v55, 1 }
  0xe9   : > { %7695 = vrot.lane.b32.xlu0 %v7694_v21, %s9284_s25  ;;  %v10642_v1 = vpop.permute.xlu1 %7410  ;;  %v7709_v21 = vpack.i.bf16 %v10639_v59, %v10637_v10  ;;  %v1663_v52 = vsel %vm665_vm3, %v1660_v9, %v1662_v20 }
  0xea   : > { %15801 = vst [vmem:[#allocation41_spill] sm:$0xff] %v10642_v1  ;;  %v1665_v1 = vrot.slane %v10526_v50, 1  ;;  %v1661_v33 = vsel %vm665_vm3, %v1659_v24, %v1660_v9  ;;  %v1680_v9 = vrot.slane %v10556_v8, 1 }
  0xeb   : > { %v10651_v60 = vpop.permute.xlu0 %7415  ;;  %7700 = vrot.lane.b32.xlu1 %v7699_v62, %s9284_s25 }
  0xec   : > { %15802 = vst [vmem:[#allocation43_spill] sm:$0xff] %v10651_v60  ;;  %v10669_v60 = vld [vmem:[#allocation2 + $0x88] sm:$0x3]  ;;  %v1666_v48 = vsel %vm665_vm3, %v1664_v18, %v1665_v1  ;;  %v1668_v24 = vsel %vm665_vm3, %v1665_v1, %v1667_v45  ;;  %v1673_v18 = vsel %vm665_vm3, %v1670_v0, %v1672_v61  ;;  %v1685_v1 = vrot.slane %v10565_v43, 1 }
  0xed   : > { %7705 = vrot.lane.b32.xlu0 %v7704_v3, %s9284_s25  ;;  %v10667_v62 = vpop.permute.xlu1 %7420  ;;  %v7719_v3 = vpack.i.bf16 %v10662_v46, %v10660_v44  ;;  %v1677_v20 = vrot.slane %v10669_v60, 1  ;;  %v1690_v61 = vrot.slane %v10574_v63, 1 }
  0xee   : > { %15803 = vst [vmem:[#allocation44_spill] sm:$0xff] %v10667_v62  ;;  %v10681_v62 = vld [vmem:[#allocation2 + $0xa0] sm:$0x3] }
  0xef   : > { %v10676_v40 = vpop.permute.xlu0 %7425  ;;  %7710 = vrot.lane.b32.xlu1 %v7709_v21, %s9284_s25  ;;  %v7724_v21 = vpack.i.bf16 %v1663_v52, %v1661_v33  ;;  %v1682_v45 = vrot.slane %v10681_v62, 1  ;;  %v1684_v52 = vrot.slane %v10563_v39, 1  ;;  %v1676_v33 = vsel %vm665_vm3, %v1674_v47, %v1675_v26 }
  0xf0   : > { %15804 = vst [vmem:[#allocation47_spill] sm:$0xff] %v10676_v40 }
  0xf1   : > { %7715 = vrot.lane.b32.xlu0 %v10336_v17, %s9284_s25  ;;  %v10690_v40 = vpop.permute.xlu1 %7430  ;;  %v7729_v17 = vpack.i.bf16 %v1668_v24, %v1666_v48  ;;  %v1689_v48 = vrot.slane %v10572_v57, 1  ;;  %v1681_v24 = vsel %vm665_vm3, %v1679_v2, %v1680_v9  ;;  %v1683_v47 = vsel %vm665_vm3, %v1680_v9, %v1682_v45 }
  0xf2   : > { %15805 = vst [vmem:[#allocation48_spill] sm:$0xff] %v10690_v40  ;;  %v1678_v40 = vsel %vm665_vm3, %v1675_v26, %v1677_v20  ;;  %v1692_v26 = vrot.slane %v10702_v32, 1  ;;  %v1695_v20 = vrot.slane %v10583_v29, 1  ;;  %v1700_v9 = vrot.slane %v10592_v5, 1 }
  0xf3   : > { %v10699_v25 = vpop.permute.xlu0 %7435  ;;  %7720 = vrot.lane.b32.xlu1 %v7719_v3, %s9284_s25  ;;  %v10712_v3 = vld [vmem:[#allocation2 + $0xe8] sm:$0x3] }
  0xf4   : > { %15806 = vst [vmem:[#allocation50_spill] sm:$0xff] %v10699_v25  ;;  %v7734_v25 = vpack.i.bf16 %v1673_v18, %v1671_v12  ;;  %v1694_v12 = vrot.slane %v10581_v42, 1  ;;  %v1686_v18 = vsel %vm665_vm3, %v1684_v52, %v1685_v1  ;;  %v1697_v2 = vrot.slane %v10712_v3, 1 }
  0xf5   : > { %7725 = vrot.lane.b32.xlu0 %v7724_v21, %s9285_s26  ;;  %v10710_v0 = vpop.permute.xlu1 %7440  ;;  %v7739_v21 = vpack.i.bf16 %v1678_v40, %v1676_v33  ;;  %v1699_v40 = vrot.slane %v10590_v30, 1  ;;  %v1693_v33 = vsel %vm665_vm3, %v1690_v61, %v1692_v26  ;;  %v1702_v52 = vrot.slane %v10722_v13, 1 }
  0xf6   : > { %15807 = vst [vmem:[#allocation53_spill] sm:$0xff] %v10710_v0  ;;  %v1688_v0 = vsel %vm665_vm3, %v1685_v1, %v1687_v51  ;;  %v1705_v1 = vrot.slane %v10601_v23, 1  ;;  %v10752_v23 = vld [vmem:[#allocation2 + $0x148] sm:$0x3] }
  0xf7   : > { %v10719_v38 = vpop.permute.xlu0 %7445  ;;  %7730 = vrot.lane.b32.xlu1 %v7729_v17, %s9285_s26  ;;  %v1691_v17 = vsel %vm665_vm3, %v1689_v48, %v1690_v61  ;;  %v1707_v48 = vrot.slane %v10732_v56, 1  ;;  %v1710_v61 = vrot.slane %v10610_v16, 1  ;;  %v10762_v16 = vld [vmem:[#allocation2 + $0x160] sm:$0x3] }
  0xf8   : > { %15808 = vst [vmem:[#allocation54_spill] sm:$0xff] %v10719_v38  ;;  %v7744_v38 = vpack.i.bf16 %v1683_v47, %v1681_v24  ;;  %v1704_v24 = vrot.slane %v10599_v11, 1  ;;  %v1696_v47 = vsel %vm665_vm3, %v1694_v12, %v1695_v20  ;;  %v1712_v12 = vrot.slane %v10742_v34, 1 }
  0xf9   : > { %7735 = vrot.lane.b32.xlu0 %v7734_v25, %s9285_s26  ;;  %v10730_v45 = vpop.permute.xlu1 %7450  ;;  %v7749_v25 = vpack.i.bf16 %v1688_v0, %v1686_v18  ;;  %v1709_v0 = vrot.slane %v10608_v54, 1  ;;  %v1703_v18 = vsel %vm665_vm3, %v1700_v9, %v1702_v52 }
  0xfa   : > { %15809 = vst [vmem:[#allocation5_spill] sm:$0xff] %v10730_v45  ;;  %v1698_v45 = vsel %vm665_vm3, %v1695_v20, %v1697_v2  ;;  %v1715_v20 = vrot.slane %v10619_v15, 1  ;;  %v10772_v15 = vld [vmem:[#allocation2 + $0x178] sm:$0x3] }
  0xfb   : > { %v10739_v51 = vpop.permute.xlu0 %7455  ;;  %7740 = vrot.lane.b32.xlu1 %v7739_v21, %s9285_s26  ;;  %v1701_v21 = vsel %vm665_vm3, %v1699_v40, %v1700_v9  ;;  %v1717_v40 = vrot.slane %v10752_v23, 1  ;;  %v1720_v9 = vrot.slane %v10628_v53, 1 }
  0xfc   : > { %15810 = vst [vmem:[#allocation10_spill] sm:$0xff] %v10739_v51  ;;  %v7754_v51 = vpack.i.bf16 %v1693_v33, %v1691_v17  ;;  %v1714_v17 = vrot.slane %v10617_v28, 1  ;;  %v1706_v33 = vsel %vm665_vm3, %v1704_v24, %v1705_v1  ;;  %v1722_v24 = vrot.slane %v10762_v16, 1 }
  0xfd   : > { %7745 = vrot.lane.b32.xlu0 %v7744_v38, %s9285_s26  ;;  %v10750_v26 = vpop.permute.xlu1 %7460  ;;  %v7759_v38 = vpack.i.bf16 %v1698_v45, %v1696_v47  ;;  %v1719_v45 = vrot.slane %v10626_v22, 1  ;;  %v1713_v47 = vsel %vm665_vm3, %v1710_v61, %v1712_v12 }
  0xfe   : > { %15811 = vst [vmem:[#allocation6_spill] sm:$0xff] %v10750_v26  ;;  %v1708_v26 = vsel %vm665_vm3, %v1705_v1, %v1707_v48  ;;  %v1725_v1 = vrot.slane %v10639_v59, 1  ;;  %v10792_v59 = vld [vmem:[#allocation2 + $0x1a8] sm:$0x3] }
  0xff   : > { %v10759_v2 = vpop.permute.xlu0 %7465  ;;  %7750 = vrot.lane.b32.xlu1 %v7749_v25, %s9285_s26  ;;  %v1711_v25 = vsel %vm665_vm3, %v1709_v0, %v1710_v61  ;;  %v1718_v0 = vsel %vm665_vm3, %v1715_v20, %v1717_v40  ;;  %v1727_v61 = vrot.slane %v10772_v15, 1  ;;  %v1734_v40 = vrot.slane %v10660_v44, 1 }
 0x100   : > { %15812 = vst [vmem:[#allocation9_spill] sm:$0xff] %v10759_v2  ;;  %v7764_v2 = vpack.i.bf16 %v1703_v18, %v1701_v21  ;;  %v9166_v21 = vld [vmem:[%s15301_s1] sm:$0xff]   ;;  %v1724_v18 = vrot.slane %v10637_v10, 1 }
 0x101   : > { %7755 = vrot.lane.b32.xlu0 %v7754_v51, %s9285_s26  ;;  %v10770_v52 = vpop.permute.xlu1 %7470  ;;  %v7769_v51 = vpack.i.bf16 %v1708_v26, %v1706_v33  ;;  %7132 = vmatprep.subr.bf16.mxu0 %v9166_v21  ;;  %v1721_v26 = vsel %vm665_vm3, %v1719_v45, %v1720_v9  ;;  %v1735_v33 = vrot.slane %v10662_v46, 1  ;;  %v1728_v45 = vsel %vm665_vm3, %v1725_v1, %v1727_v61 }
 0x102   : > { %15813 = vst [vmem:[#allocation4_spill] sm:$0xff] %v10770_v52  ;;  %v1716_v52 = vsel %vm665_vm3, %v1714_v17, %v1715_v20  ;;  %7133 = vmatpush3.bf16.msra.mxu0 %v9166_v21  ;;  %v1838_v21 = vrot.slane %v10635_v35, 2  ;;  %v1840_v61 = vrot.slane %v10524_v37, 2  ;;  %v1848_v37 = vrot.slane %v10656_v4, 2 }
 0x103   : > { %v10779_v48 = vpop.permute.xlu0 %7475  ;;  %7760 = vrot.lane.b32.xlu1 %v7759_v38, %s9285_s26  ;;  %v1723_v38 = vsel %vm665_vm3, %v1720_v9, %v1722_v24  ;;  %v7779_v20 = vpack.i.bf16 %v1718_v0, %v1716_v52  ;;  %v1737_v9 = vrot.slane %v10792_v59, 1  ;;  %v1836_v52 = vrot.slane %v10515_v6, 2 }
 0x104   : > { %15814 = vst [vmem:[#allocation15_spill] sm:$0xff] %v10779_v48  ;;  %v7774_v48 = vpack.i.bf16 %v1713_v47, %v1711_v25  ;;  %v1726_v25 = vsel %vm665_vm3, %v1724_v18, %v1725_v1  ;;  %v7784_v24 = vpack.i.bf16 %v1723_v38, %v1721_v26  ;;  %v1841_v0 = vrot.slane %v10526_v50, 2 }
 0x105   : > { %7765 = vrot.lane.b32.xlu0 %v7764_v2, %s9285_s26  ;;  %v10790_v12 = vpop.permute.xlu1 %7480  ;;  %v9167_v2 = vld [vmem:[%s15301_s1 + $0x8] sm:$0xff]   ;;  %v7789_v1 = vpack.i.bf16 %v1728_v45, %v1726_v25  ;;  %v1843_v6 = vrot.slane %v10646_v7, 2  ;;  %v1738_v35 = vsel %vm665_vm3, %v1735_v33, %v1737_v9  ;;  %v1846_v26 = vrot.slane %v10538_v36, 2 }
 0x106   : > { %15815 = vst [vmem:[#allocation11_spill] sm:$0xff] %v10790_v12  ;;  %7134 = vmatprep.subr.bf16.mxu0 %v9167_v2  ;;  %v1845_v38 = vrot.slane %v10536_v41, 2  ;;  %v1851_v7 = vrot.slane %v10547_v14, 2  ;;  %v1850_v25 = vrot.slane %v10545_v49, 2  ;;  %v1842_v45 = vsel %vm842_vm4, %v1840_v61, %v1841_v0 }
 0x107   : > { %v10797_v17 = vpop.permute.xlu0 %7485  ;;  %7770 = vrot.lane.b32.xlu1 %v7769_v51, %s9285_s26  ;;  %v1835_v51 = vrot.slane %v10513_v55, 2  ;;  %7135 = vmatpush3.bf16.msra.mxu0 %v9167_v2  ;;  %v1736_v55 = vsel %vm665_vm3, %v1734_v40, %v1735_v33  ;;  %v1839_v2 = vsel %vm842_vm4, %v1836_v52, %v1838_v21  ;;  %v1844_v41 = vsel %vm842_vm4, %v1841_v0, %v1843_v6 }
 0x108   : > { %v7799_v36 = vpack.i.bf16 %v1738_v35, %v1736_v55  ;;  %v1853_v9 = vrot.slane %v10669_v60, 2  ;;  %v1856_v4 = vrot.slane %v10556_v8, 2  ;;  %v15816_v14 = vpack.i.bf16 %v10369_v31, %v10362_v58 }
 0x109   : > { %7775 = vrot.lane.b32.xlu0 %v7774_v48, %s9285_s26  ;;  %v10808_v47 = vpop.permute.xlu1 %7490  ;;  %v9168_v48 = vld [vmem:[%s15301_s1 + $0x10] ss:$0 sps:$4 sm:$0x33]   ;;  %v1847_v49 = vsel %vm842_vm4, %v1845_v38, %v1846_v26  ;;  %v1849_v21 = vsel %vm842_vm4, %v1846_v26, %v1848_v37  ;;  %v1858_v0 = vrot.slane %v10681_v62, 2  ;;  %v1861_v60 = vrot.slane %v10565_v43, 2 }
 0x10a   : > { %7210 = vmatprep.subr.msk.bf16.mxu0 %vm2359_vm5, %v9168_v48  ;;  %v2361_v33 = vsel %vm2359_vm5, %v9168_v48, 0  ;;  %v7809_v8 = vpack.i.bf16 %v1844_v41, %v1842_v45  ;;  %v1860_v58 = vrot.slane %v10563_v39, 2  ;;  %v1852_v31 = vsel %vm842_vm4, %v1850_v25, %v1851_v7  ;;  %v15817_v25 = vld [vmem:[#allocation21_spill] sm:$0xff] }
 0x10b   : > { %v10814_v18 = vpop.permute.xlu0 %7495  ;;  %7780 = vrot.lane.b32.xlu1 %v7779_v20, %s9285_s26  ;;  %v1837_v20 = vsel %vm842_vm4, %v1835_v51, %v1836_v52  ;;  %7137 = vmatpush3.bf16.msra.mxu0 %v2361_v33  ;;  %v1855_v51 = vrot.slane %v10554_v19, 2  ;;  %v1854_v48 = vsel %vm842_vm4, %v1851_v7, %v1853_v9  ;;  %v1863_v19 = vrot.slane %v10692_v27, 2 }
 0x10c   : > { %v7804_v52 = vpack.i.bf16 %v1839_v2, %v1837_v20  ;;  %v1866_v61 = vrot.slane %v10574_v63, 2  ;;  %v7814_v43 = vpack.i.bf16 %v1849_v21, %v1847_v49  ;;  %v1865_v6 = vrot.slane %v10572_v57, 2 }
 0x10d   : > { %7785 = vrot.lane.b32.xlu0 %v7784_v24, %s9285_s26  ;;  %v10826_v50 = vpop.permute.xlu1 %7500  ;;  %v1857_v55 = vsel %vm842_vm4, %v1855_v51, %v1856_v4  ;;  %v1859_v39 = vsel %vm842_vm4, %v1856_v4, %v1858_v0  ;;  %v1868_v35 = vrot.slane %v10702_v32, 2  ;;  %v1871_v26 = vrot.slane %v10583_v29, 2 }
 0x10e   : > { %v7819_v27 = vpack.i.bf16 %v1854_v48, %v1852_v31  ;;  %v1870_v63 = vrot.slane %v10581_v42, 2  ;;  %v1862_v20 = vsel %vm842_vm4, %v1860_v58, %v1861_v60  ;;  %v1864_v2 = vsel %vm842_vm4, %v1861_v60, %v1863_v19  ;;  %v15821_v60 = vld [vmem:[#allocation29_spill] sm:$0xff] }
 0x10f   : > { %v10833_v40 = vpop.permute.xlu0 %7505  ;;  %7790 = vrot.lane.b32.xlu1 %v7789_v1, %s9285_s26  ;;  %v1873_v57 = vrot.slane %v10712_v3, 2  ;;  %v1876_v37 = vrot.slane %v10592_v5, 2  ;;  %v7824_v29 = vpack.i.bf16 %v1859_v39, %v1857_v55  ;;  %v1875_v7 = vrot.slane %v10590_v30, 2 }
 0x110   : > { %v1869_v33 = vsel %vm842_vm4, %v1866_v61, %v1868_v35  ;;  %v1878_v42 = vrot.slane %v10722_v13, 2  ;;  %v1881_v45 = vrot.slane %v15817_v25, 2  ;;  %v7829_v5 = vpack.i.bf16 %v1864_v2, %v1862_v20  ;;  %v15824_v35 = vld [vmem:[#allocation39_spill] sm:$0xff] }
 0x111   : > { %7795 = vrot.lane.b32.xlu0 %v15816_v14, %s9285_s26  ;;  %v10845_v24 = vpop.permute.xlu1 %7510  ;;  %v1880_v3 = vrot.slane %v10599_v11, 2  ;;  %v1872_v9 = vsel %vm842_vm4, %v1870_v63, %v1871_v26  ;;  %v1874_v4 = vsel %vm842_vm4, %v1871_v26, %v1873_v57  ;;  %v1883_v30 = vrot.slane %v10732_v56, 2  ;;  %v15819_v14 = vld [vmem:[#allocation26_spill] sm:$0xff] }
 0x112   : > { %v1885_v49 = vrot.slane %v10608_v54, 2  ;;  %v1877_v21 = vsel %vm842_vm4, %v1875_v7, %v1876_v37  ;;  %v1879_v0 = vsel %vm842_vm4, %v1876_v37, %v1878_v42  ;;  %v1888_v11 = vrot.slane %v10742_v34, 2 }
 0x113   : > { %v10852_v1 = vpop.permute.xlu0 %7515  ;;  %7800 = vrot.lane.b32.xlu1 %v7799_v36, %s9285_s26  ;;  %v1867_v36 = vsel %vm842_vm4, %v1865_v6, %v1866_v61  ;;  %v7839_v56 = vpack.i.bf16 %v1874_v4, %v1872_v9  ;;  %v1890_v31 = vrot.slane %v10617_v28, 2  ;;  %v1882_v48 = vsel %vm842_vm4, %v1880_v3, %v1881_v45  ;;  %s9291_s26 = smov 42  }
 0x114   : > { %v7834_v51 = vpack.i.bf16 %v1869_v33, %v1867_v36  ;;  %v1884_v19 = vsel %vm842_vm4, %v1881_v45, %v1883_v30  ;;  %v1893_v54 = vrot.slane %v10752_v23, 2  ;;  %v1896_v61 = vrot.slane %v10628_v53, 2  ;;  %v15832_v30 = vld [vmem:[#allocation55_spill] sm:$0xff] }
 0x115   : > { %7805 = vrot.lane.b32.xlu0 %v7804_v52, %s9286_s15  ;;  %v10861_v62 = vpop.permute.xlu1 %7520  ;;  %v1886_v52 = vrot.slane %v15819_v14, 2  ;;  %v1895_v6 = vrot.slane %v10626_v22, 2  ;;  %v1898_v28 = vrot.slane %v10762_v16, 2  ;;  %v1901_v26 = vrot.slane %v15824_v35, 2  ;;  %v15833_v14 = vld [vmem:[#allocation49_spill] sm:$0xff] }
 0x116   : > { %v7849_v53 = vpack.i.bf16 %v1884_v19, %v1882_v48  ;;  %v1900_v23 = vrot.slane %v10637_v10, 2  ;;  %v1903_v22 = vrot.slane %v10772_v15, 2  ;;  %v1910_v36 = vrot.slane %v10660_v44, 2  ;;  %v15842_v48 = vld [vmem:[#allocation36_spill] sm:$0xff] }
 0x117   : > { %v10868_v38 = vpop.permute.xlu0 %7525  ;;  %7810 = vrot.lane.b32.xlu1 %v7809_v8, %s9286_s15  ;;  %v1891_v8 = vrot.slane %v15821_v60, 2  ;;  %v1887_v55 = vsel %vm842_vm4, %v1885_v49, %v1886_v52  ;;  %v1889_v39 = vsel %vm842_vm4, %v1886_v52, %v1888_v11  ;;  %v1897_v57 = vsel %vm842_vm4, %v1895_v6, %v1896_v61 }
 0x118   : > { %v7854_v16 = vpack.i.bf16 %v1889_v39, %v1887_v55  ;;  %v1899_v37 = vsel %vm842_vm4, %v1896_v61, %v1898_v28  ;;  %v1902_v15 = vsel %vm842_vm4, %v1900_v23, %v1901_v26  ;;  %v1904_v33 = vsel %vm842_vm4, %v1901_v26, %v1903_v22  ;;  %v15843_v61 = vld [vmem:[#allocation40_spill] sm:$0xff]  ;;  %v15845_v39 = vld [vmem:[#allocation46_spill] sm:$0xff]  ;;  %v15846_v26 = vld [vmem:[#allocation37_spill] sm:$0xff] }
 0x119   : > { %7815 = vrot.lane.b32.xlu0 %v7814_v43, %s9286_s15  ;;  %v10877_v32 = vpop.permute.xlu1 %7530  ;;  %v7844_v43 = vpack.i.bf16 %v1879_v0, %v1877_v21  ;;  %v1892_v63 = vsel %vm842_vm4, %v1890_v31, %v1891_v8  ;;  %v1894_v20 = vsel %vm842_vm4, %v1891_v8, %v1893_v54  ;;  %v1913_v42 = vrot.slane %v10792_v59, 2  ;;  %v15841_v8 = vld [vmem:[#allocation35_spill] sm:$0xff] }
 0x11a   : > { %v7859_v10 = vpack.i.bf16 %v1894_v20, %v1892_v63  ;;  %v7864_v45 = vpack.i.bf16 %v1899_v37, %v1897_v57  ;;  %v15834_v52 = vpack.i.bf16 %v15832_v30, %v15833_v14  ;;  %v7247_v31 = vunpack.i.l.bf16 %v15841_v8  ;;  %v15847_v63 = vld [vmem:[#allocation38_spill] sm:$0xff]  ;;  %v9173_v57 = vld [vmem:[#allocation2 + $0x8] sm:$0xff]  ;;  %v9178_v14 = vld [vmem:[#allocation2 + $0x18] sm:$0xff] }
 0x11b   : > { %v10884_v41 = vpop.permute.xlu0 %7535  ;;  %7820 = vrot.lane.b32.xlu1 %v7819_v27, %s9286_s15  ;;  %v7258_v19 = vunpack.i.h.bf16 %v15842_v48  ;;  %v7257_v54 = vunpack.i.l.bf16 %v15842_v48  ;;  %v7252_v55 = vunpack.i.l.bf16 %v15843_v61  ;;  %v7263_v28 = vunpack.i.h.bf16 %v15845_v39 }
 0x11c   : > { %15818 = vst [vmem:[#allocation18_spill] sm:$0xff] %v10884_v41  ;;  %v7262_v35 = vunpack.i.l.bf16 %v15845_v39  ;;  %v7267_v23 = vunpack.i.l.bf16 %v15846_v26  ;;  %v7273_v20 = vunpack.i.h.bf16 %v15847_v63  ;;  %v7272_v22 = vunpack.i.l.bf16 %v15847_v63  ;;  %v9182_v39 = vld [vmem:[#allocation2 + $0x60] sm:$0xff] }
 0x11d   : > { %7825 = vrot.lane.b32.xlu0 %v7824_v29, %s9286_s15  ;;  %v10893_v13 = vpop.permute.xlu1 %7540  ;;  %v1911_v29 = vrot.slane %v10662_v46, 2  ;;  %v7869_v46 = vpack.i.bf16 %v1904_v33, %v1902_v15  ;;  %v9174_v15 = vld [vmem:[#allocation2] sm:$0xff] }
 0x11e   : > { %15820 = vst [vmem:[#allocation13_spill] sm:$0xff] %v10893_v13  ;;  %v10989_v33 = vsel %vm393_vm0, %v9174_v15, %v7247_v31  ;;  %v9180_v31 = vld [vmem:[#allocation2 + $0x48] sm:$0xff] }
 0x11f   : > { %v10900_v58 = vpop.permute.xlu0 %7545  ;;  %7830 = vrot.lane.b32.xlu1 %v7829_v5, %s9286_s15  ;;  %v1912_v3 = vsel %vm842_vm4, %v1910_v36, %v1911_v29  ;;  %v1914_v44 = vsel %vm842_vm4, %v1911_v29, %v1913_v42  ;;  %v15849_v29 = vld [vmem:[#allocation45_spill] sm:$0xff]  ;;  %v9175_v42 = vld [vmem:[#allocation2 + $0x38] sm:$0xff]  ;;  %v11009_v48 = vsel %vm393_vm0, %v9180_v31, %v7262_v35  ;;  %v15855_v31 = vld [vmem:[#allocation42_spill] sm:$0xff] }
 0x120   : > { %15822 = vst [vmem:[#allocation24_spill] sm:$0xff] %v10900_v58  ;;  %v7879_v59 = vpack.i.bf16 %v1914_v44, %v1912_v3  ;;  %v7277_v36 = vunpack.i.l.bf16 %v15849_v29  ;;  %v9177_v44 = vld [vmem:[#allocation2 + $0x20] sm:$0xff] }
 0x121   : > { %7835 = vrot.lane.b32.xlu0 %v7834_v51, %s9286_s15  ;;  %v10909_v34 = vpop.permute.xlu1 %7550 }
 0x122   : > { %15823 = vst [vmem:[#allocation19_spill] sm:$0xff] %v10909_v34  ;;  %v15871_v34 = vld [vmem:[#allocation14_spill] sm:$0xff] }
 0x123   : > { %v10916_v27 = vpop.permute.xlu0 %7555  ;;  %7840 = vrot.lane.b32.xlu1 %v7839_v56, %s9286_s15  ;;  %v7248_v56 = vunpack.i.h.bf16 %v15841_v8  ;;  %v9179_v8 = vld [vmem:[#allocation2 + $0x50] sm:$0xff]  ;;  %v7352_v58 = vunpack.i.l.bf16 %v15871_v34 }
 0x124   : > { %15825 = vst [vmem:[#allocation28_spill] sm:$0xff] %v10916_v27 }
 0x125   : > { %7845 = vrot.lane.b32.xlu0 %v7844_v43, %s9286_s15  ;;  %v10924_v2 = vpop.permute.xlu1 %7560  ;;  %v7253_v43 = vunpack.i.h.bf16 %v15843_v61  ;;  %v10984_v37 = vsel %vm393_vm0, %v9173_v57, %v7248_v56  ;;  %v11006_v56 = vsel %vm393_vm0, %v9179_v8, %v7263_v28  ;;  %v9181_v61 = vld [vmem:[#allocation2 + $0x68] sm:$0xff]  ;;  %v9184_v28 = vld [vmem:[#allocation2 + $0x78] sm:$0xff] }
 0x126   : > { %15826 = vst [vmem:[#allocation22_spill] sm:$0xff] %v10924_v2  ;;  %v11022_v57 = vsel %vm393_vm0, %v9184_v28, %v7272_v22 }
 0x127   : > { %v10929_v7 = vpop.permute.xlu0 %7565  ;;  %7850 = vrot.lane.b32.xlu1 %v7849_v53, %s9286_s15  ;;  %v7268_v53 = vunpack.i.h.bf16 %v15846_v26  ;;  %v11016_v26 = vsel %vm393_vm0, %v9182_v39, %v7267_v23 }
 0x128   : > { %15827 = vst [vmem:[#allocation30_spill] sm:$0xff] %v10929_v7  ;;  %v15870_v7 = vld [vmem:[#allocation31_spill] sm:$0xff] }
 0x129   : > { %7855 = vrot.lane.b32.xlu0 %v7854_v16, %s9286_s15  ;;  %v10937_v25 = vpop.permute.xlu1 %7570  ;;  %v7347_v27 = vunpack.i.l.bf16 %v15870_v7 }
 0x12a   : > { %15828 = vst [vmem:[#allocation25_spill] sm:$0xff] %v10937_v25 }
 0x12b   : > { %v10939_v5 = vpop.permute.xlu0 %7575  ;;  %7860 = vrot.lane.b32.xlu1 %v7859_v10, %s9286_s15  ;;  %v7278_v10 = vunpack.i.h.bf16 %v15849_v29  ;;  %v9185_v29 = vld [vmem:[#allocation2 + $0x98] sm:$0xff] }
 0x12c   : > { %15829 = vst [vmem:[#allocation34_spill] sm:$0xff] %v10939_v5 }
 0x12d   : > { %7865 = vrot.lane.b32.xlu0 %v7864_v45, %s9286_s15  ;;  %v10945_v9 = vpop.permute.xlu1 %7580  ;;  %v10992_v45 = vsel %vm393_vm0, %v9175_v42, %v7258_v19  ;;  %v15851_v19 = vld [vmem:[#allocation52_spill] sm:$0xff]  ;;  %v11027_v15 = vsel %vm393_vm0, %v9185_v29, %v7278_v10  ;;  %v9187_v10 = vld [vmem:[#allocation2 + $0xb0] sm:$0xff] }
 0x12e   : > { %15830 = vst [vmem:[#allocation51_spill] sm:$0xff] %v10945_v9  ;;  %v7282_v23 = vunpack.i.l.bf16 %v15851_v19 }
 0x12f   : > { %v10947_v4 = vpop.permute.xlu0 %7585  ;;  %7870 = vrot.lane.b32.xlu1 %v7869_v46, %s9286_s15  ;;  %v9176_v46 = vld [vmem:[#allocation2 + $0x30] sm:$0xff] }
 0x130   : > { %15831 = vst [vmem:[#allocation21_spill] sm:$0xff] %v10947_v4  ;;  %v10995_v3 = vsel %vm393_vm0, %v9176_v46, %v7257_v54  ;;  %v7283_v54 = vunpack.i.h.bf16 %v15851_v19  ;;  %v15853_v46 = vld [vmem:[#allocation7_spill] sm:$0xff]  ;;  %v15857_v19 = vld [vmem:[#allocation12_spill] sm:$0xff] }
 0x131   : > { %7875 = vrot.lane.b32.xlu0 %v15834_v52, %s9286_s15  ;;  %v10954_v51 = vpop.permute.xlu1 %7590  ;;  %v11003_v52 = vsel %vm393_vm0, %v9178_v14, %v7252_v55  ;;  %v9183_v55 = vld [vmem:[#allocation2 + $0x80] sm:$0xff]  ;;  %v7303_v28 = vunpack.i.h.bf16 %v15857_v19  ;;  %v7302_v29 = vunpack.i.l.bf16 %v15857_v19 }
 0x132   : > { %15835 = vst [vmem:[#allocation26_spill] sm:$0xff] %v10954_v51  ;;  %v11019_v63 = vsel %vm393_vm0, %v9183_v55, %v7273_v20  ;;  %v7287_v20 = vunpack.i.l.bf16 %v15853_v46  ;;  %v15854_v14 = vld [vmem:[#allocation8_spill] sm:$0xff]  ;;  %v11041_v55 = vsel %vm393_vm0, %v9187_v10, %v7283_v54  ;;  %v9189_v10 = vld [vmem:[#allocation2 + $0xc8] sm:$0xff] }
 0x133   : > { %v10956_v49 = vpop.permute.xlu0 %7595  ;;  %7880 = vrot.lane.b32.xlu1 %v7879_v59, %s9286_s15  ;;  %v10998_v59 = vsel %vm393_vm0, %v9177_v44, %v7253_v43  ;;  %v11013_v43 = vsel %vm393_vm0, %v9181_v61, %v7268_v53  ;;  %v9186_v53 = vld [vmem:[#allocation2 + $0x90] sm:$0xff]  ;;  %v7288_v44 = vunpack.i.h.bf16 %v15853_v46  ;;  %v7293_v8 = vunpack.i.h.bf16 %v15854_v14  ;;  %v9197_v51 = vld [vmem:[#allocation2 + $0x128] sm:$0xff] }
 0x134   : > { %15836 = vst [vmem:[#allocation29_spill] sm:$0xff] %v10956_v49  ;;  %v11030_v42 = vsel %vm393_vm0, %v9186_v53, %v7277_v36  ;;  %v7292_v22 = vunpack.i.l.bf16 %v15854_v14  ;;  %v7298_v61 = vunpack.i.h.bf16 %v15855_v31  ;;  %v7297_v36 = vunpack.i.l.bf16 %v15855_v31  ;;  %v15858_v53 = vld [vmem:[#allocation56_spill] sm:$0xff]  ;;  %v15859_v14 = vld [vmem:[#allocation57_spill] sm:$0xff]  ;;  %v9194_v49 = vld [vmem:[#allocation2 + $0xf0] sm:$0xff] }
 0x135   : > { %v10959_v21 = vpop.permute.xlu1 %7600  ;;  %v7308_v46 = vunpack.i.h.bf16 %v15858_v53  ;;  %v11056_v31 = vsel %vm393_vm0, %v9189_v10, %v7288_v44 }
 0x136   : > { %15837 = vst [vmem:[#allocation39_spill] sm:$0xff] %v10959_v21  ;;  %v9191_v21 = vld [vmem:[#allocation2 + $0xe0] sm:$0xff] }
 0x137   : > { %v10961_v0 = vpop.permute.xlu0 %7605 }
 0x138   : > { %15838 = vst [vmem:[#allocation55_spill] sm:$0xff] %v10961_v0  ;;  %v9190_v0 = vld [vmem:[#allocation2 + $0xc0] sm:$0xff] }
 0x139   : > { %v10963_v11 = vpop.permute.xlu1 %7610 }
 0x13a   : > { %15839 = vst [vmem:[#allocation49_spill] sm:$0xff] %v10963_v11 }
 0x13b   : > { %v10965_v60 = vpop.permute.xlu0 %7615 }
 0x13c   : > { %15840 = vst [vmem:[#allocation68_spill] sm:$0xff] %v10965_v60  ;;  %v15861_v60 = vld [vmem:[#allocation62_spill] sm:$0xff] }
 0x13d   : > { %v10972_v6 = vpop.permute.xlu1 %7620  ;;  %v7318_v19 = vunpack.i.h.bf16 %v15861_v60  ;;  %v7317_v11 = vunpack.i.l.bf16 %v15861_v60  ;;  %v11075_v60 = vsel %vm393_vm0, %v9194_v49, %v7297_v36  ;;  %v9199_v49 = vld [vmem:[#allocation2 + $0x140] sm:$0xff] }
 0x13e   : > { %15844 = vst [vmem:[#allocation35_spill] sm:$0xff] %v10972_v6 }
 0x13f   : > { %v10981_v16 = vpop.permute.xlu0 %7625 }
 0x140   : > { %15848 = vst [vmem:[#allocation36_spill] sm:$0xff] %v10981_v16  ;;  %v7312_v16 = vunpack.i.l.bf16 %v15859_v14 }
 0x141   : > { %v11000_v30 = vpop.permute.xlu1 %7630 }
 0x142   : > { %15850 = vst [vmem:[#allocation40_spill] sm:$0xff] %v11000_v30  ;;  %v7313_v30 = vunpack.i.h.bf16 %v15859_v14  ;;  %v11064_v14 = vsel %vm393_vm0, %v9191_v21, %v7293_v8  ;;  %v9196_v21 = vld [vmem:[#allocation2 + $0x108] sm:$0xff] }
 0x143   : > { %v11024_v35 = vpop.permute.xlu0 %7635  ;;  %v11081_v8 = vsel %vm393_vm0, %v9196_v21, %v7302_v29  ;;  %v9201_v21 = vld [vmem:[#allocation2 + $0x158] sm:$0xff] }
 0x144   : > { %15852 = vst [vmem:[#allocation46_spill] sm:$0xff] %v11024_v35  ;;  %v7307_v35 = vunpack.i.l.bf16 %v15858_v53  ;;  %v11061_v53 = vsel %vm393_vm0, %v9190_v0, %v7287_v20  ;;  %v9195_v0 = vld [vmem:[#allocation2 + $0x110] sm:$0xff]  ;;  %v11091_v36 = vsel %vm393_vm0, %v9199_v49, %v7313_v30  ;;  %v11099_v4 = vsel %vm393_vm0, %v9201_v21, %v7318_v19  ;;  %v15866_v49 = vld [vmem:[#allocation59_spill] sm:$0xff] }
 0x145   : > { %v11038_v39 = vpop.permute.xlu1 %7640  ;;  %v11078_v20 = vsel %vm393_vm0, %v9195_v0, %v7303_v28  ;;  %v9200_v28 = vld [vmem:[#allocation2 + $0x138] sm:$0xff]  ;;  %v7333_v5 = vunpack.i.h.bf16 %v15866_v49  ;;  %v9203_v19 = vld [vmem:[#allocation2 + $0x170] sm:$0xff] }
 0x146   : > { %15856 = vst [vmem:[#allocation37_spill] sm:$0xff] %v11038_v39  ;;  %v9188_v39 = vld [vmem:[#allocation2 + $0xa8] sm:$0xff]  ;;  %v11094_v0 = vsel %vm393_vm0, %v9200_v28, %v7312_v16  ;;  %v7332_v16 = vunpack.i.l.bf16 %v15866_v49  ;;  %v15867_v28 = vld [vmem:[#allocation64_spill] sm:$0xff]  ;;  %v7353_v49 = vunpack.i.h.bf16 %v15871_v34 }
 0x147   : > { %v11050_v6 = vpop.permute.xlu0 %7645  ;;  %v11053_v54 = vsel %vm393_vm0, %v9188_v39, %v7282_v23  ;;  %v9193_v39 = vld [vmem:[#allocation2 + $0xf8] sm:$0xff] }
 0x148   : > { %15860 = vst [vmem:[#allocation38_spill] sm:$0xff] %v11050_v6  ;;  %v9192_v6 = vld [vmem:[#allocation2 + $0xd8] sm:$0xff]  ;;  %v11070_v44 = vsel %vm393_vm0, %v9193_v39, %v7298_v61  ;;  %v11085_v61 = vsel %vm393_vm0, %v9197_v51, %v7308_v46  ;;  %v9198_v39 = vld [vmem:[#allocation2 + $0x120] sm:$0xff]  ;;  %v9202_v51 = vld [vmem:[#allocation2 + $0x150] sm:$0xff]  ;;  %v11139_v34 = vsel %vm2043_vm6, %v11003_v52, %v7332_v16 }
 0x149   : > { %v11067_v23 = vsel %vm393_vm0, %v9192_v6, %v7292_v22  ;;  %v11072_v10 = vpop.permute.xlu1 %7650  ;;  %v15863_v6 = vld [vmem:[#allocation63_spill] sm:$0xff]  ;;  %v11102_v46 = vsel %vm393_vm0, %v9202_v51, %v7317_v11  ;;  %v7337_v11 = vunpack.i.l.bf16 %v15867_v28  ;;  %v15869_v51 = vld [vmem:[#allocation65_spill] sm:$0xff] }
 0x14a   : > { %15862 = vst [vmem:[#allocation45_spill] sm:$0xff] %v11072_v10  ;;  %v7323_v22 = vunpack.i.h.bf16 %v15863_v6  ;;  %v11088_v10 = vsel %vm393_vm0, %v9198_v39, %v7307_v35  ;;  %v7322_v35 = vunpack.i.l.bf16 %v15863_v6  ;;  %v15865_v39 = vld [vmem:[#allocation58_spill] sm:$0xff]  ;;  %v7343_v6 = vunpack.i.h.bf16 %v15869_v51  ;;  %v15878_v16 = vld [vmem:[#allocation67_spill] sm:$0xff] }
 0x14b   : > { %v11096_v29 = vpop.permute.xlu0 %7655  ;;  %v7328_v9 = vunpack.i.h.bf16 %v15865_v39  ;;  %v7327_v30 = vunpack.i.l.bf16 %v15865_v39  ;;  %v7342_v25 = vunpack.i.l.bf16 %v15869_v51  ;;  %v7348_v39 = vunpack.i.h.bf16 %v15870_v7 }
 0x14c   : > { %15864 = vst [vmem:[#allocation52_spill] sm:$0xff] %v11096_v29  ;;  %v7338_v29 = vunpack.i.h.bf16 %v15867_v28  ;;  %v11113_v21 = vsel %vm393_vm0, %v9203_v19, %v7323_v22  ;;  %v15873_v19 = vld [vmem:[#allocation16_spill] sm:$0xff] }
 0x14d   : > { %v11110_v2 = vpop.permute.xlu1 %7660  ;;  %v11129_v28 = vsel %vm2043_vm6, %v10984_v37, %v7328_v9  ;;  %v7358_v51 = vunpack.i.h.bf16 %v15873_v19  ;;  %v7357_v41 = vunpack.i.l.bf16 %v15873_v19  ;;  %v11135_v7 = vsel %vm2043_vm6, %v10989_v33, %v7327_v30 }
 0x14e   : > { %15868 = vst [vmem:[#allocation7_spill] sm:$0xff] %v11110_v2  ;;  %v9204_v2 = vld [vmem:[#allocation2 + $0x168] sm:$0xff]  ;;  %v11147_v9 = vsel %vm2043_vm6, %v10992_v45, %v7338_v29  ;;  %v11157_v33 = vsel %vm2043_vm6, %v11006_v56, %v7343_v6  ;;  %v11161_v52 = vsel %vm2043_vm6, %v11009_v48, %v7342_v25  ;;  %v11166_v45 = vsel %vm2043_vm6, %v11016_v26, %v7347_v27 }
 0x14f   : > { %v11122_v13 = vpop.permute.xlu0 %7665  ;;  %v11125_v22 = vsel %vm393_vm0, %v9204_v2, %v7322_v35  ;;  %v11143_v2 = vsel %vm2043_vm6, %v10998_v59, %v7333_v5  ;;  %v11153_v35 = vsel %vm2043_vm6, %v10995_v3, %v7337_v11  ;;  %v15875_v5 = vld [vmem:[#allocation60_spill] sm:$0xff]  ;;  %v11170_v29 = vsel %vm2043_vm6, %v11013_v43, %v7348_v39  ;;  %v15877_v26 = vld [vmem:[#allocation61_spill] sm:$0xff] }
 0x150   : > { %15872 = vst [vmem:[#allocation8_spill] sm:$0xff] %v11122_v13  ;;  %v7363_v59 = vunpack.i.h.bf16 %v15875_v5  ;;  %v11174_v3 = vsel %vm2043_vm6, %v11019_v63, %v7353_v49  ;;  %v11178_v56 = vsel %vm2043_vm6, %v11022_v57, %v7352_v58  ;;  %v11184_v48 = vsel %vm2043_vm6, %v11030_v42, %v7357_v41  ;;  %v15879_v57 = vld [vmem:[#allocation66_spill] sm:$0xff]  ;;  %v15881_v42 = vld [vmem:[#allocation17_spill] sm:$0xff] }
 0x151   : > { %v11149_v37 = vpop.permute.xlu1 %7670  ;;  %v11188_v27 = vsel %vm2043_vm6, %v11027_v15, %v7358_v51  ;;  %v7362_v43 = vunpack.i.l.bf16 %v15875_v5  ;;  %v7367_v30 = vunpack.i.l.bf16 %v15877_v26  ;;  %v7368_v63 = vunpack.i.h.bf16 %v15877_v26  ;;  %v15882_v51 = vld [vmem:[#allocation20_spill] sm:$0xff] }
 0x152   : > { %15874 = vst [vmem:[#allocation42_spill] sm:$0xff] %v11149_v37  ;;  %v7373_v11 = vunpack.i.h.bf16 %v15878_v16  ;;  %v7372_v58 = vunpack.i.l.bf16 %v15878_v16  ;;  %v7377_v6 = vunpack.i.l.bf16 %v15879_v57  ;;  %v11200_v41 = vsel %vm2043_vm6, %v11041_v55, %v7363_v59  ;;  %v15883_v16 = vld [vmem:[#allocation23_spill] sm:$0xff] }
 0x153   : > { %v11180_v25 = vpop.permute.xlu0 %7675  ;;  %v7378_v15 = vunpack.i.h.bf16 %v15879_v57  ;;  %v7383_v49 = vunpack.i.h.bf16 %v15881_v42  ;;  %v7382_v19 = vunpack.i.l.bf16 %v15881_v42  ;;  %v7388_v5 = vunpack.i.h.bf16 %v15882_v51  ;;  %v15885_v57 = vld [vmem:[#allocation27_spill] sm:$0xff] }
 0x154   : > { %15876 = vst [vmem:[#allocation12_spill] sm:$0xff] %v11180_v25  ;;  %v7387_v26 = vunpack.i.l.bf16 %v15882_v51  ;;  %v7393_v25 = vunpack.i.h.bf16 %v15883_v16  ;;  %v7392_v37 = vunpack.i.l.bf16 %v15883_v16  ;;  %v11213_v55 = vsel %vm2043_vm6, %v11053_v54, %v7362_v43 }
 0x155   : > { %v11196_v39 = vpop.permute.xlu1 %7680  ;;  %v11217_v59 = vsel %vm2043_vm6, %v11061_v53, %v7367_v30  ;;  %v7398_v42 = vunpack.i.h.bf16 %v15885_v57  ;;  %v11223_v51 = vsel %vm2043_vm6, %v11056_v31, %v7368_v63  ;;  %v11227_v16 = vsel %vm2043_vm6, %v11064_v14, %v7373_v11 }
 0x156   : > { %15880 = vst [vmem:[#allocation56_spill] sm:$0xff] %v11196_v39  ;;  %v7397_v39 = vunpack.i.l.bf16 %v15885_v57  ;;  %v11231_v54 = vsel %vm2043_vm6, %v11067_v23, %v7372_v58  ;;  %v11235_v53 = vsel %vm2043_vm6, %v11075_v60, %v7377_v6  ;;  %v11241_v30 = vsel %vm2043_vm6, %v11070_v44, %v7378_v15  ;;  %v15887_v23 = vld [vmem:[#allocation32_spill] sm:$0xff]  ;;  %v15889_v6 = vld [vmem:[#allocation33_spill] sm:$0xff] }
 0x157   : > { %v11209_v13 = vpop.permute.xlu0 %7685  ;;  %v11245_v31 = vsel %vm2043_vm6, %v11078_v20, %v7383_v49  ;;  %v11249_v14 = vsel %vm2043_vm6, %v11081_v8, %v7382_v19  ;;  %v7403_v63 = vunpack.i.h.bf16 %v15887_v23  ;;  %v11254_v60 = vsel %vm2043_vm6, %v11088_v10, %v7387_v26 }
 0x158   : > { %15884 = vst [vmem:[#allocation57_spill] sm:$0xff] %v11209_v13  ;;  %v11258_v11 = vsel %vm2043_vm6, %v11085_v61, %v7388_v5  ;;  %v11262_v44 = vsel %vm2043_vm6, %v11091_v36, %v7393_v25  ;;  %v11266_v20 = vsel %vm2043_vm6, %v11094_v0, %v7392_v37  ;;  %v11272_v58 = vsel %vm2043_vm6, %v11102_v46, %v7397_v39  ;;  %v15890_v25 = vld [vmem:[#allocation41_spill] sm:$0xff]  ;;  %v15891_v37 = vld [vmem:[#allocation43_spill] sm:$0xff]  ;;  %v15893_v39 = vld [vmem:[#allocation44_spill] sm:$0xff] }
 0x159   : > { %v11237_v43 = vpop.permute.xlu1 %7690  ;;  %v11276_v10 = vsel %vm2043_vm6, %v11099_v4, %v7398_v42  ;;  %v7402_v61 = vunpack.i.l.bf16 %v15887_v23  ;;  %v7407_v15 = vunpack.i.l.bf16 %v15889_v6  ;;  %v7408_v36 = vunpack.i.h.bf16 %v15889_v6  ;;  %v15894_v42 = vld [vmem:[#allocation47_spill] sm:$0xff] }
 0x15a   : > { %15886 = vst [vmem:[#allocation62_spill] sm:$0xff] %v11237_v43  ;;  %v7413_v49 = vunpack.i.h.bf16 %v15890_v25  ;;  %v7412_v0 = vunpack.i.l.bf16 %v15890_v25  ;;  %v7417_v19 = vunpack.i.l.bf16 %v15891_v37  ;;  %v11288_v46 = vsel %vm2043_vm6, %v11113_v21, %v7403_v63 }
 0x15b   : > { %v11268_v8 = vpop.permute.xlu0 %7695  ;;  %15892 = vst [vmem:[#allocation58_spill] sm:$0xff] %v11288_v46  ;;  %v7418_v4 = vunpack.i.h.bf16 %v15891_v37  ;;  %v7423_v26 = vunpack.i.h.bf16 %v15893_v39  ;;  %v7422_v57 = vunpack.i.l.bf16 %v15893_v39  ;;  %v7428_v23 = vunpack.i.h.bf16 %v15894_v42  ;;  %v15897_v37 = vld [vmem:[#allocation50_spill] sm:$0xff] }
 0x15c   : > { %15888 = vst [vmem:[#allocation63_spill] sm:$0xff] %v11268_v8  ;;  %v7427_v6 = vunpack.i.l.bf16 %v15894_v42  ;;  %v15895_v8 = vld [vmem:[#allocation48_spill] sm:$0xff]  ;;  %v11301_v21 = vsel %vm2043_vm6, %v11125_v22, %v7402_v61  ;;  %v11305_v63 = vsel %vm2076_vm7, %v11135_v7, %v7407_v15  ;;  %v7438_v39 = vunpack.i.h.bf16 %v15897_v37 }
 0x15d   : > { %v11284_v5 = vpop.permute.xlu1 %7700  ;;  %v7433_v25 = vunpack.i.h.bf16 %v15895_v8  ;;  %v7432_v43 = vunpack.i.l.bf16 %v15895_v8  ;;  %15896 = vst [vmem:[#allocation59_spill] sm:$0xff] %v11301_v21  ;;  %v7437_v46 = vunpack.i.l.bf16 %v15897_v37  ;;  %v11311_v42 = vsel %vm2076_vm7, %v11129_v28, %v7408_v36  ;;  %v15907_v21 = vld [vmem:[#allocation4_spill] sm:$0xff] }
 0x15e   : > { %v11315_v8 = vsel %vm2076_vm7, %v11139_v34, %v7412_v0  ;;  %v11319_v22 = vsel %vm2076_vm7, %v11143_v2, %v7413_v49  ;;  %v11323_v7 = vsel %vm2076_vm7, %v11153_v35, %v7417_v19  ;;  %v11329_v15 = vsel %vm2076_vm7, %v11147_v9, %v7418_v4  ;;  %v15899_v2 = vld [vmem:[#allocation53_spill] sm:$0xff]  ;;  %v15901_v19 = vld [vmem:[#allocation54_spill] sm:$0xff] }
 0x15f   : > { %v11297_v13 = vpop.permute.xlu0 %7705  ;;  %v11333_v28 = vsel %vm2076_vm7, %v11161_v52, %v7422_v57  ;;  %v11337_v34 = vsel %vm2076_vm7, %v11157_v33, %v7423_v26  ;;  %v7442_v36 = vunpack.i.l.bf16 %v15899_v2  ;;  %v11342_v35 = vsel %vm2076_vm7, %v11166_v45, %v7427_v6  ;;  %v15902_v4 = vld [vmem:[#allocation5_spill] sm:$0xff]  ;;  %v15903_v57 = vld [vmem:[#allocation10_spill] sm:$0xff] }
 0x160   : > { %v11346_v49 = vsel %vm2076_vm7, %v11170_v29, %v7428_v23  ;;  %v11350_v9 = vsel %vm2076_vm7, %v11178_v56, %v7432_v43  ;;  %v11354_v52 = vsel %vm2076_vm7, %v11174_v3, %v7433_v25  ;;  %v11360_v0 = vsel %vm2076_vm7, %v11184_v48, %v7437_v46  ;;  %v15905_v46 = vld [vmem:[#allocation6_spill] sm:$0xff] }
 0x161   : > { %v11325_v61 = vpop.permute.xlu1 %7710  ;;  %v11364_v45 = vsel %vm2076_vm7, %v11188_v27, %v7438_v39  ;;  %v7443_v29 = vunpack.i.h.bf16 %v15899_v2  ;;  %v7447_v56 = vunpack.i.l.bf16 %v15901_v19  ;;  %v7448_v43 = vunpack.i.h.bf16 %v15901_v19  ;;  %v15906_v39 = vld [vmem:[#allocation9_spill] sm:$0xff] }
 0x162   : > { %15898 = vst [vmem:[#allocation64_spill] sm:$0xff] %v11325_v61  ;;  %v7453_v3 = vunpack.i.h.bf16 %v15902_v4  ;;  %v7452_v26 = vunpack.i.l.bf16 %v15902_v4  ;;  %v7457_v23 = vunpack.i.l.bf16 %v15903_v57  ;;  %v11376_v48 = vsel %vm2076_vm7, %v11213_v55, %v7442_v36 }
 0x163   : > { %v11356_v33 = vpop.permute.xlu0 %7715  ;;  %v7458_v27 = vunpack.i.h.bf16 %v15903_v57  ;;  %v7463_v25 = vunpack.i.h.bf16 %v15905_v46  ;;  %v7462_v37 = vunpack.i.l.bf16 %v15905_v46  ;;  %v7468_v2 = vunpack.i.h.bf16 %v15906_v39  ;;  %v15908_v57 = vld [vmem:[#allocation15_spill] sm:$0xff] }
 0x164   : > { %15900 = vst [vmem:[#allocation65_spill] sm:$0xff] %v11356_v33  ;;  %v7467_v19 = vunpack.i.l.bf16 %v15906_v39  ;;  %v7473_v4 = vunpack.i.h.bf16 %v15907_v21  ;;  %v7472_v33 = vunpack.i.l.bf16 %v15907_v21  ;;  %v11389_v55 = vsel %vm2076_vm7, %v11200_v41, %v7443_v29 }
 0x165   : > { %v11372_v6 = vpop.permute.xlu1 %7720  ;;  %v11393_v36 = vsel %vm2076_vm7, %v11217_v59, %v7447_v56  ;;  %v7478_v46 = vunpack.i.h.bf16 %v15908_v57  ;;  %v11399_v39 = vsel %vm2076_vm7, %v11223_v51, %v7448_v43  ;;  %v11403_v21 = vsel %vm2076_vm7, %v11231_v54, %v7452_v26 }
 0x166   : > { %15904 = vst [vmem:[#allocation31_spill] sm:$0xff] %v11372_v6  ;;  %v7477_v6 = vunpack.i.l.bf16 %v15908_v57  ;;  %v11407_v41 = vsel %vm2076_vm7, %v11227_v16, %v7453_v3  ;;  %v11411_v59 = vsel %vm2076_vm7, %v11235_v53, %v7457_v23  ;;  %v11417_v56 = vsel %vm2076_vm7, %v11241_v30, %v7458_v27 }
 0x167   : > { %v11385_v61 = vpop.permute.xlu0 %7725  ;;  %v11421_v51 = vsel %vm2076_vm7, %v11249_v14, %v7462_v37  ;;  %v11425_v54 = vsel %vm2076_vm7, %v11245_v31, %v7463_v25  ;;  %v7487_v16 = vunpack.i.l.bf16 %v10797_v17  ;;  %v11430_v53 = vsel %vm2076_vm7, %v11254_v60, %v7467_v19 }
 0x168   : > { %v11434_v43 = vsel %vm2076_vm7, %v11258_v11, %v7468_v2  ;;  %v11438_v30 = vsel %vm2076_vm7, %v11266_v20, %v7472_v33  ;;  %v11442_v14 = vsel %vm2076_vm7, %v11262_v44, %v7473_v4  ;;  %v11448_v3 = vsel %vm2076_vm7, %v11272_v58, %v7477_v6  ;;  %v15924_v58 = vld [vmem:[#allocation26_spill] sm:$0xff] }
 0x169   : > { %v11413_v29 = vpop.permute.xlu1 %7730  ;;  %v11452_v60 = vsel %vm2076_vm7, %v11276_v10, %v7478_v46  ;;  %v7488_v11 = vunpack.i.h.bf16 %v10797_v17  ;;  %v7492_v26 = vunpack.i.l.bf16 %v10808_v47  ;;  %v7493_v20 = vunpack.i.h.bf16 %v10808_v47 }
 0x16a   : > { %v7498_v33 = vunpack.i.h.bf16 %v10814_v18  ;;  %v7497_v44 = vunpack.i.l.bf16 %v10814_v18  ;;  %v7502_v23 = vunpack.i.l.bf16 %v10826_v50  ;;  %v11466_v10 = vsel %vm2109_vm8, %v11305_v63, %v7487_v16 }
 0x16b   : > { %v11444_v31 = vpop.permute.xlu0 %7735  ;;  %v7503_v17 = vunpack.i.h.bf16 %v10826_v50  ;;  %v7508_v47 = vunpack.i.h.bf16 %v10833_v40  ;;  %v7507_v25 = vunpack.i.l.bf16 %v10833_v40  ;;  %v7513_v18 = vunpack.i.h.bf16 %v10845_v24 }
 0x16c   : > { %v7512_v37 = vunpack.i.l.bf16 %v10845_v24  ;;  %v11477_v19 = vsel %vm2109_vm8, %v11311_v42, %v7488_v11  ;;  %v11481_v63 = vsel %vm2109_vm8, %v11315_v8, %v7492_v26  ;;  %v7518_v50 = vunpack.i.h.bf16 %v10852_v1 }
 0x16d   : > { %v11460_v27 = vpop.permute.xlu1 %7740  ;;  %v7517_v4 = vunpack.i.l.bf16 %v10852_v1  ;;  %v11487_v40 = vsel %vm2109_vm8, %v11319_v22, %v7493_v20  ;;  %v11491_v24 = vsel %vm2109_vm8, %v11323_v7, %v7497_v44  ;;  %v11495_v42 = vsel %vm2109_vm8, %v11329_v15, %v7498_v33  ;;  %v15909_v20 = vld [vmem:[#allocation18_spill] sm:$0xff]  ;;  %v15910_v44 = vld [vmem:[#allocation13_spill] sm:$0xff] }
 0x16e   : > { %v11499_v8 = vsel %vm2109_vm8, %v11333_v28, %v7502_v23  ;;  %v11505_v1 = vsel %vm2109_vm8, %v11337_v34, %v7503_v17  ;;  %v7523_v22 = vunpack.i.h.bf16 %v10861_v62  ;;  %v7522_v46 = vunpack.i.l.bf16 %v10861_v62 }
 0x16f   : > { %v11473_v2 = vpop.permute.xlu0 %7745  ;;  %v7527_v7 = vunpack.i.l.bf16 %v10868_v38  ;;  %v11512_v15 = vsel %vm2109_vm8, %v11342_v35, %v7507_v25  ;;  %v11516_v28 = vsel %vm2109_vm8, %v11346_v49, %v7508_v47  ;;  %v11520_v16 = vsel %vm2109_vm8, %v11350_v9, %v7512_v37  ;;  %v15911_v47 = vld [vmem:[#allocation24_spill] sm:$0xff]  ;;  %v15912_v37 = vld [vmem:[#allocation19_spill] sm:$0xff] }
 0x170   : > { %v11524_v34 = vsel %vm2109_vm8, %v11354_v52, %v7513_v18  ;;  %v11530_v11 = vsel %vm2109_vm8, %v11360_v0, %v7517_v4  ;;  %v11534_v35 = vsel %vm2109_vm8, %v11364_v45, %v7518_v50  ;;  %v7528_v49 = vunpack.i.h.bf16 %v10868_v38 }
 0x171   : > { %v11501_v57 = vpop.permute.xlu1 %7750  ;;  %v7532_v9 = vunpack.i.l.bf16 %v10877_v32  ;;  %v7533_v26 = vunpack.i.h.bf16 %v10877_v32  ;;  %v7538_v52 = vunpack.i.h.bf16 %v15909_v20  ;;  %v7537_v33 = vunpack.i.l.bf16 %v15909_v20 }
 0x172   : > { %v7542_v23 = vunpack.i.l.bf16 %v15910_v44  ;;  %v11546_v0 = vsel %vm2109_vm8, %v11376_v48, %v7522_v46  ;;  %v11550_v45 = vsel %vm2109_vm8, %v11389_v55, %v7523_v22  ;;  %v11554_v38 = vsel %vm2109_vm8, %v11393_v36, %v7527_v7  ;;  %v15913_v22 = vld [vmem:[#allocation28_spill] sm:$0xff] }
 0x173   : > { %v11526_v62 = vpop.permute.xlu0 %7755  ;;  %v7543_v32 = vunpack.i.h.bf16 %v15910_v44  ;;  %v7548_v25 = vunpack.i.h.bf16 %v15911_v47  ;;  %v7547_v18 = vunpack.i.l.bf16 %v15911_v47  ;;  %v7553_v50 = vunpack.i.h.bf16 %v15912_v37 }
 0x174   : > { %v7552_v4 = vunpack.i.l.bf16 %v15912_v37  ;;  %v11565_v55 = vsel %vm2109_vm8, %v11399_v39, %v7528_v49  ;;  %v11569_v36 = vsel %vm2109_vm8, %v11403_v21, %v7532_v9  ;;  %v7558_v46 = vunpack.i.h.bf16 %v15913_v22 }
 0x175   : > { %v11542_v17 = vpop.permute.xlu1 %7760  ;;  %v7557_v7 = vunpack.i.l.bf16 %v15913_v22  ;;  %v11575_v20 = vsel %vm2109_vm8, %v11407_v41, %v7533_v26  ;;  %v11579_v44 = vsel %vm2109_vm8, %v11411_v59, %v7537_v33  ;;  %v11583_v39 = vsel %vm2109_vm8, %v11417_v56, %v7538_v52  ;;  %v15914_v41 = vld [vmem:[#allocation30_spill] sm:$0xff]  ;;  %v15915_v33 = vld [vmem:[#allocation25_spill] sm:$0xff] }
 0x176   : > { %v11587_v21 = vsel %vm2109_vm8, %v11421_v51, %v7542_v23  ;;  %v11593_v9 = vsel %vm2109_vm8, %v11425_v54, %v7543_v32  ;;  %v7568_v26 = vunpack.i.h.bf16 %v15914_v41  ;;  %v7567_v59 = vunpack.i.l.bf16 %v15914_v41 }
 0x177   : > { %v11561_v48 = vpop.permute.xlu0 %7765  ;;  %v7572_v47 = vunpack.i.l.bf16 %v15915_v33  ;;  %v11600_v56 = vsel %vm2109_vm8, %v11430_v53, %v7547_v18  ;;  %v11604_v51 = vsel %vm2109_vm8, %v11434_v43, %v7548_v25  ;;  %v11608_v52 = vsel %vm2109_vm8, %v11438_v30, %v7552_v4  ;;  %v15921_v30 = vld [vmem:[#allocation34_spill] sm:$0xff] }
 0x178   : > { %15916 = vst [vmem:[#allocation14_spill] sm:$0xff] %v11608_v52  ;;  %v11612_v54 = vsel %vm2109_vm8, %v11442_v14, %v7553_v50  ;;  %v11618_v32 = vsel %vm2109_vm8, %v11448_v3, %v7557_v7  ;;  %v11622_v53 = vsel %vm2109_vm8, %v11452_v60, %v7558_v46  ;;  %v7573_v18 = vunpack.i.h.bf16 %v15915_v33  ;;  %v15922_v14 = vld [vmem:[#allocation51_spill] sm:$0xff]  ;;  %v15923_v33 = vld [vmem:[#allocation21_spill] sm:$0xff] }
 0x179   : > { %v11589_v49 = vpop.permute.xlu1 %7770  ;;  %15917 = vst [vmem:[#allocation16_spill] sm:$0xff] %v11612_v54  ;;  %15918 = vst [vmem:[#allocation60_spill] sm:$0xff] %v11618_v32  ;;  %v7578_v37 = vunpack.i.h.bf16 %v15921_v30  ;;  %v7577_v4 = vunpack.i.l.bf16 %v15921_v30  ;;  %v7583_v50 = vunpack.i.h.bf16 %v15922_v14  ;;  %v7582_v22 = vunpack.i.l.bf16 %v15922_v14  ;;  %v15928_v32 = vld [vmem:[#allocation52_spill] sm:$0xff] }
 0x17a   : > { %15919 = vst [vmem:[#allocation61_spill] sm:$0xff] %v11622_v53  ;;  %v2143_v60 = vsel %vm2142_vm9, %v11466_v10, %v7567_v59  ;;  %v2144_v46 = vsel %vm2142_vm9, %v11477_v19, %v7568_v26  ;;  %v2145_v7 = vsel %vm2142_vm9, %v11481_v63, %v7572_v47  ;;  %v7588_v30 = vunpack.i.h.bf16 %v15923_v33  ;;  %v15925_v59 = vld [vmem:[#allocation29_spill] sm:$0xff]  ;;  %v15926_v26 = vld [vmem:[#allocation38_spill] sm:$0xff] }
 0x17b   : > { %v11614_v23 = vpop.permute.xlu0 %7775  ;;  %v7587_v25 = vunpack.i.l.bf16 %v15923_v33  ;;  %v7593_v14 = vunpack.i.h.bf16 %v15924_v58  ;;  %v7592_v6 = vunpack.i.l.bf16 %v15924_v58  ;;  %v2146_v10 = vsel %vm2142_vm9, %v11487_v40, %v7573_v18  ;;  %v15927_v18 = vld [vmem:[#allocation45_spill] sm:$0xff] }
 0x17c   : > { %v7597_v19 = vunpack.i.l.bf16 %v15925_v59  ;;  %v7648_v3 = vunpack.i.h.bf16 %v15926_v26  ;;  %v7647_v63 = vunpack.i.l.bf16 %v15926_v26  ;;  %v2147_v47 = vsel %vm2142_vm9, %v11491_v24, %v7577_v4 }
 0x17d   : > { %v11630_v41 = vpop.permute.xlu1 %7780  ;;  %v2148_v33 = vsel %vm2142_vm9, %v11495_v42, %v7578_v37  ;;  %v11656_v58 = vsel %vm2142_vm9, %v11499_v8, %v7582_v22  ;;  %v11660_v43 = vsel %vm2142_vm9, %v11505_v1, %v7583_v50  ;;  %v7653_v53 = vunpack.i.h.bf16 %v15927_v18 }
 0x17e   : > { %v7652_v26 = vunpack.i.l.bf16 %v15927_v18  ;;  %v7658_v54 = vunpack.i.h.bf16 %v15928_v32  ;;  %v7657_v24 = vunpack.i.l.bf16 %v15928_v32  ;;  %v11670_v42 = vsel %vm2142_vm9, %v11512_v15, %v7587_v25 }
 0x17f   : > { %v11643_v12 = vpop.permute.xlu0 %7785  ;;  %v11674_v8 = vsel %vm2142_vm9, %v11516_v28, %v7588_v30  ;;  %v11678_v1 = vsel %vm2142_vm9, %v11520_v16, %v7592_v6  ;;  %v11682_v37 = vsel %vm2142_vm9, %v11524_v34, %v7593_v14  ;;  %v7598_v32 = vunpack.i.h.bf16 %v15925_v59  ;;  %v15931_v59 = vld [vmem:[#allocation7_spill] sm:$0xff] }
 0x180   : > { %v11689_v15 = vsel %vm2142_vm9, %v11530_v11, %v7597_v19  ;;  %v2176_v25 = vsel %vm2175_vm10, %v2143_v60, %v7647_v63  ;;  %v2177_v28 = vsel %vm2175_vm10, %v2144_v46, %v7648_v3  ;;  %v7728_v50 = vunpack.i.h.bf16 %v11385_v61 }
 0x181   : > { %v11662_v40 = vpop.permute.xlu1 %7790  ;;  %v7727_v6 = vunpack.i.l.bf16 %v11385_v61  ;;  %v7733_v16 = vunpack.i.h.bf16 %v11413_v29  ;;  %v7732_v34 = vunpack.i.l.bf16 %v11413_v29  ;;  %v2178_v30 = vsel %vm2175_vm10, %v2145_v7, %v7652_v26  ;;  %v15932_v29 = vld [vmem:[#allocation8_spill] sm:$0xff] }
 0x182   : > { %v2179_v14 = vsel %vm2175_vm10, %v2146_v10, %v7653_v53  ;;  %v2180_v11 = vsel %vm2175_vm10, %v2147_v47, %v7657_v24  ;;  %v2181_v60 = vsel %vm2175_vm10, %v2148_v33, %v7658_v54  ;;  %v7663_v3 = vunpack.i.h.bf16 %v15931_v59 }
 0x183   : > { %v11684_v4 = vpop.permute.xlu0 %7795  ;;  %v7662_v46 = vunpack.i.l.bf16 %v15931_v59  ;;  %v7738_v61 = vunpack.i.h.bf16 %v11444_v31  ;;  %v7737_v19 = vunpack.i.l.bf16 %v11444_v31  ;;  %v7668_v18 = vunpack.i.h.bf16 %v15932_v29 }
 0x184   : > { %15929 = vst [vmem:[#allocation67_spill] sm:$0xff] %v11684_v4  ;;  %v2211_v53 = vsel %vm2208_vm11, %v2178_v30, %v7732_v34  ;;  %v2212_v10 = vsel %vm2208_vm11, %v2179_v14, %v7733_v16  ;;  %v2209_v47 = vsel %vm2208_vm11, %v2176_v25, %v7727_v6  ;;  %v2210_v33 = vsel %vm2208_vm11, %v2177_v28, %v7728_v50 }
 0x185   : > { %v11697_v22 = vpop.permute.xlu1 %7800  ;;  %v2213_v4 = vsel %vm2208_vm11, %v2180_v11, %v7737_v19  ;;  %v7742_v50 = vunpack.i.l.bf16 %v11460_v27  ;;  %v7748_v14 = vunpack.i.h.bf16 %v11473_v2  ;;  %vm2707_vm0 = vcmask 40960  }
 0x186   : > { %15930 = vst [vmem:[#allocation66_spill] sm:$0xff] %v11697_v22  ;;  %v7667_v22 = vunpack.i.l.bf16 %v15932_v29  ;;  %v2214_v29 = vsel %vm2208_vm11, %v2181_v60, %v7738_v61 }
 0x187   : > { %v7806_v63 = vpop.permute.xlu0 %7805 }
 0x188   : > { %v7808_v7 = vunpack.i.h.bf16 %v7806_v63  ;;  %v7807_v26 = vunpack.i.l.bf16 %v7806_v63  ;;  %v7743_v63 = vunpack.i.h.bf16 %v11460_v27 }
 0x189   : > { %v7811_v54 = vpop.permute.xlu1 %7810 }
 0x18a   : > { %v7813_v24 = vunpack.i.h.bf16 %v7811_v54  ;;  %v7812_v59 = vunpack.i.l.bf16 %v7811_v54  ;;  %v2242_v31 = vsel %vm2241_vm12, %v2209_v47, %v7807_v26  ;;  %v2243_v52 = vsel %vm2241_vm12, %v2210_v33, %v7808_v7 }
 0x18b   : > { %v7816_v34 = vpop.permute.xlu0 %7815  ;;  %v2274_v30 = vpack.c.bf16 %v2243_v52, %v2242_v31  ;;  %v7747_v7 = vunpack.i.l.bf16 %v11473_v2  ;;  %v2182_v33 = vsel %vm2175_vm10, %v11656_v58, %v7662_v46  ;;  %v2184_v31 = vsel %vm2175_vm10, %v11670_v42, %v7667_v22  ;;  %v15934_v46 = vld [vmem:[#allocation55_spill] sm:$0xff] }
 0x18c   : > { %v2244_v16 = vsel %vm2241_vm12, %v2211_v53, %v7812_v59  ;;  %v2245_v25 = vsel %vm2241_vm12, %v2212_v10, %v7813_v24  ;;  %v7818_v6 = vunpack.i.h.bf16 %v7816_v34  ;;  %v7817_v28 = vunpack.i.l.bf16 %v7816_v34  ;;  %v15933_v10 = vld [vmem:[#allocation39_spill] sm:$0xff] }
 0x18d   : > { %7138 = vmatprep.mubr.msk.bf16.mxu0 %vm2310_vm13, %v2274_v30  ;;  %v7821_v11 = vpop.permute.xlu1 %7820  ;;  %v2275_v60 = vpack.c.bf16 %v2245_v25, %v2244_v16  ;;  %v2156_v53 = vsel %vm2142_vm9, %v11534_v35, %v7598_v32  ;;  %v7603_v54 = vunpack.i.h.bf16 %v15933_v10  ;;  %v7602_v27 = vunpack.i.l.bf16 %v15933_v10 }
 0x18e   : > { %v2246_v61 = vsel %vm2241_vm12, %v2213_v4, %v7817_v28  ;;  %v2247_v52 = vsel %vm2241_vm12, %v2214_v29, %v7818_v6  ;;  %v7823_v19 = vunpack.i.h.bf16 %v7821_v11  ;;  %v7822_v26 = vunpack.i.l.bf16 %v7821_v11  ;;  %v15936_v6 = vld [vmem:[#allocation12_spill] sm:$0xff] }
 0x18f   : > { %v7826_v47 = vpop.permute.xlu0 %7825  ;;  %7139 = vmatmul.mubr.msk.bf16.vlgmr.msra.gmra.mrb[0].mxu0 %vm2310_vm13, %v2275_v60  ;;  %v2276_v2 = vpack.c.bf16 %v2247_v52, %v2246_v61  ;;  %v2183_v4 = vsel %vm2175_vm10, %v11660_v43, %v7663_v3  ;;  %v2185_v35 = vsel %vm2175_vm10, %v11674_v8, %v7668_v18  ;;  %v2215_v32 = vsel %vm2208_vm11, %v2182_v33, %v7742_v50 }
 0x190   : > { %v7828_v24 = vunpack.i.h.bf16 %v7826_v47  ;;  %v7827_v59 = vunpack.i.l.bf16 %v7826_v47  ;;  %v2216_v29 = vsel %vm2208_vm11, %v2183_v4, %v7743_v63  ;;  %v2217_v34 = vsel %vm2208_vm11, %v2184_v31, %v7747_v7  ;;  %v15935_v63 = vld [vmem:[#allocation42_spill] sm:$0xff] }
 0x191   : > { %7142 = vmatprep.mubr.msk.bf16.mxu0 %vm2310_vm13, %v2276_v2  ;;  %v2218_v58 = vsel %vm2208_vm11, %v2185_v35, %v7748_v14  ;;  %v2248_v43 = vsel %vm2241_vm12, %v2215_v32, %v7822_v26  ;;  %v2249_v3 = vsel %vm2241_vm12, %v2216_v29, %v7823_v19  ;;  %v7608_v30 = vunpack.i.h.bf16 %v15934_v46  ;;  %v7831_v18 = vpop.permute.xlu1 %7830 }
 0x192   : > { %v7607_v42 = vunpack.i.l.bf16 %v15934_v46  ;;  %v2250_v8 = vsel %vm2241_vm12, %v2217_v34, %v7827_v59  ;;  %v2251_v22 = vsel %vm2241_vm12, %v2218_v58, %v7828_v24  ;;  %v7673_v16 = vunpack.i.h.bf16 %v15935_v63  ;;  %v15938_v34 = vld [vmem:[#allocation56_spill] sm:$0xff] }
 0x193   : > { %v7672_v25 = vunpack.i.l.bf16 %v15935_v63  ;;  %v7678_v28 = vunpack.i.h.bf16 %v15936_v6  ;;  %v7677_v50 = vunpack.i.l.bf16 %v15936_v6  ;;  %v7836_v14 = vpop.permute.xlu0 %7835  ;;  %v7753_v7 = vunpack.i.h.bf16 %v11501_v57 }
 0x194   : > { %v7752_v11 = vunpack.i.l.bf16 %v11501_v57  ;;  %v7758_v60 = vunpack.i.h.bf16 %v11526_v62  ;;  %v2277_v61 = vpack.c.bf16 %v2249_v3, %v2248_v43  ;;  %v7757_v52 = vunpack.i.l.bf16 %v11526_v62  ;;  %v15939_v3 = vld [vmem:[#allocation57_spill] sm:$0xff] }
 0x195   : > { %v7833_v19 = vunpack.i.h.bf16 %v7831_v18  ;;  %v7832_v26 = vunpack.i.l.bf16 %v7831_v18  ;;  %v2278_v10 = vpack.c.bf16 %v2251_v22, %v2250_v8  ;;  %v2157_v47 = vsel %vm2142_vm9, %v11546_v0, %v7602_v27  ;;  %v7841_v29 = vpop.permute.xlu1 %7840 }
 0x196   : > { %v2158_v2 = vsel %vm2142_vm9, %v11550_v45, %v7603_v54  ;;  %v7838_v33 = vunpack.i.h.bf16 %v7836_v14  ;;  %v7837_v4 = vunpack.i.l.bf16 %v7836_v14  ;;  %v2159_v57 = vsel %vm2142_vm9, %v11554_v38, %v7607_v42 }
 0x197   : > { %7143 = vmatmul.mubr.msk.bf16.gmra.mrb[4].mxu0 %vm2310_vm13, %v2277_v61  ;;  %v2160_v24 = vsel %vm2142_vm9, %v11565_v55, %v7608_v30  ;;  %v2186_v62 = vsel %vm2175_vm10, %v11678_v1, %v7672_v25  ;;  %v2187_v59 = vsel %vm2175_vm10, %v11682_v37, %v7673_v16  ;;  %v2188_v0 = vsel %vm2175_vm10, %v11689_v15, %v7677_v50  ;;  %v15937_v37 = vld [vmem:[#allocation49_spill] sm:$0xff]  ;;  %v7846_v42 = vpop.permute.xlu0 %7845 }
 0x198   : > { %7146 = vmatprep.mubr.msk.bf16.mxu0 %vm2310_vm13, %v2278_v10  ;;  %v2189_v45 = vsel %vm2175_vm10, %v2156_v53, %v7678_v28  ;;  %v2219_v54 = vsel %vm2208_vm11, %v2186_v62, %v7752_v11  ;;  %v2220_v38 = vsel %vm2208_vm11, %v2187_v59, %v7753_v7  ;;  %v2221_v27 = vsel %vm2208_vm11, %v2188_v0, %v7757_v52  ;;  %v15941_v62 = vld [vmem:[#allocation35_spill] sm:$0xff] }
 0x199   : > { %v2222_v55 = vsel %vm2208_vm11, %v2189_v45, %v7758_v60  ;;  %v2252_v1 = vsel %vm2241_vm12, %v2219_v54, %v7832_v26  ;;  %v2253_v31 = vsel %vm2241_vm12, %v2220_v38, %v7833_v19  ;;  %v7613_v35 = vunpack.i.h.bf16 %v15937_v37  ;;  %v15940_v60 = vld [vmem:[#allocation68_spill] sm:$0xff]  ;;  %v7851_v0 = vpop.permute.xlu1 %7850  ;;  %v15942_v45 = vld [vmem:[#allocation62_spill] sm:$0xff] }
 0x19a   : > { %v7612_v32 = vunpack.i.l.bf16 %v15937_v37  ;;  %v2254_v15 = vsel %vm2241_vm12, %v2221_v27, %v7837_v4  ;;  %v2255_v53 = vsel %vm2241_vm12, %v2222_v55, %v7838_v33  ;;  %v7683_v58 = vunpack.i.h.bf16 %v15938_v34  ;;  %v15943_v27 = vld [vmem:[#allocation63_spill] sm:$0xff] }
 0x19b   : > { %v7682_v43 = vunpack.i.l.bf16 %v15938_v34  ;;  %v7688_v46 = vunpack.i.h.bf16 %v15939_v3  ;;  %v7687_v30 = vunpack.i.l.bf16 %v15939_v3  ;;  %v7763_v8 = vunpack.i.h.bf16 %v11542_v17 }
 0x19c   : > { %v7762_v22 = vunpack.i.l.bf16 %v11542_v17  ;;  %v7768_v18 = vunpack.i.h.bf16 %v11561_v48  ;;  %v2279_v63 = vpack.c.bf16 %v2253_v31, %v2252_v1  ;;  %v7767_v16 = vunpack.i.l.bf16 %v11561_v48  ;;  %v7856_v31 = vpop.permute.xlu0 %7855 }
 0x19d   : > { %v7843_v25 = vunpack.i.h.bf16 %v7841_v29  ;;  %v7842_v6 = vunpack.i.l.bf16 %v7841_v29  ;;  %v2280_v28 = vpack.c.bf16 %v2255_v53, %v2254_v15  ;;  %v2161_v50 = vsel %vm2142_vm9, %v11569_v36, %v7612_v32 }
 0x19e   : > { %v2162_v14 = vsel %vm2142_vm9, %v11575_v20, %v7613_v35  ;;  %v7848_v7 = vunpack.i.h.bf16 %v7846_v42  ;;  %v7847_v11 = vunpack.i.l.bf16 %v7846_v42  ;;  %v7618_v17 = vunpack.i.h.bf16 %v15940_v60 }
 0x19f   : > { %7147 = vmatmul.mubr.msk.bf16.gmra.mrb[8].mxu0 %vm2310_vm13, %v2279_v63  ;;  %v7617_v61 = vunpack.i.l.bf16 %v15940_v60  ;;  %v2190_v52 = vsel %vm2175_vm10, %v2157_v47, %v7682_v43  ;;  %v2191_v48 = vsel %vm2175_vm10, %v2158_v2, %v7683_v58  ;;  %v2192_v19 = vsel %vm2175_vm10, %v2159_v57, %v7687_v30 }
 0x1a0   : > { %7150 = vmatprep.mubr.msk.bf16.mxu0 %vm2310_vm13, %v2280_v28  ;;  %v2193_v36 = vsel %vm2175_vm10, %v2160_v24, %v7688_v46  ;;  %v2223_v20 = vsel %vm2208_vm11, %v2190_v52, %v7762_v22  ;;  %v2224_v26 = vsel %vm2208_vm11, %v2191_v48, %v7763_v8  ;;  %v2225_v10 = vsel %vm2208_vm11, %v2192_v19, %v7767_v16  ;;  %v7866_v52 = vpop.permute.xlu0 %7865 }
 0x1a1   : > { %v2226_v33 = vsel %vm2208_vm11, %v2193_v36, %v7768_v18  ;;  %v2256_v4 = vsel %vm2241_vm12, %v2223_v20, %v7842_v6  ;;  %v2257_v47 = vsel %vm2241_vm12, %v2224_v26, %v7843_v25  ;;  %v7623_v2 = vunpack.i.h.bf16 %v15941_v62  ;;  %v15944_v25 = vld [vmem:[#allocation36_spill] sm:$0xff] }
 0x1a2   : > { %v7622_v59 = vunpack.i.l.bf16 %v15941_v62  ;;  %v2258_v57 = vsel %vm2241_vm12, %v2225_v10, %v7847_v11  ;;  %v2259_v24 = vsel %vm2241_vm12, %v2226_v33, %v7848_v7  ;;  %v7693_v54 = vunpack.i.h.bf16 %v15942_v45  ;;  %v7861_v7 = vpop.permute.xlu1 %7860 }
 0x1a3   : > { %v7692_v38 = vunpack.i.l.bf16 %v15942_v45  ;;  %v7698_v55 = vunpack.i.h.bf16 %v15943_v27  ;;  %v7697_v1 = vunpack.i.l.bf16 %v15943_v27  ;;  %v7773_v37 = vunpack.i.h.bf16 %v11589_v49 }
 0x1a4   : > { %v7772_v35 = vunpack.i.l.bf16 %v11589_v49  ;;  %v7778_v32 = vunpack.i.h.bf16 %v11614_v23  ;;  %v2281_v15 = vpack.c.bf16 %v2257_v47, %v2256_v4  ;;  %v7777_v53 = vunpack.i.l.bf16 %v11614_v23 }
 0x1a5   : > { %v7853_v29 = vunpack.i.h.bf16 %v7851_v0  ;;  %v7852_v34 = vunpack.i.l.bf16 %v7851_v0  ;;  %v2282_v58 = vpack.c.bf16 %v2259_v24, %v2258_v57  ;;  %v2163_v43 = vsel %vm2142_vm9, %v11579_v44, %v7617_v61 }
 0x1a6   : > { %v2164_v3 = vsel %vm2142_vm9, %v11583_v39, %v7618_v17  ;;  %v7858_v46 = vunpack.i.h.bf16 %v7856_v31  ;;  %v7857_v30 = vunpack.i.l.bf16 %v7856_v31  ;;  %v2165_v49 = vsel %vm2142_vm9, %v11587_v21, %v7622_v59 }
 0x1a7   : > { %7151 = vmatmul.mubr.msk.bf16.gmra.mrb[12].mxu0 %vm2310_vm13, %v2281_v15  ;;  %v2166_v42 = vsel %vm2142_vm9, %v11593_v9, %v7623_v2  ;;  %v2194_v23 = vsel %vm2175_vm10, %v2161_v50, %v7692_v38  ;;  %v2195_v8 = vsel %vm2175_vm10, %v2162_v14, %v7693_v54  ;;  %v2196_v44 = vsel %vm2175_vm10, %v2163_v43, %v7697_v1  ;;  %v15945_v2 = vld [vmem:[#allocation40_spill] sm:$0xff] }
 0x1a8   : > { %7154 = vmatprep.mubr.msk.bf16.mxu0 %vm2310_vm13, %v2282_v58  ;;  %v2197_v39 = vsel %vm2175_vm10, %v2164_v3, %v7698_v55  ;;  %v2227_v22 = vsel %vm2208_vm11, %v2194_v23, %v7772_v35  ;;  %v2228_v18 = vsel %vm2208_vm11, %v2195_v8, %v7773_v37  ;;  %v2229_v63 = vsel %vm2208_vm11, %v2196_v44, %v7777_v53  ;;  %v15946_v55 = vld [vmem:[#allocation46_spill] sm:$0xff]  ;;  %v15947_v15 = vld [vmem:[#allocation64_spill] sm:$0xff]  ;;  %v7876_v3 = vpop.permute.xlu0 %7875 }
 0x1a9   : > { %v2230_v21 = vsel %vm2208_vm11, %v2197_v39, %v7778_v32  ;;  %v2260_v9 = vsel %vm2241_vm12, %v2227_v22, %v7852_v34  ;;  %v2261_v16 = vsel %vm2241_vm12, %v2228_v18, %v7853_v29  ;;  %v7628_v6 = vunpack.i.h.bf16 %v15944_v25  ;;  %v7871_v32 = vpop.permute.xlu1 %7870  ;;  %v15948_v34 = vld [vmem:[#allocation65_spill] sm:$0xff]  ;;  %v15950_v18 = vld [vmem:[#allocation14_spill] sm:$0xff] }
 0x1aa   : > { %v7627_v28 = vunpack.i.l.bf16 %v15944_v25  ;;  %v2262_v50 = vsel %vm2241_vm12, %v2229_v63, %v7857_v30  ;;  %v2263_v14 = vsel %vm2241_vm12, %v2230_v21, %v7858_v46  ;;  %v7703_v11 = vunpack.i.h.bf16 %v11284_v5  ;;  %v15951_v21 = vld [vmem:[#allocation16_spill] sm:$0xff] }
 0x1ab   : > { %v7702_v60 = vunpack.i.l.bf16 %v11284_v5  ;;  %v7708_v17 = vunpack.i.h.bf16 %v11297_v13  ;;  %v7707_v61 = vunpack.i.l.bf16 %v11297_v13  ;;  %v7783_v48 = vunpack.i.h.bf16 %v11630_v41 }
 0x1ac   : > { %v7782_v19 = vunpack.i.l.bf16 %v11630_v41  ;;  %v7788_v36 = vunpack.i.h.bf16 %v11643_v12  ;;  %v2283_v20 = vpack.c.bf16 %v2261_v16, %v2260_v9  ;;  %v7787_v26 = vunpack.i.l.bf16 %v11643_v12 }
 0x1ad   : > { %v7863_v10 = vunpack.i.h.bf16 %v7861_v7  ;;  %v7862_v33 = vunpack.i.l.bf16 %v7861_v7  ;;  %v2284_v4 = vpack.c.bf16 %v2263_v14, %v2262_v50  ;;  %v2167_v5 = vsel %vm2142_vm9, %v11600_v56, %v7627_v28  ;;  %v15953_v28 = vld [vmem:[#allocation61_spill] sm:$0xff] }
 0x1ae   : > { %v2168_v47 = vsel %vm2142_vm9, %v11604_v51, %v7628_v6  ;;  %v7868_v13 = vunpack.i.h.bf16 %v7866_v52  ;;  %v7867_v62 = vunpack.i.l.bf16 %v7866_v52  ;;  %v7633_v41 = vunpack.i.h.bf16 %v15945_v2  ;;  %v15952_v6 = vld [vmem:[#allocation60_spill] sm:$0xff] }
 0x1af   : > { %7155 = vmatmul.mubr.msk.bf16.gmra.mrb[16].mxu0 %vm2310_vm13, %v2283_v20  ;;  %v7632_v59 = vunpack.i.l.bf16 %v15945_v2  ;;  %v2198_v57 = vsel %vm2175_vm10, %v2165_v49, %v7702_v60  ;;  %v2199_v12 = vsel %vm2175_vm10, %v2166_v42, %v7703_v11  ;;  %v2200_v24 = vsel %vm2175_vm10, %v2167_v5, %v7707_v61  ;;  %v15949_v49 = vld [vmem:[#allocation67_spill] sm:$0xff]  ;;  %v15954_v20 = vld [vmem:[#allocation37_spill] sm:$0xff]  ;;  %v7881_v5 = vpop.permute.xlu1 %7880 }
 0x1b0   : > { %7158 = vmatprep.mubr.msk.bf16.mxu0 %vm2310_vm13, %v2284_v4  ;;  %v2201_v56 = vsel %vm2175_vm10, %v2168_v47, %v7708_v17  ;;  %v2231_v51 = vsel %vm2208_vm11, %v2198_v57, %v7782_v19  ;;  %v2232_v0 = vsel %vm2208_vm11, %v2199_v12, %v7783_v48  ;;  %v2233_v45 = vsel %vm2208_vm11, %v2200_v24, %v7787_v26  ;;  %v15955_v47 = vld [vmem:[#allocation11_spill] sm:$0xff] }
 0x1b1   : > { %v2234_v54 = vsel %vm2208_vm11, %v2201_v56, %v7788_v36  ;;  %v2264_v38 = vsel %vm2241_vm12, %v2231_v51, %v7862_v33  ;;  %v2265_v27 = vsel %vm2241_vm12, %v2232_v0, %v7863_v10  ;;  %v7638_v1 = vunpack.i.h.bf16 %v15946_v55  ;;  %v15960_v12 = vld [vmem:[#allocation31_spill] sm:$0xff]  ;;  %v15961_v51 = vld [vmem:[#allocation22_spill] sm:$0xff] }
 0x1b2   : > { %v7637_v31 = vunpack.i.l.bf16 %v15946_v55  ;;  %v2266_v37 = vsel %vm2241_vm12, %v2233_v45, %v7867_v62  ;;  %v2267_v35 = vsel %vm2241_vm12, %v2234_v54, %v7868_v13  ;;  %v7713_v53 = vunpack.i.h.bf16 %v15947_v15  ;;  %v15957_v62 = vld [vmem:[#allocation59_spill] sm:$0xff]  ;;  %v15963_v54 = vld [vmem:[#allocation66_spill] sm:$0xff] }
 0x1b3   : > { %v7712_v29 = vunpack.i.l.bf16 %v15947_v15  ;;  %v7718_v58 = vunpack.i.h.bf16 %v15948_v34  ;;  %v7717_v43 = vunpack.i.l.bf16 %v15948_v34  ;;  %v7793_v46 = vunpack.i.h.bf16 %v11662_v40 }
 0x1b4   : > { %v7792_v30 = vunpack.i.l.bf16 %v11662_v40  ;;  %v7798_v42 = vunpack.i.h.bf16 %v15949_v49  ;;  %v2285_v23 = vpack.c.bf16 %v2265_v27, %v2264_v38  ;;  %v7797_v8 = vunpack.i.l.bf16 %v15949_v49 }
 0x1b5   : > { %v7873_v44 = vunpack.i.h.bf16 %v7871_v32  ;;  %v7872_v39 = vunpack.i.l.bf16 %v7871_v32  ;;  %v2286_v22 = vpack.c.bf16 %v2267_v35, %v2266_v37  ;;  %v2169_v63 = vsel %vm2142_vm9, %v15950_v18, %v7632_v59  ;;  %v15959_v59 = vld [vmem:[#allocation58_spill] sm:$0xff] }
 0x1b6   : > { %v2170_v9 = vsel %vm2142_vm9, %v15951_v21, %v7633_v41  ;;  %v7878_v16 = vunpack.i.h.bf16 %v7876_v3  ;;  %v7877_v25 = vunpack.i.l.bf16 %v7876_v3  ;;  %v2171_v40 = vsel %vm2142_vm9, %v15952_v6, %v7637_v31 }
 0x1b7   : > { %7159 = vmatmul.mubr.msk.bf16.gmra.mrb[20].mxu0 %vm2310_vm13, %v2285_v23  ;;  %v2172_v50 = vsel %vm2142_vm9, %v15953_v28, %v7638_v1  ;;  %v2202_v14 = vsel %vm2175_vm10, %v2169_v63, %v7712_v29  ;;  %v2203_v7 = vsel %vm2175_vm10, %v2170_v9, %v7713_v53  ;;  %v2204_v11 = vsel %vm2175_vm10, %v2171_v40, %v7717_v43 }
 0x1b8   : > { %7162 = vmatprep.mubr.msk.bf16.mxu0 %vm2310_vm13, %v2286_v22  ;;  %v2205_v60 = vsel %vm2175_vm10, %v2172_v50, %v7718_v58  ;;  %v2235_v17 = vsel %vm2208_vm11, %v2202_v14, %v7792_v30  ;;  %v2236_v61 = vsel %vm2208_vm11, %v2203_v7, %v7793_v46  ;;  %v2237_v52 = vsel %vm2208_vm11, %v2204_v11, %v7797_v8  ;;  %v12029_v50 = vld [vmem:[%s15302_s2] ss:$0 sm:$0xff] }
 0x1b9   : > { %v2238_v48 = vsel %vm2208_vm11, %v2205_v60, %v7798_v42  ;;  %v2268_v19 = vsel %vm2241_vm12, %v2235_v17, %v7872_v39  ;;  %v2269_v36 = vsel %vm2241_vm12, %v2236_v61, %v7873_v44  ;;  %v7643_v26 = vunpack.i.h.bf16 %v15954_v20  ;;  %v12034_v7 = vld [vmem:[%s15303_s3] ss:$0 sm:$0xff] }
 0x1ba   : > { %v7642_v10 = vunpack.i.l.bf16 %v15954_v20  ;;  %v2270_v33 = vsel %vm2241_vm12, %v2237_v52, %v7877_v25  ;;  %v2271_v4 = vsel %vm2241_vm12, %v2238_v48, %v7878_v16  ;;  %v15956_v13 = vunpack.i.l.bf16 %v15955_v47 }
 0x1bb   : > { %v15958_v41 = vunpack.i.h.bf16 %v15955_v47  ;;  %v7723_v24 = vunpack.i.h.bf16 %v15960_v12  ;;  %v7722_v56 = vunpack.i.l.bf16 %v15960_v12  ;;  %v15962_v0 = vunpack.i.l.bf16 %v15961_v51 }
 0x1bc   : > { %v2107_v2 = vsel %vm2076_vm7, %v15957_v62, %v15956_v13  ;;  %v7803_v38 = vunpack.i.h.bf16 %v15963_v54  ;;  %v7802_v27 = vunpack.i.l.bf16 %v15963_v54  ;;  %v2287_v55 = vpack.c.bf16 %v2269_v36, %v2268_v19 }
 0x1bd   : > { %v2108_v57 = vsel %vm2076_vm7, %v15959_v59, %v15958_v41  ;;  %v2140_v45 = vsel %vm2109_vm8, %v2107_v2, %v15962_v0  ;;  %v15964_v1 = vunpack.i.h.bf16 %v15961_v51  ;;  %v7883_v37 = vunpack.i.h.bf16 %v7881_v5 }
 0x1be   : > { %v7882_v35 = vunpack.i.l.bf16 %v7881_v5  ;;  %v2288_v32 = vpack.c.bf16 %v2271_v4, %v2270_v33  ;;  %v2173_v15 = vsel %vm2142_vm9, %v2140_v45, %v7642_v10  ;;  %v15965_v49 = vmov 0.0  }
 0x1bf   : > { %v2141_v31 = vsel %vm2109_vm8, %v2108_v57, %v15964_v1  ;;  %7163 = vmatmul.mubr.msk.bf16.gmra.mrb[24].mxu0 %vm2310_vm13, %v2287_v55  ;;  %v2206_v29 = vsel %vm2175_vm10, %v2173_v15, %v7722_v56  ;;  %2699 = vst.msk [vmem:[#allocation3] sm:$0xff] %vm2698_vm14, %v15965_v49  ;;  %2700 = vst.msk [vmem:[#allocation3 + $0x8] sm:$0xff] %vm2698_vm14, %v15965_v49 }
 0x1c0   : > { %v2174_v53 = vsel %vm2142_vm9, %v2141_v31, %v7643_v26  ;;  %7166 = vmatprep.mubr.msk.bf16.mxu0 %vm2310_vm13, %v2288_v32  ;;  %v2239_v58 = vsel %vm2208_vm11, %v2206_v29, %v7802_v27  ;;  %2704 = vst.msk [vmem:[#allocation3 + $0x198] sm:$0xff] %vm2698_vm14, %v15965_v49  ;;  %2705 = vst.msk [vmem:[#allocation3 + $0x1a0] sm:$0xff] %vm2698_vm14, %v15965_v49 }
 0x1c1   : > { %v2207_v34 = vsel %vm2175_vm10, %v2174_v53, %v7723_v24  ;;  %v2272_v3 = vsel %vm2241_vm12, %v2239_v58, %v7882_v35  ;;  %2702 = vst.msk [vmem:[#allocation3 + $0x10] sm:$0x3] %vm2701_vm15, %v15965_v49  ;;  %2706 = vst.msk [vmem:[#allocation3 + $0x1a8] sm:$0x3] %vm2701_vm15, %v15965_v49 }
 0x1c2   : > { %v2240_v43 = vsel %vm2208_vm11, %v2207_v34, %v7803_v38  ;;  %2708 = vst.msk [vmem:[#allocation3] sm:$0x1] %vm2707_vm0, %v15965_v49  ;;  %2726 = vst.msk [vmem:[#allocation3 + $0x11] sm:$0x1] %vm2707_vm0, %v15965_v49 }
 0x1c3   : > { %v2273_v46 = vsel %vm2241_vm12, %v2240_v43, %v7883_v37  ;;  %2709 = vst.msk [vmem:[#allocation3 + $0x18] sm:$0x1] %vm2707_vm0, %v15965_v49  ;;  %2710 = vst.msk [vmem:[#allocation3 + $0x30] sm:$0x1] %vm2707_vm0, %v15965_v49 }
 0x1c4   : > { %v2289_v30 = vpack.c.bf16 %v2273_v46, %v2272_v3  ;;  %2711 = vst.msk [vmem:[#allocation3 + $0x48] sm:$0x1] %vm2707_vm0, %v15965_v49  ;;  %2712 = vst.msk [vmem:[#allocation3 + $0x60] sm:$0x1] %vm2707_vm0, %v15965_v49 }
 0x1c5   : > { %2713 = vst.msk [vmem:[#allocation3 + $0x78] sm:$0x1] %vm2707_vm0, %v15965_v49  ;;  %2714 = vst.msk [vmem:[#allocation3 + $0x90] sm:$0x1] %vm2707_vm0, %v15965_v49 }
 0x1c6   : > { %2715 = vst.msk [vmem:[#allocation3 + $0xa8] sm:$0x1] %vm2707_vm0, %v15965_v49  ;;  %2716 = vst.msk [vmem:[#allocation3 + $0xc0] sm:$0x1] %vm2707_vm0, %v15965_v49  ;;  %v2778_v23 = vld [vmem:[#allocation3 + $0x8] sm:$0xff] }
 0x1c7   : > { %7167 = vmatmul.mubr.msk.bf16.gmra.mrb[28].mxu0 %vm2310_vm13, %v2289_v30  ;;  %2717 = vst.msk [vmem:[#allocation3 + $0xd8] sm:$0x1] %vm2707_vm0, %v15965_v49  ;;  %2718 = vst.msk [vmem:[#allocation3 + $0xf0] sm:$0x1] %vm2707_vm0, %v15965_v49  ;;  %v2971_v39 = vrot.slane %v2778_v23, 1  ;;  %v3147_v16 = vrot.slane %v2778_v23, 2 }
 0x1c8   : > { %2719 = vst.msk [vmem:[#allocation3 + $0x108] sm:$0x1] %vm2707_vm0, %v15965_v49  ;;  %2720 = vst.msk [vmem:[#allocation3 + $0x120] sm:$0x1] %vm2707_vm0, %v15965_v49 }
 0x1c9   : > { %2721 = vst.msk [vmem:[#allocation3 + $0x138] sm:$0x1] %vm2707_vm0, %v15965_v49  ;;  %2722 = vst.msk [vmem:[#allocation3 + $0x150] sm:$0x1] %vm2707_vm0, %v15965_v49  ;;  %v2777_v42 = vld [vmem:[#allocation3] sm:$0xff] }
 0x1ca   : > { %2723 = vst.msk [vmem:[#allocation3 + $0x168] sm:$0x1] %vm2707_vm0, %v15965_v49  ;;  %2724 = vst.msk [vmem:[#allocation3 + $0x180] sm:$0x1] %vm2707_vm0, %v15965_v49  ;;  %v2779_v8 = vld [vmem:[#allocation3 + $0x10] sm:$0x3] }
 0x1cb   : > { %2725 = vst.msk [vmem:[#allocation3 + $0x198] sm:$0x1] %vm2707_vm0, %v15965_v49  ;;  %2727 = vst.msk [vmem:[#allocation3 + $0x29] sm:$0x1] %vm2707_vm0, %v15965_v49  ;;  %v2970_v44 = vrot.slane %v2777_v42, 1  ;;  %v2973_v22 = vrot.slane %v2779_v8, 1 }
 0x1cc   : > { %2728 = vst.msk [vmem:[#allocation3 + $0x41] sm:$0x1] %vm2707_vm0, %v15965_v49  ;;  %2729 = vst.msk [vmem:[#allocation3 + $0x59] sm:$0x1] %vm2707_vm0, %v15965_v49  ;;  %v3146_v9 = vrot.slane %v2777_v42, 2  ;;  %v3149_v25 = vrot.slane %v2779_v8, 2 }
 0x1cd   : > { %2730 = vst.msk [vmem:[#allocation3 + $0x71] sm:$0x1] %vm2707_vm0, %v15965_v49  ;;  %2731 = vst.msk [vmem:[#allocation3 + $0x89] sm:$0x1] %vm2707_vm0, %v15965_v49  ;;  %v2972_v18 = vsel %vm665_vm3, %v2970_v44, %v2971_v39  ;;  %v2974_v63 = vsel %vm665_vm3, %v2971_v39, %v2973_v22 }
 0x1ce   : > { %2732 = vst.msk [vmem:[#allocation3 + $0xa1] sm:$0x1] %vm2707_vm0, %v15965_v49  ;;  %2733 = vst.msk [vmem:[#allocation3 + $0xb9] sm:$0x1] %vm2707_vm0, %v15965_v49  ;;  %v7884_v21 = vpack.i.bf16 %v2974_v63, %v2972_v18  ;;  %v3148_v6 = vsel %vm842_vm4, %v3146_v9, %v3147_v16  ;;  %v3150_v40 = vsel %vm842_vm4, %v3147_v16, %v3149_v25 }
 0x1cf   : > { %2734 = vst.msk [vmem:[#allocation3 + $0xd1] sm:$0x1] %vm2707_vm0, %v15965_v49  ;;  %2735 = vst.msk [vmem:[#allocation3 + $0xe9] sm:$0x1] %vm2707_vm0, %v15965_v49  ;;  %v7889_v28 = vpack.i.bf16 %v3150_v40, %v3148_v6 }
 0x1d0   : > { %2736 = vst.msk [vmem:[#allocation3 + $0x101] sm:$0x1] %vm2707_vm0, %v15965_v49  ;;  %2737 = vst.msk [vmem:[#allocation3 + $0x119] sm:$0x1] %vm2707_vm0, %v15965_v49  ;;  %7885 = vrot.lane.b32.xlu0 %v7884_v21, %s9287_s16 }
 0x1d1   : > { %2738 = vst.msk [vmem:[#allocation3 + $0x131] sm:$0x1] %vm2707_vm0, %v15965_v49  ;;  %2739 = vst.msk [vmem:[#allocation3 + $0x149] sm:$0x1] %vm2707_vm0, %v15965_v49 }
 0x1d2   : > { %2740 = vst.msk [vmem:[#allocation3 + $0x161] sm:$0x1] %vm2707_vm0, %v15965_v49  ;;  %2741 = vst.msk [vmem:[#allocation3 + $0x179] sm:$0x1] %vm2707_vm0, %v15965_v49 }
 0x1d3   : > { %2742 = vst.msk [vmem:[#allocation3 + $0x191] sm:$0x1] %vm2707_vm0, %v15965_v49  ;;  %2743 = vst.msk [vmem:[#allocation3 + $0x1a9] sm:$0x1] %vm2707_vm0, %v15965_v49 }
 0x1d4   : > { %7890 = vrot.lane.b32.xlu0 %v7889_v28, %s9281_s22 }
 0x262   : > { %v7140_v14 = vpop.f32.mrb[0].mxu0 }
 0x263   : > { %v2533_v11 = vmul.f32 %v7140_v14, %v12029_v50  ;;  %v2397_v60 = vpop.f32.mrb[1].mxu0 }
 0x264   : > { %v2531_v17 = vmul.f32 %v12029_v50, %v2397_v60  ;;  %v7141_v61 = vpop.f32.mrb[2].mxu0 }
 0x265   : > { %v2572_v52 = vadd.f32 %v12034_v7, %v2533_v11  ;;  %v2534_v48 = vmul.f32 %v7141_v61, %v12029_v50  ;;  %v2400_v19 = vpop.f32.mrb[3].mxu0 }
 0x266   : > { %v2570_v36 = vadd.f32 %v12034_v7, %v2531_v17  ;;  %v2532_v20 = vmul.f32 %v12029_v50, %v2400_v19 }
 0x267   : > { %vm2604_vm1 = vcmp.ge.f32.partialorder %v2572_v52, 0.0  ;;  %v2636_v26 = vmul.f32 0.1, %v2572_v52  ;;  %v2573_v10 = vadd.f32 %v12034_v7, %v2534_v48 }
 0x268   : > { %vm2602_vm2 = vcmp.ge.f32.partialorder %v2570_v36, 0.0  ;;  %v2634_v33 = vmul.f32 0.1, %v2570_v36  ;;  %v2571_v4 = vadd.f32 %v12034_v7, %v2532_v20 }
 0x269   : > { %v2668_v5 = vsel %vm2604_vm1, %v2572_v52, %v2636_v26  ;;  %vm2605_vm5 = vcmp.ge.f32.partialorder %v2573_v10, 0.0  ;;  %v2637_v47 = vmul.f32 0.1, %v2573_v10 }
 0x26a   : > { %2747 = vst.msk [vmem:[#allocation3 + $0x31] sm:$0xff] %vm2698_vm14, %v2668_v5  ;;  %v2666_v13 = vsel %vm2602_vm2, %v2570_v36, %v2634_v33  ;;  %vm2603_vm6 = vcmp.ge.f32.partialorder %v2571_v4, 0.0  ;;  %v2635_v62 = vmul.f32 0.1, %v2571_v4  ;;  %v7144_v2 = vpop.f32.mrb[4].mxu0 }
 0x26b   : > { %2745 = vst.msk [vmem:[#allocation3 + $0x19] sm:$0xff] %vm2698_vm14, %v2666_v13  ;;  %v2669_v41 = vsel %vm2605_vm5, %v2573_v10, %v2637_v47  ;;  %v2537_v59 = vmul.f32 %v7144_v2, %v12029_v50  ;;  %v2413_v57 = vpop.f32.mrb[5].mxu0 }
 0x26c   : > { %2748 = vst.msk [vmem:[#allocation3 + $0x39] sm:$0xff] %vm2698_vm14, %v2669_v41  ;;  %v2667_v12 = vsel %vm2603_vm6, %v2571_v4, %v2635_v62  ;;  %v2535_v24 = vmul.f32 %v12029_v50, %v2413_v57  ;;  %v7145_v56 = vpop.f32.mrb[6].mxu0 }
 0x26d   : > { %2746 = vst.msk [vmem:[#allocation3 + $0x21] sm:$0xff] %vm2698_vm14, %v2667_v12  ;;  %v2576_v51 = vadd.f32 %v12034_v7, %v2537_v59  ;;  %v2538_v0 = vmul.f32 %v7145_v56, %v12029_v50  ;;  %v2416_v45 = vpop.f32.mrb[7].mxu0 }
 0x26e   : > { %v2574_v54 = vadd.f32 %v12034_v7, %v2535_v24  ;;  %v2536_v38 = vmul.f32 %v12029_v50, %v2416_v45 }
 0x26f   : > { %vm2608_vm8 = vcmp.ge.f32.partialorder %v2576_v51, 0.0  ;;  %v2640_v27 = vmul.f32 0.1, %v2576_v51  ;;  %v2577_v55 = vadd.f32 %v12034_v7, %v2538_v0 }
 0x270   : > { %vm2606_vm9 = vcmp.ge.f32.partialorder %v2574_v54, 0.0  ;;  %v2638_v1 = vmul.f32 0.1, %v2574_v54  ;;  %v2575_v31 = vadd.f32 %v12034_v7, %v2536_v38 }
 0x271   : > { %v2672_v37 = vsel %vm2608_vm8, %v2576_v51, %v2640_v27  ;;  %vm2609_vm11 = vcmp.ge.f32.partialorder %v2577_v55, 0.0  ;;  %v2641_v35 = vmul.f32 0.1, %v2577_v55  ;;  %v2874_v32 = vld [vmem:[#allocation3 + $0x30] sm:$0xff] }
 0x272   : > { %2751 = vst.msk [vmem:[#allocation3 + $0x61] sm:$0xff] %vm2698_vm14, %v2672_v37  ;;  %v2670_v15 = vsel %vm2606_vm9, %v2574_v54, %v2638_v1  ;;  %vm2607_vm12 = vcmp.ge.f32.partialorder %v2575_v31, 0.0  ;;  %v2639_v53 = vmul.f32 0.1, %v2575_v31  ;;  %v7148_v29 = vpop.f32.mrb[8].mxu0  ;;  %v3471_v34 = vrot.slane %v2874_v32, 1 }
 0x273   : > { %v12057_v58 = vld [vmem:[#allocation3 + $0x18] sm:$0xff]  ;;  %2749 = vst.msk [vmem:[#allocation3 + $0x49] sm:$0xff] %vm2698_vm14, %v2670_v15  ;;  %v2673_v43 = vsel %vm2609_vm11, %v2577_v55, %v2641_v35  ;;  %v2541_v3 = vmul.f32 %v7148_v29, %v12029_v50  ;;  %v2429_v46 = vpop.f32.mrb[9].mxu0  ;;  %v2830_v49 = vld [vmem:[#allocation3 + $0x40] sm:$0x3]  ;;  %v3647_v42 = vrot.slane %v2874_v32, 2 }
 0x274   : > { %v2875_v30 = vld [vmem:[#allocation3 + $0x38] sm:$0xff]  ;;  %v3466_v23 = vrot.slane %v12057_v58, 1  ;;  %2752 = vst.msk [vmem:[#allocation3 + $0x69] sm:$0xff] %vm2698_vm14, %v2673_v43  ;;  %v2671_v8 = vsel %vm2607_vm12, %v2575_v31, %v2639_v53  ;;  %v2539_v44 = vmul.f32 %v12029_v50, %v2429_v46  ;;  %v7149_v39 = vpop.f32.mrb[10].mxu0  ;;  %v12064_v63 = vld [vmem:[#allocation3 + $0x20] sm:$0xff]  ;;  %v3474_v25 = vrot.slane %v2830_v49, 1 }
 0x275   : > { %v7899_v22 = vpack.i.bf16 %v2875_v30, %v2874_v32  ;;  %v3472_v18 = vrot.slane %v2875_v30, 1  ;;  %2750 = vst.msk [vmem:[#allocation3 + $0x51] sm:$0xff] %vm2698_vm14, %v2671_v8  ;;  %v2580_v21 = vadd.f32 %v12034_v7, %v2541_v3  ;;  %v2542_v9 = vmul.f32 %v7149_v39, %v12029_v50  ;;  %v2432_v16 = vpop.f32.mrb[11].mxu0  ;;  %v2785_v52 = vld [vmem:[#allocation3 + $0x40] sm:$0x3] }
 0x276   : > { %v7904_v6 = vpack.i.bf16 %v12064_v63, %v12057_v58  ;;  %v2578_v40 = vadd.f32 %v12034_v7, %v2539_v44  ;;  %v2540_v28 = vmul.f32 %v12029_v50, %v2432_v16  ;;  %v3648_v11 = vrot.slane %v2875_v30, 2  ;;  %v2876_v20 = vld [vmem:[#allocation3 + $0x40] sm:$0x3]  ;;  %v12105_v29 = vld [vmem:[#allocation3 + $0x28] sm:$0x3] }
 0x277   : > { %7900 = vrot.lane.b32.xlu0 %v7899_v22, %s9288_s21  ;;  %7895 = vrot.lane.b32.xlu1 %v7899_v22, %s9289_s23  ;;  %v12076_v14 = vsel %vm665_vm3, %v3471_v34, %v3472_v18  ;;  %vm2612_vm15 = vcmp.ge.f32.partialorder %v2580_v21, 0.0  ;;  %v2644_v60 = vmul.f32 0.1, %v2580_v21  ;;  %v2581_v17 = vadd.f32 %v12034_v7, %v2542_v9  ;;  %v12110_v46 = vld [vmem:[#allocation3 + $0x28] sm:$0x3] }
 0x278   : > { %v3475_v61 = vsel %vm665_vm3, %v3472_v18, %v3474_v25  ;;  %vm2610_vm0 = vcmp.ge.f32.partialorder %v2578_v40, 0.0  ;;  %v2642_v48 = vmul.f32 0.1, %v2578_v40  ;;  %v2579_v19 = vadd.f32 %v12034_v7, %v2540_v28 }
 0x279   : > { %v7919_v36 = vpack.i.bf16 %v3475_v61, %v12076_v14  ;;  %v2676_v26 = vsel %vm2612_vm15, %v2580_v21, %v2644_v60  ;;  %vm2613_vm1 = vcmp.ge.f32.partialorder %v2581_v17, 0.0  ;;  %v2645_v10 = vmul.f32 0.1, %v2581_v17 }
 0x27a   : > { %v12083_v33 = vsel %vm842_vm4, %v3647_v42, %v3648_v11  ;;  %2755 = vst.msk [vmem:[#allocation3 + $0x91] sm:$0xff] %vm2698_vm14, %v2676_v26  ;;  %v2674_v4 = vsel %vm2610_vm0, %v2578_v40, %v2642_v48  ;;  %vm2611_vm2 = vcmp.ge.f32.partialorder %v2579_v19, 0.0  ;;  %v2643_v5 = vmul.f32 0.1, %v2579_v19  ;;  %v7152_v47 = vpop.f32.mrb[12].mxu0 }
 0x27b   : > { %7920 = vrot.lane.b32.xlu1 %v7919_v36, %s9284_s25  ;;  %7905 = vrot.lane.b32.xlu0 %v7904_v6, %s9289_s23  ;;  %v3650_v13 = vrot.slane %v2830_v49, 2  ;;  %2753 = vst.msk [vmem:[#allocation3 + $0x79] sm:$0xff] %vm2698_vm14, %v2674_v4  ;;  %v2677_v62 = vsel %vm2613_vm1, %v2581_v17, %v2645_v10  ;;  %v2545_v2 = vmul.f32 %v7152_v47, %v12029_v50  ;;  %v2445_v41 = vpop.f32.mrb[13].mxu0  ;;  %v2983_v59 = vrot.slane %v2785_v52, 1 }
 0x27c   : > { %v3965_v57 = vrot.slane %v2876_v20, 1  ;;  %2756 = vst.msk [vmem:[#allocation3 + $0x99] sm:$0xff] %vm2698_vm14, %v2677_v62  ;;  %v2675_v12 = vsel %vm2611_vm2, %v2579_v19, %v2643_v5  ;;  %v2543_v24 = vmul.f32 %v12029_v50, %v2445_v41  ;;  %v7153_v56 = vpop.f32.mrb[14].mxu0  ;;  %v3159_v0 = vrot.slane %v2785_v52, 2  ;;  %v12143_v41 = vld [vmem:[#allocation3 + $0x50] sm:$0xff] }
 0x27d   : > { %v3651_v51 = vsel %vm842_vm4, %v3648_v11, %v3650_v13  ;;  %2754 = vst.msk [vmem:[#allocation3 + $0x81] sm:$0xff] %vm2698_vm14, %v2675_v12  ;;  %v2584_v45 = vadd.f32 %v12034_v7, %v2545_v2  ;;  %v2546_v54 = vmul.f32 %v7153_v56, %v12029_v50  ;;  %v2448_v38 = vpop.f32.mrb[15].mxu0  ;;  %v2984_v55 = vsel %vm665_vm3, %v3472_v18, %v2983_v59  ;;  %v12141_v2 = vld [vmem:[#allocation3 + $0x68] sm:$0xff] }
 0x27e   : > { %v7924_v27 = vpack.i.bf16 %v3651_v51, %v12083_v33  ;;  %v2582_v1 = vadd.f32 %v12034_v7, %v2543_v24  ;;  %v2544_v31 = vmul.f32 %v12029_v50, %v2448_v38  ;;  %v7909_v37 = vpack.i.bf16 %v2984_v55, %v12076_v14  ;;  %v12147_v24 = vld [vmem:[#allocation3 + $0x60] sm:$0xff]  ;;  %v12152_v38 = vld [vmem:[#allocation3 + $0x48] sm:$0xff] }
 0x27f   : > { %v3966_v35 = vsel %vm665_vm3, %v3472_v18, %v3965_v57  ;;  %vm2616_vm5 = vcmp.ge.f32.partialorder %v2584_v45, 0.0  ;;  %v2648_v32 = vmul.f32 0.1, %v2584_v45  ;;  %v2585_v15 = vadd.f32 %v12034_v7, %v2546_v54 }
 0x280   : > { %7925 = vrot.lane.b32.xlu1 %v7924_v27, %s9290_s24  ;;  %v7929_v53 = vpack.i.bf16 %v3966_v35, %v12076_v14  ;;  %vm2614_vm6 = vcmp.ge.f32.partialorder %v2582_v1, 0.0  ;;  %v2646_v34 = vmul.f32 0.1, %v2582_v1  ;;  %v2583_v43 = vadd.f32 %v12034_v7, %v2544_v31  ;;  %7910 = vrot.lane.b32.xlu0 %v7909_v37, %s9287_s16  ;;  %v2836_v35 = vld [vmem:[#allocation3 + $0x70] sm:$0x3] }
 0x281   : > { %v3160_v3 = vsel %vm842_vm4, %v3648_v11, %v3159_v0  ;;  %v2680_v30 = vsel %vm2616_vm5, %v2584_v45, %v2648_v32  ;;  %vm2617_vm8 = vcmp.ge.f32.partialorder %v2585_v15, 0.0  ;;  %v2649_v49 = vmul.f32 0.1, %v2585_v15 }
 0x282   : > { %v7914_v42 = vpack.i.bf16 %v3160_v3, %v12083_v33  ;;  %2759 = vst.msk [vmem:[#allocation3 + $0xc1] sm:$0xff] %vm2698_vm14, %v2680_v30  ;;  %v2678_v8 = vsel %vm2614_vm6, %v2582_v1, %v2646_v34  ;;  %vm2615_vm9 = vcmp.ge.f32.partialorder %v2583_v43, 0.0  ;;  %v2647_v44 = vmul.f32 0.1, %v2583_v43  ;;  %v7156_v39 = vpop.f32.mrb[16].mxu0 }
 0x283   : > { %v3467_v22 = vrot.slane %v12064_v63, 1  ;;  %2757 = vst.msk [vmem:[#allocation3 + $0xa9] sm:$0xff] %vm2698_vm14, %v2678_v8  ;;  %v2681_v18 = vsel %vm2617_vm8, %v2585_v15, %v2649_v49  ;;  %v2549_v21 = vmul.f32 %v7156_v39, %v12029_v50  ;;  %v2461_v9 = vpop.f32.mrb[17].mxu0  ;;  %v3469_v16 = vrot.slane %v12105_v29, 1 }
 0x284   : > { %7930 = vrot.lane.b32.xlu1 %v7929_v53, %s9291_s26  ;;  %v2978_v25 = vrot.slane %v12110_v46, 1  ;;  %2760 = vst.msk [vmem:[#allocation3 + $0xc9] sm:$0xff] %vm2698_vm14, %v2681_v18  ;;  %v2679_v6 = vsel %vm2615_vm9, %v2583_v43, %v2647_v44  ;;  %7915 = vrot.lane.b32.xlu0 %v7914_v42, %s9281_s22  ;;  %v2547_v40 = vmul.f32 %v12029_v50, %v2461_v9  ;;  %v7157_v28 = vpop.f32.mrb[18].mxu0  ;;  %v3642_v11 = vrot.slane %v12057_v58, 2  ;;  %v2791_v18 = vld [vmem:[#allocation3 + $0x70] sm:$0x3] }
 0x285   : > { %v3468_v14 = vsel %vm665_vm3, %v3466_v23, %v3467_v22  ;;  %2758 = vst.msk [vmem:[#allocation3 + $0xb1] sm:$0xff] %vm2698_vm14, %v2679_v6  ;;  %v2588_v60 = vadd.f32 %v12034_v7, %v2549_v21  ;;  %v2550_v17 = vmul.f32 %v7157_v28, %v12029_v50  ;;  %v2464_v61 = vpop.f32.mrb[19].mxu0  ;;  %v3470_v52 = vsel %vm665_vm3, %v3467_v22, %v3469_v16 }
 0x286   : > { %v2979_v48 = vsel %vm665_vm3, %v3467_v22, %v2978_v25  ;;  %v2586_v19 = vadd.f32 %v12034_v7, %v2547_v40  ;;  %v2548_v36 = vmul.f32 %v12029_v50, %v2464_v61  ;;  %v7944_v20 = vpack.i.bf16 %v3470_v52, %v3468_v14 }
 0x287   : > { %v7934_v26 = vpack.i.bf16 %v2979_v48, %v3468_v14  ;;  %vm2620_vm11 = vcmp.ge.f32.partialorder %v2588_v60, 0.0  ;;  %v2652_v23 = vmul.f32 0.1, %v2588_v60  ;;  %v2589_v58 = vadd.f32 %v12034_v7, %v2550_v17 }
 0x288   : > { %v3643_v10 = vrot.slane %v12064_v63, 2  ;;  %vm2618_vm12 = vcmp.ge.f32.partialorder %v2586_v19, 0.0  ;;  %v2650_v33 = vmul.f32 0.1, %v2586_v19  ;;  %v2587_v4 = vadd.f32 %v12034_v7, %v2548_v36  ;;  %7945 = vrot.lane.b32.xlu0 %v7944_v20, %s9284_s25 }
 0x289   : > { %7935 = vrot.lane.b32.xlu1 %v7934_v26, %s9287_s16  ;;  %v3645_v5 = vrot.slane %v12105_v29, 2  ;;  %v2684_v47 = vsel %vm2620_vm11, %v2588_v60, %v2652_v23  ;;  %vm2621_vm15 = vcmp.ge.f32.partialorder %v2589_v58, 0.0  ;;  %v2653_v13 = vmul.f32 0.1, %v2589_v58 }
 0x28a   : > { %v3644_v62 = vsel %vm842_vm4, %v3642_v11, %v3643_v10  ;;  %2763 = vst.msk [vmem:[#allocation3 + $0xf1] sm:$0xff] %vm2698_vm14, %v2684_v47  ;;  %v2682_v63 = vsel %vm2618_vm12, %v2586_v19, %v2650_v33  ;;  %vm2619_vm0 = vcmp.ge.f32.partialorder %v2587_v4, 0.0  ;;  %v2651_v59 = vmul.f32 0.1, %v2587_v4  ;;  %v7160_v12 = vpop.f32.mrb[20].mxu0 }
 0x28b   : > { %v3646_v57 = vsel %vm842_vm4, %v3643_v10, %v3645_v5  ;;  %2761 = vst.msk [vmem:[#allocation3 + $0xd9] sm:$0xff] %vm2698_vm14, %v2682_v63  ;;  %v2685_v56 = vsel %vm2621_vm15, %v2589_v58, %v2653_v13  ;;  %v3154_v0 = vrot.slane %v12110_v46, 2  ;;  %v2553_v45 = vmul.f32 %v7160_v12, %v12029_v50  ;;  %v2477_v54 = vpop.f32.mrb[21].mxu0 }
 0x28c   : > { %v7949_v51 = vpack.i.bf16 %v3646_v57, %v3644_v62  ;;  %2764 = vst.msk [vmem:[#allocation3 + $0xf9] sm:$0xff] %vm2698_vm14, %v2685_v56  ;;  %v2683_v27 = vsel %vm2619_vm0, %v2587_v4, %v2651_v59  ;;  %v2551_v55 = vmul.f32 %v12029_v50, %v2477_v54  ;;  %v7161_v1 = vpop.f32.mrb[22].mxu0  ;;  %v7959_v31 = vpack.i.bf16 %v12141_v2, %v12147_v24 }
 0x28d   : > { %v12160_v37 = vpack.i.bf16 %v12143_v41, %v12152_v38  ;;  %2762 = vst.msk [vmem:[#allocation3 + $0xe1] sm:$0xff] %vm2698_vm14, %v2683_v27  ;;  %v3155_v32 = vsel %vm842_vm4, %v3643_v10, %v3154_v0  ;;  %v2592_v15 = vadd.f32 %v12034_v7, %v2553_v45  ;;  %v2554_v53 = vmul.f32 %v7161_v1, %v12029_v50  ;;  %v2480_v29 = vpop.f32.mrb[23].mxu0  ;;  %v2788_v45 = vld [vmem:[#allocation3 + $0x58] sm:$0x3] }
 0x28e   : > { %7950 = vrot.lane.b32.xlu0 %v7949_v51, %s9290_s24  ;;  %v3481_v34 = vrot.slane %v12147_v24, 1  ;;  %v7939_v43 = vpack.i.bf16 %v3155_v32, %v3644_v62  ;;  %v2590_v3 = vadd.f32 %v12034_v7, %v2551_v55  ;;  %v2552_v46 = vmul.f32 %v12029_v50, %v2480_v29 }
 0x28f   : > { %v3482_v30 = vrot.slane %v12141_v2, 1  ;;  %vm2624_vm1 = vcmp.ge.f32.partialorder %v2592_v15, 0.0  ;;  %v2656_v49 = vmul.f32 0.1, %v2592_v15  ;;  %v2593_v42 = vadd.f32 %v12034_v7, %v2554_v53 }
 0x290   : > { %v3484_v8 = vrot.slane %v2836_v35, 1  ;;  %7940 = vrot.lane.b32.xlu1 %v7939_v43, %s9281_s22  ;;  %vm2622_vm2 = vcmp.ge.f32.partialorder %v2590_v3, 0.0  ;;  %v2654_v44 = vmul.f32 0.1, %v2590_v3  ;;  %v2591_v39 = vadd.f32 %v12034_v7, %v2552_v46 }
 0x291   : > { %v12175_v22 = vsel %vm665_vm3, %v3481_v34, %v3482_v30  ;;  %v2688_v21 = vsel %vm2624_vm1, %v2592_v15, %v2656_v49  ;;  %vm2625_vm5 = vcmp.ge.f32.partialorder %v2593_v42, 0.0  ;;  %v2657_v9 = vmul.f32 0.1, %v2593_v42 }
 0x292   : > { %7960 = vrot.lane.b32.xlu0 %v7959_v31, %s9288_s21  ;;  %v3485_v16 = vsel %vm665_vm3, %v3482_v30, %v3484_v8  ;;  %2767 = vst.msk [vmem:[#allocation3 + $0x121] sm:$0xff] %vm2698_vm14, %v2688_v21  ;;  %v2686_v25 = vsel %vm2622_vm2, %v2590_v3, %v2654_v44  ;;  %vm2623_vm6 = vcmp.ge.f32.partialorder %v2591_v39, 0.0  ;;  %v2655_v6 = vmul.f32 0.1, %v2591_v39  ;;  %v7164_v40 = vpop.f32.mrb[24].mxu0 }
 0x293   : > { %v7984_v28 = vpack.i.bf16 %v3485_v16, %v12175_v22  ;;  %2765 = vst.msk [vmem:[#allocation3 + $0x109] sm:$0xff] %vm2698_vm14, %v2686_v25  ;;  %v2689_v14 = vsel %vm2625_vm5, %v2593_v42, %v2657_v9  ;;  %v2557_v11 = vmul.f32 %v7164_v40, %v12029_v50  ;;  %v2493_v60 = vpop.f32.mrb[25].mxu0  ;;  %v2993_v17 = vrot.slane %v2791_v18, 1 }
 0x294   : > { %v3657_v61 = vrot.slane %v12147_v24, 2  ;;  %2768 = vst.msk [vmem:[#allocation3 + $0x129] sm:$0xff] %vm2698_vm14, %v2689_v14  ;;  %v2687_v52 = vsel %vm2623_vm6, %v2591_v39, %v2655_v6  ;;  %7955 = vrot.lane.b32.xlu1 %v7959_v31, %s9289_s23  ;;  %v2555_v48 = vmul.f32 %v12029_v50, %v2493_v60  ;;  %v7165_v19 = vpop.f32.mrb[26].mxu0  ;;  %v3658_v36 = vrot.slane %v12141_v2, 2  ;;  %v12203_v24 = vld [vmem:[#allocation3 + $0x58] sm:$0x3] }
 0x295   : > { %v3660_v20 = vrot.slane %v2836_v35, 2  ;;  %2766 = vst.msk [vmem:[#allocation3 + $0x111] sm:$0xff] %vm2698_vm14, %v2687_v52  ;;  %v2596_v26 = vadd.f32 %v12034_v7, %v2557_v11  ;;  %v2558_v23 = vmul.f32 %v7165_v19, %v12029_v50  ;;  %v2496_v58 = vpop.f32.mrb[27].mxu0  ;;  %v2994_v10 = vsel %vm665_vm3, %v3482_v30, %v2993_v17 }
 0x296   : > { %7965 = vrot.lane.b32.xlu0 %v12160_v37, %s9289_s23  ;;  %v3169_v33 = vrot.slane %v2791_v18, 2  ;;  %v2594_v4 = vadd.f32 %v12034_v7, %v2555_v48  ;;  %v2556_v5 = vmul.f32 %v12029_v50, %v2496_v58  ;;  %v7974_v47 = vpack.i.bf16 %v2994_v10, %v12175_v22  ;;  %v2886_v58 = vld [vmem:[#allocation3 + $0x90] sm:$0xff] }
 0x297   : > { %v3659_v13 = vsel %vm842_vm4, %v3657_v61, %v3658_v36  ;;  %vm2628_vm8 = vcmp.ge.f32.partialorder %v2596_v26, 0.0  ;;  %v2660_v62 = vmul.f32 0.1, %v2596_v26  ;;  %v2597_v2 = vadd.f32 %v12034_v7, %v2558_v23  ;;  %v2797_v23 = vld [vmem:[#allocation3 + $0xa0] sm:$0x3] }
 0x298   : > { %v3661_v63 = vsel %vm842_vm4, %v3658_v36, %v3660_v20  ;;  %7970 = vrot.lane.b32.xlu1 %v12160_v37, %s9288_s21  ;;  %vm2626_vm9 = vcmp.ge.f32.partialorder %v2594_v4, 0.0  ;;  %v2658_v59 = vmul.f32 0.1, %v2594_v4  ;;  %v2595_v57 = vadd.f32 %v12034_v7, %v2556_v5  ;;  %v2887_v20 = vld [vmem:[#allocation3 + $0x98] sm:$0xff] }
 0x299   : > { %v7989_v12 = vpack.i.bf16 %v3661_v63, %v3659_v13  ;;  %v2692_v56 = vsel %vm2628_vm8, %v2596_v26, %v2660_v62  ;;  %vm2629_vm11 = vcmp.ge.f32.partialorder %v2597_v2, 0.0  ;;  %v2661_v51 = vmul.f32 0.1, %v2597_v2  ;;  %v2842_v26 = vld [vmem:[#allocation3 + $0xa0] sm:$0x3]  ;;  %v2883_v62 = vld [vmem:[#allocation3 + $0x78] sm:$0xff] }
 0x29a   : > { %7975 = vrot.lane.b32.xlu0 %v7974_v47, %s9287_s16  ;;  %v3170_v0 = vsel %vm842_vm4, %v3658_v36, %v3169_v33  ;;  %2771 = vst.msk [vmem:[#allocation3 + $0x151] sm:$0xff] %vm2698_vm14, %v2692_v56  ;;  %v2690_v54 = vsel %vm2626_vm9, %v2594_v4, %v2658_v59  ;;  %vm2627_vm12 = vcmp.ge.f32.partialorder %v2595_v57, 0.0  ;;  %v2659_v27 = vmul.f32 0.1, %v2595_v57  ;;  %v7168_v1 = vpop.f32.mrb[28].mxu0  ;;  %v2884_v4 = vld [vmem:[#allocation3 + $0x80] sm:$0xff] }
 0x29b   : > { %v7979_v55 = vpack.i.bf16 %v3170_v0, %v3659_v13  ;;  %2769 = vst.msk [vmem:[#allocation3 + $0x139] sm:$0xff] %vm2698_vm14, %v2690_v54  ;;  %v2693_v31 = vsel %vm2629_vm11, %v2597_v2, %v2661_v51  ;;  %v2561_v37 = vmul.f32 %v7168_v1, %v12029_v50  ;;  %v2509_v35 = vpop.f32.mrb[29].mxu0  ;;  %v3476_v32 = vrot.slane %v12152_v38, 1  ;;  %v2839_v0 = vld [vmem:[#allocation3 + $0x88] sm:$0x3] }
 0x29c   : > { %v3477_v15 = vrot.slane %v12143_v41, 1  ;;  %2772 = vst.msk [vmem:[#allocation3 + $0x159] sm:$0xff] %vm2698_vm14, %v2693_v31  ;;  %v2691_v53 = vsel %vm2627_vm12, %v2595_v57, %v2659_v27  ;;  %7985 = vrot.lane.b32.xlu1 %v7984_v28, %s9284_s25  ;;  %v2559_v29 = vmul.f32 %v12029_v50, %v2509_v35  ;;  %v7169_v34 = vpop.f32.mrb[30].mxu0  ;;  %v3479_v43 = vrot.slane %v12203_v24, 1 }
 0x29d   : > { %v2988_v3 = vrot.slane %v2788_v45, 1  ;;  %2770 = vst.msk [vmem:[#allocation3 + $0x141] sm:$0xff] %vm2698_vm14, %v2691_v53  ;;  %v2600_v46 = vadd.f32 %v12034_v7, %v2561_v37  ;;  %v2562_v30 = vmul.f32 %v7169_v34, %v12029_v50  ;;  %v2512_v49 = vpop.f32.mrb[31].mxu0  ;;  %v3652_v8 = vrot.slane %v12152_v38, 2 }
 0x29e   : > { %7980 = vrot.lane.b32.xlu0 %v7979_v55, %s9281_s22  ;;  %v3478_v42 = vsel %vm665_vm3, %v3476_v32, %v3477_v15  ;;  %v2598_v44 = vadd.f32 %v12034_v7, %v2559_v29  ;;  %v2560_v39 = vmul.f32 %v12029_v50, %v2512_v49  ;;  %v3480_v22 = vsel %vm665_vm3, %v3477_v15, %v3479_v43 }
 0x29f   : > { %v2989_v18 = vsel %vm665_vm3, %v3477_v15, %v2988_v3  ;;  %vm2632_vm15 = vcmp.ge.f32.partialorder %v2600_v46, 0.0  ;;  %v2664_v21 = vmul.f32 0.1, %v2600_v46  ;;  %v2601_v9 = vadd.f32 %v12034_v7, %v2562_v30 }
 0x2a0   : > { %v8004_v16 = vpack.i.bf16 %v3480_v22, %v3478_v42  ;;  %7990 = vrot.lane.b32.xlu1 %v7989_v12, %s9290_s24  ;;  %vm2630_vm0 = vcmp.ge.f32.partialorder %v2598_v44, 0.0  ;;  %v2662_v25 = vmul.f32 0.1, %v2598_v44  ;;  %v2599_v6 = vadd.f32 %v12034_v7, %v2560_v39 }
 0x2a1   : > { %v7994_v38 = vpack.i.bf16 %v2989_v18, %v3478_v42  ;;  %v2696_v40 = vsel %vm2632_vm15, %v2600_v46, %v2664_v21  ;;  %vm2633_vm1 = vcmp.ge.f32.partialorder %v2601_v9, 0.0  ;;  %v2665_v28 = vmul.f32 0.1, %v2601_v9 }
 0x2a2   : > { %8005 = vrot.lane.b32.xlu0 %v8004_v16, %s9284_s25  ;;  %v3653_v50 = vrot.slane %v12143_v41, 2  ;;  %2775 = vst.msk [vmem:[#allocation3 + $0x181] sm:$0xff] %vm2698_vm14, %v2696_v40  ;;  %v2694_v14 = vsel %vm2630_vm0, %v2598_v44, %v2662_v25  ;;  %vm2631_vm2 = vcmp.ge.f32.partialorder %v2599_v6, 0.0  ;;  %v2663_v11 = vmul.f32 0.1, %v2599_v6  ;;  %v2893_v16 = vld [vmem:[#allocation3 + $0xc8] sm:$0xff] }
 0x2a3   : > { %v3655_v60 = vrot.slane %v12203_v24, 2  ;;  %2773 = vst.msk [vmem:[#allocation3 + $0x169] sm:$0xff] %vm2698_vm14, %v2694_v14  ;;  %v2697_v17 = vsel %vm2633_vm1, %v2601_v9, %v2665_v28  ;;  %v3164_v61 = vrot.slane %v2788_v45, 2  ;;  %v8019_v10 = vpack.i.bf16 %v2887_v20, %v2886_v58  ;;  %v2794_v45 = vld [vmem:[#allocation3 + $0x88] sm:$0x3]  ;;  %v2890_v28 = vld [vmem:[#allocation3 + $0xb0] sm:$0xff] }
 0x2a4   : > { %v3654_v7 = vsel %vm842_vm4, %v3652_v8, %v3653_v50  ;;  %2776 = vst.msk [vmem:[#allocation3 + $0x189] sm:$0xff] %vm2698_vm14, %v2697_v17  ;;  %v2695_v52 = vsel %vm2631_vm2, %v2599_v6, %v2663_v11  ;;  %7995 = vrot.lane.b32.xlu1 %v7994_v38, %s9287_s16  ;;  %v12242_v33 = vrot.slane %v2887_v20, 1  ;;  %v3494_v5 = vrot.slane %v2842_v26, 1  ;;  %v2848_v25 = vld [vmem:[#allocation3 + $0xd0] sm:$0x3]  ;;  %v2892_v38 = vld [vmem:[#allocation3 + $0xc0] sm:$0xff] }
 0x2a5   : > { %v3656_v41 = vsel %vm842_vm4, %v3653_v50, %v3655_v60  ;;  %2774 = vst.msk [vmem:[#allocation3 + $0x171] sm:$0xff] %vm2698_vm14, %v2695_v52  ;;  %v3165_v19 = vsel %vm842_vm4, %v3653_v50, %v3164_v61  ;;  %v3003_v47 = vrot.slane %v2797_v23, 1  ;;  %v3491_v13 = vrot.slane %v2886_v58, 1  ;;  %v2803_v6 = vld [vmem:[#allocation3 + $0xd0] sm:$0x3]  ;;  %v2889_v60 = vld [vmem:[#allocation3 + $0xa8] sm:$0xff] }
 0x2a6   : > { %v8009_v48 = vpack.i.bf16 %v3656_v41, %v3654_v7  ;;  %v7999_v36 = vpack.i.bf16 %v3165_v19, %v3654_v7  ;;  %v8029_v2 = vpack.i.bf16 %v2884_v4, %v2883_v62  ;;  %v12250_v59 = vrot.slane %v2887_v20, 2 }
 0x2a7   : > { %v12248_v63 = vsel %vm665_vm3, %v3491_v13, %v12242_v33  ;;  %v3495_v57 = vsel %vm665_vm3, %v12242_v33, %v3494_v5  ;;  %v3004_v12 = vsel %vm665_vm3, %v12242_v33, %v3003_v47  ;;  %v3670_v24 = vrot.slane %v2842_v26, 2  ;;  %v2845_v26 = vld [vmem:[#allocation3 + $0xb8] sm:$0x3] }
 0x2a8   : > { %8010 = vrot.lane.b32.xlu0 %v8009_v48, %s9290_s24  ;;  %8000 = vrot.lane.b32.xlu1 %v7999_v36, %s9281_s22  ;;  %v3179_v56 = vrot.slane %v2797_v23, 2  ;;  %v3667_v51 = vrot.slane %v2886_v58, 2  ;;  %v8044_v54 = vpack.i.bf16 %v3495_v57, %v12248_v63  ;;  %v8034_v27 = vpack.i.bf16 %v3004_v12, %v12248_v63  ;;  %v2800_v23 = vld [vmem:[#allocation3 + $0xb8] sm:$0x3] }
 0x2a9   : > { %v3671_v1 = vsel %vm842_vm4, %v12250_v59, %v3670_v24  ;;  %v12268_v37 = vrot.slane %v2884_v4, 1  ;;  %v3489_v35 = vrot.slane %v2839_v0, 1  ;;  %v2998_v32 = vrot.slane %v2794_v45, 1 }
 0x2aa   : > { %v12262_v55 = vsel %vm842_vm4, %v3667_v51, %v12250_v59  ;;  %v3180_v31 = vsel %vm842_vm4, %v12250_v59, %v3179_v56  ;;  %v3486_v15 = vrot.slane %v2883_v62, 1  ;;  %v12280_v3 = vrot.slane %v2884_v4, 2 }
 0x2ab   : > { %v8049_v53 = vpack.i.bf16 %v3671_v1, %v12262_v55  ;;  %v8039_v29 = vpack.i.bf16 %v3180_v31, %v12262_v55  ;;  %v3490_v43 = vsel %vm665_vm3, %v12268_v37, %v3489_v35  ;;  %v3665_v46 = vrot.slane %v2839_v0, 2 }
 0x2ac   : > { %8020 = vrot.lane.b32.xlu0 %v8019_v10, %s9288_s21  ;;  %8015 = vrot.lane.b32.xlu1 %v8019_v10, %s9289_s23  ;;  %v12276_v34 = vsel %vm665_vm3, %v3486_v15, %v12268_v37  ;;  %v2999_v30 = vsel %vm665_vm3, %v12268_v37, %v2998_v32  ;;  %v3174_v49 = vrot.slane %v2794_v45, 2  ;;  %v3662_v42 = vrot.slane %v2883_v62, 2 }
 0x2ad   : > { %v8064_v8 = vpack.i.bf16 %v3490_v43, %v12276_v34  ;;  %v8054_v44 = vpack.i.bf16 %v2999_v30, %v12276_v34  ;;  %v3666_v22 = vsel %vm842_vm4, %v12280_v3, %v3665_v46  ;;  %v8079_v40 = vpack.i.bf16 %v2893_v16, %v2892_v38  ;;  %v2899_v46 = vld [vmem:[#allocation3 + $0xf8] sm:$0xff]  ;;  %v2809_v30 = vld [vmem:[#allocation3 + $0x100] sm:$0x3] }
 0x2ae   : > { %v12290_v39 = vsel %vm842_vm4, %v3662_v42, %v12280_v3  ;;  %v3175_v18 = vsel %vm842_vm4, %v12280_v3, %v3174_v49  ;;  %v12302_v50 = vrot.slane %v2893_v16, 1  ;;  %v3504_v14 = vrot.slane %v2848_v25, 1  ;;  %v2898_v49 = vld [vmem:[#allocation3 + $0xf0] sm:$0xff]  ;;  %v2854_v42 = vld [vmem:[#allocation3 + $0x100] sm:$0x3] }
 0x2af   : > { %v8069_v21 = vpack.i.bf16 %v3666_v22, %v12290_v39  ;;  %v8059_v9 = vpack.i.bf16 %v3175_v18, %v12290_v39  ;;  %v3013_v11 = vrot.slane %v2803_v6, 1  ;;  %v3501_v17 = vrot.slane %v2892_v38, 1 }
 0x2b0   : > { %8025 = vrot.lane.b32.xlu0 %v8029_v2, %s9289_s23  ;;  %8030 = vrot.lane.b32.xlu1 %v8029_v2, %s9288_s21  ;;  %v8089_v7 = vpack.i.bf16 %v2890_v28, %v2889_v60  ;;  %v12306_v61 = vrot.slane %v2893_v16, 2  ;;  %v3680_v52 = vrot.slane %v2848_v25, 2  ;;  %v3505_v48 = vsel %vm665_vm3, %v12302_v50, %v3504_v14  ;;  %v12366_v25 = vpop.permute.xlu0 %7885 }
 0x2b1   : > { %v12310_v41 = vsel %vm665_vm3, %v3501_v17, %v12302_v50  ;;  %v3014_v19 = vsel %vm665_vm3, %v12302_v50, %v3013_v11  ;;  %v3189_v36 = vrot.slane %v2803_v6, 2  ;;  %v3677_v20 = vrot.slane %v2892_v38, 2  ;;  %15966 = vst [vmem:[#allocation17_spill] sm:$0xff] %v12366_v25 }
 0x2b2   : > { %v8104_v58 = vpack.i.bf16 %v3505_v48, %v12310_v41  ;;  %v8094_v10 = vpack.i.bf16 %v3014_v19, %v12310_v41  ;;  %v3681_v5 = vsel %vm842_vm4, %v12306_v61, %v3680_v52  ;;  %v12328_v13 = vrot.slane %v2890_v28, 1  ;;  %v2806_v52 = vld [vmem:[#allocation3 + $0xe8] sm:$0x3] }
 0x2b3   : > { %v12322_v4 = vsel %vm842_vm4, %v3677_v20, %v12306_v61  ;;  %v3190_v47 = vsel %vm842_vm4, %v12306_v61, %v3189_v36  ;;  %v3499_v62 = vrot.slane %v2845_v26, 1  ;;  %v3008_v2 = vrot.slane %v2800_v23, 1 }
 0x2b4   : > { %8035 = vrot.lane.b32.xlu0 %v8034_v27, %s9287_s16  ;;  %8045 = vrot.lane.b32.xlu1 %v8044_v54, %s9284_s25  ;;  %v3496_v57 = vrot.slane %v2889_v60, 1  ;;  %v8109_v12 = vpack.i.bf16 %v3681_v5, %v12322_v4  ;;  %v8099_v24 = vpack.i.bf16 %v3190_v47, %v12322_v4  ;;  %v12340_v0 = vrot.slane %v2890_v28, 2 }
 0x2b5   : > { %v3500_v51 = vsel %vm665_vm3, %v12328_v13, %v3499_v62  ;;  %v3675_v45 = vrot.slane %v2845_v26, 2  ;;  %v3009_v54 = vsel %vm665_vm3, %v12328_v13, %v3008_v2  ;;  %v3184_v27 = vrot.slane %v2800_v23, 2 }
 0x2b6   : > { %v12336_v56 = vsel %vm665_vm3, %v3496_v57, %v12328_v13  ;;  %v3672_v1 = vrot.slane %v2889_v60, 2  ;;  %v12362_v22 = vrot.slane %v2899_v46, 1  ;;  %v3023_v18 = vrot.slane %v2809_v30, 1 }
 0x2b7   : > { %v8124_v31 = vpack.i.bf16 %v3500_v51, %v12336_v56  ;;  %v8114_v35 = vpack.i.bf16 %v3009_v54, %v12336_v56  ;;  %v3676_v15 = vsel %vm842_vm4, %v12340_v0, %v3675_v45  ;;  %v3511_v16 = vrot.slane %v2898_v49, 1 }
 0x2b8   : > { %8040 = vrot.lane.b32.xlu0 %v8039_v29, %s9281_s22  ;;  %8050 = vrot.lane.b32.xlu1 %v8049_v53, %s9290_s24  ;;  %v12350_v32 = vsel %vm842_vm4, %v3672_v1, %v12340_v0  ;;  %v3185_v53 = vsel %vm842_vm4, %v12340_v0, %v3184_v27  ;;  %v12368_v38 = vrot.slane %v2899_v46, 2  ;;  %v3024_v28 = vsel %vm665_vm3, %v12362_v22, %v3023_v18 }
 0x2b9   : > { %v8129_v29 = vpack.i.bf16 %v3676_v15, %v12350_v32  ;;  %v8119_v43 = vpack.i.bf16 %v3185_v53, %v12350_v32  ;;  %v3690_v14 = vrot.slane %v2854_v42, 2  ;;  %v3199_v11 = vrot.slane %v2809_v30, 2  ;;  %v2859_v30 = vld [vmem:[#allocation3 + $0x128] sm:$0xff] }
 0x2ba   : > { %v3687_v17 = vrot.slane %v2898_v49, 2  ;;  %v3018_v47 = vrot.slane %v2806_v52, 1  ;;  %v3194_v45 = vrot.slane %v2806_v52, 2  ;;  %vm4667_vm5 = vcmask 1042432  }
 0x2bb   : > { %v3691_v26 = vsel %vm842_vm4, %v12368_v38, %v3690_v14  ;;  %v3200_v23 = vsel %vm842_vm4, %v12368_v38, %v3199_v11  ;;  %v3522_v14 = vrot.slane %v2859_v30, 1  ;;  %vm4378_vm6 = vcmask 146432  }
 0x2bc   : > { %8065 = vrot.lane.b32.xlu0 %v8064_v8, %s9284_s25  ;;  %8055 = vrot.lane.b32.xlu1 %v8054_v44, %s9287_s16  ;;  %v8139_v8 = vpack.i.bf16 %v2899_v46, %v2898_v49  ;;  %v2896_v44 = vld [vmem:[#allocation3 + $0xe0] sm:$0xff]  ;;  %v12383_v19 = vsel %vm842_vm4, %v3687_v17, %v12368_v38  ;;  %v2860_v49 = vld [vmem:[#allocation3 + $0x130] sm:$0x3]  ;;  %vm4443_vm8 = vcmask 244736   ;;  %vm4508_vm9 = vcmask 343040  }
 0x2bd   : > { %v3507_v36 = vrot.slane %v2896_v44, 1  ;;  %v8169_v62 = vpack.i.bf16 %v3691_v26, %v12383_v19  ;;  %v8159_v2 = vpack.i.bf16 %v3200_v23, %v12383_v19  ;;  %v3524_v11 = vrot.slane %v2860_v49, 1 }
 0x2be   : > { %vm4541_vm11 = vcmask 392192   ;;  %vm4618_vm12 = vcmask 441344  }
 0x2bf   : > { %v3019_v54 = vsel %vm665_vm3, %v3507_v36, %v3018_v47  ;;  %v3700_v47 = vrot.slane %v2860_v49, 2 }
 0x2c0   : > { %8070 = vrot.lane.b32.xlu0 %v8069_v21, %s9290_s24  ;;  %8060 = vrot.lane.b32.xlu1 %v8059_v9, %s9281_s22  ;;  %v3514_v21 = vrot.slane %v2854_v42, 1  ;;  %v2895_v9 = vld [vmem:[#allocation3 + $0xd8] sm:$0xff]  ;;  %v2815_v42 = vld [vmem:[#allocation3 + $0x130] sm:$0x3] }
 0x2c1   : > { %v8149_v6 = vpack.i.bf16 %v2896_v44, %v2895_v9  ;;  %v3506_v5 = vrot.slane %v2895_v9, 1 }
 0x2c2   : > { %v3515_v60 = vsel %vm665_vm3, %v12362_v22, %v3514_v21 }
 0x2c3   : > { %v12397_v57 = vsel %vm665_vm3, %v3506_v5, %v3507_v36  ;;  %v3698_v5 = vrot.slane %v2859_v30, 2 }
 0x2c4   : > { %8080 = vrot.lane.b32.xlu0 %v8079_v40, %s9288_s21  ;;  %8075 = vrot.lane.b32.xlu1 %v8079_v40, %s9289_s23  ;;  %v12372_v40 = vsel %vm665_vm3, %v3511_v16, %v12362_v22  ;;  %v8174_v53 = vpack.i.bf16 %v3019_v54, %v12397_v57  ;;  %v2857_v54 = vld [vmem:[#allocation3 + $0x118] sm:$0x3] }
 0x2c5   : > { %v8154_v48 = vpack.i.bf16 %v3024_v28, %v12372_v40  ;;  %v8164_v20 = vpack.i.bf16 %v3515_v60, %v12372_v40  ;;  %v2856_v28 = vld [vmem:[#allocation3 + $0x110] sm:$0xff]  ;;  %v3033_v60 = vrot.slane %v2815_v42, 1 }
 0x2c8   : > { %8085 = vrot.lane.b32.xlu0 %v8089_v7, %s9289_s23  ;;  %8090 = vrot.lane.b32.xlu1 %v8089_v7, %s9288_s21  ;;  %v2851_v7 = vld [vmem:[#allocation3 + $0xe8] sm:$0x3] }
 0x2c9   : > { %v3685_v51 = vrot.slane %v2851_v7, 2 }
 0x2cc   : > { %8095 = vrot.lane.b32.xlu0 %v8094_v10, %s9287_s16  ;;  %8105 = vrot.lane.b32.xlu1 %v8104_v58, %s9284_s25  ;;  %v12390_v58 = vpop.permute.xlu0 %7890  ;;  %v3509_v10 = vrot.slane %v2851_v7, 1 }
 0x2cd   : > { %15967 = vst [vmem:[#allocation20_spill] sm:$0xff] %v12390_v58 }
 0x2d0   : > { %8100 = vrot.lane.b32.xlu0 %v8099_v24, %s9281_s22  ;;  %8110 = vrot.lane.b32.xlu1 %v8109_v12, %s9290_s24  ;;  %v3510_v12 = vsel %vm665_vm3, %v3507_v36, %v3509_v10  ;;  %v3683_v24 = vrot.slane %v2896_v44, 2 }
 0x2d1   : > { %v8184_v15 = vpack.i.bf16 %v3510_v12, %v12397_v57  ;;  %v3525_v12 = vsel %vm665_vm3, %v3522_v14, %v3524_v11  ;;  %v3695_v11 = vrot.slane %v2857_v54, 2 }
 0x2d2   : > { %v3195_v46 = vsel %vm842_vm4, %v3683_v24, %v3194_v45  ;;  %v3209_v45 = vrot.slane %v2815_v42, 2  ;;  %v3517_v42 = vrot.slane %v2856_v28, 1 }
 0x2d4   : > { %8125 = vrot.lane.b32.xlu0 %v8124_v31, %s9284_s25  ;;  %8115 = vrot.lane.b32.xlu1 %v8114_v35, %s9287_s16  ;;  %v3682_v31 = vrot.slane %v2895_v9, 2  ;;  %v2897_v35 = vld [vmem:[#allocation3 + $0xe8] sm:$0x3]  ;;  %v3210_v49 = vsel %vm842_vm4, %v3698_v5, %v3209_v45  ;;  %v2862_v45 = vld [vmem:[#allocation3 + $0x140] sm:$0xff] }
 0x2d5   : > { %v4176_v21 = vrot.slane %v2897_v35, 2 }
 0x2d7   : > { %v12430_v26 = vsel %vm842_vm4, %v3683_v24, %v4176_v21 }
 0x2d8   : > { %8130 = vrot.lane.b32.xlu0 %v8129_v29, %s9290_s24  ;;  %8120 = vrot.lane.b32.xlu1 %v8119_v43, %s9281_s22  ;;  %v12410_v29 = vsel %vm842_vm4, %v3682_v31, %v3683_v24  ;;  %v3686_v43 = vsel %vm842_vm4, %v3683_v24, %v3685_v51  ;;  %v3034_v51 = vsel %vm665_vm3, %v3522_v14, %v3033_v60  ;;  %v2812_v31 = vld [vmem:[#allocation3 + $0x118] sm:$0x3] }
 0x2d9   : > { %v8189_v9 = vpack.i.bf16 %v3686_v43, %v12410_v29  ;;  %v8179_v16 = vpack.i.bf16 %v3195_v46, %v12410_v29  ;;  %v3701_v43 = vsel %vm842_vm4, %v3698_v5, %v3700_v47  ;;  %v3028_v21 = vrot.slane %v2812_v31, 1 }
 0x2dc   : > { %8140 = vrot.lane.b32.xlu0 %v8139_v8, %s9288_s21  ;;  %8135 = vrot.lane.b32.xlu1 %v8139_v8, %s9289_s23  ;;  %v4000_v8 = vrot.slane %v2897_v35, 1 }
 0x2de   : > { %v12423_v17 = vsel %vm665_vm3, %v3507_v36, %v4000_v8  ;;  %v3519_v8 = vrot.slane %v2857_v54, 1 }
 0x2e0   : > { %8145 = vrot.lane.b32.xlu0 %v8149_v6, %s9289_s23  ;;  %8150 = vrot.lane.b32.xlu1 %v8149_v6, %s9288_s21  ;;  %v2858_v6 = vld [vmem:[#allocation3 + $0x120] sm:$0xff] }
 0x2e1   : > { %v8194_v52 = vpack.i.bf16 %v2859_v30, %v2858_v6  ;;  %v3697_v24 = vrot.slane %v2858_v6, 2 }
 0x2e4   : > { %8155 = vrot.lane.b32.xlu0 %v8154_v48, %s9287_s16  ;;  %8165 = vrot.lane.b32.xlu1 %v8164_v20, %s9284_s25  ;;  %v2855_v48 = vld [vmem:[#allocation3 + $0x108] sm:$0xff]  ;;  %v3521_v20 = vrot.slane %v2858_v6, 1 }
 0x2e5   : > { %v8199_v23 = vpack.i.bf16 %v2856_v28, %v2855_v48  ;;  %v3692_v47 = vrot.slane %v2855_v48, 2 }
 0x2e8   : > { %8160 = vrot.lane.b32.xlu0 %v8159_v2, %s9281_s22  ;;  %8170 = vrot.lane.b32.xlu1 %v8169_v62, %s9290_s24  ;;  %v3523_v2 = vsel %vm665_vm3, %v3521_v20, %v3522_v14  ;;  %v3693_v14 = vrot.slane %v2856_v28, 2  ;;  %v3520_v20 = vsel %vm665_vm3, %v3517_v42, %v3519_v8 }
 0x2e9   : > { %v12403_v27 = vpop.permute.xlu0 %7900  ;;  %v12405_v1 = vpop.permute.xlu1 %7895  ;;  %v8214_v35 = vpack.i.bf16 %v3525_v12, %v3523_v2  ;;  %v2866_v12 = vld [vmem:[#allocation3 + $0x160] sm:$0x3] }
 0x2ea   : > { %15968 = vst [vmem:[#allocation23_spill] sm:$0xff] %v12403_v27  ;;  %15969 = vst [vmem:[#allocation27_spill] sm:$0xff] %v12405_v1 }
 0x2ec   : > { %8185 = vrot.lane.b32.xlu0 %v8184_v15, %s9284_s25  ;;  %8175 = vrot.lane.b32.xlu1 %v8174_v53, %s9287_s16  ;;  %v8204_v15 = vpack.i.bf16 %v3034_v51, %v3523_v2  ;;  %v3699_v53 = vsel %vm842_vm4, %v3697_v24, %v3698_v5  ;;  %v3204_v5 = vrot.slane %v2812_v31, 2  ;;  %v2865_v2 = vld [vmem:[#allocation3 + $0x158] sm:$0xff]  ;;  %v12458_v51 = vld [vmem:[#allocation3 + $0x160] sm:$0x3] }
 0x2ed   : > { %v12416_v44 = vpop.permute.xlu1 %7920  ;;  %v12418_v18 = vpop.permute.xlu0 %7905  ;;  %v8209_v6 = vpack.i.bf16 %v3210_v49, %v3699_v53  ;;  %v3534_v49 = vrot.slane %v2866_v12, 1 }
 0x2ee   : > { %15970 = vst [vmem:[#allocation32_spill] sm:$0xff] %v12416_v44  ;;  %15971 = vst [vmem:[#allocation33_spill] sm:$0xff] %v12418_v18  ;;  %v3205_v31 = vsel %vm842_vm4, %v3693_v14, %v3204_v5  ;;  %v2912_v5 = vld [vmem:[#allocation3 + $0x160] sm:$0x3] }
 0x2ef   : > { %v4201_v1 = vrot.slane %v2912_v5, 2 }
 0x2f0   : > { %8190 = vrot.lane.b32.xlu0 %v8189_v9, %s9290_s24  ;;  %8180 = vrot.lane.b32.xlu1 %v8179_v16, %s9281_s22  ;;  %v3516_v9 = vrot.slane %v2855_v48, 1  ;;  %v8219_v16 = vpack.i.bf16 %v3701_v43, %v3699_v53  ;;  %v2864_v53 = vld [vmem:[#allocation3 + $0x150] sm:$0xff]  ;;  %v2861_v43 = vld [vmem:[#allocation3 + $0x138] sm:$0xff]  ;;  %v3532_v48 = vrot.slane %v2865_v2, 1 }
 0x2f1   : > { %v3707_v7 = vrot.slane %v2864_v53, 2 }
 0x2f2   : > { %v12432_v10 = vpop.permute.xlu1 %7925  ;;  %v12436_v62 = vpop.permute.xlu0 %7910  ;;  %v3535_v36 = vsel %vm665_vm3, %v3532_v48, %v3534_v49 }
 0x2f3   : > { %15972 = vst [vmem:[#allocation41_spill] sm:$0xff] %v12432_v10  ;;  %15973 = vst [vmem:[#allocation43_spill] sm:$0xff] %v12436_v62 }
 0x2f4   : > { %8200 = vrot.lane.b32.xlu0 %v8199_v23, %s9289_s23  ;;  %8195 = vrot.lane.b32.xlu1 %v8194_v52, %s9289_s23  ;;  %v3518_v52 = vsel %vm665_vm3, %v3516_v9, %v3517_v42  ;;  %v3029_v23 = vsel %vm665_vm3, %v3517_v42, %v3028_v21  ;;  %v3043_v42 = vrot.slane %v12458_v51, 1  ;;  %v12470_v21 = vrot.slane %v2862_v45, 1 }
 0x2f5   : > { %v8234_v24 = vpack.i.bf16 %v3520_v20, %v3518_v52  ;;  %v8224_v54 = vpack.i.bf16 %v3029_v23, %v3518_v52  ;;  %v3531_v9 = vrot.slane %v2864_v53, 1  ;;  %v12477_v20 = vpack.i.bf16 %v2865_v2, %v2864_v53 }
 0x2f6   : > { %v12445_v46 = vpop.permute.xlu1 %7930  ;;  %v12447_v30 = vpop.permute.xlu0 %7915  ;;  %v3526_v23 = vrot.slane %v2861_v43, 1 }
 0x2f7   : > { %15974 = vst [vmem:[#allocation44_spill] sm:$0xff] %v12445_v46  ;;  %15975 = vst [vmem:[#allocation47_spill] sm:$0xff] %v12447_v30 }
 0x2f8   : > { %8205 = vrot.lane.b32.xlu0 %v8204_v15, %s9287_s16  ;;  %8215 = vrot.lane.b32.xlu1 %v8214_v35, %s9284_s25  ;;  %v3694_v35 = vsel %vm842_vm4, %v3692_v47, %v3693_v14  ;;  %v3696_v15 = vsel %vm842_vm4, %v3693_v14, %v3695_v11  ;;  %v12475_v11 = vld [vmem:[#allocation3 + $0x148] sm:$0x3] }
 0x2f9   : > { %v8239_v14 = vpack.i.bf16 %v3696_v15, %v3694_v35  ;;  %v8229_v52 = vpack.i.bf16 %v3205_v31, %v3694_v35  ;;  %v12489_v15 = vpack.i.bf16 %v2862_v45, %v2861_v43  ;;  %v12494_v35 = vsel %vm665_vm3, %v3526_v23, %v12470_v21  ;;  %v12496_v31 = vld [vmem:[#allocation3 + $0x188] sm:$0xff] }
 0x2fa   : > { %v12452_v60 = vpop.permute.xlu0 %7945  ;;  %v4020_v49 = vrot.slane %v12475_v11, 1  ;;  %v12514_v23 = vrot.slane %v2862_v45, 2  ;;  %v4196_v62 = vrot.slane %v12475_v11, 2  ;;  %v12574_v25 = vrot.slane %v12496_v31, 2 }
 0x2fb   : > { %15976 = vst [vmem:[#allocation48_spill] sm:$0xff] %v12452_v60  ;;  %v12461_v28 = vpop.permute.xlu1 %7935  ;;  %v12518_v60 = vld [vmem:[#allocation3 + $0x180] sm:$0xff] }
 0x2fc   : > { %8210 = vrot.lane.b32.xlu0 %v8209_v6, %s9281_s22  ;;  %8220 = vrot.lane.b32.xlu1 %v8219_v16, %s9290_s24  ;;  %15977 = vst [vmem:[#allocation50_spill] sm:$0xff] %v12461_v28  ;;  %v12473_v16 = vrot.slane %v2865_v2, 2  ;;  %v3710_v6 = vrot.slane %v2866_v12, 2  ;;  %v3219_v2 = vrot.slane %v12458_v51, 2  ;;  %v12510_v51 = vld [vmem:[#allocation3 + $0x148] sm:$0x3] }
 0x2fd   : > { %v3529_v10 = vrot.slane %v12510_v51, 1 }
 0x2fe   : > { %v12504_v53 = vsel %vm842_vm4, %v3707_v7, %v12473_v16  ;;  %v12520_v7 = vld [vmem:[#allocation3 + $0x168] sm:$0xff]  ;;  %v3220_v28 = vsel %vm842_vm4, %v12473_v16, %v3219_v2 }
 0x2ff   : > { %v3712_v11 = vrot.slane %v12520_v7, 2 }
 0x300   : > { %8235 = vrot.lane.b32.xlu0 %v8234_v24, %s9284_s25  ;;  %v12468_v8 = vpop.permute.xlu0 %7950  ;;  %8225 = vrot.lane.b32.xlu1 %v8224_v54, %s9287_s16  ;;  %v12482_v24 = vsel %vm665_vm3, %v3531_v9, %v3532_v48  ;;  %v3044_v54 = vsel %vm665_vm3, %v3532_v48, %v3043_v42  ;;  %v12498_v9 = vld [vmem:[#allocation3 + $0x170] sm:$0xff]  ;;  %v12508_v42 = vsel %vm842_vm4, %v12473_v16, %v3710_v6 }
 0x301   : > { %15978 = vst [vmem:[#allocation53_spill] sm:$0xff] %v12468_v8  ;;  %15980 = vst [vmem:[#allocation5_spill] sm:$0xff] %v12482_v24  ;;  %v8264_v46 = vpack.i.bf16 %v3535_v36, %v12482_v24  ;;  %v8254_v8 = vpack.i.bf16 %v3044_v54, %v12482_v24  ;;  %v12524_v6 = vsel %vm665_vm3, %v12470_v21, %v4020_v49  ;;  %v12532_v45 = vrot.slane %v12498_v9, 1  ;;  %v2915_v54 = vld [vmem:[#allocation3 + $0x178] sm:$0x3] }
 0x302   : > { %v12479_v47 = vpop.permute.xlu1 %7940  ;;  %15982 = vst [vmem:[#allocation6_spill] sm:$0xff] %v12524_v6  ;;  %v2918_v36 = vld [vmem:[#allocation3 + $0x190] sm:$0x3]  ;;  %v4030_v27 = vrot.slane %v2915_v54, 1 }
 0x303   : > { %15979 = vst [vmem:[#allocation54_spill] sm:$0xff] %v12479_v47  ;;  %v12529_v47 = vrot.slane %v12496_v31, 1  ;;  %v4035_v6 = vrot.slane %v2918_v36, 1 }
 0x304   : > { %8240 = vrot.lane.b32.xlu0 %v8239_v14, %s9290_s24  ;;  %v12487_v12 = vpop.permute.xlu0 %7960  ;;  %8230 = vrot.lane.b32.xlu1 %v8229_v52, %s9281_s22  ;;  %v12512_v14 = vld [vmem:[#allocation3 + $0x148] sm:$0x3]  ;;  %v3702_v52 = vrot.slane %v2861_v43, 2 }
 0x305   : > { %15981 = vst [vmem:[#allocation10_spill] sm:$0xff] %v12487_v12  ;;  %v4025_v12 = vrot.slane %v2912_v5, 1  ;;  %v3038_v44 = vrot.slane %v12512_v14, 1  ;;  %v12582_v5 = vsel %vm842_vm4, %v12514_v23, %v4196_v62  ;;  %v3717_v62 = vrot.slane %v12518_v60, 2 }
 0x306   : > { %v12526_v30 = vpop.permute.xlu1 %7955 }
 0x307   : > { %15983 = vst [vmem:[#allocation9_spill] sm:$0xff] %v12526_v30  ;;  %v12537_v43 = vsel %vm665_vm3, %v3532_v48, %v4025_v12  ;;  %v8269_v30 = vpack.i.bf16 %v12508_v42, %v12504_v53  ;;  %v12553_v48 = vsel %vm842_vm4, %v3702_v52, %v12514_v23  ;;  %v3541_v12 = vrot.slane %v12518_v60, 1 }
 0x308   : > { %8250 = vrot.lane.b32.xlu0 %v12489_v15, %s9289_s23  ;;  %v12541_v49 = vpop.permute.xlu0 %7965  ;;  %8245 = vrot.lane.b32.xlu1 %v12477_v20, %s9289_s23  ;;  %v12558_v42 = vrot.slane %v12498_v9, 2 }
 0x309   : > { %15984 = vst [vmem:[#allocation4_spill] sm:$0xff] %v12541_v49  ;;  %v3536_v49 = vrot.slane %v12520_v7, 1  ;;  %v12567_v52 = vsel %vm665_vm3, %v3541_v12, %v12529_v47  ;;  %v12586_v12 = vsel %vm842_vm4, %v12473_v16, %v4201_v1  ;;  %v3705_v16 = vrot.slane %v12510_v51, 2 }
 0x30a   : > { %v12563_v18 = vpop.permute.xlu1 %7970  ;;  %v12599_v1 = vsel %vm842_vm4, %v3712_v11, %v12558_v42 }
 0x30b   : > { %15985 = vst [vmem:[#allocation15_spill] sm:$0xff] %v12563_v18  ;;  %v12571_v58 = vsel %vm665_vm3, %v3536_v49, %v12532_v45  ;;  %v4206_v49 = vrot.slane %v2915_v54, 2  ;;  %v8259_v18 = vpack.i.bf16 %v3220_v28, %v12504_v53  ;;  %v12607_v28 = vsel %vm665_vm3, %v12529_v47, %v4035_v6 }
 0x30c   : > { %8255 = vrot.lane.b32.xlu0 %v8254_v8, %s9287_s16  ;;  %v12577_v2 = vpop.permute.xlu0 %7975  ;;  %8265 = vrot.lane.b32.xlu1 %v8264_v46, %s9284_s25  ;;  %v3530_v8 = vsel %vm665_vm3, %v12470_v21, %v3529_v10  ;;  %v12603_v46 = vsel %vm665_vm3, %v12532_v45, %v4030_v27  ;;  %v3214_v54 = vrot.slane %v12512_v14, 2  ;;  %v3039_v6 = vsel %vm665_vm3, %v12470_v21, %v3038_v44 }
 0x30d   : > { %15986 = vst [vmem:[#allocation18_spill] sm:$0xff] %v12577_v2  ;;  %v12624_v2 = vsel %vm842_vm4, %v3717_v62, %v12574_v25  ;;  %v12628_v51 = vsel %vm842_vm4, %v12558_v42, %v4206_v49  ;;  %v4211_v14 = vrot.slane %v2918_v36, 2  ;;  %v8274_v21 = vpack.i.bf16 %v3039_v6, %v12494_v35  ;;  %v2869_v62 = vld [vmem:[#allocation3 + $0x178] sm:$0x3] }
 0x30e   : > { %v12609_v10 = vpop.permute.xlu1 %7985  ;;  %v3706_v49 = vsel %vm842_vm4, %v12514_v23, %v3705_v16 }
 0x30f   : > { %15987 = vst [vmem:[#allocation13_spill] sm:$0xff] %v12609_v10  ;;  %v12636_v24 = vsel %vm842_vm4, %v12574_v25, %v4211_v14  ;;  %v2872_v14 = vld [vmem:[#allocation3 + $0x190] sm:$0x3]  ;;  %v8289_v11 = vpack.i.bf16 %v3706_v49, %v12553_v48  ;;  %v12670_v49 = vpack.i.bf16 %v12496_v31, %v12518_v60  ;;  %v2824_v31 = vld [vmem:[#allocation3 + $0x178] sm:$0x3] }
 0x310   : > { %8260 = vrot.lane.b32.xlu0 %v8259_v18, %s9281_s22  ;;  %v12618_v27 = vpop.permute.xlu0 %7980  ;;  %8270 = vrot.lane.b32.xlu1 %v8269_v30, %s9290_s24  ;;  %v8284_v18 = vpack.i.bf16 %v3530_v8, %v12494_v35  ;;  %15989 = vst [vmem:[#allocation19_spill] sm:$0xff] %v12636_v24  ;;  %v3215_v8 = vsel %vm842_vm4, %v12514_v23, %v3214_v54  ;;  %v3544_v36 = vrot.slane %v2872_v14, 1  ;;  %v9169_v23 = vld [vmem:[%s15304_s4] sm:$0xff]  }
 0x311   : > { %15988 = vst [vmem:[#allocation24_spill] sm:$0xff] %v12618_v27  ;;  %v8279_v16 = vpack.i.bf16 %v3215_v8, %v12553_v48  ;;  %v3715_v8 = vrot.slane %v2869_v62, 2  ;;  %7170 = vmatprep.subr.bf16.mxu1 %v9169_v23 }
 0x312   : > { %v12638_v44 = vpop.permute.xlu1 %7990  ;;  %v3545_v10 = vsel %vm665_vm3, %v12529_v47, %v3544_v36  ;;  %7171 = vmatpush3.bf16.msra.mxu1 %v9169_v23  ;;  %v12694_v23 = vld [vmem:[#allocation3 + $0x48] sm:$0xff] }
 0x313   : > { %15990 = vst [vmem:[#allocation28_spill] sm:$0xff] %v12638_v44  ;;  %v3539_v44 = vrot.slane %v2869_v62, 1  ;;  %v8304_v36 = vpack.i.bf16 %v3545_v10, %v12567_v52  ;;  %15998 = vst [vmem:[#allocation38_spill] sm:$0xff] %v12694_v23 }
 0x314   : > { %8285 = vrot.lane.b32.xlu0 %v8284_v18, %s9284_s25  ;;  %v12646_v30 = vpop.permute.xlu0 %8005  ;;  %8275 = vrot.lane.b32.xlu1 %v8274_v21, %s9287_s16  ;;  %v12664_v18 = vpack.i.bf16 %v12498_v9, %v12520_v7  ;;  %v3720_v9 = vrot.slane %v2872_v14, 2  ;;  %v12680_v7 = vld [vmem:[#allocation3 + $0x50] sm:$0xff]  ;;  %v3716_v14 = vsel %vm842_vm4, %v12558_v42, %v3715_v8 }
 0x315   : > { %15991 = vst [vmem:[#allocation30_spill] sm:$0xff] %v12646_v30  ;;  %15995 = vst [vmem:[#allocation21_spill] sm:$0xff] %v12680_v7  ;;  %v3968_v60 = vrot.slane %v12680_v7, 1  ;;  %v3967_v30 = vrot.slane %v12694_v23, 1  ;;  %v8329_v8 = vpack.i.bf16 %v3716_v14, %v12599_v1 }
 0x316   : > { %v12652_v6 = vpop.permute.xlu1 %7995 }
 0x317   : > { %15992 = vst [vmem:[#allocation25_spill] sm:$0xff] %v12652_v6  ;;  %v4144_v6 = vrot.slane %v12680_v7, 2 }
 0x318   : > { %8290 = vrot.lane.b32.xlu0 %v8289_v11, %s9290_s24  ;;  %8280 = vrot.lane.b32.xlu1 %v8279_v16, %s9281_s22  ;;  %v3540_v11 = vsel %vm665_vm3, %v12532_v45, %v3539_v44  ;;  %v2879_v16 = vld [vmem:[#allocation3 + $0x58] sm:$0x3] }
 0x319   : > { %v8324_v62 = vpack.i.bf16 %v3540_v11, %v12571_v58  ;;  %v3970_v27 = vrot.slane %v2879_v16, 1  ;;  %v3721_v11 = vsel %vm842_vm4, %v12574_v25, %v3720_v9  ;;  %v4146_v24 = vrot.slane %v2879_v16, 2  ;;  %v2885_v9 = vld [vmem:[#allocation3 + $0x88] sm:$0x3] }
 0x31a   : > { %v12660_v54 = vpop.permute.xlu0 %8010  ;;  %v12666_v21 = vpop.permute.xlu1 %8000  ;;  %v8309_v25 = vpack.i.bf16 %v3721_v11, %v12624_v2 }
 0x31b   : > { %15993 = vst [vmem:[#allocation34_spill] sm:$0xff] %v12660_v54  ;;  %15994 = vst [vmem:[#allocation51_spill] sm:$0xff] %v12666_v21  ;;  %v9170_v54 = vld [vmem:[%s15304_s4 + $0x8] sm:$0xff]   ;;  %v3971_v21 = vsel %vm665_vm3, %v3968_v60, %v3970_v27  ;;  %v3224_v27 = vrot.slane %v2824_v31, 2 }
 0x31c   : > { %8300 = vrot.lane.b32.xlu0 %v12664_v18, %s9289_s23  ;;  %8295 = vrot.lane.b32.xlu1 %v12670_v49, %s9289_s23 }
 0x31d   : > { %7172 = vmatprep.subr.bf16.mxu1 %v9170_v54 }
 0x31e   : > { %v12683_v44 = vpop.permute.xlu0 %8020  ;;  %v12689_v47 = vpop.permute.xlu1 %8015  ;;  %7173 = vmatpush3.bf16.msra.mxu1 %v9170_v54  ;;  %v4143_v54 = vrot.slane %v12694_v23, 2 }
 0x31f   : > { %15996 = vst [vmem:[#allocation26_spill] sm:$0xff] %v12683_v44  ;;  %15997 = vst [vmem:[#allocation29_spill] sm:$0xff] %v12689_v47  ;;  %v3048_v44 = vrot.slane %v2824_v31, 1  ;;  %v3969_v47 = vsel %vm665_vm3, %v3967_v30, %v3968_v60  ;;  %v9172_v60 = vld [vmem:[%s15304_s4 + $0x18] ss:$0 sps:$4 sm:$0x77]  }
 0x320   : > { %8325 = vrot.lane.b32.xlu0 %v8324_v62, %s9284_s25  ;;  %8305 = vrot.lane.b32.xlu1 %v8304_v36, %s9284_s25  ;;  %v9171_v36 = vld [vmem:[%s15304_s4 + $0x10] sm:$0xff]   ;;  %v8334_v16 = vpack.i.bf16 %v3971_v21, %v3969_v47  ;;  %v4145_v11 = vsel %vm842_vm4, %v4143_v54, %v4144_v6  ;;  %v4669_v21 = vsel %vm4667_vm5, %v9172_v60, 0  ;;  %v3225_v47 = vsel %vm842_vm4, %v12558_v42, %v3224_v27  ;;  %v12742_v42 = vld [vmem:[#allocation3 + $0x68] sm:$0xff] }
 0x321   : > { %v3049_v30 = vsel %vm665_vm3, %v12532_v45, %v3048_v44  ;;  %7174 = vmatprep.subr.bf16.mxu1 %v9171_v36  ;;  %v2882_v44 = vld [vmem:[#allocation3 + $0x70] sm:$0x3]  ;;  %v3973_v27 = vrot.slane %v12742_v42, 1 }
 0x322   : > { %v12702_v10 = vpop.permute.xlu0 %8025  ;;  %v12707_v62 = vpop.permute.xlu1 %8030  ;;  %7175 = vmatpush3.bf16.msra.mxu1 %v9171_v36  ;;  %v8314_v31 = vpack.i.bf16 %v3049_v30, %v12571_v58  ;;  %v12735_v36 = vld [vmem:[#allocation3 + $0x30] sm:$0xff]  ;;  %v4151_v23 = vrot.slane %v2882_v44, 2 }
 0x323   : > { %15999 = vst [vmem:[#allocation45_spill] sm:$0xff] %v12702_v10  ;;  %16000 = vst [vmem:[#allocation52_spill] sm:$0xff] %v12707_v62  ;;  %v3980_v62 = vrot.slane %v2885_v9, 1  ;;  %7211 = vmatprep.subr.msk.bf16.mxu1 %vm4667_vm5, %v9172_v60  ;;  %v4138_v30 = vrot.slane %v12735_v36, 2  ;;  %v3975_v10 = vrot.slane %v2882_v44, 1 }
 0x324   : > { %8330 = vrot.lane.b32.xlu0 %v8329_v8, %s9290_s24  ;;  %8310 = vrot.lane.b32.xlu1 %v8309_v25, %s9290_s24  ;;  %v4147_v8 = vsel %vm842_vm4, %v4144_v6, %v4146_v24  ;;  %v12731_v25 = vld [vmem:[#allocation3 + $0x38] sm:$0xff] }
 0x325   : > { %v4139_v54 = vrot.slane %v12731_v25, 2  ;;  %v8344_v6 = vpack.i.bf16 %v4147_v8, %v4145_v11  ;;  %v8319_v11 = vpack.i.bf16 %v3225_v47, %v12599_v1  ;;  %v2891_v8 = vld [vmem:[#allocation3 + $0xb8] sm:$0x3] }
 0x326   : > { %v12721_v14 = vpop.permute.xlu0 %8035  ;;  %v12725_v45 = vpop.permute.xlu1 %8045  ;;  %7177 = vmatpush3.bf16.msra.mxu1 %v4669_v21 }
 0x327   : > { %16001 = vst [vmem:[#allocation7_spill] sm:$0xff] %v12721_v14  ;;  %16002 = vst [vmem:[#allocation8_spill] sm:$0xff] %v12725_v45  ;;  %v9208_v14 = vld [vmem:[#allocation3 + $0x40] sm:$0x3]  ;;  %v4156_v45 = vrot.slane %v2885_v9, 2  ;;  %v4140_v9 = vsel %vm842_vm4, %v4138_v30, %v4139_v54  ;;  %v3990_v30 = vrot.slane %v2891_v8, 1 }
 0x328   : > { %8335 = vrot.lane.b32.xlu0 %v8334_v16, %s9291_s26  ;;  %v4141_v24 = vrot.slane %v9208_v14, 2  ;;  %8315 = vrot.lane.b32.xlu1 %v8314_v31, %s9287_s16  ;;  %v3981_v16 = vsel %vm665_vm3, %v12268_v37, %v3980_v62 }
 0x329   : > { %v8354_v62 = vpack.i.bf16 %v3981_v16, %v12276_v34  ;;  %v4157_v21 = vsel %vm842_vm4, %v12280_v3, %v4156_v45 }
 0x32a   : > { %v12738_v60 = vpop.permute.xlu0 %8040  ;;  %v12745_v14 = vpop.permute.xlu1 %8050  ;;  %v4142_v31 = vsel %vm842_vm4, %v4139_v54, %v4141_v24  ;;  %v4149_v24 = vrot.slane %v12742_v42, 2  ;;  %v8364_v34 = vpack.i.bf16 %v4157_v21, %v12290_v39 }
 0x32b   : > { %16003 = vst [vmem:[#allocation39_spill] sm:$0xff] %v12738_v60  ;;  %16004 = vst [vmem:[#allocation55_spill] sm:$0xff] %v12745_v14  ;;  %v12751_v60 = vld [vmem:[#allocation3 + $0x60] sm:$0xff]  ;;  %v8339_v54 = vpack.i.bf16 %v4142_v31, %v4140_v9 }
 0x32c   : > { %8345 = vrot.lane.b32.xlu0 %v8344_v6, %s9292_s18  ;;  %v3972_v37 = vrot.slane %v12751_v60, 1  ;;  %8320 = vrot.lane.b32.xlu1 %v8319_v11, %s9281_s22  ;;  %v3976_v6 = vsel %vm665_vm3, %v3973_v27, %v3975_v10  ;;  %v2888_v11 = vld [vmem:[#allocation3 + $0xa0] sm:$0x3]  ;;  %v4148_v45 = vrot.slane %v12751_v60, 2  ;;  %v3991_v10 = vsel %vm665_vm3, %v12328_v13, %v3990_v30 }
 0x32d   : > { %v4152_v31 = vsel %vm842_vm4, %v4149_v24, %v4151_v23  ;;  %v2894_v23 = vld [vmem:[#allocation3 + $0xd0] sm:$0x3] }
 0x32e   : > { %v12758_v47 = vpop.permute.xlu0 %8065  ;;  %v3974_v14 = vsel %vm665_vm3, %v3972_v37, %v3973_v27  ;;  %v12762_v7 = vpop.permute.xlu1 %8055  ;;  %v4166_v27 = vrot.slane %v2891_v8, 2  ;;  %v4150_v44 = vsel %vm842_vm4, %v4148_v45, %v4149_v24  ;;  %v3985_v37 = vrot.slane %v2888_v11, 1 }
 0x32f   : > { %v8349_v3 = vpack.i.bf16 %v3976_v6, %v3974_v14  ;;  %v8374_v14 = vpack.i.bf16 %v3991_v10, %v12336_v56  ;;  %v4161_v6 = vrot.slane %v2888_v11, 2 }
 0x330   : > { %8355 = vrot.lane.b32.xlu0 %v8354_v62, %s9291_s26  ;;  %8340 = vrot.lane.b32.xlu1 %v8339_v54, %s9292_s18  ;;  %v8359_v62 = vpack.i.bf16 %v4152_v31, %v4150_v44  ;;  %v4167_v13 = vsel %vm842_vm4, %v12340_v0, %v4166_v27  ;;  %v3986_v21 = vsel %vm665_vm3, %v12242_v33, %v3985_v37 }
 0x331   : > { %v8384_v54 = vpack.i.bf16 %v4167_v13, %v12350_v32  ;;  %v8369_v56 = vpack.i.bf16 %v3986_v21, %v12248_v63  ;;  %v4162_v0 = vsel %vm842_vm4, %v12250_v59, %v4161_v6  ;;  %v4171_v32 = vrot.slane %v2894_v23, 2  ;;  %v2901_v13 = vld [vmem:[#allocation3 + $0x108] sm:$0xff] }
 0x332   : > { %v12769_v16 = vpop.permute.xlu0 %8070  ;;  %v12773_v9 = vpop.permute.xlu1 %8060  ;;  %v8379_v11 = vpack.i.bf16 %v4162_v0, %v12262_v55  ;;  %v16005_v59 = vpack.i.bf16 %v12423_v17, %v12397_v57  ;;  %v16006_v57 = vpack.i.bf16 %v12430_v26, %v12410_v29  ;;  %v2902_v17 = vld [vmem:[#allocation3 + $0x110] sm:$0xff]  ;;  %v2905_v29 = vld [vmem:[#allocation3 + $0x128] sm:$0xff]  ;;  %v2904_v0 = vld [vmem:[#allocation3 + $0x120] sm:$0xff] }
 0x333   : > { %v4008_v6 = vrot.slane %v2902_v17, 1  ;;  %v2906_v26 = vld [vmem:[#allocation3 + $0x130] sm:$0x3] }
 0x334   : > { %8365 = vrot.lane.b32.xlu0 %v8364_v34, %s9292_s18  ;;  %8350 = vrot.lane.b32.xlu1 %v8349_v3, %s9291_s26  ;;  %v3995_v34 = vrot.slane %v2894_v23, 1  ;;  %v2900_v3 = vld [vmem:[#allocation3 + $0x100] sm:$0x3] }
 0x335   : > { %v4005_v45 = vrot.slane %v2900_v3, 1  ;;  %v4181_v37 = vrot.slane %v2900_v3, 2 }
 0x336   : > { %v12779_v39 = vpop.permute.xlu0 %8080  ;;  %v12784_v8 = vpop.permute.xlu1 %8075  ;;  %v3996_v63 = vsel %vm665_vm3, %v12302_v50, %v3995_v34  ;;  %v4172_v50 = vsel %vm842_vm4, %v12306_v61, %v4171_v32 }
 0x337   : > { %v8389_v44 = vpack.i.bf16 %v3996_v63, %v12310_v41  ;;  %v4006_v55 = vsel %vm665_vm3, %v12362_v22, %v4005_v45  ;;  %v8399_v22 = vpack.i.bf16 %v4172_v50, %v12322_v4  ;;  %v4182_v61 = vsel %vm842_vm4, %v12368_v38, %v4181_v37 }
 0x338   : > { %8375 = vrot.lane.b32.xlu0 %v8374_v14, %s9291_s26  ;;  %8360 = vrot.lane.b32.xlu1 %v8359_v62, %s9292_s18  ;;  %v2903_v14 = vld [vmem:[#allocation3 + $0x118] sm:$0x3]  ;;  %v8414_v41 = vpack.i.bf16 %v4006_v55, %v12372_v40  ;;  %v8424_v40 = vpack.i.bf16 %v4182_v61, %v12383_v19  ;;  %v8409_v4 = vpack.i.bf16 %v2902_v17, %v2901_v13  ;;  %v4015_v45 = vrot.slane %v2906_v26, 1 }
 0x339   : > { %v4010_v23 = vrot.slane %v2903_v14, 1  ;;  %v4184_v63 = vrot.slane %v2902_v17, 2  ;;  %v4186_v32 = vrot.slane %v2903_v14, 2  ;;  %v8434_v19 = vpack.i.bf16 %v2905_v29, %v2904_v0 }
 0x33a   : > { %v12790_v30 = vpop.permute.xlu0 %8085  ;;  %v12794_v24 = vpop.permute.xlu1 %8090  ;;  %v4183_v50 = vrot.slane %v2901_v13, 2  ;;  %v4191_v61 = vrot.slane %v2906_v26, 2 }
 0x33b   : > { %v4011_v38 = vsel %vm665_vm3, %v4008_v6, %v4010_v23  ;;  %v4187_v14 = vsel %vm842_vm4, %v4184_v63, %v4186_v32  ;;  %v16012_v32 = vld [vmem:[#allocation17_spill] sm:$0xff] }
 0x33c   : > { %8385 = vrot.lane.b32.xlu0 %v8384_v54, %s9292_s18  ;;  %8370 = vrot.lane.b32.xlu1 %v8369_v56, %s9291_s26  ;;  %v4007_v54 = vrot.slane %v2901_v13, 1  ;;  %v4185_v17 = vsel %vm842_vm4, %v4183_v50, %v4184_v63 }
 0x33e   : > { %v12800_v33 = vpop.permute.xlu0 %8095  ;;  %v12803_v10 = vpop.permute.xlu1 %8105  ;;  %v4009_v3 = vsel %vm665_vm3, %v4007_v54, %v4008_v6  ;;  %v4188_v6 = vrot.slane %v2904_v0, 2 }
 0x33f   : > { %v8419_v55 = vpack.i.bf16 %v4011_v38, %v4009_v3 }
 0x340   : > { %8395 = vrot.lane.b32.xlu0 %v16005_v59, %s9291_s26  ;;  %8380 = vrot.lane.b32.xlu1 %v8379_v11, %s9292_s18  ;;  %v4013_v11 = vrot.slane %v2905_v29, 1  ;;  %v4012_v59 = vrot.slane %v2904_v0, 1 }
 0x342   : > { %v12812_v27 = vpop.permute.xlu0 %8100  ;;  %v12817_v31 = vpop.permute.xlu1 %8110 }
 0x344   : > { %8405 = vrot.lane.b32.xlu0 %v16006_v57, %s9292_s18  ;;  %8390 = vrot.lane.b32.xlu1 %v8389_v44, %s9291_s26  ;;  %v4014_v57 = vsel %vm665_vm3, %v4012_v59, %v4013_v11  ;;  %v7888_v59 = vunpack.i.h.bf16 %v16012_v32 }
 0x346   : > { %v12826_v62 = vpop.permute.xlu0 %8125  ;;  %v12830_v21 = vpop.permute.xlu1 %8115 }
 0x348   : > { %8415 = vrot.lane.b32.xlu0 %v8414_v41, %s9291_s26  ;;  %8400 = vrot.lane.b32.xlu1 %v8399_v22, %s9292_s18  ;;  %v4016_v41 = vsel %vm665_vm3, %v4013_v11, %v4015_v45  ;;  %v4189_v22 = vrot.slane %v2905_v29, 2  ;;  %v16010_v45 = vld [vmem:[#allocation6_spill] sm:$0xff] }
 0x349   : > { %v8444_v13 = vpack.i.bf16 %v4016_v41, %v4014_v57  ;;  %v16011_v63 = vpack.i.bf16 %v16010_v45, %v12494_v35  ;;  %v16017_v41 = vld [vmem:[#allocation20_spill] sm:$0xff]  ;;  %v16018_v35 = vpack.i.bf16 %v12582_v5, %v12553_v48  ;;  %v16022_v48 = vpack.i.bf16 %v12586_v12, %v12504_v53  ;;  %v16023_v45 = vld [vmem:[#allocation23_spill] sm:$0xff] }
 0x34a   : > { %v12836_v56 = vpop.permute.xlu0 %8130  ;;  %v12839_v34 = vpop.permute.xlu1 %8120  ;;  %v4192_v29 = vsel %vm842_vm4, %v4189_v22, %v4191_v61  ;;  %v9212_v61 = vld [vmem:[#allocation3 + $0x8] sm:$0xff]  ;;  %v16027_v12 = vld [vmem:[#allocation32_spill] sm:$0xff] }
 0x34c   : > { %8425 = vrot.lane.b32.xlu0 %v8424_v40, %s9292_s18  ;;  %8410 = vrot.lane.b32.xlu1 %v8409_v4, %s9288_s21  ;;  %v8429_v40 = vpack.i.bf16 %v4187_v14, %v4185_v17  ;;  %v4190_v4 = vsel %vm842_vm4, %v4188_v6, %v4189_v22  ;;  %v7892_v22 = vunpack.i.l.bf16 %v16017_v41  ;;  %v4315_v17 = vsel %vm2698_vm14, %v9212_v61, %v7888_v59  ;;  %v9213_v14 = vld [vmem:[#allocation3] sm:$0xff]  ;;  %v16024_v59 = vld [vmem:[#allocation27_spill] sm:$0xff]  ;;  %v2919_v61 = vld [vmem:[#allocation3 + $0x198] sm:$0xff] }
 0x34d   : > { %v8454_v3 = vpack.i.bf16 %v4192_v29, %v4190_v4  ;;  %v7897_v53 = vunpack.i.l.bf16 %v16024_v59 }
 0x34e   : > { %v12845_v44 = vpop.permute.xlu0 %8140  ;;  %v12847_v37 = vpop.permute.xlu1 %8135 }
 0x350   : > { %8435 = vrot.lane.b32.xlu0 %v8434_v19, %s9288_s21  ;;  %8420 = vrot.lane.b32.xlu1 %v8419_v55, %s9291_s26  ;;  %v7887_v19 = vunpack.i.l.bf16 %v16012_v32 }
 0x352   : > { %v12855_v23 = vpop.permute.xlu0 %8145  ;;  %v12857_v54 = vpop.permute.xlu1 %8150  ;;  %v4314_v6 = vsel %vm2698_vm14, %v9213_v14, %v7887_v19  ;;  %v7898_v19 = vunpack.i.h.bf16 %v16024_v59  ;;  %v2921_v14 = vld [vmem:[#allocation3 + $0x1a8] sm:$0x3] }
 0x353   : > { %v4346_v5 = vsel %vm2076_vm7, %v4314_v6, %v7892_v22  ;;  %v16034_v59 = vld [vmem:[#allocation47_spill] sm:$0xff] }
 0x354   : > { %8445 = vrot.lane.b32.xlu0 %v8444_v13, %s9291_s26  ;;  %8430 = vrot.lane.b32.xlu1 %v8429_v40, %s9292_s18  ;;  %v16020_v40 = vld [vmem:[#allocation33_spill] sm:$0xff] }
 0x355   : > { %v7907_v29 = vunpack.i.l.bf16 %v16020_v40 }
 0x356   : > { %v12863_v26 = vpop.permute.xlu0 %8155  ;;  %v12865_v38 = vpop.permute.xlu1 %8165 }
 0x357   : > { %16007 = vst [vmem:[#allocation42_spill] sm:$0xff] %v12865_v38  ;;  %v4379_v6 = vsel %vm4378_vm6, %v4346_v5, %v7907_v29  ;;  %v16032_v29 = vpack.i.bf16 %v12603_v46, %v12571_v58  ;;  %v9214_v58 = vld [vmem:[#allocation3 + $0x20] sm:$0xff] }
 0x358   : > { %8455 = vrot.lane.b32.xlu0 %v8454_v3, %s9292_s18  ;;  %8440 = vrot.lane.b32.xlu1 %v12489_v15, %s9288_s21  ;;  %v16015_v15 = vld [vmem:[#allocation5_spill] sm:$0xff] }
 0x359   : > { %v16016_v57 = vpack.i.bf16 %v12537_v43, %v16015_v15  ;;  %v7908_v43 = vunpack.i.h.bf16 %v16020_v40  ;;  %v16025_v15 = vld [vmem:[#allocation43_spill] sm:$0xff]  ;;  %v16029_v40 = vld [vmem:[#allocation41_spill] sm:$0xff] }
 0x35a   : > { %v12870_v0 = vpop.permute.xlu0 %8160  ;;  %v12872_v11 = vpop.permute.xlu1 %8170 }
 0x35b   : > { %16008 = vst [vmem:[#allocation12_spill] sm:$0xff] %v12870_v0  ;;  %16009 = vst [vmem:[#allocation49_spill] sm:$0xff] %v12872_v11  ;;  %v7918_v11 = vunpack.i.h.bf16 %v16034_v59 }
 0x35c   : > { %8465 = vrot.lane.b32.xlu0 %v12477_v20, %s9288_s21  ;;  %8450 = vrot.lane.b32.xlu1 %v16011_v63, %s9291_s26  ;;  %v7893_v20 = vunpack.i.h.bf16 %v16017_v41  ;;  %v16030_v63 = vld [vmem:[#allocation50_spill] sm:$0xff] }
 0x35d   : > { %v7938_v32 = vunpack.i.h.bf16 %v16030_v63 }
 0x35e   : > { %v12882_v55 = vpop.permute.xlu0 %8185  ;;  %v12884_v50 = vpop.permute.xlu1 %8175  ;;  %v4347_v3 = vsel %vm2076_vm7, %v4315_v17, %v7893_v20  ;;  %v2920_v17 = vld [vmem:[#allocation3 + $0x1a0] sm:$0xff] }
 0x35f   : > { %16013 = vst [vmem:[#allocation56_spill] sm:$0xff] %v12882_v55  ;;  %16014 = vst [vmem:[#allocation57_spill] sm:$0xff] %v12884_v50  ;;  %v4317_v46 = vsel %vm2698_vm14, %v9214_v58, %v7938_v32  ;;  %v16039_v32 = vpack.i.bf16 %v12628_v51, %v12599_v1  ;;  %v4214_v58 = vrot.slane %v2920_v17, 2 }
 0x360   : > { %8475 = vrot.lane.b32.xlu0 %v16016_v57, %s9291_s26  ;;  %8460 = vrot.lane.b32.xlu1 %v16018_v35, %s9292_s18  ;;  %v7912_v57 = vunpack.i.l.bf16 %v16025_v15  ;;  %v4380_v35 = vsel %vm4378_vm6, %v4347_v3, %v7908_v43  ;;  %v7913_v43 = vunpack.i.h.bf16 %v16025_v15  ;;  %v16031_v3 = vld [vmem:[#allocation54_spill] sm:$0xff]  ;;  %v7917_v15 = vunpack.i.l.bf16 %v16034_v59 }
 0x361   : > { %v7943_v22 = vunpack.i.h.bf16 %v16031_v3  ;;  %v7942_v20 = vunpack.i.l.bf16 %v16031_v3  ;;  %v16038_v59 = vpack.i.bf16 %v12607_v28, %v12567_v52  ;;  %v4216_v52 = vrot.slane %v2921_v14, 2 }
 0x362   : > { %v12898_v13 = vpop.permute.xlu0 %8190  ;;  %v12901_v4 = vpop.permute.xlu1 %8180  ;;  %v4318_v5 = vsel %vm2698_vm14, %v12735_v36, %v7912_v57  ;;  %v16037_v57 = vld [vmem:[#allocation53_spill] sm:$0xff]  ;;  %v4319_v28 = vsel %vm2698_vm14, %v12731_v25, %v7913_v43 }
 0x363   : > { %16019 = vst [vmem:[#allocation68_spill] sm:$0xff] %v12898_v13  ;;  %16021 = vst [vmem:[#allocation35_spill] sm:$0xff] %v12901_v4  ;;  %v16035_v13 = vld [vmem:[#allocation48_spill] sm:$0xff]  ;;  %v7952_v38 = vunpack.i.l.bf16 %v16037_v57  ;;  %v4350_v1 = vsel %vm2076_vm7, %v4318_v5, %v7917_v15  ;;  %v16043_v15 = vld [vmem:[#allocation10_spill] sm:$0xff] }
 0x364   : > { %8485 = vrot.lane.b32.xlu0 %v16022_v48, %s9292_s18  ;;  %8470 = vrot.lane.b32.xlu1 %v12664_v18, %s9288_s21  ;;  %v4038_v48 = vrot.slane %v2920_v17, 1  ;;  %v7948_v0 = vunpack.i.h.bf16 %v16035_v13  ;;  %v7947_v3 = vunpack.i.l.bf16 %v16035_v13  ;;  %v4349_v13 = vsel %vm2076_vm7, %v4317_v46, %v7943_v22 }
 0x365   : > { %v4382_v5 = vsel %vm4378_vm6, %v4349_v13, %v7898_v19  ;;  %v16046_v19 = vld [vmem:[#allocation4_spill] sm:$0xff]  ;;  %v16047_v13 = vunpack.i.h.bf16 %v16027_v12 }
 0x366   : > { %v12916_v41 = vpop.permute.xlu0 %8200  ;;  %v12922_v18 = vpop.permute.xlu1 %8195 }
 0x367   : > { %16026 = vst [vmem:[#allocation62_spill] sm:$0xff] %v12916_v41  ;;  %16028 = vst [vmem:[#allocation63_spill] sm:$0xff] %v12922_v18  ;;  %v7937_v41 = vunpack.i.l.bf16 %v16030_v63  ;;  %v4040_v18 = vrot.slane %v2921_v14, 1  ;;  %v16041_v14 = vld [vmem:[#allocation19_spill] sm:$0xff] }
 0x368   : > { %8495 = vrot.lane.b32.xlu0 %v12670_v49, %s9288_s21  ;;  %8480 = vrot.lane.b32.xlu1 %v16032_v29, %s9291_s26  ;;  %v4037_v49 = vrot.slane %v2919_v61, 1  ;;  %v9215_v29 = vld [vmem:[#allocation3 + $0x18] sm:$0xff]  ;;  %v16042_v25 = vpack.i.bf16 %v16041_v14, %v12624_v2  ;;  %v4217_v2 = vsel %vm842_vm4, %v4214_v58, %v4216_v52 }
 0x369   : > { %v4316_v36 = vsel %vm2698_vm14, %v9215_v29, %v7937_v41  ;;  %v8499_v41 = vpack.i.bf16 %v2920_v17, %v2919_v61  ;;  %v4041_v50 = vsel %vm665_vm3, %v4038_v48, %v4040_v18  ;;  %v4351_v17 = vsel %vm2076_vm7, %v4319_v28, %v7918_v11 }
 0x36a   : > { %v12940_v63 = vpop.permute.xlu0 %8205  ;;  %v12946_v55 = vpop.permute.xlu1 %8215  ;;  %v4348_v4 = vsel %vm2076_vm7, %v4316_v36, %v7942_v20  ;;  %v16040_v20 = vld [vmem:[#allocation44_spill] sm:$0xff]  ;;  %v7968_v36 = vunpack.i.h.bf16 %v16046_v19 }
 0x36b   : > { %16033 = vst [vmem:[#allocation36_spill] sm:$0xff] %v12940_v63  ;;  %16036 = vst [vmem:[#allocation40_spill] sm:$0xff] %v12946_v55  ;;  %v7953_v63 = vunpack.i.h.bf16 %v16037_v57  ;;  %v4213_v55 = vrot.slane %v2919_v61, 2  ;;  %v4039_v57 = vsel %vm665_vm3, %v4037_v49, %v4038_v48  ;;  %v7932_v46 = vunpack.i.l.bf16 %v16040_v20 }
 0x36c   : > { %8505 = vrot.lane.b32.xlu0 %v16038_v59, %s9291_s26  ;;  %8490 = vrot.lane.b32.xlu1 %v16039_v32, %s9292_s18  ;;  %v4412_v61 = vsel %vm2175_vm10, %v4380_v35, %v7948_v0  ;;  %v4411_v49 = vsel %vm2175_vm10, %v4379_v6, %v7947_v3  ;;  %v4381_v18 = vsel %vm4378_vm6, %v4348_v4, %v7897_v53  ;;  %v16044_v53 = vld [vmem:[#allocation9_spill] sm:$0xff] }
 0x36d   : > { %v4444_v48 = vsel %vm4443_vm8, %v4411_v49, %v7952_v38  ;;  %v4445_v43 = vsel %vm4443_vm8, %v4412_v61, %v7953_v63  ;;  %v8509_v11 = vpack.i.bf16 %v4041_v50, %v4039_v57  ;;  %v4215_v4 = vsel %vm842_vm4, %v4213_v55, %v4214_v58  ;;  %v16049_v57 = vld [vmem:[#allocation25_spill] sm:$0xff]  ;;  %v16050_v49 = vld [vmem:[#allocation51_spill] sm:$0xff] }
 0x36e   : > { %v12962_v29 = vpop.permute.xlu0 %8210  ;;  %v12971_v51 = vpop.permute.xlu1 %8220  ;;  %v7958_v3 = vunpack.i.h.bf16 %v16044_v53  ;;  %v16045_v38 = vunpack.i.l.bf16 %v16027_v12  ;;  %v7967_v50 = vunpack.i.l.bf16 %v16046_v19  ;;  %v4414_v32 = vsel %vm2175_vm10, %v4382_v5, %v16047_v13  ;;  %v16052_v5 = vld [vmem:[#allocation18_spill] sm:$0xff] }
 0x36f   : > { %v7997_v52 = vunpack.i.l.bf16 %v16049_v57  ;;  %v7957_v28 = vunpack.i.l.bf16 %v16044_v53  ;;  %v7998_v61 = vunpack.i.h.bf16 %v16049_v57  ;;  %v8519_v14 = vpack.i.bf16 %v4217_v2, %v4215_v4  ;;  %v16054_v4 = vld [vmem:[#allocation30_spill] sm:$0xff] }
 0x370   : > { %8515 = vrot.lane.b32.xlu0 %v16042_v25, %s9292_s18  ;;  %8500 = vrot.lane.b32.xlu1 %v8499_v41, %s9288_s21  ;;  %v4413_v63 = vsel %vm2175_vm10, %v4381_v18, %v16045_v38  ;;  %v16048_v41 = vld [vmem:[#allocation15_spill] sm:$0xff]  ;;  %v8002_v18 = vunpack.i.l.bf16 %v16050_v49  ;;  %v16051_v25 = vunpack.i.l.bf16 %v16029_v40  ;;  %v7978_v38 = vunpack.i.h.bf16 %v16052_v5 }
 0x371   : > { %v7973_v55 = vunpack.i.h.bf16 %v16048_v41  ;;  %v7972_v58 = vunpack.i.l.bf16 %v16048_v41  ;;  %v7977_v19 = vunpack.i.l.bf16 %v16052_v5  ;;  %v8003_v13 = vunpack.i.h.bf16 %v16050_v49  ;;  %v16055_v49 = vld [vmem:[#allocation38_spill] sm:$0xff] }
 0x372   : > { %v12987_v6 = vpop.permute.xlu0 %8235  ;;  %v12997_v59 = vpop.permute.xlu1 %8225  ;;  %v4446_v12 = vsel %vm4443_vm8, %v4413_v63, %v16051_v25  ;;  %v16053_v53 = vunpack.i.h.bf16 %v16029_v40  ;;  %v4384_v0 = vsel %vm4378_vm6, %v4351_v17, %v7968_v36  ;;  %v8007_v2 = vunpack.i.l.bf16 %v16054_v4  ;;  %v16056_v40 = vld [vmem:[#allocation34_spill] sm:$0xff] }
 0x373   : > { %v13029_v25 = vsel %vm2310_vm13, %v4446_v12, %v7972_v58  ;;  %v4320_v5 = vsel %vm2698_vm14, %v16055_v49, %v7997_v52  ;;  %v8012_v35 = vunpack.i.l.bf16 %v16056_v40  ;;  %v4322_v58 = vsel %vm2698_vm14, %v12751_v60, %v7977_v19 }
 0x374   : > { %8510 = vrot.lane.b32.xlu1 %v8509_v11, %s9291_s26  ;;  %v4447_v57 = vsel %vm4443_vm8, %v4414_v32, %v16053_v53  ;;  %v4383_v11 = vsel %vm4378_vm6, %v4350_v1, %v7967_v50  ;;  %v16057_v32 = vld [vmem:[#allocation24_spill] sm:$0xff]  ;;  %v16058_v1 = vld [vmem:[#allocation21_spill] sm:$0xff]  ;;  %v4352_v50 = vsel %vm2076_vm7, %v4320_v5, %v8002_v18  ;;  %v8008_v52 = vunpack.i.h.bf16 %v16054_v4 }
 0x375   : > { %v13026_v63 = vsel %vm2310_vm13, %v4447_v57, %v7973_v55  ;;  %v7983_v53 = vunpack.i.h.bf16 %v16057_v32  ;;  %v7982_v17 = vunpack.i.l.bf16 %v16057_v32  ;;  %v4321_v36 = vsel %vm2698_vm14, %v16058_v1, %v7998_v61  ;;  %v16063_v1 = vld [vmem:[#allocation28_spill] sm:$0xff] }
 0x376   : > { %v13015_v41 = vpop.permute.xlu0 %8240  ;;  %v13023_v22 = vpop.permute.xlu1 %8230  ;;  %v4323_v55 = vsel %vm2698_vm14, %v12742_v42, %v7978_v38  ;;  %v4353_v12 = vsel %vm2076_vm7, %v4321_v36, %v8003_v13  ;;  %v4415_v49 = vsel %vm2175_vm10, %v4383_v11, %v8007_v2  ;;  %v8013_v61 = vunpack.i.h.bf16 %v16056_v40 }
 0x377   : > { %v16060_v18 = vunpack.i.l.bf16 %v16023_v45  ;;  %v4448_v60 = vsel %vm4443_vm8, %v4415_v49, %v8012_v35  ;;  %v4385_v19 = vsel %vm4378_vm6, %v4352_v50, %v7957_v28  ;;  %v16062_v13 = vunpack.i.h.bf16 %v16023_v45 }
 0x378   : > { %8520 = vrot.lane.b32.xlu1 %v8519_v14, %s9292_s18  ;;  %v16061_v14 = vld [vmem:[#allocation13_spill] sm:$0xff]  ;;  %v4354_v2 = vsel %vm2076_vm7, %v4322_v58, %v7982_v17  ;;  %v4355_v5 = vsel %vm2076_vm7, %v4323_v55, %v7983_v53  ;;  %v4386_v40 = vsel %vm4378_vm6, %v4353_v12, %v7958_v3  ;;  %v7992_v36 = vunpack.i.l.bf16 %v16063_v1  ;;  %v16067_v55 = vld [vmem:[#allocation26_spill] sm:$0xff] }
 0x379   : > { %v4476_v42 = vsel %vm2310_vm13, %v4444_v48, %v16060_v18  ;;  %v7988_v38 = vunpack.i.h.bf16 %v16061_v14  ;;  %v4477_v4 = vsel %vm2310_vm13, %v4445_v43, %v16062_v13  ;;  %v7987_v11 = vunpack.i.l.bf16 %v16061_v14  ;;  %v16069_v18 = vld [vmem:[#allocation45_spill] sm:$0xff] }
 0x37a   : > { %v13046_v57 = vpop.permute.xlu0 %8250  ;;  %v13050_v32 = vpop.permute.xlu1 %8245  ;;  %v7993_v48 = vunpack.i.h.bf16 %v16063_v1  ;;  %v4416_v35 = vsel %vm2175_vm10, %v4384_v0, %v8008_v52  ;;  %v13073_v45 = vsel %vm4508_vm9, %v4476_v42, %v7932_v46  ;;  %v16065_v3 = vunpack.i.l.bf16 %v16043_v15  ;;  %v16068_v52 = vld [vmem:[#allocation29_spill] sm:$0xff] }
 0x37b   : > { %16059 = vst [vmem:[#allocation46_spill] sm:$0xff] %v13050_v32  ;;  %v4449_v43 = vsel %vm4443_vm8, %v4416_v35, %v8013_v61  ;;  %v4417_v28 = vsel %vm2175_vm10, %v4385_v19, %v7987_v11  ;;  %v16066_v0 = vunpack.i.h.bf16 %v16040_v20  ;;  %v8023_v58 = vunpack.i.h.bf16 %v16067_v55 }
 0x37c   : > { %v13082_v17 = vsel %vm2310_vm13, %v4448_v60, %v16065_v3  ;;  %v8022_v46 = vunpack.i.l.bf16 %v16067_v55  ;;  %v8018_v12 = vunpack.i.h.bf16 %v16068_v52  ;;  %v4418_v61 = vsel %vm2175_vm10, %v4386_v40, %v7988_v38 }
 0x37d   : > { %v13087_v50 = vsel %vm4508_vm9, %v4477_v4, %v16066_v0  ;;  %v8028_v42 = vunpack.i.h.bf16 %v16069_v18  ;;  %v8027_v14 = vunpack.i.l.bf16 %v16069_v18  ;;  %v8058_v60 = vunpack.i.h.bf16 %v12762_v7 }
 0x37e   : > { %v13068_v49 = vpop.permute.xlu0 %8255  ;;  %v13077_v53 = vpop.permute.xlu1 %8265  ;;  %v8057_v19 = vunpack.i.l.bf16 %v12762_v7  ;;  %v8017_v20 = vunpack.i.l.bf16 %v16068_v52  ;;  %v4450_v13 = vsel %vm4443_vm8, %v4417_v28, %v7992_v36  ;;  %v8063_v4 = vunpack.i.h.bf16 %v12773_v9  ;;  %v16073_v36 = vld [vmem:[#allocation52_spill] sm:$0xff] }
 0x37f   : > { %16064 = vst [vmem:[#allocation64_spill] sm:$0xff] %v13077_v53  ;;  %v8062_v11 = vunpack.i.l.bf16 %v12773_v9  ;;  %v4451_v38 = vsel %vm4443_vm8, %v4418_v61, %v7993_v48  ;;  %v8068_v40 = vunpack.i.h.bf16 %v12758_v47  ;;  %v8067_v35 = vunpack.i.l.bf16 %v12758_v47  ;;  %v9216_v47 = vld [vmem:[#allocation3 + $0x80] sm:$0xff] }
 0x380   : > { %v16072_v7 = vunpack.i.h.bf16 %v16043_v15  ;;  %v8033_v28 = vunpack.i.h.bf16 %v16073_v36  ;;  %v8032_v55 = vunpack.i.l.bf16 %v16073_v36  ;;  %v8073_v9 = vunpack.i.h.bf16 %v12769_v16 }
 0x381   : > { %v8072_v52 = vunpack.i.l.bf16 %v12769_v16  ;;  %v4388_v48 = vsel %vm4378_vm6, %v4355_v5, %v8028_v42  ;;  %v4387_v61 = vsel %vm4378_vm6, %v4354_v2, %v8027_v14  ;;  %v4325_v18 = vsel %vm2698_vm14, %v9216_v47, %v8058_v60  ;;  %v16075_v16 = vld [vmem:[#allocation39_spill] sm:$0xff]  ;;  %v16076_v47 = vld [vmem:[#allocation8_spill] sm:$0xff] }
 0x382   : > { %v13101_v1 = vpop.permute.xlu0 %8260  ;;  %v13106_v3 = vpop.permute.xlu1 %8270  ;;  %v13111_v0 = vsel %vm2310_vm13, %v4449_v43, %v16072_v7  ;;  %v16074_v43 = vld [vmem:[#allocation7_spill] sm:$0xff]  ;;  %v4357_v53 = vsel %vm2076_vm7, %v4325_v18, %v8063_v4  ;;  %v8043_v5 = vunpack.i.h.bf16 %v16075_v16  ;;  %v8042_v2 = vunpack.i.l.bf16 %v16075_v16 }
 0x383   : > { %16070 = vst [vmem:[#allocation65_spill] sm:$0xff] %v13101_v1  ;;  %16071 = vst [vmem:[#allocation67_spill] sm:$0xff] %v13106_v3  ;;  %v9217_v3 = vld [vmem:[#allocation3 + $0x78] sm:$0xff]  ;;  %v8038_v7 = vunpack.i.h.bf16 %v16074_v43  ;;  %v8037_v1 = vunpack.i.l.bf16 %v16074_v43  ;;  %v4420_v42 = vsel %vm2175_vm10, %v4388_v48, %v8068_v40  ;;  %v4419_v14 = vsel %vm2175_vm10, %v4387_v61, %v8067_v35 }
 0x384   : > { %v4324_v15 = vsel %vm2698_vm14, %v9217_v3, %v8057_v19  ;;  %v13134_v19 = vsel %vm2310_vm13, %v4451_v38, %v8033_v28  ;;  %v13137_v3 = vsel %vm2310_vm13, %v4450_v13, %v8032_v55  ;;  %v4452_v4 = vsel %vm4443_vm8, %v4419_v14, %v8072_v52  ;;  %v9218_v48 = vld [vmem:[#allocation3 + $0x98] sm:$0xff]  ;;  %v9219_v38 = vld [vmem:[#allocation3 + $0x90] sm:$0xff]  ;;  %v16077_v13 = vld [vmem:[#allocation55_spill] sm:$0xff] }
 0x385   : > { %v4356_v36 = vsel %vm2076_vm7, %v4324_v15, %v8062_v11  ;;  %v4453_v11 = vsel %vm4443_vm8, %v4420_v42, %v8073_v9  ;;  %v8048_v18 = vunpack.i.h.bf16 %v16076_v47  ;;  %v8047_v15 = vunpack.i.l.bf16 %v16076_v47 }
 0x386   : > { %v13125_v32 = vpop.permute.xlu0 %8285  ;;  %v13131_v60 = vpop.permute.xlu1 %8275  ;;  %v4389_v40 = vsel %vm4378_vm6, %v4356_v36, %v8017_v20  ;;  %v4390_v35 = vsel %vm4378_vm6, %v4357_v53, %v8018_v12  ;;  %v4327_v61 = vsel %vm2698_vm14, %v9218_v48, %v8038_v7  ;;  %v4326_v28 = vsel %vm2698_vm14, %v9219_v38, %v8037_v1 }
 0x387   : > { %v8053_v55 = vunpack.i.h.bf16 %v16077_v13  ;;  %v8052_v52 = vunpack.i.l.bf16 %v16077_v13  ;;  %v4358_v9 = vsel %vm2076_vm7, %v4326_v28, %v8042_v2  ;;  %v4359_v16 = vsel %vm2076_vm7, %v4327_v61, %v8043_v5  ;;  %v9220_v61 = vld [vmem:[#allocation3 + $0xa8] sm:$0xff]  ;;  %v9221_v13 = vld [vmem:[#allocation3 + $0xb0] sm:$0xff] }
 0x388   : > { %v13156_v53 = vsel %vm2310_vm13, %v4452_v4, %v8022_v46  ;;  %v13159_v12 = vsel %vm2310_vm13, %v4453_v11, %v8023_v58  ;;  %v4421_v20 = vsel %vm2175_vm10, %v4389_v40, %v8047_v15  ;;  %v4422_v1 = vsel %vm2175_vm10, %v4390_v35, %v8048_v18 }
 0x389   : > { %v8088_v7 = vunpack.i.h.bf16 %v12790_v30  ;;  %v8117_v36 = vunpack.i.l.bf16 %v12830_v21  ;;  %v8083_v2 = vunpack.i.h.bf16 %v12779_v39  ;;  %v8082_v5 = vunpack.i.l.bf16 %v12779_v39 }
 0x38a   : > { %v13149_v43 = vpop.permute.xlu0 %8290  ;;  %v13153_v42 = vpop.permute.xlu1 %8280  ;;  %v8118_v14 = vunpack.i.h.bf16 %v12830_v21  ;;  %v8122_v46 = vunpack.i.l.bf16 %v12839_v34  ;;  %v8078_v4 = vunpack.i.h.bf16 %v12784_v8  ;;  %v8077_v58 = vunpack.i.l.bf16 %v12784_v8 }
 0x38b   : > { %v8087_v11 = vunpack.i.l.bf16 %v12790_v30  ;;  %v8123_v47 = vunpack.i.h.bf16 %v12839_v34  ;;  %v4454_v15 = vsel %vm4443_vm8, %v4421_v20, %v8052_v52  ;;  %v4455_v40 = vsel %vm4443_vm8, %v4422_v1, %v8053_v55 }
 0x38c   : > { %v8093_v39 = vunpack.i.h.bf16 %v12794_v24  ;;  %v8092_v21 = vunpack.i.l.bf16 %v12794_v24  ;;  %v4392_v48 = vsel %vm4378_vm6, %v4359_v16, %v8088_v7  ;;  %v8098_v8 = vunpack.i.h.bf16 %v12800_v33 }
 0x38d   : > { %v8097_v30 = vunpack.i.l.bf16 %v12800_v33  ;;  %v4328_v34 = vsel %vm2698_vm14, %v9220_v61, %v8117_v36  ;;  %v8128_v38 = vunpack.i.h.bf16 %v12826_v62  ;;  %v8127_v28 = vunpack.i.l.bf16 %v12826_v62 }
 0x38e   : > { %v13173_v18 = vpop.permute.xlu0 %8300  ;;  %v13179_v35 = vpop.permute.xlu1 %8295  ;;  %v4329_v55 = vsel %vm2698_vm14, %v9221_v13, %v8118_v14  ;;  %v4360_v24 = vsel %vm2076_vm7, %v4328_v34, %v8122_v46  ;;  %v4391_v52 = vsel %vm4378_vm6, %v4358_v9, %v8087_v11  ;;  %v8133_v16 = vunpack.i.h.bf16 %v12836_v56  ;;  %v9222_v11 = vld [vmem:[#allocation3 + $0xc8] sm:$0xff] }
 0x38f   : > { %16078 = vst [vmem:[#allocation14_spill] sm:$0xff] %v13173_v18  ;;  %16079 = vst [vmem:[#allocation16_spill] sm:$0xff] %v13179_v35  ;;  %v8132_v20 = vunpack.i.l.bf16 %v12836_v56  ;;  %v4361_v33 = vsel %vm2076_vm7, %v4329_v55, %v8123_v47  ;;  %v13196_v7 = vsel %vm2310_vm13, %v4455_v40, %v8093_v39  ;;  %v13199_v62 = vsel %vm2310_vm13, %v4454_v15, %v8092_v21  ;;  %v9223_v40 = vld [vmem:[#allocation3 + $0xc0] sm:$0xff] }
 0x390   : > { %v8103_v36 = vunpack.i.h.bf16 %v12812_v27  ;;  %v8102_v14 = vunpack.i.l.bf16 %v12812_v27  ;;  %v8108_v9 = vunpack.i.h.bf16 %v12803_v10  ;;  %v8107_v56 = vunpack.i.l.bf16 %v12803_v10 }
 0x391   : > { %v4331_v47 = vsel %vm2698_vm14, %v9222_v11, %v8098_v8  ;;  %v4393_v61 = vsel %vm4378_vm6, %v4360_v24, %v8077_v58  ;;  %v4330_v39 = vsel %vm2698_vm14, %v9223_v40, %v8097_v30  ;;  %v4424_v15 = vsel %vm2175_vm10, %v4392_v48, %v8128_v38 }
 0x392   : > { %v13193_v1 = vpop.permute.xlu0 %8325  ;;  %v13203_v46 = vpop.permute.xlu1 %8305  ;;  %v4423_v21 = vsel %vm2175_vm10, %v4391_v52, %v8127_v28  ;;  %v4394_v27 = vsel %vm4378_vm6, %v4361_v33, %v8078_v4  ;;  %v8113_v34 = vunpack.i.h.bf16 %v12817_v31  ;;  %v8112_v13 = vunpack.i.l.bf16 %v12817_v31 }
 0x393   : > { %16080 = vst [vmem:[#allocation60_spill] sm:$0xff] %v13193_v1  ;;  %16081 = vst [vmem:[#allocation61_spill] sm:$0xff] %v13203_v46  ;;  %v4456_v10 = vsel %vm4443_vm8, %v4423_v21, %v8132_v20  ;;  %v4457_v55 = vsel %vm4443_vm8, %v4424_v15, %v8133_v16  ;;  %v4362_v58 = vsel %vm2076_vm7, %v4330_v39, %v8102_v14  ;;  %v8148_v38 = vunpack.i.h.bf16 %v12855_v23  ;;  %v9226_v16 = vld [vmem:[#allocation3 + $0xd8] sm:$0xff]  ;;  %v16090_v14 = vld [vmem:[#allocation68_spill] sm:$0xff] }
 0x394   : > { %v4363_v30 = vsel %vm2076_vm7, %v4331_v47, %v8103_v36  ;;  %v4425_v48 = vsel %vm2175_vm10, %v4393_v61, %v8107_v56  ;;  %v4426_v4 = vsel %vm2175_vm10, %v4394_v27, %v8108_v9  ;;  %v8153_v31 = vunpack.i.h.bf16 %v12857_v54  ;;  %v16084_v61 = vld [vmem:[#allocation57_spill] sm:$0xff]  ;;  %v16087_v27 = vld [vmem:[#allocation42_spill] sm:$0xff] }
 0x395   : > { %v8152_v24 = vunpack.i.l.bf16 %v12857_v54  ;;  %v8147_v52 = vunpack.i.l.bf16 %v12855_v23  ;;  %v8158_v20 = vunpack.i.h.bf16 %v12863_v26  ;;  %v13232_v33 = vsel %vm2310_vm13, %v4456_v10, %v8082_v5  ;;  %v9224_v10 = vld [vmem:[#allocation3 + $0xf8] sm:$0xff] }
 0x396   : > { %v13217_v8 = vpop.permute.xlu0 %8330  ;;  %v13223_v28 = vpop.permute.xlu1 %8310  ;;  %v13235_v36 = vsel %vm2310_vm13, %v4457_v55, %v8083_v2  ;;  %v8138_v9 = vunpack.i.h.bf16 %v12847_v37  ;;  %v8137_v56 = vunpack.i.l.bf16 %v12847_v37  ;;  %v8157_v54 = vunpack.i.l.bf16 %v12863_v26  ;;  %v16086_v26 = vld [vmem:[#allocation35_spill] sm:$0xff] }
 0x397   : > { %16082 = vst [vmem:[#allocation37_spill] sm:$0xff] %v13217_v8  ;;  %16083 = vst [vmem:[#allocation11_spill] sm:$0xff] %v13223_v28  ;;  %v4458_v23 = vsel %vm4443_vm8, %v4425_v48, %v8112_v13  ;;  %v4459_v47 = vsel %vm4443_vm8, %v4426_v4, %v8113_v34  ;;  %v4396_v5 = vsel %vm4378_vm6, %v4363_v30, %v8148_v38  ;;  %v8177_v40 = vunpack.i.l.bf16 %v16084_v61  ;;  %v9225_v48 = vld [vmem:[#allocation3 + $0xf0] sm:$0xff] }
 0x398   : > { %v13248_v39 = vsel %vm2310_vm13, %v4459_v47, %v8153_v31  ;;  %v13251_v15 = vsel %vm2310_vm13, %v4458_v23, %v8152_v24  ;;  %v4395_v37 = vsel %vm4378_vm6, %v4362_v58, %v8147_v52  ;;  %v8182_v21 = vunpack.i.l.bf16 %v16086_v26  ;;  %v16088_v4 = vld [vmem:[#allocation56_spill] sm:$0xff] }
 0x399   : > { %v8168_v13 = vunpack.i.h.bf16 %v16087_v27  ;;  %v8167_v34 = vunpack.i.l.bf16 %v16087_v27  ;;  %v4335_v55 = vsel %vm2698_vm14, %v9224_v10, %v8158_v20  ;;  %v8178_v30 = vunpack.i.h.bf16 %v16084_v61  ;;  %v16089_v23 = vld [vmem:[#allocation12_spill] sm:$0xff] }
 0x39a   : > { %v8336_v11 = vpop.permute.xlu0 %8335  ;;  %v13245_v2 = vpop.permute.xlu1 %8315  ;;  %v4334_v38 = vsel %vm2698_vm14, %v9225_v48, %v8157_v54  ;;  %v8188_v31 = vunpack.i.h.bf16 %v16088_v4  ;;  %v8187_v24 = vunpack.i.l.bf16 %v16088_v4  ;;  %v8183_v58 = vunpack.i.h.bf16 %v16086_v26  ;;  %v16092_v26 = vld [vmem:[#allocation49_spill] sm:$0xff] }
 0x39b   : > { %16085 = vst [vmem:[#allocation59_spill] sm:$0xff] %v13245_v2  ;;  %v8162_v47 = vunpack.i.l.bf16 %v16089_v23  ;;  %v4332_v27 = vsel %vm2698_vm14, %v9226_v16, %v8177_v40  ;;  %v8193_v20 = vunpack.i.h.bf16 %v16090_v14  ;;  %v8192_v61 = vunpack.i.l.bf16 %v16090_v14  ;;  %v9227_v2 = vld [vmem:[#allocation3 + $0xe0] sm:$0xff] }
 0x39c   : > { %v8163_v54 = vunpack.i.h.bf16 %v16089_v23  ;;  %v4364_v48 = vsel %vm2076_vm7, %v4332_v27, %v8182_v21  ;;  %v8338_v4 = vunpack.i.h.bf16 %v8336_v11  ;;  %v8337_v28 = vunpack.i.l.bf16 %v8336_v11 }
 0x39d   : > { %v8173_v46 = vunpack.i.h.bf16 %v16092_v26  ;;  %v4333_v8 = vsel %vm2698_vm14, %v9227_v2, %v8178_v30  ;;  %v8172_v16 = vunpack.i.l.bf16 %v16092_v26  ;;  %v4428_v40 = vsel %vm2175_vm10, %v4396_v5, %v8188_v31 }
 0x39e   : > { %v8346_v52 = vpop.permute.xlu0 %8345  ;;  %v13267_v10 = vpop.permute.xlu1 %8320  ;;  %v4427_v14 = vsel %vm2175_vm10, %v4395_v37, %v8187_v24  ;;  %v4366_v21 = vsel %vm2076_vm7, %v4334_v38, %v8162_v47  ;;  %v4461_v27 = vsel %vm4443_vm8, %v4428_v40, %v8193_v20  ;;  %v4397_v18 = vsel %vm4378_vm6, %v4364_v48, %v8137_v56 }
 0x39f   : > { %16091 = vst [vmem:[#allocation58_spill] sm:$0xff] %v13267_v10  ;;  %v8348_v1 = vunpack.i.h.bf16 %v8346_v52  ;;  %v8347_v35 = vunpack.i.l.bf16 %v8346_v52  ;;  %v4365_v10 = vsel %vm2076_vm7, %v4333_v8, %v8183_v58  ;;  %v4460_v11 = vsel %vm4443_vm8, %v4427_v14, %v8192_v61  ;;  %v16093_v52 = vld [vmem:[#allocation62_spill] sm:$0xff] }
 0x3a0   : > { %v4512_v30 = vsel %vm4508_vm9, %v13026_v63, %v8338_v4  ;;  %v4511_v5 = vsel %vm4508_vm9, %v13029_v25, %v8337_v28  ;;  %v4367_v8 = vsel %vm2076_vm7, %v4335_v55, %v8163_v54  ;;  %v4398_v24 = vsel %vm4378_vm6, %v4365_v10, %v8138_v9 }
 0x3a1   : > { %v4544_v38 = vsel %vm4541_vm11, %v4511_v5, %v8347_v35  ;;  %v4545_v58 = vsel %vm4541_vm11, %v4512_v30, %v8348_v1  ;;  %v8203_v47 = vunpack.i.h.bf16 %v16093_v52  ;;  %v8202_v56 = vunpack.i.l.bf16 %v16093_v52 }
 0x3a2   : > { %v8356_v23 = vpop.permute.xlu0 %8355  ;;  %v8341_v2 = vpop.permute.xlu1 %8340  ;;  %v16094_v55 = vunpack.i.l.bf16 %v12845_v44  ;;  %v16095_v35 = vunpack.i.h.bf16 %v12845_v44  ;;  %v4429_v10 = vsel %vm2175_vm10, %v4397_v18, %v8167_v34  ;;  %v4430_v4 = vsel %vm2175_vm10, %v4398_v24, %v8168_v13  ;;  %v16097_v13 = vld [vmem:[#allocation36_spill] sm:$0xff] }
 0x3a3   : > { %v8343_v31 = vunpack.i.h.bf16 %v8341_v2  ;;  %v8342_v37 = vunpack.i.l.bf16 %v8341_v2  ;;  %v8358_v54 = vunpack.i.h.bf16 %v8356_v23  ;;  %v8357_v48 = vunpack.i.l.bf16 %v8356_v23 }
 0x3a4   : > { %v13298_v9 = vsel %vm2310_vm13, %v4460_v11, %v16094_v55  ;;  %v13303_v1 = vsel %vm2310_vm13, %v4461_v27, %v16095_v35  ;;  %v16096_v11 = vld [vmem:[#allocation63_spill] sm:$0xff]  ;;  %v13311_v27 = vsel %vm4378_vm6, %v4367_v8, %v8203_v47  ;;  %v13314_v18 = vsel %vm4378_vm6, %v4366_v21, %v8202_v56  ;;  %v9229_v55 = vld [vmem:[#allocation3 + $0x120] sm:$0xff] }
 0x3a5   : > { %v4542_v63 = vsel %vm4541_vm11, %v13073_v45, %v8342_v37  ;;  %v4543_v25 = vsel %vm4541_vm11, %v13087_v50, %v8343_v31  ;;  %v4575_v45 = vpack.c.bf16 %v4545_v58, %v4544_v38  ;;  %v8198_v2 = vunpack.i.h.bf16 %v16096_v11 }
 0x3a6   : > { %v8366_v20 = vpop.permute.xlu0 %8365  ;;  %v8351_v28 = vpop.permute.xlu1 %8350  ;;  %v4574_v61 = vpack.c.bf16 %v4543_v25, %v4542_v63  ;;  %v8197_v44 = vunpack.i.l.bf16 %v16096_v11  ;;  %v8208_v23 = vunpack.i.h.bf16 %v16097_v13  ;;  %v8207_v30 = vunpack.i.l.bf16 %v16097_v13 }
 0x3a7   : > { %v8368_v50 = vunpack.i.h.bf16 %v8366_v20  ;;  %v8367_v26 = vunpack.i.l.bf16 %v8366_v20  ;;  %v8353_v40 = vunpack.i.h.bf16 %v8351_v28  ;;  %v8352_v14 = vunpack.i.l.bf16 %v8351_v28  ;;  %v9228_v28 = vld [vmem:[#allocation3 + $0x128] sm:$0xff] }
 0x3a8   : > { %7178 = vmatprep.mubr.msk.bf16.mxu1 %vm4618_vm12, %v4574_v61  ;;  %v13320_v31 = vsel %vm4443_vm8, %v4429_v10, %v8172_v16  ;;  %v13323_v37 = vsel %vm4443_vm8, %v4430_v4, %v8173_v46  ;;  %v4516_v8 = vsel %vm4508_vm9, %v13134_v19, %v8358_v54  ;;  %v4515_v21 = vsel %vm4508_vm9, %v13137_v3, %v8357_v48  ;;  %v16098_v46 = vld [vmem:[#allocation40_spill] sm:$0xff] }
 0x3a9   : > { %7179 = vmatmul.mubr.msk.bf16.vlgmr.msra.gmra.mrb[0].mxu1 %vm4618_vm12, %v4575_v45  ;;  %v4548_v58 = vsel %vm4541_vm11, %v4515_v21, %v8367_v26  ;;  %v4549_v52 = vsel %vm4541_vm11, %v4516_v8, %v8368_v50  ;;  %v4514_v47 = vsel %vm4508_vm9, %v13111_v0, %v8353_v40  ;;  %v4513_v16 = vsel %vm4508_vm9, %v13082_v17, %v8352_v14 }
 0x3aa   : > { %v8376_v34 = vpop.permute.xlu0 %8375  ;;  %v8361_v5 = vpop.permute.xlu1 %8360  ;;  %v8218_v56 = vunpack.i.h.bf16 %v16098_v46  ;;  %v8212_v20 = vunpack.i.l.bf16 %v12962_v29  ;;  %v8217_v25 = vunpack.i.l.bf16 %v16098_v46  ;;  %v4339_v61 = vsel %vm2698_vm14, %v9228_v28, %v8208_v23 }
 0x3ab   : > { %v8363_v24 = vunpack.i.h.bf16 %v8361_v5  ;;  %v8362_v38 = vunpack.i.l.bf16 %v8361_v5  ;;  %v4338_v0 = vsel %vm2698_vm14, %v9229_v55, %v8207_v30  ;;  %v8213_v17 = vunpack.i.h.bf16 %v12962_v29 }
 0x3ac   : > { %v8378_v54 = vunpack.i.h.bf16 %v8376_v34  ;;  %v8377_v48 = vunpack.i.l.bf16 %v8376_v34  ;;  %v4577_v45 = vpack.c.bf16 %v4549_v52, %v4548_v58  ;;  %v8223_v14 = vunpack.i.h.bf16 %v12971_v51 }
 0x3ad   : > { %v4546_v19 = vsel %vm4541_vm11, %v4513_v16, %v8362_v38  ;;  %v4547_v3 = vsel %vm4541_vm11, %v4514_v47, %v8363_v24  ;;  %v8222_v13 = vunpack.i.l.bf16 %v12971_v51  ;;  %v13347_v23 = vsel %vm2076_vm7, %v4338_v0, %v8212_v20 }
 0x3ae   : > { %v8386_v63 = vpop.permute.xlu0 %8385  ;;  %v8371_v35 = vpop.permute.xlu1 %8370  ;;  %v4576_v10 = vpack.c.bf16 %v4547_v3, %v4546_v19  ;;  %v8227_v30 = vunpack.i.l.bf16 %v12997_v59  ;;  %v8238_v34 = vunpack.i.h.bf16 %v12987_v6  ;;  %v8237_v5 = vunpack.i.l.bf16 %v12987_v6  ;;  %v9230_v19 = vld [vmem:[#allocation3 + $0x108] sm:$0xff] }
 0x3af   : > { %v8388_v4 = vunpack.i.h.bf16 %v8386_v63  ;;  %v8387_v50 = vunpack.i.l.bf16 %v8386_v63  ;;  %v8373_v26 = vunpack.i.h.bf16 %v8371_v35  ;;  %v8372_v40 = vunpack.i.l.bf16 %v8371_v35 }
 0x3b0   : > { %7182 = vmatprep.mubr.msk.bf16.mxu1 %vm4618_vm12, %v4576_v10  ;;  %v8228_v8 = vunpack.i.h.bf16 %v12997_v59  ;;  %v8232_v21 = vunpack.i.l.bf16 %v13023_v22  ;;  %v4520_v38 = vsel %vm4508_vm9, %v13196_v7, %v8378_v54  ;;  %v4519_v58 = vsel %vm4508_vm9, %v13199_v62, %v8377_v48 }
 0x3b1   : > { %7183 = vmatmul.mubr.msk.bf16.gmra.mrb[4].mxu1 %vm4618_vm12, %v4577_v45  ;;  %v4552_v16 = vsel %vm4541_vm11, %v4519_v58, %v8387_v50  ;;  %v4553_v20 = vsel %vm4541_vm11, %v4520_v38, %v8388_v4  ;;  %v4518_v6 = vsel %vm4508_vm9, %v13159_v12, %v8373_v26  ;;  %v4517_v59 = vsel %vm4508_vm9, %v13156_v53, %v8372_v40 }
 0x3b2   : > { %v8396_v29 = vpop.permute.xlu0 %8395  ;;  %v8381_v24 = vpop.permute.xlu1 %8380  ;;  %v4336_v3 = vsel %vm2698_vm14, %v9230_v19, %v8227_v30  ;;  %v8242_v7 = vunpack.i.l.bf16 %v13015_v41  ;;  %v8233_v55 = vunpack.i.h.bf16 %v13023_v22  ;;  %v4371_v12 = vsel %vm2076_vm7, %v4339_v61, %v8213_v17  ;;  %v9231_v30 = vld [vmem:[#allocation3 + $0x110] sm:$0xff] }
 0x3b3   : > { %v8383_v52 = vunpack.i.h.bf16 %v8381_v24  ;;  %v8382_v47 = vunpack.i.l.bf16 %v8381_v24  ;;  %v8398_v0 = vunpack.i.h.bf16 %v8396_v29  ;;  %v8397_v35 = vunpack.i.l.bf16 %v8396_v29 }
 0x3b4   : > { %v4431_v53 = vsel %vm2175_vm10, %v13314_v18, %v8237_v5  ;;  %v4368_v48 = vsel %vm2076_vm7, %v4336_v3, %v8232_v21  ;;  %v4579_v45 = vpack.c.bf16 %v4553_v20, %v4552_v16  ;;  %v4432_v22 = vsel %vm2175_vm10, %v13311_v27, %v8238_v34 }
 0x3b5   : > { %v4550_v63 = vsel %vm4541_vm11, %v4517_v59, %v8382_v47  ;;  %v4551_v62 = vsel %vm4541_vm11, %v4518_v6, %v8383_v52  ;;  %v4337_v29 = vsel %vm2698_vm14, %v9231_v30, %v8228_v8  ;;  %v8243_v61 = vunpack.i.h.bf16 %v13015_v41 }
 0x3b6   : > { %v8406_v28 = vpop.permute.xlu0 %8405  ;;  %v8391_v10 = vpop.permute.xlu1 %8390  ;;  %v4578_v54 = vpack.c.bf16 %v4551_v62, %v4550_v63  ;;  %v13380_v17 = vsel %vm4443_vm8, %v4431_v53, %v8242_v7  ;;  %v4369_v5 = vsel %vm2076_vm7, %v4337_v29, %v8233_v55  ;;  %v4401_v21 = vsel %vm4378_vm6, %v4368_v48, %v8197_v44 }
 0x3b7   : > { %v8408_v4 = vunpack.i.h.bf16 %v8406_v28  ;;  %v8407_v50 = vunpack.i.l.bf16 %v8406_v28  ;;  %v8393_v26 = vunpack.i.h.bf16 %v8391_v10  ;;  %v8392_v40 = vunpack.i.l.bf16 %v8391_v10 }
 0x3b8   : > { %7186 = vmatprep.mubr.msk.bf16.mxu1 %vm4618_vm12, %v4578_v54  ;;  %v4524_v27 = vsel %vm4508_vm9, %v13248_v39, %v8398_v0  ;;  %v4523_v34 = vsel %vm4508_vm9, %v13251_v15, %v8397_v35  ;;  %v4402_v39 = vsel %vm4378_vm6, %v4369_v5, %v8198_v2  ;;  %v8253_v15 = vunpack.i.h.bf16 %v13046_v57  ;;  %v16101_v5 = vld [vmem:[#allocation65_spill] sm:$0xff] }
 0x3b9   : > { %7187 = vmatmul.mubr.msk.bf16.gmra.mrb[8].mxu1 %vm4618_vm12, %v4579_v45  ;;  %v4556_v52 = vsel %vm4541_vm11, %v4523_v34, %v8407_v50  ;;  %v4557_v47 = vsel %vm4541_vm11, %v4524_v27, %v8408_v4  ;;  %v4522_v16 = vsel %vm4508_vm9, %v13235_v36, %v8393_v26  ;;  %v4521_v44 = vsel %vm4508_vm9, %v13232_v33, %v8392_v40  ;;  %v16100_v50 = vld [vmem:[#allocation64_spill] sm:$0xff] }
 0x3ba   : > { %v8416_v18 = vpop.permute.xlu0 %8415  ;;  %v8401_v8 = vpop.permute.xlu1 %8400  ;;  %v8252_v19 = vunpack.i.l.bf16 %v13046_v57  ;;  %v4581_v2 = vpack.c.bf16 %v4557_v47, %v4556_v52  ;;  %v4433_v62 = vsel %vm2175_vm10, %v4401_v21, %v8217_v25  ;;  %v8258_v28 = vunpack.i.h.bf16 %v13068_v49 }
 0x3bb   : > { %v8418_v41 = vunpack.i.h.bf16 %v8416_v18  ;;  %v8417_v24 = vunpack.i.l.bf16 %v8416_v18  ;;  %v8403_v38 = vunpack.i.h.bf16 %v8401_v8  ;;  %v8402_v58 = vunpack.i.l.bf16 %v8401_v8 }
 0x3bc   : > { %v4465_v0 = vsel %vm4443_vm8, %v4432_v22, %v8243_v61  ;;  %v8257_v10 = vunpack.i.l.bf16 %v13068_v49  ;;  %v13424_v48 = vsel %vm4378_vm6, %v4371_v12, %v8253_v15  ;;  %v8268_v26 = vunpack.i.h.bf16 %v16100_v50  ;;  %v9232_v22 = vld [vmem:[#allocation3 + $0x158] sm:$0xff]  ;;  %v9233_v61 = vld [vmem:[#allocation3 + $0x150] sm:$0xff] }
 0x3bd   : > { %v4554_v20 = vsel %vm4541_vm11, %v4521_v44, %v8402_v58  ;;  %v4555_v6 = vsel %vm4541_vm11, %v4522_v16, %v8403_v38  ;;  %v4526_v33 = vsel %vm4508_vm9, %v13303_v1, %v8418_v41  ;;  %v4525_v11 = vsel %vm4508_vm9, %v13298_v9, %v8417_v24  ;;  %v16099_v9 = vld [vmem:[#allocation46_spill] sm:$0xff] }
 0x3be   : > { %v8426_v59 = vpop.permute.xlu0 %8425  ;;  %v8411_v63 = vpop.permute.xlu1 %8410  ;;  %v4580_v36 = vpack.c.bf16 %v4555_v6, %v4554_v20  ;;  %v4434_v1 = vsel %vm2175_vm10, %v4402_v39, %v8218_v56  ;;  %v8248_v35 = vunpack.i.h.bf16 %v16099_v9  ;;  %v8247_v53 = vunpack.i.l.bf16 %v16099_v9 }
 0x3bf   : > { %v8428_v3 = vunpack.i.h.bf16 %v8426_v59  ;;  %v8427_v7 = vunpack.i.l.bf16 %v8426_v59  ;;  %v8413_v45 = vunpack.i.h.bf16 %v8411_v63  ;;  %v8412_v4 = vunpack.i.l.bf16 %v8411_v63 }
 0x3c0   : > { %7190 = vmatprep.mubr.msk.bf16.mxu1 %vm4618_vm12, %v4580_v36  ;;  %v13428_v56 = vsel %vm4378_vm6, %v13347_v23, %v8252_v19  ;;  %v13435_v49 = vsel %vm4443_vm8, %v4433_v62, %v8222_v13  ;;  %v13440_v12 = vsel %vm4443_vm8, %v4434_v1, %v8223_v14  ;;  %v8267_v40 = vunpack.i.l.bf16 %v16100_v50  ;;  %v16102_v36 = vld [vmem:[#allocation67_spill] sm:$0xff] }
 0x3c1   : > { %v4558_v55 = vsel %vm4541_vm11, %v4525_v11, %v8427_v7  ;;  %v4559_v57 = vsel %vm4541_vm11, %v4526_v33, %v8428_v3  ;;  %7191 = vmatmul.mubr.msk.bf16.gmra.mrb[12].mxu1 %vm4618_vm12, %v4581_v2  ;;  %v4343_v23 = vsel %vm2698_vm14, %v9232_v22, %v8258_v28  ;;  %v4342_v18 = vsel %vm2698_vm14, %v9233_v61, %v8257_v10 }
 0x3c2   : > { %v8436_v25 = vpop.permute.xlu0 %8435  ;;  %v4582_v54 = vpack.c.bf16 %v4559_v57, %v4558_v55  ;;  %v8421_v46 = vpop.permute.xlu1 %8420  ;;  %v8263_v21 = vunpack.i.h.bf16 %v16101_v5  ;;  %v8262_v13 = vunpack.i.l.bf16 %v16101_v5  ;;  %v8278_v51 = vunpack.i.h.bf16 %v13131_v60  ;;  %v9234_v57 = vld [vmem:[#allocation3 + $0x140] sm:$0xff] }
 0x3c3   : > { %v8423_v30 = vunpack.i.h.bf16 %v8421_v46  ;;  %v8422_v29 = vunpack.i.l.bf16 %v8421_v46  ;;  %v8438_v27 = vunpack.i.h.bf16 %v8436_v25  ;;  %v4495_v14 = vsel %vm2310_vm13, %v13323_v37, %v8413_v45 }
 0x3c4   : > { %7194 = vmatprep.mubr.msk.bf16.mxu1 %vm4618_vm12, %v4582_v54  ;;  %v4494_v8 = vsel %vm2310_vm13, %v13320_v31, %v8412_v4  ;;  %v8437_v41 = vunpack.i.l.bf16 %v8436_v25  ;;  %v8277_v16 = vunpack.i.l.bf16 %v13131_v60  ;;  %v8283_v44 = vunpack.i.h.bf16 %v13153_v42 }
 0x3c5   : > { %v4527_v39 = vsel %vm4508_vm9, %v4494_v8, %v8422_v29  ;;  %v4528_v15 = vsel %vm4508_vm9, %v4495_v14, %v8423_v30  ;;  %v8282_v20 = vunpack.i.l.bf16 %v13153_v42  ;;  %v4497_v37 = vsel %vm2310_vm13, %v4465_v0, %v8438_v27  ;;  %v9235_v0 = vld [vmem:[#allocation3 + $0x138] sm:$0xff] }
 0x3c6   : > { %v8446_v34 = vpop.permute.xlu0 %8445  ;;  %v8431_v24 = vpop.permute.xlu1 %8430  ;;  %v4496_v19 = vsel %vm2310_vm13, %v13380_v17, %v8437_v41  ;;  %v8273_v33 = vunpack.i.h.bf16 %v16102_v36  ;;  %v8287_v11 = vunpack.i.l.bf16 %v13125_v32  ;;  %v8288_v62 = vunpack.i.h.bf16 %v13125_v32 }
 0x3c7   : > { %v8448_v38 = vunpack.i.h.bf16 %v8446_v34  ;;  %v8447_v58 = vunpack.i.l.bf16 %v8446_v34  ;;  %v8433_v52 = vunpack.i.h.bf16 %v8431_v24  ;;  %v8432_v47 = vunpack.i.l.bf16 %v8431_v24 }
 0x3c8   : > { %v8292_v28 = vunpack.i.l.bf16 %v13149_v43  ;;  %v4341_v1 = vsel %vm2698_vm14, %v9234_v57, %v8278_v51  ;;  %v4340_v10 = vsel %vm2698_vm14, %v9235_v0, %v8277_v16  ;;  %v8293_v25 = vunpack.i.h.bf16 %v13149_v43 }
 0x3c9   : > { %v4560_v31 = vsel %vm4541_vm11, %v4527_v39, %v8432_v47  ;;  %v4561_v6 = vsel %vm4541_vm11, %v4528_v15, %v8433_v52  ;;  %v4529_v42 = vsel %vm4508_vm9, %v4496_v19, %v8447_v58  ;;  %v4530_v2 = vsel %vm4508_vm9, %v4497_v37, %v8448_v38 }
 0x3ca   : > { %v8456_v59 = vpop.permute.xlu0 %8455  ;;  %v8441_v7 = vpop.permute.xlu1 %8440  ;;  %v4583_v63 = vpack.c.bf16 %v4561_v6, %v4560_v31  ;;  %v4372_v32 = vsel %vm2076_vm7, %v4340_v10, %v8282_v20  ;;  %v4373_v4 = vsel %vm2076_vm7, %v4341_v1, %v8283_v44  ;;  %v8272_v29 = vunpack.i.l.bf16 %v16102_v36  ;;  %v16104_v44 = vld [vmem:[#allocation16_spill] sm:$0xff]  ;;  %v16106_v1 = vld [vmem:[#allocation37_spill] sm:$0xff] }
 0x3cb   : > { %v8458_v3 = vunpack.i.h.bf16 %v8456_v59  ;;  %v8457_v60 = vunpack.i.l.bf16 %v8456_v59  ;;  %v8443_v46 = vunpack.i.h.bf16 %v8441_v7  ;;  %v8442_v22 = vunpack.i.l.bf16 %v8441_v7  ;;  %v16105_v7 = vld [vmem:[#allocation60_spill] sm:$0xff] }
 0x3cc   : > { %7195 = vmatmul.mubr.msk.bf16.gmra.mrb[16].mxu1 %vm4618_vm12, %v4583_v63  ;;  %v4374_v61 = vsel %vm2076_vm7, %v4342_v18, %v8262_v13  ;;  %v4375_v5 = vsel %vm2076_vm7, %v4343_v23, %v8263_v21  ;;  %v4435_v27 = vsel %vm2175_vm10, %v13428_v56, %v8287_v11  ;;  %v4436_v43 = vsel %vm2175_vm10, %v13424_v48, %v8288_v62  ;;  %v16103_v13 = vld [vmem:[#allocation14_spill] sm:$0xff] }
 0x3cd   : > { %v4562_v55 = vsel %vm4541_vm11, %v4529_v42, %v8457_v60  ;;  %v4563_v17 = vsel %vm4541_vm11, %v4530_v2, %v8458_v3  ;;  %v4468_v34 = vsel %vm4443_vm8, %v4435_v27, %v8292_v28  ;;  %v4469_v8 = vsel %vm4443_vm8, %v4436_v43, %v8293_v25 }
 0x3ce   : > { %v8466_v54 = vpop.permute.xlu0 %8465  ;;  %v4584_v45 = vpack.c.bf16 %v4563_v17, %v4562_v55  ;;  %v8451_v30 = vpop.permute.xlu1 %8450  ;;  %v4405_v18 = vsel %vm4378_vm6, %v4372_v32, %v8247_v53  ;;  %v4406_v23 = vsel %vm4378_vm6, %v4373_v4, %v8248_v35  ;;  %v8303_v41 = vunpack.i.h.bf16 %v16103_v13  ;;  %v16107_v32 = vld [vmem:[#allocation59_spill] sm:$0xff] }
 0x3cf   : > { %v8453_v51 = vunpack.i.h.bf16 %v8451_v30  ;;  %v8452_v14 = vunpack.i.l.bf16 %v8451_v30  ;;  %v8468_v56 = vunpack.i.h.bf16 %v8466_v54  ;;  %v4499_v48 = vsel %vm2310_vm13, %v13440_v12, %v8443_v46 }
 0x3d0   : > { %7198 = vmatprep.mubr.msk.bf16.mxu1 %vm4618_vm12, %v4584_v45  ;;  %v4498_v24 = vsel %vm2310_vm13, %v13435_v49, %v8442_v22  ;;  %v8467_v38 = vunpack.i.l.bf16 %v8466_v54  ;;  %v8298_v9 = vunpack.i.h.bf16 %v16104_v44  ;;  %v8302_v35 = vunpack.i.l.bf16 %v16103_v13 }
 0x3d1   : > { %v4531_v39 = vsel %vm4508_vm9, %v4498_v24, %v8452_v14  ;;  %v4532_v15 = vsel %vm4508_vm9, %v4499_v48, %v8453_v51  ;;  %v8297_v20 = vunpack.i.l.bf16 %v16104_v44  ;;  %v4501_v12 = vsel %vm2310_vm13, %v4469_v8, %v8468_v56  ;;  %v9236_v56 = vld [vmem:[#allocation3 + $0x168] sm:$0xff] }
 0x3d2   : > { %v8476_v21 = vpop.permute.xlu0 %8475  ;;  %v8461_v58 = vpop.permute.xlu1 %8460  ;;  %v4500_v6 = vsel %vm2310_vm13, %v4468_v34, %v8467_v38  ;;  %v8328_v63 = vunpack.i.h.bf16 %v16105_v7  ;;  %v8327_v11 = vunpack.i.l.bf16 %v16105_v7  ;;  %v4437_v55 = vsel %vm2175_vm10, %v4405_v18, %v8267_v40 }
 0x3d3   : > { %v8478_v52 = vunpack.i.h.bf16 %v8476_v21  ;;  %v8477_v47 = vunpack.i.l.bf16 %v8476_v21  ;;  %v8463_v16 = vunpack.i.h.bf16 %v8461_v58  ;;  %v8462_v53 = vunpack.i.l.bf16 %v8461_v58 }
 0x3d4   : > { %v4438_v17 = vsel %vm2175_vm10, %v4406_v23, %v8268_v26  ;;  %v4408_v57 = vsel %vm4378_vm6, %v4375_v5, %v8303_v41  ;;  %v8333_v0 = vunpack.i.h.bf16 %v16106_v1  ;;  %v8332_v10 = vunpack.i.l.bf16 %v16106_v1 }
 0x3d5   : > { %v4564_v49 = vsel %vm4541_vm11, %v4531_v39, %v8462_v53  ;;  %v4565_v37 = vsel %vm4541_vm11, %v4532_v15, %v8463_v16  ;;  %v4533_v42 = vsel %vm4508_vm9, %v4500_v6, %v8477_v47  ;;  %v4534_v2 = vsel %vm4508_vm9, %v4501_v12, %v8478_v52  ;;  %v9237_v52 = vld [vmem:[#allocation3 + $0x170] sm:$0xff] }
 0x3d6   : > { %v8486_v31 = vpop.permute.xlu0 %8485  ;;  %v8471_v3 = vpop.permute.xlu1 %8470  ;;  %v4585_v60 = vpack.c.bf16 %v4565_v37, %v4564_v49  ;;  %v4407_v45 = vsel %vm4378_vm6, %v4374_v61, %v8302_v35  ;;  %v8317_v4 = vunpack.i.l.bf16 %v16107_v32  ;;  %v4440_v50 = vsel %vm2175_vm10, %v4408_v57, %v8328_v63  ;;  %v16108_v61 = vld [vmem:[#allocation58_spill] sm:$0xff] }
 0x3d7   : > { %v8488_v59 = vunpack.i.h.bf16 %v8486_v31  ;;  %v8487_v19 = vunpack.i.l.bf16 %v8486_v31  ;;  %v8473_v46 = vunpack.i.h.bf16 %v8471_v3  ;;  %v8472_v40 = vunpack.i.l.bf16 %v8471_v3 }
 0x3d8   : > { %7199 = vmatmul.mubr.msk.bf16.gmra.mrb[20].mxu1 %vm4618_vm12, %v4585_v60  ;;  %v4439_v26 = vsel %vm2175_vm10, %v4407_v45, %v8327_v11  ;;  %v4470_v30 = vsel %vm4443_vm8, %v4437_v55, %v8272_v29  ;;  %v4471_v5 = vsel %vm4443_vm8, %v4438_v17, %v8273_v33  ;;  %v8318_v27 = vunpack.i.h.bf16 %v16107_v32 }
 0x3d9   : > { %v4566_v62 = vsel %vm4541_vm11, %v4533_v42, %v8487_v19  ;;  %v4567_v28 = vsel %vm4541_vm11, %v4534_v2, %v8488_v59  ;;  %v8322_v43 = vunpack.i.l.bf16 %v16108_v61  ;;  %v4472_v14 = vsel %vm4443_vm8, %v4439_v26, %v8332_v10 }
 0x3da   : > { %v8496_v25 = vpop.permute.xlu0 %8495  ;;  %v4586_v54 = vpack.c.bf16 %v4567_v28, %v4566_v62  ;;  %v8481_v22 = vpop.permute.xlu1 %8480  ;;  %v4473_v8 = vsel %vm4443_vm8, %v4440_v50, %v8333_v0  ;;  %v8323_v18 = vunpack.i.h.bf16 %v16108_v61  ;;  %v4344_v36 = vsel %vm2698_vm14, %v9236_v56, %v8317_v4  ;;  %v16109_v62 = vld [vmem:[#allocation61_spill] sm:$0xff] }
 0x3db   : > { %v8483_v34 = vunpack.i.h.bf16 %v8481_v22  ;;  %v8482_v51 = vunpack.i.l.bf16 %v8481_v22  ;;  %v8497_v23 = vunpack.i.l.bf16 %v8496_v25  ;;  %v4503_v33 = vsel %vm2310_vm13, %v4471_v5, %v8473_v46 }
 0x3dc   : > { %7202 = vmatprep.mubr.msk.bf16.mxu1 %vm4618_vm12, %v4586_v54  ;;  %v4502_v21 = vsel %vm2310_vm13, %v4470_v30, %v8472_v40  ;;  %v8498_v13 = vunpack.i.h.bf16 %v8496_v25  ;;  %v4345_v47 = vsel %vm2698_vm14, %v9237_v52, %v8318_v27  ;;  %v4376_v16 = vsel %vm2076_vm7, %v4344_v36, %v8322_v43  ;;  %v13589_v52 = vld [vmem:[%s15306_s6] ss:$0 sm:$0xff] }
 0x3dd   : > { %v4535_v53 = vsel %vm4508_vm9, %v4502_v21, %v8482_v51  ;;  %v4536_v35 = vsel %vm4508_vm9, %v4503_v33, %v8483_v34  ;;  %v4377_v39 = vsel %vm2076_vm7, %v4345_v47, %v8323_v18  ;;  %v4504_v15 = vsel %vm2310_vm13, %v4472_v14, %v8497_v23  ;;  %v5038_v34 = vld [vmem:[#allocation3] sm:$0xff]  ;;  %v5039_v51 = vld [vmem:[#allocation3 + $0x8] sm:$0xff]  ;;  %v5040_v14 = vld [vmem:[#allocation3 + $0x10] sm:$0x3] }
 0x3de   : > { %v8506_v29 = vpop.permute.xlu0 %8505  ;;  %v8491_v41 = vpop.permute.xlu1 %8490  ;;  %v4505_v31 = vsel %vm2310_vm13, %v4473_v8, %v8498_v13  ;;  %v4409_v63 = vsel %vm4378_vm6, %v4376_v16, %v8297_v20  ;;  %v4410_v11 = vsel %vm4378_vm6, %v4377_v39, %v8298_v9  ;;  %v8308_v28 = vunpack.i.h.bf16 %v16109_v62  ;;  %v16110_v9 = vld [vmem:[#allocation11_spill] sm:$0xff] }
 0x3df   : > { %v8508_v48 = vunpack.i.h.bf16 %v8506_v29  ;;  %v8507_v24 = vunpack.i.l.bf16 %v8506_v29  ;;  %v8493_v38 = vunpack.i.h.bf16 %v8491_v41  ;;  %v8492_v58 = vunpack.i.l.bf16 %v8491_v41 }
 0x3e0   : > { %v8307_v55 = vunpack.i.l.bf16 %v16109_v62  ;;  %v4442_v44 = vsel %vm2175_vm10, %v4410_v11, %v8308_v28  ;;  %v8313_v10 = vunpack.i.h.bf16 %v16110_v9  ;;  %v8312_v25 = vunpack.i.l.bf16 %v16110_v9 }
 0x3e1   : > { %v4568_v12 = vsel %vm4541_vm11, %v4535_v53, %v8492_v58  ;;  %v4569_v49 = vsel %vm4541_vm11, %v4536_v35, %v8493_v38  ;;  %v4537_v60 = vsel %vm4508_vm9, %v4504_v15, %v8507_v24  ;;  %v4538_v7 = vsel %vm4508_vm9, %v4505_v31, %v8508_v48  ;;  %v13584_v38 = vld [vmem:[%s15305_s5] ss:$0 sm:$0xff] }
 0x3e2   : > { %v8516_v37 = vpop.permute.xlu0 %8515  ;;  %v8501_v19 = vpop.permute.xlu1 %8500  ;;  %v4587_v3 = vpack.c.bf16 %v4569_v49, %v4568_v12  ;;  %v4441_v20 = vsel %vm2175_vm10, %v4409_v63, %v8307_v55  ;;  %v4475_v4 = vsel %vm4443_vm8, %v4442_v44, %v8313_v10  ;;  %v5230_v8 = vrot.slane %v5038_v34, 1 }
 0x3e3   : > { %v8518_v6 = vunpack.i.h.bf16 %v8516_v37  ;;  %v8517_v59 = vunpack.i.l.bf16 %v8516_v37  ;;  %v8503_v1 = vunpack.i.h.bf16 %v8501_v19  ;;  %v8502_v0 = vunpack.i.l.bf16 %v8501_v19 }
 0x3e4   : > { %7203 = vmatmul.mubr.msk.bf16.gmra.mrb[24].mxu1 %vm4618_vm12, %v4587_v3  ;;  %v4474_v32 = vsel %vm4443_vm8, %v4441_v20, %v8312_v25  ;;  %v5231_v18 = vrot.slane %v5039_v51, 1  ;;  %v5233_v23 = vrot.slane %v5040_v14, 1  ;;  %v5406_v33 = vrot.slane %v5038_v34, 2 }
 0x3e5   : > { %v4570_v42 = vsel %vm4541_vm11, %v4537_v60, %v8517_v59  ;;  %v4571_v2 = vsel %vm4541_vm11, %v4538_v7, %v8518_v6  ;;  %v4506_v40 = vsel %vm2310_vm13, %v4474_v32, %v8502_v0  ;;  %v4507_v22 = vsel %vm2310_vm13, %v4475_v4, %v8503_v1 }
 0x3e6   : > { %v4588_v17 = vpack.c.bf16 %v4571_v2, %v4570_v42  ;;  %v8511_v57 = vpop.permute.xlu1 %8510  ;;  %v5232_v29 = vsel %vm665_vm3, %v5230_v8, %v5231_v18  ;;  %v5234_v56 = vsel %vm665_vm3, %v5231_v18, %v5233_v23  ;;  %v5407_v21 = vrot.slane %v5039_v51, 2 }
 0x3e7   : > { %v8513_v54 = vunpack.i.h.bf16 %v8511_v57  ;;  %v8512_v45 = vunpack.i.l.bf16 %v8511_v57  ;;  %v8524_v36 = vpack.i.bf16 %v5234_v56, %v5232_v29  ;;  %v5409_v13 = vrot.slane %v5040_v14, 2 }
 0x3e8   : > { %7206 = vmatprep.mubr.msk.bf16.mxu1 %vm4618_vm12, %v4588_v17  ;;  %v5408_v41 = vsel %vm842_vm4, %v5406_v33, %v5407_v21 }
 0x3e9   : > { %v4539_v30 = vsel %vm4508_vm9, %v4506_v40, %v8512_v45  ;;  %v4540_v5 = vsel %vm4508_vm9, %v4507_v22, %v8513_v54  ;;  %8525 = vrot.lane.b32.xlu0 %v8524_v36, %s9287_s16  ;;  %v5410_v48 = vsel %vm842_vm4, %v5407_v21, %v5409_v13 }
 0x3ea   : > { %v8521_v46 = vpop.permute.xlu1 %8520  ;;  %v8529_v24 = vpack.i.bf16 %v5410_v48, %v5408_v41 }
 0x3eb   : > { %v8523_v50 = vunpack.i.h.bf16 %v8521_v46  ;;  %v8522_v26 = vunpack.i.l.bf16 %v8521_v46 }
 0x3ed   : > { %v4572_v27 = vsel %vm4541_vm11, %v4539_v30, %v8522_v26  ;;  %v4573_v61 = vsel %vm4541_vm11, %v4540_v5, %v8523_v50  ;;  %8530 = vrot.lane.b32.xlu0 %v8529_v24, %s9281_s22 }
 0x3ee   : > { %v4589_v43 = vpack.c.bf16 %v4573_v61, %v4572_v27 }
 0x3f0   : > { %7207 = vmatmul.mubr.msk.bf16.gmra.mrb[28].mxu1 %vm4618_vm12, %v4589_v43 }
 0x47c   : > { %v7180_v58 = vpop.f32.mrb[0].mxu1 }
 0x47d   : > { %v4841_v47 = vmul.f32 %v7180_v58, %v13584_v38  ;;  %v4705_v16 = vpop.f32.mrb[1].mxu1 }
 0x47e   : > { %v4839_v53 = vmul.f32 %v13584_v38, %v4705_v16  ;;  %v7181_v35 = vpop.f32.mrb[2].mxu1 }
 0x47f   : > { %v4880_v39 = vadd.f32 %v13589_v52, %v4841_v47  ;;  %v4842_v15 = vmul.f32 %v7181_v35, %v13584_v38  ;;  %v4708_v12 = vpop.f32.mrb[3].mxu1 }
 0x480   : > { %v4878_v49 = vadd.f32 %v13589_v52, %v4839_v53  ;;  %v4840_v37 = vmul.f32 %v13584_v38, %v4708_v12 }
 0x481   : > { %vm4912_vm15 = vcmp.ge.f32.partialorder %v4880_v39, 0.0  ;;  %v4944_v31 = vmul.f32 0.1, %v4880_v39  ;;  %v4881_v6 = vadd.f32 %v13589_v52, %v4842_v15 }
 0x482   : > { %vm4910_vm0 = vcmp.ge.f32.partialorder %v4878_v49, 0.0  ;;  %v4942_v59 = vmul.f32 0.1, %v4878_v49  ;;  %v4879_v19 = vadd.f32 %v13589_v52, %v4840_v37 }
 0x483   : > { %v4976_v3 = vsel %vm4912_vm15, %v4880_v39, %v4944_v31  ;;  %vm4913_vm1 = vcmp.ge.f32.partialorder %v4881_v6, 0.0  ;;  %v4945_v60 = vmul.f32 0.1, %v4881_v6 }
 0x484   : > { %5008 = vst.msk [vmem:[#allocation3 + $0x31] sm:$0xff] %vm2698_vm14, %v4976_v3  ;;  %v4974_v7 = vsel %vm4910_vm0, %v4878_v49, %v4942_v59  ;;  %vm4911_vm2 = vcmp.ge.f32.partialorder %v4879_v19, 0.0  ;;  %v4943_v63 = vmul.f32 0.1, %v4879_v19  ;;  %v7184_v11 = vpop.f32.mrb[4].mxu1 }
 0x485   : > { %5006 = vst.msk [vmem:[#allocation3 + $0x19] sm:$0xff] %vm2698_vm14, %v4974_v7  ;;  %v4977_v42 = vsel %vm4913_vm1, %v4881_v6, %v4945_v60  ;;  %v4845_v2 = vmul.f32 %v7184_v11, %v13584_v38  ;;  %v4721_v62 = vpop.f32.mrb[5].mxu1 }
 0x486   : > { %5009 = vst.msk [vmem:[#allocation3 + $0x39] sm:$0xff] %vm2698_vm14, %v4977_v42  ;;  %v4975_v28 = vsel %vm4911_vm2, %v4879_v19, %v4943_v63  ;;  %v4843_v55 = vmul.f32 %v13584_v38, %v4721_v62  ;;  %v7185_v17 = vpop.f32.mrb[6].mxu1 }
 0x487   : > { %5007 = vst.msk [vmem:[#allocation3 + $0x21] sm:$0xff] %vm2698_vm14, %v4975_v28  ;;  %v4884_v57 = vadd.f32 %v13589_v52, %v4845_v2  ;;  %v4846_v1 = vmul.f32 %v7185_v17, %v13584_v38  ;;  %v4724_v0 = vpop.f32.mrb[7].mxu1 }
 0x488   : > { %v4882_v20 = vadd.f32 %v13589_v52, %v4843_v55  ;;  %v4844_v44 = vmul.f32 %v13584_v38, %v4724_v0 }
 0x489   : > { %vm4916_vm5 = vcmp.ge.f32.partialorder %v4884_v57, 0.0  ;;  %v4948_v9 = vmul.f32 0.1, %v4884_v57  ;;  %v4885_v10 = vadd.f32 %v13589_v52, %v4846_v1 }
 0x48a   : > { %vm4914_vm15 = vcmp.ge.f32.partialorder %v4882_v20, 0.0  ;;  %v4946_v25 = vmul.f32 0.1, %v4882_v20  ;;  %v4883_v54 = vadd.f32 %v13589_v52, %v4844_v44 }
 0x48b   : > { %v4980_v45 = vsel %vm4916_vm5, %v4884_v57, %v4948_v9  ;;  %vm4917_vm0 = vcmp.ge.f32.partialorder %v4885_v10, 0.0  ;;  %v4949_v32 = vmul.f32 0.1, %v4885_v10  ;;  %v5089_v22 = vld [vmem:[#allocation3 + $0x30] sm:$0xff] }
 0x48c   : > { %5012 = vst.msk [vmem:[#allocation3 + $0x61] sm:$0xff] %vm2698_vm14, %v4980_v45  ;;  %v4978_v4 = vsel %vm4914_vm15, %v4882_v20, %v4946_v25  ;;  %vm4915_vm1 = vcmp.ge.f32.partialorder %v4883_v54, 0.0  ;;  %v4947_v46 = vmul.f32 0.1, %v4883_v54  ;;  %v7188_v40 = vpop.f32.mrb[8].mxu1  ;;  %v5731_v29 = vrot.slane %v5089_v22, 1 }
 0x48d   : > { %5010 = vst.msk [vmem:[#allocation3 + $0x49] sm:$0xff] %vm2698_vm14, %v4978_v4  ;;  %v4981_v50 = vsel %vm4917_vm0, %v4885_v10, %v4949_v32  ;;  %v4849_v26 = vmul.f32 %v7188_v40, %v13584_v38  ;;  %v4737_v30 = vpop.f32.mrb[9].mxu1  ;;  %v5090_v5 = vld [vmem:[#allocation3 + $0x38] sm:$0xff]  ;;  %v5907_v21 = vrot.slane %v5089_v22, 2  ;;  %v5046_v41 = vld [vmem:[#allocation3 + $0x40] sm:$0x3] }
 0x48e   : > { %5013 = vst.msk [vmem:[#allocation3 + $0x69] sm:$0xff] %vm2698_vm14, %v4981_v50  ;;  %v4979_v27 = vsel %vm4915_vm1, %v4883_v54, %v4947_v46  ;;  %v4847_v61 = vmul.f32 %v13584_v38, %v4737_v30  ;;  %v7189_v43 = vpop.f32.mrb[10].mxu1  ;;  %v8534_v34 = vpack.i.bf16 %v5090_v5, %v5089_v22  ;;  %v13616_v51 = vrot.slane %v5090_v5, 1  ;;  %v13618_v14 = vld [vmem:[#allocation3 + $0x20] sm:$0xff]  ;;  %v13623_v56 = vld [vmem:[#allocation3 + $0x18] sm:$0xff] }
 0x48f   : > { %5011 = vst.msk [vmem:[#allocation3 + $0x51] sm:$0xff] %vm2698_vm14, %v4979_v27  ;;  %v4888_v8 = vadd.f32 %v13589_v52, %v4849_v26  ;;  %v4850_v18 = vmul.f32 %v7189_v43, %v13584_v38  ;;  %v4740_v23 = vpop.f32.mrb[11].mxu1  ;;  %v8544_v13 = vpack.i.bf16 %v13618_v14, %v13623_v56  ;;  %v13631_v58 = vrot.slane %v5090_v5, 2  ;;  %v5136_v35 = vld [vmem:[#allocation3 + $0x40] sm:$0x3] }
 0x490   : > { %v4886_v36 = vadd.f32 %v13589_v52, %v4847_v61  ;;  %v4848_v33 = vmul.f32 %v13584_v38, %v4740_v23  ;;  %8535 = vrot.lane.b32.xlu1 %v8534_v34, %s9289_s23  ;;  %v13637_v53 = vsel %vm665_vm3, %v5731_v29, %v13616_v51  ;;  %v5243_v12 = vrot.slane %v5046_v41, 1  ;;  %v5091_v32 = vld [vmem:[#allocation3 + $0x40] sm:$0x3] }
 0x491   : > { %vm4920_vm2 = vcmp.ge.f32.partialorder %v4888_v8, 0.0  ;;  %v4952_v48 = vmul.f32 0.1, %v4888_v8  ;;  %v4889_v24 = vadd.f32 %v13589_v52, %v4850_v18  ;;  %8545 = vrot.lane.b32.xlu0 %v8544_v13, %s9289_s23  ;;  %v6225_v60 = vrot.slane %v5136_v35, 1 }
 0x492   : > { %vm4918_vm5 = vcmp.ge.f32.partialorder %v4886_v36, 0.0  ;;  %v4950_v47 = vmul.f32 0.1, %v4886_v36  ;;  %v4887_v16 = vadd.f32 %v13589_v52, %v4848_v33  ;;  %v5244_v19 = vsel %vm665_vm3, %v13616_v51, %v5243_v12 }
 0x493   : > { %v4984_v39 = vsel %vm4920_vm2, %v4888_v8, %v4952_v48  ;;  %vm4921_vm15 = vcmp.ge.f32.partialorder %v4889_v24, 0.0  ;;  %v4953_v15 = vmul.f32 0.1, %v4889_v24  ;;  %v8549_v63 = vpack.i.bf16 %v5244_v19, %v13637_v53  ;;  %v13671_v30 = vld [vmem:[#allocation3 + $0x60] sm:$0xff] }
 0x494   : > { %5016 = vst.msk [vmem:[#allocation3 + $0x91] sm:$0xff] %vm2698_vm14, %v4984_v39  ;;  %v4982_v49 = vsel %vm4918_vm5, %v4886_v36, %v4950_v47  ;;  %vm4919_vm0 = vcmp.ge.f32.partialorder %v4887_v16, 0.0  ;;  %v4951_v37 = vmul.f32 0.1, %v4887_v16  ;;  %8540 = vrot.lane.b32.xlu1 %v8534_v34, %s9288_s21  ;;  %v7192_v31 = vpop.f32.mrb[12].mxu1  ;;  %v13650_v2 = vsel %vm842_vm4, %v5907_v21, %v13631_v58  ;;  %v13682_v8 = vld [vmem:[#allocation3 + $0x48] sm:$0xff] }
 0x495   : > { %5014 = vst.msk [vmem:[#allocation3 + $0x79] sm:$0xff] %vm2698_vm14, %v4982_v49  ;;  %v4985_v6 = vsel %vm4921_vm15, %v4889_v24, %v4953_v15  ;;  %v4853_v59 = vmul.f32 %v7192_v31, %v13584_v38  ;;  %v4753_v3 = vpop.f32.mrb[13].mxu1  ;;  %v6226_v17 = vsel %vm665_vm3, %v13616_v51, %v6225_v60  ;;  %v5419_v57 = vrot.slane %v5046_v41, 2  ;;  %8550 = vrot.lane.b32.xlu0 %v8549_v63, %s9287_s16  ;;  %v13673_v5 = vld [vmem:[#allocation3 + $0x68] sm:$0xff]  ;;  %v5052_v18 = vld [vmem:[#allocation3 + $0x70] sm:$0x3] }
 0x496   : > { %5017 = vst.msk [vmem:[#allocation3 + $0x99] sm:$0xff] %vm2698_vm14, %v4985_v6  ;;  %v4983_v7 = vsel %vm4919_vm0, %v4887_v16, %v4951_v37  ;;  %v4851_v11 = vmul.f32 %v13584_v38, %v4753_v3  ;;  %v7193_v42 = vpop.f32.mrb[14].mxu1  ;;  %v8559_v20 = vpack.i.bf16 %v6226_v17, %v13637_v53  ;;  %v6401_v40 = vrot.slane %v5136_v35, 2  ;;  %v13667_v22 = vld [vmem:[#allocation3 + $0x50] sm:$0xff] }
 0x497   : > { %5015 = vst.msk [vmem:[#allocation3 + $0x81] sm:$0xff] %vm2698_vm14, %v4983_v7  ;;  %v4892_v62 = vadd.f32 %v13589_v52, %v4853_v59  ;;  %v4854_v28 = vmul.f32 %v7193_v42, %v13584_v38  ;;  %v4756_v55 = vpop.f32.mrb[15].mxu1  ;;  %v5420_v10 = vsel %vm842_vm4, %v13631_v58, %v5419_v57  ;;  %v5726_v27 = vrot.slane %v13623_v56, 1 }
 0x498   : > { %v4890_v1 = vadd.f32 %v13589_v52, %v4851_v11  ;;  %v4852_v0 = vmul.f32 %v13584_v38, %v4756_v55  ;;  %8560 = vrot.lane.b32.xlu1 %v8559_v20, %s9291_s26  ;;  %v8554_v45 = vpack.i.bf16 %v5420_v10, %v13650_v2  ;;  %v13677_v61 = vrot.slane %v13618_v14, 1  ;;  %v5043_v55 = vld [vmem:[#allocation3 + $0x28] sm:$0x3] }
 0x499   : > { %vm4924_vm1 = vcmp.ge.f32.partialorder %v4892_v62, 0.0  ;;  %v4956_v44 = vmul.f32 0.1, %v4892_v62  ;;  %v4893_v9 = vadd.f32 %v13589_v52, %v4854_v28  ;;  %v6402_v34 = vsel %vm842_vm4, %v13631_v58, %v6401_v40 }
 0x49a   : > { %vm4922_vm2 = vcmp.ge.f32.partialorder %v4890_v1, 0.0  ;;  %v4954_v25 = vmul.f32 0.1, %v4890_v1  ;;  %v4891_v54 = vadd.f32 %v13589_v52, %v4852_v0  ;;  %8555 = vrot.lane.b32.xlu0 %v8554_v45, %s9281_s22  ;;  %v13685_v23 = vrot.slane %v13618_v14, 2 }
 0x49b   : > { %v4988_v4 = vsel %vm4924_vm1, %v4892_v62, %v4956_v44  ;;  %vm4925_vm5 = vcmp.ge.f32.partialorder %v4893_v9, 0.0  ;;  %v4957_v46 = vmul.f32 0.1, %v4893_v9  ;;  %v8564_v36 = vpack.i.bf16 %v6402_v34, %v13650_v2 }
 0x49c   : > { %5020 = vst.msk [vmem:[#allocation3 + $0xc1] sm:$0xff] %vm2698_vm14, %v4988_v4  ;;  %v4986_v50 = vsel %vm4922_vm2, %v4890_v1, %v4954_v25  ;;  %vm4923_vm15 = vcmp.ge.f32.partialorder %v4891_v54, 0.0  ;;  %v4955_v26 = vmul.f32 0.1, %v4891_v54  ;;  %v13691_v33 = vpack.i.bf16 %v13667_v22, %v13682_v8  ;;  %v5097_v1 = vld [vmem:[#allocation3 + $0x70] sm:$0x3] }
 0x49d   : > { %5018 = vst.msk [vmem:[#allocation3 + $0xa9] sm:$0xff] %vm2698_vm14, %v4986_v50  ;;  %v4989_v43 = vsel %vm4925_vm5, %v4893_v9, %v4957_v46  ;;  %v5734_v13 = vrot.slane %v5091_v32, 1  ;;  %v5250_v41 = vrot.slane %v13671_v30, 1  ;;  %v13696_v48 = vrot.slane %v13673_v5, 1  ;;  %8565 = vrot.lane.b32.xlu1 %v8564_v36, %s9292_s18  ;;  %v5088_v4 = vld [vmem:[#allocation3 + $0x28] sm:$0x3] }
 0x49e   : > { %5021 = vst.msk [vmem:[#allocation3 + $0xc9] sm:$0xff] %vm2698_vm14, %v4989_v43  ;;  %v4987_v29 = vsel %vm4923_vm15, %v4891_v54, %v4955_v26  ;;  %8610 = vrot.lane.b32.xlu0 %v13691_v33, %s9289_s23  ;;  %v5253_v47 = vrot.slane %v5052_v18, 1  ;;  %v5910_v16 = vrot.slane %v5091_v32, 2  ;;  %v5426_v49 = vrot.slane %v13671_v30, 2 }
 0x49f   : > { %5019 = vst.msk [vmem:[#allocation3 + $0xb1] sm:$0xff] %vm2698_vm14, %v4987_v29  ;;  %v7196_v21 = vpop.f32.mrb[16].mxu1  ;;  %v5735_v35 = vsel %vm665_vm3, %v13616_v51, %v5734_v13  ;;  %v13707_v15 = vsel %vm665_vm3, %v5250_v41, %v13696_v48  ;;  %v13726_v28 = vrot.slane %v13673_v5, 2  ;;  %v5429_v57 = vrot.slane %v5052_v18, 2 }
 0x4a0   : > { %v4857_v14 = vmul.f32 %v7196_v21, %v13584_v38  ;;  %v4769_v24 = vpop.f32.mrb[17].mxu1  ;;  %v8569_v31 = vpack.i.bf16 %v5735_v35, %v13637_v53  ;;  %v5254_v6 = vsel %vm665_vm3, %v13696_v48, %v5253_v47  ;;  %v5911_v7 = vsel %vm842_vm4, %v13631_v58, %v5910_v16 }
 0x4a1   : > { %v4855_v39 = vmul.f32 %v13584_v38, %v4769_v24  ;;  %v7197_v12 = vpop.f32.mrb[18].mxu1  ;;  %v8619_v3 = vpack.i.bf16 %v5254_v6, %v13707_v15  ;;  %v8574_v11 = vpack.i.bf16 %v5911_v7, %v13650_v2  ;;  %v13731_v20 = vsel %vm842_vm4, %v5426_v49, %v13726_v28 }
 0x4a2   : > { %v4896_v37 = vadd.f32 %v13589_v52, %v4857_v14  ;;  %v4858_v59 = vmul.f32 %v7197_v12, %v13584_v38  ;;  %v4772_v19 = vpop.f32.mrb[19].mxu1  ;;  %8570 = vrot.lane.b32.xlu1 %v8569_v31, %s9284_s25  ;;  %v5430_v9 = vsel %vm842_vm4, %v13726_v28, %v5429_v57  ;;  %v13741_v10 = vsel %vm665_vm3, %v5726_v27, %v13677_v61  ;;  %v13788_v57 = vld [vmem:[#allocation3 + $0x90] sm:$0xff] }
 0x4a3   : > { %v4894_v51 = vadd.f32 %v13589_v52, %v4855_v39  ;;  %v4856_v60 = vmul.f32 %v13584_v38, %v4772_v19  ;;  %8620 = vrot.lane.b32.xlu0 %v8619_v3, %s9287_s16  ;;  %v5238_v25 = vrot.slane %v5043_v55, 1  ;;  %v8624_v45 = vpack.i.bf16 %v5430_v9, %v13731_v20  ;;  %v13774_v3 = vld [vmem:[#allocation3 + $0xa0] sm:$0x3] }
 0x4a4   : > { %vm4928_vm0 = vcmp.ge.f32.partialorder %v4896_v37, 0.0  ;;  %v4960_v63 = vmul.f32 0.1, %v4896_v37  ;;  %v4897_v53 = vadd.f32 %v13589_v52, %v4858_v59  ;;  %v5744_v32 = vrot.slane %v5097_v1, 1 }
 0x4a5   : > { %vm4926_vm1 = vcmp.ge.f32.partialorder %v4894_v51, 0.0  ;;  %v4958_v42 = vmul.f32 0.1, %v4894_v51  ;;  %v4895_v62 = vadd.f32 %v13589_v52, %v4856_v60  ;;  %v5902_v46 = vrot.slane %v13623_v56, 2 }
 0x4a6   : > { %v4992_v17 = vsel %vm4928_vm0, %v4896_v37, %v4960_v63  ;;  %vm4929_vm2 = vcmp.ge.f32.partialorder %v4897_v53, 0.0  ;;  %v4961_v58 = vmul.f32 0.1, %v4897_v53  ;;  %8575 = vrot.lane.b32.xlu1 %v8574_v11, %s9290_s24  ;;  %v5239_v40 = vsel %vm665_vm3, %v13677_v61, %v5238_v25  ;;  %v13776_v63 = vld [vmem:[#allocation3 + $0x80] sm:$0xff]  ;;  %v13778_v11 = vld [vmem:[#allocation3 + $0x98] sm:$0xff] }
 0x4a7   : > { %5024 = vst.msk [vmem:[#allocation3 + $0xf1] sm:$0xff] %vm2698_vm14, %v4992_v17  ;;  %v4990_v0 = vsel %vm4926_vm1, %v4894_v51, %v4958_v42  ;;  %vm4927_vm5 = vcmp.ge.f32.partialorder %v4895_v62, 0.0  ;;  %v4959_v2 = vmul.f32 0.1, %v4895_v62  ;;  %v5414_v50 = vrot.slane %v5043_v55, 2  ;;  %8625 = vrot.lane.b32.xlu0 %v8624_v45, %s9281_s22  ;;  %v13784_v17 = vld [vmem:[#allocation3 + $0x78] sm:$0xff] }
 0x4a8   : > { %5022 = vst.msk [vmem:[#allocation3 + $0xd9] sm:$0xff] %vm2698_vm14, %v4990_v0  ;;  %v4993_v44 = vsel %vm4929_vm2, %v4897_v53, %v4961_v58  ;;  %v5920_v26 = vrot.slane %v5097_v1, 2  ;;  %v8579_v27 = vpack.i.bf16 %v5239_v40, %v13741_v10  ;;  %v5745_v43 = vsel %vm665_vm3, %v13696_v48, %v5744_v32  ;;  %v5103_v45 = vld [vmem:[#allocation3 + $0xa0] sm:$0x3] }
 0x4a9   : > { %5025 = vst.msk [vmem:[#allocation3 + $0xf9] sm:$0xff] %vm2698_vm14, %v4993_v44  ;;  %v4991_v54 = vsel %vm4927_vm5, %v4895_v62, %v4959_v2  ;;  %v5413_v56 = vsel %vm842_vm4, %v5902_v46, %v13685_v23  ;;  %v5415_v29 = vsel %vm842_vm4, %v13685_v23, %v5414_v50  ;;  %v5729_v21 = vrot.slane %v5088_v4, 1 }
 0x4aa   : > { %5023 = vst.msk [vmem:[#allocation3 + $0xe1] sm:$0xff] %vm2698_vm14, %v4991_v54  ;;  %8580 = vrot.lane.b32.xlu1 %v8579_v27, %s9287_s16  ;;  %v8639_v13 = vpack.i.bf16 %v5745_v43, %v13707_v15  ;;  %v5921_v47 = vsel %vm842_vm4, %v13726_v28, %v5920_v26  ;;  %v8584_v39 = vpack.i.bf16 %v5415_v29, %v5413_v56  ;;  %v5905_v53 = vrot.slane %v5088_v4, 2 }
 0x4ab   : > { %v7200_v34 = vpop.f32.mrb[20].mxu1  ;;  %v5730_v6 = vsel %vm665_vm3, %v13677_v61, %v5729_v21  ;;  %v8644_v19 = vpack.i.bf16 %v5921_v47, %v13731_v20  ;;  %v8689_v0 = vpack.i.bf16 %v13776_v63, %v13784_v17  ;;  %v13795_v2 = vrot.slane %v13778_v11, 1 }
 0x4ac   : > { %v4861_v18 = vmul.f32 %v7200_v34, %v13584_v38  ;;  %v4785_v36 = vpop.f32.mrb[21].mxu1  ;;  %8640 = vrot.lane.b32.xlu0 %v8639_v13, %s9284_s25  ;;  %v8589_v62 = vpack.i.bf16 %v5730_v6, %v13741_v10  ;;  %v5906_v58 = vsel %vm842_vm4, %v13685_v23, %v5905_v53  ;;  %v5263_v44 = vrot.slane %v13774_v3, 1 }
 0x4ad   : > { %v4859_v41 = vmul.f32 %v13584_v38, %v4785_v36  ;;  %v7201_v14 = vpop.f32.mrb[22].mxu1  ;;  %v8594_v23 = vpack.i.bf16 %v5906_v58, %v5413_v56  ;;  %v5260_v10 = vrot.slane %v13788_v57, 1  ;;  %v13811_v50 = vrot.slane %v13778_v11, 2 }
 0x4ae   : > { %v4900_v24 = vadd.f32 %v13589_v52, %v4861_v18  ;;  %v4862_v16 = vmul.f32 %v7201_v14, %v13584_v38  ;;  %v4788_v35 = vpop.f32.mrb[23].mxu1  ;;  %8585 = vrot.lane.b32.xlu1 %v8584_v39, %s9281_s22  ;;  %v5264_v46 = vsel %vm665_vm3, %v13795_v2, %v5263_v44  ;;  %v8599_v27 = vpack.i.bf16 %v13673_v5, %v13671_v30  ;;  %v5142_v5 = vld [vmem:[#allocation3 + $0x70] sm:$0x3] }
 0x4af   : > { %v4898_v12 = vadd.f32 %v13589_v52, %v4859_v41  ;;  %v4860_v49 = vmul.f32 %v13584_v38, %v4788_v35  ;;  %v13806_v4 = vsel %vm665_vm3, %v5260_v10, %v13795_v2  ;;  %v5439_v18 = vrot.slane %v13774_v3, 2 }
 0x4b0   : > { %vm4932_vm15 = vcmp.ge.f32.partialorder %v4900_v24, 0.0  ;;  %v4964_v37 = vmul.f32 0.1, %v4900_v24  ;;  %v4901_v31 = vadd.f32 %v13589_v52, %v4862_v16  ;;  %8645 = vrot.lane.b32.xlu0 %v8644_v19, %s9290_s24  ;;  %v5436_v36 = vrot.slane %v13788_v57, 2 }
 0x4b1   : > { %vm4930_vm0 = vcmp.ge.f32.partialorder %v4898_v12, 0.0  ;;  %v4962_v59 = vmul.f32 0.1, %v4898_v12  ;;  %v4899_v51 = vadd.f32 %v13589_v52, %v4860_v49  ;;  %v5754_v21 = vrot.slane %v5103_v45, 1 }
 0x4b2   : > { %v4996_v60 = vsel %vm4932_vm15, %v4900_v24, %v4964_v37  ;;  %vm4933_vm1 = vcmp.ge.f32.partialorder %v4901_v31, 0.0  ;;  %v4965_v7 = vmul.f32 0.1, %v4901_v31  ;;  %8590 = vrot.lane.b32.xlu1 %v8589_v62, %s9284_s25  ;;  %v8699_v41 = vpack.i.bf16 %v5264_v46, %v13806_v4 }
 0x4b3   : > { %5028 = vst.msk [vmem:[#allocation3 + $0x121] sm:$0xff] %vm2698_vm14, %v4996_v60  ;;  %v4994_v61 = vsel %vm4930_vm0, %v4898_v12, %v4962_v59  ;;  %vm4931_vm2 = vcmp.ge.f32.partialorder %v4899_v51, 0.0  ;;  %v4963_v42 = vmul.f32 0.1, %v4899_v51  ;;  %v13828_v47 = vsel %vm842_vm4, %v5436_v36, %v13811_v50 }
 0x4b4   : > { %5026 = vst.msk [vmem:[#allocation3 + $0x109] sm:$0xff] %vm2698_vm14, %v4994_v61  ;;  %v4997_v55 = vsel %vm4933_vm1, %v4901_v31, %v4965_v7  ;;  %8690 = vrot.lane.b32.xlu0 %v8689_v0, %s9289_s23  ;;  %v5440_v39 = vsel %vm842_vm4, %v13811_v50, %v5439_v18  ;;  %v6235_v37 = vrot.slane %v5142_v5, 1  ;;  %v5930_v6 = vrot.slane %v5103_v45, 2  ;;  %v13842_v7 = vld [vmem:[#allocation3 + $0x88] sm:$0x3] }
 0x4b5   : > { %5029 = vst.msk [vmem:[#allocation3 + $0x129] sm:$0xff] %vm2698_vm14, %v4997_v55  ;;  %v4995_v1 = vsel %vm4931_vm2, %v4899_v51, %v4963_v42  ;;  %v8704_v19 = vpack.i.bf16 %v5440_v39, %v13828_v47  ;;  %v5736_v51 = vrot.slane %v13682_v8, 1  ;;  %v5755_v3 = vsel %vm665_vm3, %v13795_v2, %v5754_v21 }
 0x4b6   : > { %5027 = vst.msk [vmem:[#allocation3 + $0x111] sm:$0xff] %vm2698_vm14, %v4995_v1  ;;  %8595 = vrot.lane.b32.xlu1 %v8594_v23, %s9290_s24  ;;  %v6411_v60 = vrot.slane %v5142_v5, 2  ;;  %v13845_v53 = vrot.slane %v13667_v22, 1  ;;  %v13848_v61 = vrot.slane %v13667_v22, 2  ;;  %v13851_v42 = vrot.slane %v13776_v63, 1 }
 0x4b7   : > { %v7204_v9 = vpop.f32.mrb[24].mxu1  ;;  %v6236_v55 = vsel %vm665_vm3, %v13696_v48, %v6235_v37  ;;  %v5746_v58 = vrot.slane %v13784_v17, 1  ;;  %v5922_v1 = vrot.slane %v13784_v17, 2  ;;  %v5931_v22 = vsel %vm842_vm4, %v13811_v50, %v5930_v6  ;;  %v5049_v17 = vld [vmem:[#allocation3 + $0x58] sm:$0x3] }
 0x4b8   : > { %v4865_v25 = vmul.f32 %v7204_v9, %v13584_v38  ;;  %v4801_v54 = vpop.f32.mrb[25].mxu1  ;;  %8695 = vrot.lane.b32.xlu0 %v8689_v0, %s9288_s21  ;;  %v13862_v23 = vrot.slane %v13776_v63, 2  ;;  %v8719_v9 = vpack.i.bf16 %v5755_v3, %v13806_v4  ;;  %v8629_v45 = vpack.i.bf16 %v6236_v55, %v13707_v15  ;;  %v5064_v3 = vld [vmem:[#allocation3 + $0xd0] sm:$0x3] }
 0x4b9   : > { %v4863_v32 = vmul.f32 %v13584_v38, %v4801_v54  ;;  %v7205_v40 = vpop.f32.mrb[26].mxu1  ;;  %v6412_v63 = vsel %vm842_vm4, %v13726_v28, %v6411_v60  ;;  %v6416_v36 = vrot.slane %v13842_v7, 2  ;;  %v13917_v60 = vld [vmem:[#allocation3 + $0xa8] sm:$0xff] }
 0x4ba   : > { %v4904_v26 = vadd.f32 %v13589_v52, %v4865_v25  ;;  %v4866_v43 = vmul.f32 %v7205_v40, %v13584_v38  ;;  %v4804_v34 = vpop.f32.mrb[27].mxu1  ;;  %8600 = vrot.lane.b32.xlu1 %v8599_v27, %s9289_s23  ;;  %v6240_v25 = vrot.slane %v13842_v7, 1  ;;  %v8724_v40 = vpack.i.bf16 %v5931_v22, %v13828_v47 }
 0x4bb   : > { %v4902_v56 = vadd.f32 %v13589_v52, %v4863_v32  ;;  %v4864_v29 = vmul.f32 %v13584_v38, %v4804_v34  ;;  %v5248_v34 = vrot.slane %v5049_v17, 1  ;;  %v13903_v39 = vsel %vm842_vm4, %v5922_v1, %v13862_v23  ;;  %v5094_v1 = vld [vmem:[#allocation3 + $0x58] sm:$0x3] }
 0x4bc   : > { %vm4936_vm5 = vcmp.ge.f32.partialorder %v4904_v26, 0.0  ;;  %v4968_v13 = vmul.f32 0.1, %v4904_v26  ;;  %v4905_v30 = vadd.f32 %v13589_v52, %v4866_v43  ;;  %8700 = vrot.lane.b32.xlu0 %v8699_v41, %s9287_s16  ;;  %v8634_v41 = vpack.i.bf16 %v6412_v63, %v13731_v20 }
 0x4bd   : > { %vm4934_vm15 = vcmp.ge.f32.partialorder %v4902_v56, 0.0  ;;  %v4966_v14 = vmul.f32 0.1, %v4902_v56  ;;  %v4903_v24 = vadd.f32 %v13589_v52, %v4864_v29  ;;  %v5249_v5 = vsel %vm665_vm3, %v13845_v53, %v5248_v34 }
 0x4be   : > { %v5000_v16 = vsel %vm4936_vm5, %v4904_v26, %v4968_v13  ;;  %vm4937_vm0 = vcmp.ge.f32.partialorder %v4905_v30, 0.0  ;;  %v4969_v35 = vmul.f32 0.1, %v4905_v30  ;;  %8605 = vrot.lane.b32.xlu1 %v8599_v27, %s9288_s21  ;;  %v13880_v27 = vsel %vm665_vm3, %v5746_v58, %v13851_v42  ;;  %v13923_v58 = vld [vmem:[#allocation3 + $0xc0] sm:$0xff] }
 0x4bf   : > { %5032 = vst.msk [vmem:[#allocation3 + $0x151] sm:$0xff] %vm2698_vm14, %v5000_v16  ;;  %v4998_v12 = vsel %vm4934_vm15, %v4902_v56, %v4966_v14  ;;  %vm4935_vm1 = vcmp.ge.f32.partialorder %v4903_v24, 0.0  ;;  %v4967_v49 = vmul.f32 0.1, %v4903_v24  ;;  %v6241_v56 = vsel %vm665_vm3, %v13851_v42, %v6240_v25 }
 0x4c0   : > { %5030 = vst.msk [vmem:[#allocation3 + $0x139] sm:$0xff] %vm2698_vm14, %v4998_v12  ;;  %v5001_v31 = vsel %vm4937_vm0, %v4905_v30, %v4969_v35  ;;  %8705 = vrot.lane.b32.xlu0 %v8704_v19, %s9281_s22  ;;  %v5247_v30 = vsel %vm665_vm3, %v5736_v51, %v13845_v53  ;;  %v5424_v14 = vrot.slane %v5049_v17, 2  ;;  %v8739_v16 = vpack.i.bf16 %v6241_v56, %v13880_v27  ;;  %v5139_v35 = vld [vmem:[#allocation3 + $0x58] sm:$0x3]  ;;  %v13915_v51 = vld [vmem:[#allocation3 + $0xc8] sm:$0xff] }
 0x4c1   : > { %5033 = vst.msk [vmem:[#allocation3 + $0x159] sm:$0xff] %vm2698_vm14, %v5001_v31  ;;  %v4999_v59 = vsel %vm4935_vm1, %v4903_v24, %v4967_v49  ;;  %v5912_v20 = vrot.slane %v13682_v8, 2  ;;  %v6417_v12 = vsel %vm842_vm4, %v13862_v23, %v6416_v36  ;;  %v8649_v49 = vpack.i.bf16 %v5249_v5, %v5247_v30  ;;  %v5151_v36 = vld [vmem:[#allocation3 + $0xb8] sm:$0x3] }
 0x4c2   : > { %5031 = vst.msk [vmem:[#allocation3 + $0x141] sm:$0xff] %vm2698_vm14, %v4999_v59  ;;  %8615 = vrot.lane.b32.xlu1 %v13691_v33, %s9288_s21  ;;  %v5425_v31 = vsel %vm842_vm4, %v13848_v61, %v5424_v14  ;;  %v6230_v6 = vrot.slane %v5139_v35, 1  ;;  %v8744_v8 = vpack.i.bf16 %v6417_v12, %v13903_v39  ;;  %v5105_v59 = vld [vmem:[#allocation3 + $0xb0] sm:$0xff]  ;;  %v5756_v5 = vrot.slane %v13917_v60, 1 }
 0x4c3   : > { %v7208_v62 = vpop.f32.mrb[28].mxu1  ;;  %v5423_v37 = vsel %vm842_vm4, %v5912_v20, %v13848_v61  ;;  %v8769_v55 = vpack.i.bf16 %v5105_v59, %v13917_v60  ;;  %v6426_v12 = vrot.slane %v5151_v36, 2 }
 0x4c4   : > { %v4869_v0 = vmul.f32 %v7208_v62, %v13584_v38  ;;  %v4817_v44 = vpop.f32.mrb[29].mxu1  ;;  %8720 = vrot.lane.b32.xlu0 %v8719_v9, %s9284_s25  ;;  %v8654_v19 = vpack.i.bf16 %v5425_v31, %v5423_v37  ;;  %v6231_v7 = vsel %vm665_vm3, %v13845_v53, %v6230_v6  ;;  %v6406_v62 = vrot.slane %v5139_v35, 2  ;;  %v5055_v31 = vld [vmem:[#allocation3 + $0x88] sm:$0x3] }
 0x4c5   : > { %v4867_v48 = vmul.f32 %v13584_v38, %v4817_v44  ;;  %v7209_v10 = vpop.f32.mrb[30].mxu1  ;;  %v5273_v44 = vrot.slane %v5064_v3, 1  ;;  %v8659_v22 = vpack.i.bf16 %v6231_v7, %v5247_v30 }
 0x4c6   : > { %v4908_v54 = vadd.f32 %v13589_v52, %v4869_v0  ;;  %v4870_v32 = vmul.f32 %v7209_v10, %v13584_v38  ;;  %v4820_v46 = vpop.f32.mrb[31].mxu1  ;;  %8630 = vrot.lane.b32.xlu1 %v8629_v45, %s9291_s26  ;;  %v13926_v0 = vrot.slane %v13915_v51, 1  ;;  %v6407_v9 = vsel %vm842_vm4, %v13848_v61, %v6406_v62  ;;  %v5070_v62 = vld [vmem:[#allocation3 + $0x100] sm:$0x3] }
 0x4c7   : > { %v4906_v33 = vadd.f32 %v13589_v52, %v4867_v48  ;;  %v4868_v26 = vmul.f32 %v13584_v38, %v4820_v46  ;;  %v5270_v48 = vrot.slane %v13923_v58, 1  ;;  %v5739_v10 = vrot.slane %v5094_v1, 1  ;;  %v5109_v46 = vld [vmem:[#allocation3 + $0xd0] sm:$0x3] }
 0x4c8   : > { %vm4940_vm2 = vcmp.ge.f32.partialorder %v4908_v54, 0.0  ;;  %v4972_v15 = vmul.f32 0.1, %v4908_v54  ;;  %v4909_v43 = vadd.f32 %v13589_v52, %v4870_v32  ;;  %8725 = vrot.lane.b32.xlu0 %v8724_v40, %s9290_s24  ;;  %v5274_v17 = vsel %vm665_vm3, %v13926_v0, %v5273_v44 }
 0x4c9   : > { %vm4938_vm5 = vcmp.ge.f32.partialorder %v4906_v33, 0.0  ;;  %v4970_v28 = vmul.f32 0.1, %v4906_v33  ;;  %v4907_v18 = vadd.f32 %v13589_v52, %v4868_v26  ;;  %v13935_v25 = vsel %vm665_vm3, %v5270_v48, %v13926_v0 }
 0x4ca   : > { %v5004_v29 = vsel %vm4940_vm2, %v4908_v54, %v4972_v15  ;;  %vm4941_vm15 = vcmp.ge.f32.partialorder %v4909_v43, 0.0  ;;  %v4973_v38 = vmul.f32 0.1, %v4909_v43  ;;  %8635 = vrot.lane.b32.xlu1 %v8634_v41, %s9292_s18  ;;  %v13940_v54 = vrot.slane %v13915_v51, 2 }
 0x4cb   : > { %5036 = vst.msk [vmem:[#allocation3 + $0x181] sm:$0xff] %vm2698_vm14, %v5004_v29  ;;  %v5002_v21 = vsel %vm4938_vm5, %v4906_v33, %v4970_v28  ;;  %vm4939_vm0 = vcmp.ge.f32.partialorder %v4907_v18, 0.0  ;;  %v4971_v13 = vmul.f32 0.1, %v4907_v18  ;;  %v5449_v45 = vrot.slane %v5064_v3, 2 }
 0x4cc   : > { %5034 = vst.msk [vmem:[#allocation3 + $0x169] sm:$0xff] %vm2698_vm14, %v5002_v21  ;;  %v5005_v52 = vsel %vm4941_vm15, %v4909_v43, %v4973_v38  ;;  %8740 = vrot.lane.b32.xlu0 %v8739_v16, %s9291_s26  ;;  %v8664_v32 = vpack.i.bf16 %v6407_v9, %v5423_v37  ;;  %v5740_v63 = vsel %vm665_vm3, %v13845_v53, %v5739_v10  ;;  %v5446_v33 = vrot.slane %v13923_v58, 2  ;;  %v14007_v9 = vld [vmem:[#allocation3 + $0xe0] sm:$0xff] }
 0x4cd   : > { %5037 = vst.msk [vmem:[#allocation3 + $0x189] sm:$0xff] %vm2698_vm14, %v5005_v52  ;;  %v5003_v24 = vsel %vm4939_vm0, %v4907_v18, %v4971_v13  ;;  %v5915_v40 = vrot.slane %v5094_v1, 2  ;;  %v8779_v26 = vpack.i.bf16 %v5274_v17, %v13935_v25  ;;  %v5450_v43 = vsel %vm842_vm4, %v13940_v54, %v5449_v45  ;;  %v5148_v13 = vld [vmem:[#allocation3 + $0xa0] sm:$0x3]  ;;  %v14012_v17 = vld [vmem:[#allocation3 + $0xd8] sm:$0xff] }
 0x4ce   : > { %5035 = vst.msk [vmem:[#allocation3 + $0x171] sm:$0xff] %vm2698_vm14, %v5003_v24  ;;  %8650 = vrot.lane.b32.xlu1 %v8649_v49, %s9287_s16  ;;  %v13950_v15 = vsel %vm842_vm4, %v5446_v33, %v13940_v54  ;;  %v5764_v34 = vrot.slane %v5109_v46, 1  ;;  %v8669_v28 = vpack.i.bf16 %v5740_v63, %v5247_v30  ;;  %v5940_v29 = vrot.slane %v5109_v46, 2 }
 0x4cf   : > { %v5916_v53 = vsel %vm842_vm4, %v13848_v61, %v5915_v40  ;;  %v8784_v18 = vpack.i.bf16 %v5450_v43, %v13950_v15  ;;  %v13964_v41 = vrot.slane %v5105_v59, 1  ;;  %v6250_v52 = vrot.slane %v5151_v36, 1 }
 0x4d0   : > { %8745 = vrot.lane.b32.xlu0 %v8744_v8, %s9292_s18  ;;  %v5765_v56 = vsel %vm665_vm3, %v13926_v0, %v5764_v34  ;;  %v8674_v38 = vpack.i.bf16 %v5916_v53, %v5423_v37  ;;  %v5941_v61 = vsel %vm842_vm4, %v13940_v54, %v5940_v29  ;;  %v8679_v30 = vpack.i.bf16 %v13778_v11, %v13788_v57 }
 0x4d1   : > { %v8799_v21 = vpack.i.bf16 %v5765_v56, %v13935_v25  ;;  %v6245_v14 = vrot.slane %v5148_v13, 1  ;;  %v8804_v24 = vpack.i.bf16 %v5941_v61, %v13950_v15  ;;  %v13974_v16 = vrot.slane %v5105_v59, 2 }
 0x4d2   : > { %8655 = vrot.lane.b32.xlu1 %v8654_v19, %s9281_s22  ;;  %v13978_v35 = vsel %vm665_vm3, %v5756_v5, %v13964_v41  ;;  %v6251_v20 = vsel %vm665_vm3, %v13964_v41, %v6250_v52  ;;  %v5932_v11 = vrot.slane %v13917_v60, 2  ;;  %v6421_v49 = vrot.slane %v5148_v13, 2  ;;  %v5159_v60 = vld [vmem:[#allocation3 + $0xf8] sm:$0xff] }
 0x4d3   : > { %v6246_v57 = vsel %vm665_vm3, %v13795_v2, %v6245_v14  ;;  %v8819_v37 = vpack.i.bf16 %v6251_v20, %v13978_v35  ;;  %v6427_v8 = vsel %vm842_vm4, %v13974_v16, %v6426_v12  ;;  %v5258_v19 = vrot.slane %v5055_v31, 1  ;;  %v5115_v20 = vld [vmem:[#allocation3 + $0x100] sm:$0x3] }
 0x4d4   : > { %8770 = vrot.lane.b32.xlu0 %v8769_v55, %s9289_s23  ;;  %v13990_v6 = vsel %vm842_vm4, %v5932_v11, %v13974_v16  ;;  %v8709_v59 = vpack.i.bf16 %v6246_v57, %v13806_v4  ;;  %v6422_v2 = vsel %vm842_vm4, %v13811_v50, %v6421_v49  ;;  %v5434_v44 = vrot.slane %v5055_v31, 2  ;;  %v5100_v50 = vld [vmem:[#allocation3 + $0x88] sm:$0x3]  ;;  %v5154_v11 = vld [vmem:[#allocation3 + $0xd0] sm:$0x3] }
 0x4d5   : > { %v8824_v3 = vpack.i.bf16 %v6427_v8, %v13990_v6  ;;  %v8714_v7 = vpack.i.bf16 %v6422_v2, %v13828_v47  ;;  %v5259_v1 = vsel %vm665_vm3, %v13851_v42, %v5258_v19  ;;  %v5283_v48 = vrot.slane %v5070_v62, 1  ;;  %v5112_v19 = vld [vmem:[#allocation3 + $0xe8] sm:$0x3] }
 0x4d6   : > { %8660 = vrot.lane.b32.xlu1 %v8659_v22, %s9291_s26  ;;  %v6263_v22 = vrot.slane %v5159_v60, 1  ;;  %v8729_v47 = vpack.i.bf16 %v5259_v1, %v13880_v27  ;;  %v5435_v45 = vsel %vm842_vm4, %v13862_v23, %v5434_v44  ;;  %v5749_v46 = vrot.slane %v5100_v50, 1 }
 0x4d7   : > { %v8849_v63 = vpack.i.bf16 %v14007_v9, %v14012_v17  ;;  %v6439_v33 = vrot.slane %v5159_v60, 2  ;;  %v5459_v43 = vrot.slane %v5070_v62, 2  ;;  %v8734_v34 = vpack.i.bf16 %v5435_v45, %v13903_v39 }
 0x4d8   : > { %8775 = vrot.lane.b32.xlu0 %v8769_v55, %s9288_s21  ;;  %v5158_v55 = vld [vmem:[#allocation3 + $0xf0] sm:$0xff]  ;;  %v5925_v56 = vrot.slane %v5100_v50, 2  ;;  %v5774_v49 = vrot.slane %v5115_v20, 1  ;;  %v6255_v31 = vrot.slane %v5154_v11, 1  ;;  %v5950_v2 = vrot.slane %v5115_v20, 2 }
 0x4d9   : > { %v14005_v4 = vpack.i.bf16 %v5159_v60, %v5158_v55  ;;  %v6262_v10 = vrot.slane %v5158_v55, 1  ;;  %v6438_v53 = vrot.slane %v5158_v55, 2  ;;  %v5460_v36 = vsel %vm842_vm4, %v6439_v33, %v5459_v43  ;;  %v5117_v20 = vld [vmem:[#allocation3 + $0x110] sm:$0xff] }
 0x4da   : > { %8665 = vrot.lane.b32.xlu1 %v8664_v32, %s9292_s18  ;;  %v14016_v32 = vpop.permute.xlu0 %8525  ;;  %v5926_v52 = vsel %vm842_vm4, %v13862_v23, %v5925_v56  ;;  %v6256_v60 = vsel %vm665_vm3, %v13926_v0, %v6255_v31  ;;  %v14062_v62 = vrot.slane %v14007_v9, 1  ;;  %v5951_v1 = vsel %vm842_vm4, %v6439_v33, %v5950_v2 }
 0x4db   : > { %v5282_v40 = vsel %vm665_vm3, %v6262_v10, %v6263_v22  ;;  %v5769_v44 = vrot.slane %v5112_v19, 1  ;;  %v8789_v50 = vpack.i.bf16 %v6256_v60, %v13935_v25  ;;  %v14074_v10 = vrot.slane %v14007_v9, 2 }
 0x4dc   : > { %8780 = vrot.lane.b32.xlu0 %v8779_v26, %s9287_s16  ;;  %v5284_v26 = vsel %vm665_vm3, %v6263_v22, %v5283_v48  ;;  %v8527_v60 = vunpack.i.l.bf16 %v14016_v32 }
 0x4dd   : > { %v8854_v29 = vpack.i.bf16 %v5284_v26, %v5282_v40  ;;  %v5770_v25 = vsel %vm665_vm3, %v14062_v62, %v5769_v44 }
 0x4de   : > { %8670 = vrot.lane.b32.xlu1 %v8669_v28, %s9284_s25  ;;  %v5160_v28 = vld [vmem:[#allocation3 + $0x100] sm:$0x3] }
 0x4df   : > { %v6265_v13 = vrot.slane %v5160_v28, 1  ;;  %v6441_v14 = vrot.slane %v5160_v28, 2 }
 0x4e0   : > { %8785 = vrot.lane.b32.xlu0 %v8784_v18, %s9281_s22  ;;  %v5750_v18 = vsel %vm665_vm3, %v13851_v42, %v5749_v46 }
 0x4e1   : > { %v8749_v61 = vpack.i.bf16 %v5750_v18, %v13880_v27  ;;  %v6442_v23 = vsel %vm842_vm4, %v6439_v33, %v6441_v14 }
 0x4e2   : > { %8675 = vrot.lane.b32.xlu1 %v8674_v38, %s9290_s24  ;;  %v5458_v38 = vsel %vm842_vm4, %v6438_v53, %v6439_v33  ;;  %v5945_v33 = vrot.slane %v5112_v19, 2  ;;  %v5067_v19 = vld [vmem:[#allocation3 + $0xe8] sm:$0x3] }
 0x4e3   : > { %v8859_v42 = vpack.i.bf16 %v5460_v36, %v5458_v38 }
 0x4e4   : > { %8800 = vrot.lane.b32.xlu0 %v8799_v21, %s9284_s25  ;;  %v14030_v21 = vpop.permute.xlu0 %8530 }
 0x4e6   : > { %8680 = vrot.lane.b32.xlu1 %v8679_v30, %s9289_s23 }
 0x4e8   : > { %8805 = vrot.lane.b32.xlu0 %v8804_v24, %s9290_s24  ;;  %v8754_v24 = vpack.i.bf16 %v5926_v52, %v13903_v39  ;;  %v8869_v39 = vpack.i.bf16 %v6442_v23, %v5458_v38  ;;  %v5164_v52 = vld [vmem:[#allocation3 + $0x120] sm:$0xff] }
 0x4ea   : > { %8685 = vrot.lane.b32.xlu1 %v8679_v30, %s9288_s21  ;;  %v6266_v30 = vsel %vm665_vm3, %v6263_v22, %v6265_v13  ;;  %v5165_v13 = vld [vmem:[#allocation3 + $0x128] sm:$0xff] }
 0x4eb   : > { %v8864_v27 = vpack.i.bf16 %v6266_v30, %v5282_v40  ;;  %v14130_v31 = vrot.slane %v5165_v13, 1  ;;  %v6449_v44 = vrot.slane %v5165_v13, 2 }
 0x4ec   : > { %8820 = vrot.lane.b32.xlu0 %v8819_v37, %s9291_s26  ;;  %v8759_v37 = vpack.i.bf16 %v13915_v51, %v13923_v58  ;;  %v5061_v58 = vld [vmem:[#allocation3 + $0xb8] sm:$0x3] }
 0x4ed   : > { %v5268_v48 = vrot.slane %v5061_v58, 1  ;;  %v5444_v26 = vrot.slane %v5061_v58, 2  ;;  %v9238_v58 = vld [vmem:[#allocation3 + $0x8] sm:$0xff] }
 0x4ee   : > { %8710 = vrot.lane.b32.xlu1 %v8709_v59, %s9291_s26  ;;  %v5775_v59 = vsel %vm665_vm3, %v6263_v22, %v5774_v49  ;;  %v5766_v22 = vrot.slane %v14012_v17, 1  ;;  %v8528_v49 = vunpack.i.h.bf16 %v14016_v32 }
 0x4ef   : > { %v8874_v51 = vpack.i.bf16 %v5775_v59, %v5282_v40  ;;  %v5942_v40 = vrot.slane %v14012_v17, 2  ;;  %v5269_v9 = vsel %vm665_vm3, %v13964_v41, %v5268_v48  ;;  %v5445_v56 = vsel %vm842_vm4, %v13974_v16, %v5444_v26 }
 0x4f0   : > { %8825 = vrot.lane.b32.xlu0 %v8824_v3, %s9292_s18  ;;  %v8809_v18 = vpack.i.bf16 %v5269_v9, %v13978_v35  ;;  %v8532_v9 = vunpack.i.l.bf16 %v14030_v21 }
 0x4f1   : > { %v14097_v53 = vsel %vm842_vm4, %v5942_v40, %v14074_v10  ;;  %v5121_v40 = vld [vmem:[#allocation3 + $0x130] sm:$0x3] }
 0x4f2   : > { %8715 = vrot.lane.b32.xlu1 %v8714_v7, %s9292_s18  ;;  %v6431_v7 = vrot.slane %v5154_v11, 2 }
 0x4f4   : > { %8845 = vrot.lane.b32.xlu0 %v14005_v4, %s9288_s21  ;;  %v6432_v0 = vsel %vm842_vm4, %v13940_v54, %v6431_v7  ;;  %v6272_v7 = vrot.slane %v5164_v52, 1 }
 0x4f5   : > { %v8794_v54 = vpack.i.bf16 %v6432_v0, %v13950_v15  ;;  %v5946_v15 = vsel %vm842_vm4, %v14074_v10, %v5945_v33  ;;  %v6448_v33 = vrot.slane %v5164_v52, 2 }
 0x4f6   : > { %8730 = vrot.lane.b32.xlu1 %v8729_v47, %s9287_s16  ;;  %v8879_v47 = vpack.i.bf16 %v5951_v1, %v5458_v38  ;;  %v8899_v38 = vpack.i.bf16 %v5946_v15, %v14097_v53  ;;  %v6575_v1 = vsel %vm2698_vm14, %v9238_v58, %v8528_v49  ;;  %v14148_v32 = vsel %vm665_vm3, %v6272_v7, %v14130_v31 }
 0x4f8   : > { %8850 = vrot.lane.b32.xlu0 %v8849_v63, %s9289_s23  ;;  %v14082_v63 = vsel %vm665_vm3, %v5766_v22, %v14062_v62 }
 0x4f9   : > { %v8894_v43 = vpack.i.bf16 %v5770_v25, %v14082_v63  ;;  %v9239_v25 = vld [vmem:[#allocation3] sm:$0xff] }
 0x4fa   : > { %8735 = vrot.lane.b32.xlu1 %v8734_v34, %s9281_s22  ;;  %v5106_v34 = vld [vmem:[#allocation3 + $0xb8] sm:$0x3] }
 0x4fb   : > { %v5935_v30 = vrot.slane %v5106_v34, 2 }
 0x4fc   : > { %8855 = vrot.lane.b32.xlu0 %v8854_v29, %s9287_s16  ;;  %v5759_v29 = vrot.slane %v5106_v34, 1  ;;  %v5777_v34 = vrot.slane %v5117_v20, 1 }
 0x4fe   : > { %8750 = vrot.lane.b32.xlu1 %v8749_v61, %s9284_s25  ;;  %v8814_v61 = vpack.i.bf16 %v5445_v56, %v13990_v6 }
 0x500   : > { %8860 = vrot.lane.b32.xlu0 %v8859_v42, %s9281_s22  ;;  %v5760_v42 = vsel %vm665_vm3, %v13964_v41, %v5759_v29  ;;  %v5936_v41 = vsel %vm842_vm4, %v13974_v16, %v5935_v30 }
 0x501   : > { %v8829_v23 = vpack.i.bf16 %v5760_v42, %v13978_v35  ;;  %v8533_v35 = vunpack.i.h.bf16 %v14030_v21  ;;  %v8834_v16 = vpack.i.bf16 %v5936_v41, %v13990_v6  ;;  %v6574_v6 = vsel %vm2698_vm14, %v9239_v25, %v8527_v60 }
 0x502   : > { %v14038_v5 = vpop.permute.xlu1 %8535  ;;  %8755 = vrot.lane.b32.xlu1 %v8754_v24, %s9290_s24  ;;  %v14118_v24 = vpack.i.bf16 %v5165_v13, %v5164_v52  ;;  %v5073_v13 = vld [vmem:[#allocation3 + $0x118] sm:$0x3] }
 0x503   : > { %v14042_v12 = vpop.permute.xlu0 %8545  ;;  %v14155_v26 = vsel %vm2076_vm7, %v6575_v1, %v8533_v35 }
 0x504   : > { %8865 = vrot.lane.b32.xlu0 %v8864_v27, %s9291_s26  ;;  %v5076_v27 = vld [vmem:[#allocation3 + $0x130] sm:$0x3] }
 0x505   : > { %v5293_v2 = vrot.slane %v5076_v27, 1  ;;  %v5469_v22 = vrot.slane %v5076_v27, 2  ;;  %v5784_v27 = vrot.slane %v5121_v40, 1 }
 0x506   : > { %v14046_v57 = vpop.permute.xlu1 %8540  ;;  %8760 = vrot.lane.b32.xlu1 %v8759_v37, %s9289_s23 }
 0x507   : > { %v14052_v8 = vpop.permute.xlu0 %8550  ;;  %v5294_v48 = vsel %vm665_vm3, %v14130_v31, %v5293_v2  ;;  %v5470_v21 = vsel %vm842_vm4, %v6449_v44, %v5469_v22 }
 0x508   : > { %8870 = vrot.lane.b32.xlu0 %v8869_v39, %s9292_s18  ;;  %v8924_v56 = vpack.i.bf16 %v5294_v48, %v14148_v32 }
 0x50a   : > { %v14056_v3 = vpop.permute.xlu1 %8560  ;;  %8765 = vrot.lane.b32.xlu1 %v8759_v37, %s9288_s21  ;;  %v14126_v37 = vld [vmem:[#allocation3 + $0x108] sm:$0xff] }
 0x50b   : > { %v8914_v59 = vpack.i.bf16 %v5117_v20, %v14126_v37  ;;  %v5952_v2 = vrot.slane %v14126_v37, 2 }
 0x50c   : > { %v14064_v55 = vpop.permute.xlu0 %8555  ;;  %8875 = vrot.lane.b32.xlu0 %v8874_v51, %s9284_s25 }
 0x50e   : > { %8790 = vrot.lane.b32.xlu1 %v8789_v50, %s9291_s26  ;;  %v5278_v50 = vrot.slane %v5067_v19, 1 }
 0x50f   : > { %v14076_v45 = vpop.permute.xlu1 %8565 }
 0x510   : > { %v14078_v46 = vpop.permute.xlu0 %8610  ;;  %8880 = vrot.lane.b32.xlu0 %v8879_v47, %s9290_s24  ;;  %v5454_v47 = vrot.slane %v5067_v19, 2  ;;  %v5279_v29 = vsel %vm665_vm3, %v14062_v62, %v5278_v50  ;;  %v5960_v62 = vrot.slane %v5121_v40, 2 }
 0x511   : > { %v8884_v60 = vpack.i.bf16 %v5279_v29, %v14082_v63  ;;  %v5785_v63 = vsel %vm665_vm3, %v14130_v31, %v5784_v27  ;;  %v5169_v29 = vld [vmem:[#allocation3 + $0x148] sm:$0x3] }
 0x512   : > { %8795 = vrot.lane.b32.xlu1 %v8794_v54, %s9292_s18  ;;  %v5166_v54 = vld [vmem:[#allocation3 + $0x130] sm:$0x3]  ;;  %v5455_v52 = vsel %vm842_vm4, %v14074_v10, %v5454_v47  ;;  %v8944_v40 = vpack.i.bf16 %v5785_v63, %v14148_v32 }
 0x513   : > { %v6275_v42 = vrot.slane %v5166_v54, 1  ;;  %v6451_v30 = vrot.slane %v5166_v54, 2  ;;  %v8889_v10 = vpack.i.bf16 %v5455_v52, %v14097_v53  ;;  %v14196_v53 = vsel %vm842_vm4, %v6449_v44, %v5960_v62  ;;  %v5168_v52 = vld [vmem:[#allocation3 + $0x140] sm:$0xff] }
 0x514   : > { %v14093_v28 = vpop.permute.xlu1 %8570  ;;  %8895 = vrot.lane.b32.xlu0 %v8894_v43, %s9284_s25  ;;  %v5776_v43 = vrot.slane %v14126_v37, 1 }
 0x515   : > { %v14102_v17 = vpop.permute.xlu0 %8620  ;;  %v6276_v37 = vsel %vm665_vm3, %v14130_v31, %v6275_v42  ;;  %v5464_v31 = vrot.slane %v5073_v13, 2  ;;  %v5082_v42 = vld [vmem:[#allocation3 + $0x160] sm:$0x3] }
 0x516   : > { %8810 = vrot.lane.b32.xlu1 %v8809_v18, %s9287_s16  ;;  %v5163_v18 = vld [vmem:[#allocation3 + $0x118] sm:$0x3]  ;;  %v14182_v7 = vsel %vm665_vm3, %v5776_v43, %v5777_v34  ;;  %v5125_v43 = vld [vmem:[#allocation3 + $0x150] sm:$0xff]  ;;  %v5479_v63 = vrot.slane %v5082_v42, 2 }
 0x517   : > { %v6270_v49 = vrot.slane %v5163_v18, 1  ;;  %v6446_v41 = vrot.slane %v5163_v18, 2  ;;  %v5967_v62 = vrot.slane %v5125_v43, 2 }
 0x518   : > { %v14109_v36 = vpop.permute.xlu1 %8575  ;;  %8900 = vrot.lane.b32.xlu0 %v8899_v38, %s9290_s24  ;;  %v14165_v38 = vsel %vm842_vm4, %v6448_v33, %v6449_v44  ;;  %v14211_v33 = vsel %vm2076_vm7, %v6574_v6, %v8532_v9  ;;  %v5126_v9 = vld [vmem:[#allocation3 + $0x158] sm:$0xff] }
 0x519   : > { %v14115_v14 = vpop.permute.xlu0 %8625  ;;  %v8929_v35 = vpack.i.bf16 %v5470_v21, %v14165_v38  ;;  %v14193_v1 = vsel %vm665_vm3, %v5777_v34, %v6270_v49  ;;  %v5127_v21 = vld [vmem:[#allocation3 + $0x160] sm:$0x3]  ;;  %v5791_v49 = vrot.slane %v5125_v43, 1 }
 0x51a   : > { %8815 = vrot.lane.b32.xlu1 %v8814_v61, %s9281_s22 }
 0x51c   : > { %8905 = vrot.lane.b32.xlu0 %v14118_v24, %s9288_s21  ;;  %v14122_v11 = vpop.permute.xlu1 %8580 }
 0x51e   : > { %v14132_v39 = vpop.permute.xlu0 %8640  ;;  %8830 = vrot.lane.b32.xlu1 %v8829_v23, %s9284_s25  ;;  %v5953_v23 = vrot.slane %v5117_v20, 2 }
 0x520   : > { %8915 = vrot.lane.b32.xlu0 %v8914_v59, %s9289_s23  ;;  %v14139_v51 = vpop.permute.xlu1 %8585  ;;  %v14199_v50 = vsel %vm842_vm4, %v5952_v2, %v5953_v23  ;;  %v14202_v22 = vsel %vm842_vm4, %v5953_v23, %v6446_v41  ;;  %v14234_v27 = vsel %vm842_vm4, %v5953_v23, %v5464_v31  ;;  %v5079_v41 = vld [vmem:[#allocation3 + $0x148] sm:$0x3]  ;;  %v5792_v2 = vrot.slane %v5126_v9, 1 }
 0x521   : > { %v8582_v31 = vunpack.i.l.bf16 %v14122_v11 }
 0x522   : > { %v14143_v0 = vpop.permute.xlu0 %8645  ;;  %8835 = vrot.lane.b32.xlu1 %v8834_v16, %s9290_s24  ;;  %v6452_v16 = vsel %vm842_vm4, %v6449_v44, %v6451_v30  ;;  %v8934_v44 = vpack.i.bf16 %v6276_v37, %v14148_v32  ;;  %v14247_v37 = vrot.slane %v5168_v52, 1 }
 0x523   : > { %v8939_v54 = vpack.i.bf16 %v6452_v16, %v14165_v38  ;;  %v5970_v16 = vrot.slane %v5127_v21, 2 }
 0x524   : > { %8920 = vrot.lane.b32.xlu0 %v8914_v59, %s9288_s21  ;;  %v14159_v15 = vpop.permute.xlu1 %8590  ;;  %v5118_v59 = vld [vmem:[#allocation3 + $0x118] sm:$0x3] }
 0x525   : > { %16111 = vst [vmem:[#allocation31_spill] sm:$0xff] %v14159_v15  ;;  %v5779_v58 = vrot.slane %v5118_v59, 1  ;;  %v5955_v25 = vrot.slane %v5118_v59, 2 }
 0x526   : > { %v14168_v61 = vpop.permute.xlu0 %8690  ;;  %8840 = vrot.lane.b32.xlu1 %v14005_v4, %s9289_s23  ;;  %v5288_v4 = vrot.slane %v5073_v13, 1 }
 0x527   : > { %16112 = vst [vmem:[#allocation22_spill] sm:$0xff] %v14168_v61  ;;  %v14224_v6 = vsel %vm665_vm3, %v5777_v34, %v5779_v58  ;;  %v5172_v58 = vld [vmem:[#allocation3 + $0x160] sm:$0x3] }
 0x528   : > { %8925 = vrot.lane.b32.xlu0 %v8924_v56, %s9287_s16  ;;  %v14176_v19 = vpop.permute.xlu1 %8595  ;;  %v14208_v47 = vsel %vm665_vm3, %v5777_v34, %v5288_v4  ;;  %v8964_v56 = vpack.i.bf16 %v14193_v1, %v14182_v7  ;;  %v14237_v34 = vsel %vm842_vm4, %v5953_v23, %v5955_v25  ;;  %v5167_v4 = vld [vmem:[#allocation3 + $0x138] sm:$0xff]  ;;  %v5303_v23 = vrot.slane %v5082_v42, 1 }
 0x529   : > { %16113 = vst [vmem:[#allocation66_spill] sm:$0xff] %v14176_v19  ;;  %v14253_v25 = vpack.i.bf16 %v5126_v9, %v5125_v43  ;;  %v6453_v32 = vrot.slane %v5167_v4, 2  ;;  %v14258_v13 = vpack.i.bf16 %v5168_v52, %v5167_v4  ;;  %v14263_v42 = vsel %vm665_vm3, %v5791_v49, %v5792_v2 }
 0x52a   : > { %v14184_v20 = vpop.permute.xlu0 %8695  ;;  %8885 = vrot.lane.b32.xlu1 %v8884_v60, %s9287_s16  ;;  %v14241_v60 = vrot.slane %v5126_v9, 2  ;;  %v6285_v9 = vrot.slane %v5172_v58, 1 }
 0x52c   : > { %8930 = vrot.lane.b32.xlu0 %v8929_v35, %s9281_s22  ;;  %v14205_v48 = vpop.permute.xlu1 %8600  ;;  %v5794_v35 = vrot.slane %v5127_v21, 1  ;;  %v14260_v21 = vrot.slane %v5168_v52, 2  ;;  %v14270_v43 = vsel %vm842_vm4, %v5967_v62, %v14241_v60  ;;  %v14280_v52 = vsel %vm842_vm4, %v14241_v60, %v5970_v16  ;;  %v14296_v16 = vld [vmem:[#allocation3 + $0x148] sm:$0x3] }
 0x52d   : > { %v14284_v49 = vsel %vm842_vm4, %v14241_v60, %v5479_v63  ;;  %v8587_v63 = vunpack.i.l.bf16 %v14139_v51  ;;  %v14312_v19 = vsel %vm665_vm3, %v5792_v2, %v6285_v9  ;;  %v9240_v9 = vld [vmem:[#allocation3 + $0x20] sm:$0xff] }
 0x52e   : > { %v14216_v18 = vpop.permute.xlu0 %8700  ;;  %8890 = vrot.lane.b32.xlu1 %v8889_v10, %s9281_s22  ;;  %v14266_v1 = vsel %vm665_vm3, %v5792_v2, %v5794_v35  ;;  %v8583_v35 = vunpack.i.h.bf16 %v14122_v11  ;;  %v6461_v11 = vrot.slane %v5172_v58, 2  ;;  %v16119_v58 = vpack.i.bf16 %v14202_v22, %v14199_v50 }
 0x52f   : > { %16114 = vst [vmem:[#allocation6_spill] sm:$0xff] %v14216_v18  ;;  %v16120_v22 = vpack.i.bf16 %v14208_v47, %v14182_v7  ;;  %v6456_v47 = vrot.slane %v5169_v29, 2 }
 0x530   : > { %8935 = vrot.lane.b32.xlu0 %v8934_v44, %s9291_s26  ;;  %v14231_v30 = vpop.permute.xlu1 %8605  ;;  %v5298_v44 = vrot.slane %v5079_v41, 1  ;;  %v6577_v18 = vsel %vm2698_vm14, %v9240_v9, %v8583_v35  ;;  %v8538_v35 = vunpack.i.h.bf16 %v14038_v5 }
 0x532   : > { %v14243_v10 = vpop.permute.xlu0 %8705  ;;  %8910 = vrot.lane.b32.xlu1 %v14118_v24, %s9289_s23  ;;  %v6277_v24 = vrot.slane %v5167_v4, 1  ;;  %v14276_v4 = vsel %vm665_vm3, %v5792_v2, %v5303_v23  ;;  %v5474_v23 = vrot.slane %v5079_v41, 2  ;;  %v6280_v41 = vrot.slane %v5169_v29, 1 }
 0x533   : > { %16115 = vst [vmem:[#allocation17_spill] sm:$0xff] %v14243_v10  ;;  %v8588_v10 = vunpack.i.h.bf16 %v14139_v51  ;;  %v8548_v2 = vunpack.i.h.bf16 %v14042_v12 }
 0x534   : > { %8940 = vrot.lane.b32.xlu0 %v8939_v54, %s9292_s18  ;;  %v14256_v59 = vpop.permute.xlu1 %8615  ;;  %v14288_v62 = vsel %vm665_vm3, %v6277_v24, %v14247_v37 }
 0x536   : > { %v14272_v54 = vpop.permute.xlu0 %8720  ;;  %8945 = vrot.lane.b32.xlu1 %v8944_v40, %s9284_s25  ;;  %v14294_v40 = vsel %vm665_vm3, %v14247_v37, %v5298_v44  ;;  %v14324_v44 = vsel %vm842_vm4, %v6453_v32, %v14260_v21 }
 0x537   : > { %16116 = vst [vmem:[#allocation5_spill] sm:$0xff] %v14272_v54  ;;  %v5789_v54 = vrot.slane %v14296_v16, 1 }
 0x538   : > { %8965 = vrot.lane.b32.xlu0 %v8964_v56, %s9291_s26  ;;  %v14301_v24 = vpop.permute.xlu1 %8630  ;;  %v16118_v56 = vpack.i.bf16 %v14196_v53, %v14165_v38  ;;  %v14332_v38 = vsel %vm842_vm4, %v14260_v21, %v5474_v23  ;;  %v8547_v53 = vunpack.i.l.bf16 %v14042_v12  ;;  %v8537_v23 = vunpack.i.l.bf16 %v14038_v5 }
 0x539   : > { %v9014_v12 = vpack.i.bf16 %v14312_v19, %v14263_v42  ;;  %v14365_v5 = vsel %vm665_vm3, %v14247_v37, %v5789_v54  ;;  %v16121_v54 = vpack.i.bf16 %v14224_v6, %v14182_v7  ;;  %v16122_v7 = vpack.i.bf16 %v14234_v27, %v14199_v50 }
 0x53a   : > { %v14314_v51 = vpop.permute.xlu0 %8725  ;;  %8950 = vrot.lane.b32.xlu1 %v16118_v56, %s9290_s24  ;;  %v6609_v56 = vsel %vm2076_vm7, %v6577_v18, %v8588_v10  ;;  %v8578_v6 = vunpack.i.h.bf16 %v14109_v36  ;;  %v16123_v27 = vpack.i.bf16 %v14237_v34, %v14199_v50  ;;  %v8698_v50 = vunpack.i.h.bf16 %v14184_v20 }
 0x53b   : > { %16117 = vst [vmem:[#allocation20_spill] sm:$0xff] %v14314_v51  ;;  %v9241_v51 = vld [vmem:[#allocation3 + $0x18] sm:$0xff]  ;;  %v8697_v34 = vunpack.i.l.bf16 %v14184_v20 }
 0x53c   : > { %v6576_v61 = vsel %vm2698_vm14, %v9241_v51, %v8582_v31  ;;  %8970 = vrot.lane.b32.xlu0 %v16119_v58, %s9292_s18  ;;  %v14341_v15 = vpop.permute.xlu1 %8635  ;;  %v14345_v31 = vsel %vm842_vm4, %v14241_v60, %v6461_v11  ;;  %v14361_v60 = vsel %vm665_vm3, %v14247_v37, %v6280_v41  ;;  %v14373_v51 = vsel %vm4378_vm6, %v14155_v26, %v8548_v2 }
 0x53d   : > { %v6608_v32 = vsel %vm2076_vm7, %v6576_v61, %v8587_v63  ;;  %v6641_v63 = vsel %vm4378_vm6, %v6609_v56, %v8538_v35  ;;  %v14377_v41 = vsel %vm4378_vm6, %v14211_v33, %v8547_v53  ;;  %v8573_v58 = vunpack.i.h.bf16 %v14093_v28  ;;  %v9242_v33 = vld [vmem:[#allocation3 + $0x50] sm:$0xff] }
 0x53e   : > { %v14351_v61 = vpop.permute.xlu0 %8740  ;;  %8955 = vrot.lane.b32.xlu1 %v16120_v22, %s9287_s16  ;;  %v6640_v10 = vsel %vm4378_vm6, %v6608_v32, %v8537_v23  ;;  %v8572_v37 = vunpack.i.l.bf16 %v14093_v28  ;;  %v8577_v23 = vunpack.i.l.bf16 %v14109_v36  ;;  %v14401_v22 = vsel %vm842_vm4, %v14260_v21, %v6456_v47 }
 0x53f   : > { %v6673_v28 = vsel %vm2175_vm10, %v6641_v63, %v8573_v58  ;;  %v8643_v63 = vunpack.i.h.bf16 %v14132_v39  ;;  %v8642_v58 = vunpack.i.l.bf16 %v14132_v39  ;;  %v8603_v32 = vunpack.i.h.bf16 %v14205_v48 }
 0x540   : > { %8975 = vrot.lane.b32.xlu0 %v16121_v54, %s9284_s25  ;;  %v8651_v9 = vpop.permute.xlu1 %8650  ;;  %v6672_v2 = vsel %vm2175_vm10, %v6640_v10, %v8572_v37  ;;  %v5965_v10 = vrot.slane %v14296_v16, 2  ;;  %v8648_v37 = vunpack.i.h.bf16 %v14143_v0  ;;  %v8647_v54 = vunpack.i.l.bf16 %v14143_v0  ;;  %v9243_v0 = vld [vmem:[#allocation3 + $0x48] sm:$0xff] }
 0x541   : > { %v8653_v53 = vunpack.i.h.bf16 %v8651_v9  ;;  %v8652_v56 = vunpack.i.l.bf16 %v8651_v9  ;;  %v6704_v9 = vsel %vm4443_vm8, %v6672_v2, %v8577_v23  ;;  %v6705_v47 = vsel %vm4443_vm8, %v6673_v28, %v8578_v6 }
 0x542   : > { %v8746_v35 = vpop.permute.xlu0 %8745  ;;  %8960 = vrot.lane.b32.xlu1 %v16122_v7, %s9281_s22  ;;  %v8602_v39 = vunpack.i.l.bf16 %v14205_v48  ;;  %v8618_v48 = vunpack.i.h.bf16 %v14256_v59  ;;  %v8743_v23 = vunpack.i.h.bf16 %v14351_v61  ;;  %v8742_v20 = vunpack.i.l.bf16 %v14351_v61 }
 0x543   : > { %v6581_v26 = vsel %vm2698_vm14, %v9242_v33, %v8653_v53  ;;  %v6580_v11 = vsel %vm2698_vm14, %v9243_v0, %v8652_v56  ;;  %v8617_v33 = vunpack.i.l.bf16 %v14256_v59 }
 0x544   : > { %8980 = vrot.lane.b32.xlu0 %v16123_v27, %s9290_s24  ;;  %v8656_v36 = vpop.permute.xlu1 %8655 }
 0x545   : > { %v8658_v7 = vunpack.i.h.bf16 %v8656_v36  ;;  %v8657_v29 = vunpack.i.l.bf16 %v8656_v36 }
 0x546   : > { %v14418_v18 = vpop.permute.xlu0 %8770  ;;  %8990 = vrot.lane.b32.xlu1 %v14253_v25, %s9289_s23 }
 0x547   : > { %v6612_v2 = vsel %vm2076_vm7, %v6580_v11, %v8657_v29  ;;  %v6613_v28 = vsel %vm2076_vm7, %v6581_v26, %v8658_v7 }
 0x548   : > { %v6644_v53 = vsel %vm4378_vm6, %v6612_v2, %v8602_v39  ;;  %v6645_v56 = vsel %vm4378_vm6, %v6613_v28, %v8603_v32  ;;  %8985 = vrot.lane.b32.xlu0 %v14253_v25, %s9288_s21  ;;  %v8661_v6 = vpop.permute.xlu1 %8660  ;;  %v8748_v25 = vunpack.i.h.bf16 %v8746_v35  ;;  %v8747_v32 = vunpack.i.l.bf16 %v8746_v35 }
 0x549   : > { %v6676_v11 = vsel %vm2175_vm10, %v6644_v53, %v8642_v58  ;;  %v6677_v29 = vsel %vm2175_vm10, %v6645_v56, %v8643_v63  ;;  %v8663_v27 = vunpack.i.h.bf16 %v8661_v6  ;;  %v8662_v36 = vunpack.i.l.bf16 %v8661_v6  ;;  %v14450_v53 = vld [vmem:[#allocation3 + $0x180] sm:$0xff]  ;;  %v16138_v56 = vld [vmem:[#allocation31_spill] sm:$0xff] }
 0x54a   : > { %v6708_v26 = vsel %vm4443_vm8, %v6676_v11, %v8647_v54  ;;  %v6709_v59 = vsel %vm4443_vm8, %v6677_v29, %v8648_v37  ;;  %v14438_v7 = vpop.permute.xlu0 %8775  ;;  %8995 = vrot.lane.b32.xlu1 %v14258_v13, %s9288_s21  ;;  %v6737_v58 = vsel %vm2310_vm13, %v6705_v47, %v8618_v48  ;;  %v6736_v63 = vsel %vm2310_vm13, %v6704_v9, %v8617_v33  ;;  %v5132_v33 = vld [vmem:[#allocation3 + $0x188] sm:$0xff] }
 0x54b   : > { %v6740_v39 = vsel %vm2310_vm13, %v6708_v26, %v8697_v34  ;;  %v6741_v61 = vsel %vm2310_vm13, %v6709_v59, %v8698_v50  ;;  %v6769_v9 = vsel %vm4508_vm9, %v6737_v58, %v8663_v27  ;;  %v6768_v47 = vsel %vm4508_vm9, %v6736_v63, %v8662_v36  ;;  %v14485_v36 = vld [vmem:[#allocation3 + $0x168] sm:$0xff] }
 0x54c   : > { %9000 = vrot.lane.b32.xlu0 %v14258_v13, %s9289_s23  ;;  %v8666_v37 = vpop.permute.xlu1 %8665  ;;  %v6772_v54 = vsel %vm4508_vm9, %v6740_v39, %v8742_v20  ;;  %v6773_v0 = vsel %vm4508_vm9, %v6741_v61, %v8743_v23  ;;  %v16126_v34 = vpack.i.bf16 %v14266_v1, %v14263_v42  ;;  %v9049_v48 = vpack.i.bf16 %v14401_v22, %v14324_v44  ;;  %v14495_v61 = vld [vmem:[#allocation3 + $0x190] sm:$0x3] }
 0x54d   : > { %v8668_v2 = vunpack.i.h.bf16 %v8666_v37  ;;  %v8667_v28 = vunpack.i.l.bf16 %v8666_v37  ;;  %v14453_v35 = vsel %vm4541_vm11, %v6772_v54, %v8747_v32  ;;  %v14456_v50 = vsel %vm4541_vm11, %v6773_v0, %v8748_v25 }
 0x54e   : > { %16124 = vst [vmem:[#allocation33_spill] sm:$0xff] %v14453_v35  ;;  %16125 = vst [vmem:[#allocation23_spill] sm:$0xff] %v14456_v50  ;;  %v14460_v13 = vpop.permute.xlu0 %8780  ;;  %9025 = vrot.lane.b32.xlu1 %v16126_v34, %s9284_s25  ;;  %v8553_v6 = vunpack.i.h.bf16 %v14052_v8  ;;  %v8552_v23 = vunpack.i.l.bf16 %v14052_v8  ;;  %v8558_v1 = vunpack.i.h.bf16 %v14064_v55  ;;  %v8557_v29 = vunpack.i.l.bf16 %v14064_v55 }
 0x54f   : > { %v14473_v20 = vsel %vm4541_vm11, %v6768_v47, %v8667_v28  ;;  %v14476_v11 = vsel %vm4541_vm11, %v6769_v9, %v8668_v2  ;;  %v16128_v26 = vpack.i.bf16 %v14276_v4, %v14263_v42  ;;  %v5801_v27 = vrot.slane %v14450_v53, 1  ;;  %v14497_v4 = vld [vmem:[#allocation3 + $0x190] sm:$0x3]  ;;  %v9244_v2 = vld [vmem:[#allocation3 + $0x38] sm:$0xff] }
 0x550   : > { %16127 = vst [vmem:[#allocation27_spill] sm:$0xff] %v14473_v20  ;;  %v8671_v59 = vpop.permute.xlu1 %8670  ;;  %v8613_v25 = vunpack.i.h.bf16 %v14078_v46  ;;  %v8612_v32 = vunpack.i.l.bf16 %v14078_v46  ;;  %v5977_v39 = vrot.slane %v14450_v53, 2  ;;  %v14493_v55 = vpack.i.bf16 %v5132_v33, %v14450_v53  ;;  %v9245_v9 = vld [vmem:[#allocation3 + $0x30] sm:$0xff] }
 0x551   : > { %9005 = vrot.lane.b32.xlu0 %v16128_v26, %s9287_s16  ;;  %v8673_v58 = vunpack.i.h.bf16 %v8671_v59  ;;  %v8672_v63 = vunpack.i.l.bf16 %v8671_v59  ;;  %v16129_v54 = vpack.i.bf16 %v14280_v52, %v14270_v43  ;;  %v14509_v46 = vsel %vm842_vm4, %v14260_v21, %v5965_v10 }
 0x552   : > { %v14499_v37 = vpop.permute.xlu0 %8785  ;;  %v5802_v0 = vrot.slane %v5132_v33, 1  ;;  %v6579_v28 = vsel %vm2698_vm14, %v9244_v2, %v8553_v6  ;;  %v6578_v47 = vsel %vm2698_vm14, %v9245_v9, %v8552_v23  ;;  %v14513_v34 = vrot.slane %v5132_v33, 2 }
 0x553   : > { %9030 = vrot.lane.b32.xlu1 %v16129_v54, %s9290_s24  ;;  %v6287_v26 = vrot.slane %v14485_v36, 1  ;;  %v6610_v52 = vsel %vm2076_vm7, %v6578_v47, %v8557_v29  ;;  %v6611_v59 = vsel %vm2076_vm7, %v6579_v28, %v8558_v1  ;;  %v16130_v21 = vpack.i.bf16 %v14284_v49, %v14270_v43 }
 0x554   : > { %v8676_v16 = vpop.permute.xlu1 %8675  ;;  %v5804_v10 = vrot.slane %v14495_v61, 1  ;;  %v6295_v6 = vrot.slane %v14497_v4, 1  ;;  %v6643_v23 = vsel %vm4378_vm6, %v6611_v59, %v8613_v25  ;;  %v6642_v33 = vsel %vm4378_vm6, %v6610_v52, %v8612_v32 }
 0x555   : > { %9010 = vrot.lane.b32.xlu0 %v16130_v21, %s9281_s22  ;;  %v8678_v54 = vunpack.i.h.bf16 %v8676_v16  ;;  %v8677_v2 = vunpack.i.l.bf16 %v8676_v16  ;;  %v8608_v29 = vunpack.i.h.bf16 %v14231_v30  ;;  %v8607_v1 = vunpack.i.l.bf16 %v14231_v30  ;;  %v5174_v30 = vld [vmem:[#allocation3 + $0x170] sm:$0xff]  ;;  %v5085_v21 = vld [vmem:[#allocation3 + $0x178] sm:$0x3] }
 0x556   : > { %v6675_v28 = vsel %vm2175_vm10, %v6643_v23, %v8673_v58  ;;  %v6674_v49 = vsel %vm2175_vm10, %v6642_v33, %v8672_v63  ;;  %v14530_v9 = vpop.permute.xlu0 %8800  ;;  %v16131_v47 = vpack.i.bf16 %v14294_v40, %v14288_v62  ;;  %v8633_v25 = vunpack.i.h.bf16 %v14301_v24 }
 0x557   : > { %v8632_v32 = vunpack.i.l.bf16 %v14301_v24  ;;  %v6706_v52 = vsel %vm4443_vm8, %v6674_v49, %v8677_v2  ;;  %v6707_v59 = vsel %vm4443_vm8, %v6675_v28, %v8678_v54  ;;  %v8638_v58 = vunpack.i.h.bf16 %v14341_v15  ;;  %v5130_v54 = vld [vmem:[#allocation3 + $0x178] sm:$0x3] }
 0x558   : > { %9035 = vrot.lane.b32.xlu1 %v16131_v47, %s9287_s16  ;;  %v8637_v63 = vunpack.i.l.bf16 %v14341_v15  ;;  %v6738_v16 = vsel %vm2310_vm13, %v6706_v52, %v8607_v1  ;;  %v6739_v23 = vsel %vm2310_vm13, %v6707_v59, %v8608_v29  ;;  %v14548_v40 = vpop.permute.xlu1 %8680  ;;  %v9059_v24 = vpack.i.bf16 %v14509_v46, %v14324_v44 }
 0x559   : > { %9015 = vrot.lane.b32.xlu0 %v9014_v12, %s9291_s26  ;;  %v6463_v33 = vrot.slane %v14485_v36, 2  ;;  %v6770_v2 = vsel %vm4508_vm9, %v6738_v16, %v8632_v32  ;;  %v6771_v15 = vsel %vm4508_vm9, %v6739_v23, %v8633_v25  ;;  %v16132_v29 = vpack.i.bf16 %v14332_v38, %v14324_v44  ;;  %v5175_v12 = vld [vmem:[#allocation3 + $0x178] sm:$0x3] }
 0x55a   : > { %v14555_v1 = vpop.permute.xlu0 %8805  ;;  %v6288_v19 = vrot.slane %v5174_v30, 1  ;;  %v5308_v42 = vrot.slane %v5085_v21, 1  ;;  %v14562_v28 = vsel %vm4541_vm11, %v6770_v2, %v8637_v63  ;;  %v14565_v46 = vsel %vm4541_vm11, %v6771_v15, %v8638_v58 }
 0x55b   : > { %16133 = vst [vmem:[#allocation43_spill] sm:$0xff] %v14562_v28  ;;  %16134 = vst [vmem:[#allocation32_spill] sm:$0xff] %v14565_v46  ;;  %v6464_v49 = vrot.slane %v5174_v30, 2  ;;  %v14570_v47 = vsel %vm665_vm3, %v5801_v27, %v5802_v0  ;;  %v6471_v25 = vrot.slane %v14497_v4, 2  ;;  %v16135_v32 = vpack.i.bf16 %v14345_v31, %v14270_v43  ;;  %v14675_v4 = vld [vmem:[#allocation3 + $0xe8] sm:$0x3] }
 0x55c   : > { %9040 = vrot.lane.b32.xlu1 %v16132_v29, %s9281_s22  ;;  %v14579_v52 = vpop.permute.xlu1 %8685  ;;  %v14582_v59 = vsel %vm665_vm3, %v5802_v0, %v5804_v10  ;;  %v14585_v58 = vsel %vm665_vm3, %v5802_v0, %v6295_v6  ;;  %v5484_v27 = vrot.slane %v5085_v21, 2  ;;  %v5799_v63 = vrot.slane %v5130_v54, 1  ;;  %v9246_v43 = vld [vmem:[#allocation3 + $0x68] sm:$0xff] }
 0x55d   : > { %9020 = vrot.lane.b32.xlu0 %v16135_v32, %s9292_s18  ;;  %v14589_v16 = vpack.i.bf16 %v5174_v30, %v14485_v36  ;;  %v6290_v23 = vrot.slane %v5175_v12, 1  ;;  %v5975_v2 = vrot.slane %v5130_v54, 2  ;;  %v16136_v10 = vpack.i.bf16 %v14361_v60, %v14288_v62  ;;  %v9248_v30 = vld [vmem:[#allocation3 + $0x80] sm:$0xff] }
 0x55e   : > { %v14592_v31 = vpop.permute.xlu0 %8820  ;;  %v14599_v0 = vsel %vm665_vm3, %v6287_v26, %v6288_v19  ;;  %v14602_v6 = vsel %vm665_vm3, %v6288_v19, %v5308_v42  ;;  %v14608_v36 = vsel %vm842_vm4, %v5977_v39, %v14513_v34  ;;  %v14616_v60 = vsel %vm842_vm4, %v14513_v34, %v6471_v25 }
 0x55f   : > { %v14619_v26 = vsel %vm842_vm4, %v6463_v33, %v6464_v49  ;;  %v16137_v53 = vpack.i.bf16 %v14365_v5, %v14288_v62  ;;  %v14628_v54 = vsel %vm842_vm4, %v6464_v49, %v5484_v27  ;;  %v14631_v15 = vsel %vm665_vm3, %v6288_v19, %v5799_v63 }
 0x560   : > { %9045 = vrot.lane.b32.xlu1 %v16136_v10, %s9291_s26  ;;  %v14625_v39 = vpop.permute.xlu1 %8710  ;;  %v6466_v29 = vrot.slane %v5175_v12, 2  ;;  %v14634_v42 = vsel %vm665_vm3, %v6288_v19, %v6290_v23  ;;  %v14637_v33 = vsel %vm842_vm4, %v6464_v49, %v5975_v2  ;;  %v8623_v62 = vunpack.i.h.bf16 %v14102_v17  ;;  %v14656_v23 = vld [vmem:[#allocation3 + $0xd8] sm:$0xff]  ;;  %v14669_v10 = vld [vmem:[#allocation3 + $0xe0] sm:$0xff] }
 0x561   : > { %9055 = vrot.lane.b32.xlu0 %v16137_v53, %s9284_s25  ;;  %v8622_v32 = vunpack.i.l.bf16 %v14102_v17  ;;  %v8628_v2 = vunpack.i.h.bf16 %v14115_v14  ;;  %v8627_v53 = vunpack.i.l.bf16 %v14115_v14  ;;  %v8593_v38 = vunpack.i.h.bf16 %v16138_v56 }
 0x562   : > { %v14641_v5 = vpop.permute.xlu0 %8825  ;;  %v8592_v8 = vunpack.i.l.bf16 %v16138_v56  ;;  %v6583_v22 = vsel %vm2698_vm14, %v9246_v43, %v8623_v62  ;;  %v8682_v19 = vunpack.i.l.bf16 %v14548_v40  ;;  %v8688_v43 = vunpack.i.h.bf16 %v14579_v52 }
 0x563   : > { %v6615_v62 = vsel %vm2076_vm7, %v6583_v22, %v8628_v2  ;;  %v16140_v22 = vld [vmem:[#allocation66_spill] sm:$0xff]  ;;  %v8687_v21 = vunpack.i.l.bf16 %v14579_v52 }
 0x564   : > { %9050 = vrot.lane.b32.xlu1 %v9049_v48, %s9292_s18  ;;  %v14660_v44 = vpop.permute.xlu1 %8715  ;;  %v14667_v48 = vsel %vm842_vm4, %v6464_v49, %v6466_v29  ;;  %v9247_v29 = vld [vmem:[#allocation3 + $0x60] sm:$0xff] }
 0x565   : > { %9060 = vrot.lane.b32.xlu0 %v9059_v24, %s9290_s24  ;;  %v16139_v24 = vld [vmem:[#allocation22_spill] sm:$0xff]  ;;  %v6582_v56 = vsel %vm2698_vm14, %v9247_v29, %v8622_v32  ;;  %v14698_v32 = vsel %vm2175_vm10, %v14373_v51, %v8593_v38  ;;  %v14702_v29 = vsel %vm2175_vm10, %v14377_v41, %v8592_v8  ;;  %v16141_v38 = vld [vmem:[#allocation5_spill] sm:$0xff] }
 0x566   : > { %v8693_v25 = vunpack.i.h.bf16 %v16139_v24  ;;  %v8692_v17 = vunpack.i.l.bf16 %v16139_v24  ;;  %v14679_v63 = vpop.permute.xlu0 %8845  ;;  %v6614_v12 = vsel %vm2076_vm7, %v6582_v56, %v8627_v53  ;;  %v8723_v41 = vunpack.i.h.bf16 %v16141_v38 }
 0x567   : > { %v8722_v8 = vunpack.i.l.bf16 %v16141_v38  ;;  %v8777_v56 = vunpack.i.l.bf16 %v14438_v7 }
 0x568   : > { %9070 = vrot.lane.b32.xlu1 %v14493_v55, %s9289_s23  ;;  %v8731_v24 = vpop.permute.xlu1 %8730  ;;  %v14705_v2 = vsel %vm4378_vm6, %v6615_v62, %v8693_v25  ;;  %v16142_v25 = vld [vmem:[#allocation20_spill] sm:$0xff]  ;;  %v8683_v62 = vunpack.i.h.bf16 %v14548_v40  ;;  %v8822_v40 = vunpack.i.l.bf16 %v14592_v31 }
 0x569   : > { %9065 = vrot.lane.b32.xlu0 %v14493_v55, %s9288_s21  ;;  %v14708_v55 = vsel %vm4378_vm6, %v6614_v12, %v8692_v17  ;;  %v8733_v27 = vunpack.i.h.bf16 %v8731_v24  ;;  %v8732_v49 = vunpack.i.l.bf16 %v8731_v24  ;;  %v8728_v53 = vunpack.i.h.bf16 %v16142_v25 }
 0x56a   : > { %v14711_v14 = vpop.permute.xlu0 %8850  ;;  %v8727_v12 = vunpack.i.l.bf16 %v16142_v25  ;;  %v8778_v17 = vunpack.i.h.bf16 %v14438_v7  ;;  %v8823_v25 = vunpack.i.h.bf16 %v14592_v31  ;;  %v9249_v7 = vld [vmem:[#allocation3 + $0x78] sm:$0xff]  ;;  %v8828_v31 = vunpack.i.h.bf16 %v14641_v5 }
 0x56b   : > { %v6585_v35 = vsel %vm2698_vm14, %v9248_v30, %v8733_v27  ;;  %v6584_v50 = vsel %vm2698_vm14, %v9249_v7, %v8732_v49  ;;  %v16144_v7 = vpack.i.bf16 %v14585_v58, %v14570_v47 }
 0x56c   : > { %9075 = vrot.lane.b32.xlu1 %v14589_v16, %s9288_s21  ;;  %v8736_v24 = vpop.permute.xlu1 %8735 }
 0x56d   : > { %9080 = vrot.lane.b32.xlu0 %v14589_v16, %s9289_s23  ;;  %v8738_v51 = vunpack.i.h.bf16 %v8736_v24  ;;  %v8737_v38 = vunpack.i.l.bf16 %v8736_v24  ;;  %v16143_v16 = vpack.i.bf16 %v14582_v59, %v14570_v47  ;;  %v8713_v24 = vunpack.i.h.bf16 %v14625_v39 }
 0x56e   : > { %v8856_v28 = vpop.permute.xlu0 %8855  ;;  %v16145_v47 = vpack.i.bf16 %v14602_v6, %v14599_v0 }
 0x56f   : > { %v6616_v52 = vsel %vm2076_vm7, %v6584_v50, %v8737_v38  ;;  %v6617_v46 = vsel %vm2076_vm7, %v6585_v35, %v8738_v51  ;;  %v8858_v27 = vunpack.i.h.bf16 %v8856_v28  ;;  %v8857_v49 = vunpack.i.l.bf16 %v8856_v28 }
 0x570   : > { %9095 = vrot.lane.b32.xlu1 %v16143_v16, %s9284_s25  ;;  %v6648_v20 = vsel %vm4378_vm6, %v6616_v52, %v8682_v19  ;;  %v6649_v30 = vsel %vm4378_vm6, %v6617_v46, %v8683_v62  ;;  %v8751_v59 = vpop.permute.xlu1 %8750  ;;  %v8827_v16 = vunpack.i.l.bf16 %v14641_v5  ;;  %v16146_v52 = vpack.i.bf16 %v14616_v60, %v14608_v36 }
 0x571   : > { %9085 = vrot.lane.b32.xlu0 %v16144_v7, %s9291_s26  ;;  %v6680_v50 = vsel %vm2175_vm10, %v6648_v20, %v8722_v8  ;;  %v6681_v35 = vsel %vm2175_vm10, %v6649_v30, %v8723_v41  ;;  %v8753_v51 = vunpack.i.h.bf16 %v8751_v59  ;;  %v8752_v28 = vunpack.i.l.bf16 %v8751_v59  ;;  %v9250_v8 = vld [vmem:[#allocation3 + $0xf8] sm:$0xff] }
 0x572   : > { %v6712_v19 = vsel %vm4443_vm8, %v6680_v50, %v8727_v12  ;;  %v6713_v46 = vsel %vm4443_vm8, %v6681_v35, %v8728_v53  ;;  %v8861_v62 = vpop.permute.xlu0 %8860  ;;  %v6595_v41 = vsel %vm2698_vm14, %v9250_v8, %v8858_v27  ;;  %v9251_v12 = vld [vmem:[#allocation3 + $0xf0] sm:$0xff]  ;;  %v16151_v8 = vpack.i.bf16 %v14634_v42, %v14599_v0 }
 0x573   : > { %v8863_v58 = vunpack.i.h.bf16 %v8861_v62  ;;  %v8862_v38 = vunpack.i.l.bf16 %v8861_v62  ;;  %v6744_v5 = vsel %vm2310_vm13, %v6712_v19, %v8777_v56  ;;  %v6745_v20 = vsel %vm2310_vm13, %v6713_v46, %v8778_v17  ;;  %v14802_v62 = vld [vmem:[#allocation3 + $0x198] sm:$0xff] }
 0x574   : > { %9100 = vrot.lane.b32.xlu1 %v16145_v47, %s9287_s16  ;;  %v6594_v53 = vsel %vm2698_vm14, %v9251_v12, %v8857_v49  ;;  %v8756_v30 = vpop.permute.xlu1 %8755  ;;  %v6776_v6 = vsel %vm4508_vm9, %v6744_v5, %v8822_v40  ;;  %v6777_v7 = vsel %vm4508_vm9, %v6745_v20, %v8823_v25  ;;  %v6679_v49 = vsel %vm2175_vm10, %v14705_v2, %v8753_v51  ;;  %v14791_v51 = vld [vmem:[#allocation3 + $0x1a0] sm:$0xff] }
 0x575   : > { %9090 = vrot.lane.b32.xlu0 %v16146_v52, %s9292_s18  ;;  %v14766_v56 = vsel %vm2076_vm7, %v6594_v53, %v8862_v38  ;;  %v14769_v17 = vsel %vm2076_vm7, %v6595_v41, %v8863_v58  ;;  %v8758_v27 = vunpack.i.h.bf16 %v8756_v30  ;;  %v8757_v59 = vunpack.i.l.bf16 %v8756_v30  ;;  %v5181_v38 = vld [vmem:[#allocation3 + $0x1a8] sm:$0x3] }
 0x576   : > { %v6678_v60 = vsel %vm2175_vm10, %v14708_v55, %v8752_v28  ;;  %v14775_v50 = vpop.permute.xlu0 %8865  ;;  %v16147_v25 = vpack.i.bf16 %v14628_v54, %v14619_v26  ;;  %v14782_v40 = vsel %vm4541_vm11, %v6776_v6, %v8827_v16  ;;  %v14785_v35 = vsel %vm4541_vm11, %v6777_v7, %v8828_v31 }
 0x577   : > { %v8712_v19 = vunpack.i.l.bf16 %v14625_v39  ;;  %v8718_v2 = vunpack.i.h.bf16 %v14660_v44  ;;  %v6710_v46 = vsel %vm4443_vm8, %v6678_v60, %v8757_v59  ;;  %v6711_v55 = vsel %vm4443_vm8, %v6679_v49, %v8758_v27 }
 0x578   : > { %9105 = vrot.lane.b32.xlu1 %v16147_v25, %s9281_s22  ;;  %v8717_v28 = vunpack.i.l.bf16 %v14660_v44  ;;  %v6742_v54 = vsel %vm2310_vm13, %v6710_v46, %v8687_v21  ;;  %v6743_v16 = vsel %vm2310_vm13, %v6711_v55, %v8688_v43  ;;  %v16148_v31 = vpack.i.bf16 %v14631_v15, %v14599_v0  ;;  %v14800_v39 = vpop.permute.xlu1 %8760 }
 0x579   : > { %v6836_v47 = vpack.c.bf16 %v14785_v35, %v14782_v40  ;;  %v16149_v58 = vunpack.i.l.bf16 %v16140_v22  ;;  %v16150_v21 = vunpack.i.h.bf16 %v16140_v22  ;;  %v6774_v15 = vsel %vm4508_vm9, %v6742_v54, %v8712_v19 }
 0x57a   : > { %9125 = vrot.lane.b32.xlu0 %v16148_v31, %s9284_s25  ;;  %v6775_v5 = vsel %vm4508_vm9, %v6743_v16, %v8713_v24  ;;  %v14816_v20 = vpop.permute.xlu0 %8870  ;;  %v16152_v41 = vrot.slane %v14669_v10, 1  ;;  %v14829_v12 = vsel %vm4541_vm11, %v6774_v15, %v8717_v28  ;;  %v16154_v53 = vrot.slane %v14495_v61, 2  ;;  %v16165_v15 = vld [vmem:[#allocation6_spill] sm:$0xff] }
 0x57b   : > { %v6702_v44 = vsel %vm4443_vm8, %v14702_v29, %v16149_v58  ;;  %v6703_v43 = vsel %vm4443_vm8, %v14698_v32, %v16150_v21  ;;  %v16153_v29 = vrot.slane %v14656_v23, 1  ;;  %v6298_v32 = vrot.slane %v14791_v51, 1 }
 0x57c   : > { %9110 = vrot.lane.b32.xlu1 %v16151_v8, %s9291_s26  ;;  %v14832_v24 = vsel %vm4541_vm11, %v6775_v5, %v8718_v2  ;;  %v5981_v0 = vsel %vm842_vm4, %v14513_v34, %v16154_v53  ;;  %v16155_v42 = vrot.slane %v14675_v4, 1  ;;  %v16156_v52 = vmov %v16152_v41  ;;  %v14856_v60 = vpop.permute.xlu1 %8765 }
 0x57d   : > { %v6259_v22 = vsel %vm665_vm3, %v16153_v29, %v16152_v41  ;;  %v6297_v6 = vrot.slane %v14802_v62, 1  ;;  %v6835_v7 = vpack.c.bf16 %v14832_v24, %v14829_v12  ;;  %v16157_v27 = vunpack.i.l.bf16 %v14046_v57  ;;  %v16167_v29 = vld [vmem:[#allocation17_spill] sm:$0xff] }
 0x57e   : > { %v6261_v30 = vsel %vm665_vm3, %v16156_v52, %v16155_v42  ;;  %v16158_v61 = vunpack.i.h.bf16 %v14046_v57  ;;  %v16159_v34 = vpack.i.bf16 %v14637_v33, %v14619_v26  ;;  %v6436_v25 = vrot.slane %v14675_v4, 2  ;;  %v14862_v57 = vpop.permute.xlu0 %8875 }
 0x57f   : > { %v6734_v59 = vsel %vm2310_vm13, %v6702_v44, %v16157_v27  ;;  %v6300_v19 = vrot.slane %v5181_v38, 1  ;;  %v8567_v2 = vunpack.i.l.bf16 %v14076_v45  ;;  %v6474_v46 = vrot.slane %v14791_v51, 2 }
 0x580   : > { %v6735_v49 = vsel %vm2310_vm13, %v6703_v43, %v16158_v61  ;;  %9130 = vrot.lane.b32.xlu0 %v16159_v34, %s9290_s24  ;;  %v6473_v55 = vrot.slane %v14802_v62, 2  ;;  %v6476_v28 = vrot.slane %v5181_v38, 2  ;;  %v16160_v54 = vpack.i.bf16 %v14667_v48, %v14619_v26 }
 0x581   : > { %v9134_v33 = vpack.i.bf16 %v14669_v10, %v14656_v23  ;;  %v9119_v4 = vpack.i.bf16 %v5981_v0, %v14608_v36  ;;  %v9139_v16 = vpack.i.bf16 %v14791_v51, %v14802_v62  ;;  %v16161_v31 = vrot.slane %v14669_v10, 2 }
 0x582   : > { %9115 = vrot.lane.b32.xlu1 %v16160_v54, %s9292_s18  ;;  %v16162_v58 = vrot.slane %v14656_v23, 2  ;;  %v9144_v21 = vpack.i.bf16 %v6261_v30, %v6259_v22  ;;  %v14879_v43 = vsel %vm665_vm3, %v6297_v6, %v6298_v32  ;;  %v16163_v26 = vunpack.i.l.bf16 %v14056_v3  ;;  %v14890_v23 = vpop.permute.xlu1 %8790  ;;  %v14906_v30 = vpop.permute.xlu0 %8880  ;;  %v9254_v54 = vld [vmem:[#allocation3 + $0xc8] sm:$0xff] }
 0x583   : > { %v16164_v38 = vunpack.i.h.bf16 %v14056_v3  ;;  %v8703_v51 = vunpack.i.h.bf16 %v16165_v15  ;;  %v8702_v62 = vunpack.i.l.bf16 %v16165_v15  ;;  %v16166_v5 = vmov %v16161_v31 }
 0x584   : > { %v6435_v44 = vsel %vm842_vm4, %v16162_v58, %v16161_v31  ;;  %v6766_v48 = vsel %vm4508_vm9, %v6734_v59, %v16163_v26  ;;  %9135 = vrot.lane.b32.xlu0 %v9134_v33, %s9288_s21  ;;  %v6437_v8 = vsel %vm842_vm4, %v16166_v5, %v6436_v25  ;;  %v6301_v41 = vsel %vm665_vm3, %v6298_v32, %v6300_v19  ;;  %v9253_v25 = vld [vmem:[#allocation3 + $0x90] sm:$0xff] }
 0x585   : > { %v6767_v36 = vsel %vm4508_vm9, %v6735_v49, %v16164_v38  ;;  %v8708_v22 = vunpack.i.h.bf16 %v16167_v29  ;;  %v8707_v3 = vunpack.i.l.bf16 %v16167_v29  ;;  %v14899_v53 = vsel %vm842_vm4, %v6473_v55, %v6474_v46  ;;  %v9252_v49 = vld [vmem:[#allocation3 + $0x98] sm:$0xff] }
 0x586   : > { %v14902_v0 = vsel %vm842_vm4, %v6474_v46, %v6476_v28  ;;  %v8783_v42 = vunpack.i.h.bf16 %v14460_v13  ;;  %v8782_v52 = vunpack.i.l.bf16 %v14460_v13  ;;  %9120 = vrot.lane.b32.xlu1 %v9119_v4, %s9290_s24  ;;  %v14910_v10 = vsel %vm4541_vm11, %v6766_v48, %v8567_v2  ;;  %v9255_v4 = vld [vmem:[#allocation3 + $0xc0] sm:$0xff] }
 0x587   : > { %v16168_v32 = vunpack.i.h.bf16 %v14076_v45  ;;  %v8773_v27 = vunpack.i.h.bf16 %v14418_v18  ;;  %v8772_v59 = vunpack.i.l.bf16 %v14418_v18  ;;  %v8788_v61 = vunpack.i.h.bf16 %v14499_v37  ;;  %v14924_v45 = vpop.permute.xlu1 %8795 }
 0x588   : > { %v8787_v13 = vunpack.i.l.bf16 %v14499_v37  ;;  %v6587_v34 = vsel %vm2698_vm14, %v9252_v49, %v8703_v51  ;;  %v6586_v19 = vsel %vm2698_vm14, %v9253_v25, %v8702_v62  ;;  %9145 = vrot.lane.b32.xlu0 %v9144_v21, %s9291_s26  ;;  %v9154_v2 = vpack.i.bf16 %v6437_v8, %v6435_v44  ;;  %v8896_v21 = vpop.permute.xlu0 %8895 }
 0x589   : > { %v14915_v6 = vsel %vm4541_vm11, %v6767_v36, %v16168_v32  ;;  %v9149_v46 = vpack.i.bf16 %v6301_v41, %v14879_v43  ;;  %v6618_v55 = vsel %vm2076_vm7, %v6586_v19, %v8707_v3  ;;  %v6619_v18 = vsel %vm2076_vm7, %v6587_v34, %v8708_v22  ;;  %v14949_v36 = vld [vmem:[%s15307_s7] sm:$0xf] }
 0x58a   : > { %v9159_v37 = vpack.i.bf16 %v14902_v0, %v14899_v53  ;;  %v6831_v28 = vpack.c.bf16 %v14915_v6, %v14910_v10  ;;  %v6591_v33 = vsel %vm2698_vm14, %v9254_v54, %v8783_v42  ;;  %v6590_v31 = vsel %vm2698_vm14, %v9255_v4, %v8782_v52  ;;  %9140 = vrot.lane.b32.xlu1 %v9139_v16, %s9288_s21 }
 0x58b   : > { %v8853_v58 = vunpack.i.h.bf16 %v14711_v14  ;;  %v8852_v44 = vunpack.i.l.bf16 %v14711_v14  ;;  %v14939_v43 = vsel %vm4378_vm6, %v6619_v18, %v8773_v27  ;;  %v14942_v26 = vsel %vm4378_vm6, %v6618_v55, %v8772_v59  ;;  %v8811_v62 = vpop.permute.xlu1 %8810  ;;  %7130 = vmatprep.mubr.msk.bf16.mxu0 %vm4618_vm12, %v14949_v36 }
 0x58c   : > { %v6622_v48 = vsel %vm2076_vm7, %v6590_v31, %v8787_v13  ;;  %v6623_v38 = vsel %vm2076_vm7, %v6591_v33, %v8788_v61  ;;  %v8803_v14 = vunpack.i.h.bf16 %v14530_v9  ;;  %v8802_v15 = vunpack.i.l.bf16 %v14530_v9  ;;  %9155 = vrot.lane.b32.xlu0 %v9154_v2, %s9292_s18  ;;  %v8901_v0 = vpop.permute.xlu0 %8900  ;;  %v9256_v13 = vld [vmem:[#allocation3 + $0xb0] sm:$0xff] }
 0x58d   : > { %v8898_v16 = vunpack.i.h.bf16 %v8896_v21  ;;  %v8897_v51 = vunpack.i.l.bf16 %v8896_v21  ;;  %v8808_v5 = vunpack.i.h.bf16 %v14555_v1  ;;  %v8848_v8 = vunpack.i.h.bf16 %v14679_v63  ;;  %v6939_v33 = vld [vmem:[%s15308_s8] sm:$0xff] }
 0x58e   : > { %v8847_v41 = vunpack.i.l.bf16 %v14679_v63  ;;  %v8813_v29 = vunpack.i.h.bf16 %v8811_v62  ;;  %v6655_v22 = vsel %vm4378_vm6, %v6623_v38, %v8853_v58  ;;  %v6654_v3 = vsel %vm4378_vm6, %v6622_v48, %v8852_v44  ;;  %9150 = vrot.lane.b32.xlu1 %v9149_v46, %s9291_s26  ;;  %v9257_v46 = vld [vmem:[#allocation3 + $0xa8] sm:$0xff]  ;;  %v6947_v48 = vld [vmem:[%s15309_s9] sm:$0xff]  ;;  %s7074_s26 = sshll.u32 %s16178_s14, 4 }
 0x58f   : > { %v8868_v9 = vunpack.i.h.bf16 %v14775_v50  ;;  %v8812_v53 = vunpack.i.l.bf16 %v8811_v62  ;;  %v8867_v42 = vunpack.i.l.bf16 %v14775_v50  ;;  %v8763_v52 = vunpack.i.h.bf16 %v14800_v39  ;;  %v8816_v34 = vpop.permute.xlu1 %8815  ;;  %s359_s11 = scalar_lea.vmem %s15310_s10, %s7074_s26 }
 0x590   : > { %v8903_v32 = vunpack.i.h.bf16 %v8901_v0  ;;  %v8902_v27 = vunpack.i.l.bf16 %v8901_v0  ;;  %v8762_v59 = vunpack.i.l.bf16 %v14800_v39  ;;  %v6687_v63 = vsel %vm2175_vm10, %v6655_v22, %v8898_v16  ;;  %v14974_v54 = vpop.permute.xlu0 %8905 }
 0x591   : > { %v6686_v61 = vsel %vm2175_vm10, %v6654_v3, %v8897_v51  ;;  %v6589_v49 = vsel %vm2698_vm14, %v9256_v13, %v8813_v29  ;;  %v8818_v2 = vunpack.i.h.bf16 %v8816_v34  ;;  %v8817_v50 = vunpack.i.l.bf16 %v8816_v34 }
 0x592   : > { %v6718_v25 = vsel %vm4443_vm8, %v6686_v61, %v8902_v27  ;;  %v6719_v19 = vsel %vm4443_vm8, %v6687_v63, %v8903_v32  ;;  %v6588_v55 = vsel %vm2698_vm14, %v9257_v46, %v8812_v53  ;;  %9160 = vrot.lane.b32.xlu1 %v9159_v37, %s9292_s18  ;;  %v8873_v4 = vunpack.i.h.bf16 %v14816_v20 }
 0x593   : > { %v6750_v18 = vsel %vm2310_vm13, %v6718_v25, %v8847_v41  ;;  %v6751_v39 = vsel %vm2310_vm13, %v6719_v19, %v8848_v8  ;;  %v8872_v31 = vunpack.i.l.bf16 %v14816_v20  ;;  %v6620_v58 = vsel %vm2076_vm7, %v6588_v55, %v8817_v50  ;;  %v8831_v16 = vpop.permute.xlu1 %8830 }
 0x594   : > { %v6621_v44 = vsel %vm2076_vm7, %v6589_v49, %v8818_v2  ;;  %v9293_v21 = vmov 0   ;;  %v6652_v37 = vsel %vm4378_vm6, %v6620_v58, %v8762_v59  ;;  %v6782_v51 = vsel %vm4508_vm9, %v6750_v18, %v8867_v42  ;;  %v14994_v3 = vpop.permute.xlu0 %8915  ;;  %v9258_v58 = vld [vmem:[#allocation3 + $0xe0] sm:$0xff] }
 0x595   : > { %9164 = vset.pattern.permute.xlu0 %v9293_v21  ;;  %9165 = vset.pattern.permute.xlu1 %v9293_v21  ;;  %v6653_v38 = vsel %vm4378_vm6, %v6621_v44, %v8763_v52  ;;  %v6783_v20 = vsel %vm4508_vm9, %v6751_v39, %v8868_v9  ;;  %v8833_v62 = vunpack.i.h.bf16 %v8831_v16  ;;  %v8832_v8 = vunpack.i.l.bf16 %v8831_v16  ;;  %v9259_v21 = vld [vmem:[#allocation3 + $0xd8] sm:$0xff] }
 0x596   : > { %6942 = vperm.xlu0 %9164, %v6939_v33   ;;  %v6814_v41 = vsel %vm4541_vm11, %v6782_v51, %v8872_v31  ;;  %v6815_v29 = vsel %vm4541_vm11, %v6783_v20, %v8873_v4  ;;  %v8807_v22 = vunpack.i.l.bf16 %v14555_v1  ;;  %v6684_v0 = vsel %vm2175_vm10, %v6652_v37, %v8802_v15  ;;  %6950 = vperm.xlu1 %9165, %v6947_v48  }
 0x597   : > { %v6839_v53 = vpack.c.bf16 %v6815_v29, %v6814_v41  ;;  %v6685_v52 = vsel %vm2175_vm10, %v6653_v38, %v8803_v14  ;;  %v6683_v9 = vsel %vm2175_vm10, %v14939_v43, %v8833_v62  ;;  %v6682_v42 = vsel %vm2175_vm10, %v14942_v26, %v8832_v8  ;;  %v8836_v32 = vpop.permute.xlu1 %8835 }
 0x598   : > { %v6851_v1 = vsel %vm4618_vm12, %v6831_v28, 0  ;;  %v15008_v27 = vsel %vm4443_vm8, %v6684_v0, %v8807_v22  ;;  %v15011_v14 = vsel %vm4443_vm8, %v6685_v52, %v8808_v5  ;;  %v8838_v15 = vunpack.i.h.bf16 %v8836_v32  ;;  %v8921_v63 = vpop.permute.xlu0 %8920 }
 0x599   : > { %7212 = vmatprep.subr.msk.bf16.mxu0 %vm4618_vm12, %v6839_v53  ;;  %v8837_v43 = vunpack.i.l.bf16 %v8836_v32  ;;  %v8768_v59 = vunpack.i.h.bf16 %v14856_v60  ;;  %v8767_v26 = vunpack.i.l.bf16 %v14856_v60  ;;  %v8793_v61 = vunpack.i.h.bf16 %v14890_v23 }
 0x59a   : > { %7115 = vmatpush3.bf16.xpose.msra.mxu0 %v6851_v1  ;;  %v8792_v10 = vunpack.i.l.bf16 %v14890_v23  ;;  %v6715_v28 = vsel %vm4443_vm8, %v6683_v9, %v8838_v15  ;;  %v8798_v13 = vunpack.i.h.bf16 %v14924_v45  ;;  %v8797_v5 = vunpack.i.l.bf16 %v14924_v45 }
 0x59b   : > { %v6714_v6 = vsel %vm4443_vm8, %v6682_v42, %v8837_v43  ;;  %v6747_v34 = vsel %vm2310_vm13, %v6715_v28, %v8768_v59  ;;  %v8841_v25 = vpop.permute.xlu1 %8840  ;;  %v8878_v22 = vunpack.i.h.bf16 %v14862_v57  ;;  %v8877_v53 = vunpack.i.l.bf16 %v14862_v57 }
 0x59c   : > { %v6746_v49 = vsel %vm2310_vm13, %v6714_v6, %v8767_v26  ;;  %v6779_v19 = vsel %vm4508_vm9, %v6747_v34, %v8793_v61  ;;  %v15025_v2 = vpop.permute.xlu0 %8925  ;;  %v8843_v51 = vunpack.i.h.bf16 %v8841_v25  ;;  %v8842_v20 = vunpack.i.l.bf16 %v8841_v25 }
 0x59d   : > { %v6778_v60 = vsel %vm4508_vm9, %v6746_v49, %v8792_v10  ;;  %v15031_v50 = vsel %vm4541_vm11, %v6779_v19, %v8798_v13  ;;  %v8883_v42 = vunpack.i.h.bf16 %v14906_v30  ;;  %v8882_v1 = vunpack.i.l.bf16 %v14906_v30 }
 0x59e   : > { %v15028_v23 = vsel %vm4541_vm11, %v6778_v60, %v8797_v5  ;;  %v8923_v57 = vunpack.i.h.bf16 %v8921_v63  ;;  %v8922_v10 = vunpack.i.l.bf16 %v8921_v63  ;;  %v8918_v63 = vunpack.i.h.bf16 %v14994_v3 }
 0x59f   : > { %v6837_v45 = vpack.c.bf16 %v15031_v50, %v15028_v23  ;;  %v8886_v46 = vpop.permute.xlu1 %8885 }
 0x5a0   : > { %v8888_v55 = vunpack.i.h.bf16 %v8886_v46  ;;  %v8887_v18 = vunpack.i.l.bf16 %v8886_v46  ;;  %v15035_v39 = vpop.permute.xlu0 %8930 }
 0x5a2   : > { %v6593_v44 = vsel %vm2698_vm14, %v9258_v58, %v8888_v55  ;;  %v6592_v48 = vsel %vm2698_vm14, %v9259_v21, %v8887_v18  ;;  %v8917_v18 = vunpack.i.l.bf16 %v14994_v3 }
 0x5a3   : > { %v8891_v33 = vpop.permute.xlu1 %8890 }
 0x5a4   : > { %v8893_v4 = vunpack.i.h.bf16 %v8891_v33  ;;  %v8892_v31 = vunpack.i.l.bf16 %v8891_v33  ;;  %v15039_v37 = vpop.permute.xlu0 %8935 }
 0x5a6   : > { %v6624_v38 = vsel %vm2076_vm7, %v6592_v48, %v8892_v31  ;;  %v6625_v16 = vsel %vm2076_vm7, %v6593_v44, %v8893_v4  ;;  %v16169_v31 = vld [vmem:[#allocation27_spill] sm:$0xff] }
 0x5a7   : > { %v15043_v62 = vpop.permute.xlu1 %8910  ;;  %v6656_v8 = vsel %vm4378_vm6, %v6624_v38, %v8842_v20  ;;  %v6657_v41 = vsel %vm4378_vm6, %v6625_v16, %v8843_v51  ;;  %v16170_v58 = vpack.c.bf16 %v14476_v11, %v16169_v31  ;;  %v6659_v38 = vsel %vm4378_vm6, %v14769_v17, %v8918_v63 }
 0x5a8   : > { %v8941_v29 = vpop.permute.xlu0 %8940  ;;  %v6688_v52 = vsel %vm2175_vm10, %v6656_v8, %v8877_v53  ;;  %v6689_v9 = vsel %vm2175_vm10, %v6657_v41, %v8878_v22  ;;  %v6658_v16 = vsel %vm4378_vm6, %v14766_v56, %v8917_v18  ;;  %v8908_v20 = vunpack.i.h.bf16 %v14974_v54  ;;  %v9260_v18 = vld [vmem:[#allocation3 + $0x110] sm:$0xff] }
 0x5a9   : > { %v6720_v15 = vsel %vm4443_vm8, %v6688_v52, %v8882_v1  ;;  %v6721_v43 = vsel %vm4443_vm8, %v6689_v9, %v8883_v42  ;;  %v6854_v44 = vsel %vm4618_vm12, %v16170_v58, 0  ;;  %v8907_v8 = vunpack.i.l.bf16 %v14974_v54 }
 0x5aa   : > { %v6752_v28 = vsel %vm2310_vm13, %v6720_v15, %v8922_v10  ;;  %v6753_v13 = vsel %vm2310_vm13, %v6721_v43, %v8923_v57  ;;  %v8938_v17 = vunpack.i.h.bf16 %v15039_v37  ;;  %v8937_v56 = vunpack.i.l.bf16 %v15039_v37 }
 0x5ab   : > { %v15049_v0 = vpop.permute.xlu1 %8945  ;;  %v8943_v54 = vunpack.i.h.bf16 %v8941_v29 }
 0x5ac   : > { %v8966_v32 = vpop.permute.xlu0 %8965 }
 0x5ad   : > { %v8968_v59 = vunpack.i.h.bf16 %v8966_v32  ;;  %v8967_v26 = vunpack.i.l.bf16 %v8966_v32  ;;  %v8942_v32 = vunpack.i.l.bf16 %v8941_v29 }
 0x5af   : > { %v15057_v61 = vpop.permute.xlu1 %8950  ;;  %v6784_v30 = vsel %vm4508_vm9, %v6752_v28, %v8967_v26  ;;  %v6785_v34 = vsel %vm4508_vm9, %v6753_v13, %v8968_v59  ;;  %v16172_v28 = vld [vmem:[#allocation43_spill] sm:$0xff] }
 0x5b0   : > { %v8971_v6 = vpop.permute.xlu0 %8970 }
 0x5b1   : > { %v8973_v5 = vunpack.i.h.bf16 %v8971_v6  ;;  %v8972_v49 = vunpack.i.l.bf16 %v8971_v6  ;;  %v16171_v6 = vld [vmem:[#allocation32_spill] sm:$0xff] }
 0x5b2   : > { %v16173_v13 = vpack.c.bf16 %v16171_v6, %v16172_v28 }
 0x5b3   : > { %v8956_v25 = vpop.permute.xlu1 %8955  ;;  %v6816_v60 = vsel %vm4541_vm11, %v6784_v30, %v8972_v49  ;;  %v6817_v19 = vsel %vm4541_vm11, %v6785_v34, %v8973_v5 }
 0x5b4   : > { %v6840_v46 = vpack.c.bf16 %v6817_v19, %v6816_v60  ;;  %v8976_v55 = vpop.permute.xlu0 %8975  ;;  %v6857_v29 = vsel %vm4618_vm12, %v16173_v13, 0  ;;  %v8958_v34 = vunpack.i.h.bf16 %v8956_v25  ;;  %v8957_v60 = vunpack.i.l.bf16 %v8956_v25 }
 0x5b5   : > { %v8978_v33 = vunpack.i.h.bf16 %v8976_v55  ;;  %v8977_v4 = vunpack.i.l.bf16 %v8976_v55  ;;  %v8928_v25 = vunpack.i.h.bf16 %v15025_v2 }
 0x5b6   : > { %7213 = vmatprep.subr.msk.bf16.mxu0 %vm4618_vm12, %v6840_v46 }
 0x5b7   : > { %v8961_v21 = vpop.permute.xlu1 %8960  ;;  %7117 = vmatpush3.bf16.xpose.msra.mxu0 %v6854_v44  ;;  %v6691_v41 = vsel %vm2175_vm10, %v6659_v38, %v8978_v33  ;;  %v6690_v11 = vsel %vm2175_vm10, %v6658_v16, %v8977_v4  ;;  %v6597_v33 = vsel %vm2698_vm14, %v9260_v18, %v8958_v34  ;;  %v9261_v4 = vld [vmem:[#allocation3 + $0x108] sm:$0xff]  ;;  %v8927_v38 = vunpack.i.l.bf16 %v15025_v2  ;;  %v16175_v34 = vld [vmem:[#allocation33_spill] sm:$0xff] }
 0x5b8   : > { %v8981_v48 = vpop.permute.xlu0 %8980  ;;  %v8963_v46 = vunpack.i.h.bf16 %v8961_v21  ;;  %v8962_v55 = vunpack.i.l.bf16 %v8961_v21  ;;  %v6596_v31 = vsel %vm2698_vm14, %v9261_v4, %v8957_v60  ;;  %v8913_v21 = vunpack.i.h.bf16 %v15043_v62 }
 0x5b9   : > { %v8983_v51 = vunpack.i.h.bf16 %v8981_v48  ;;  %v8982_v3 = vunpack.i.l.bf16 %v8981_v48  ;;  %v8912_v16 = vunpack.i.l.bf16 %v15043_v62  ;;  %v8947_v2 = vunpack.i.l.bf16 %v15049_v0  ;;  %v9263_v62 = vld [vmem:[#allocation3 + $0x120] sm:$0xff] }
 0x5ba   : > { %v6628_v44 = vsel %vm2076_vm7, %v6596_v31, %v8962_v55  ;;  %v6629_v48 = vsel %vm2076_vm7, %v6597_v33, %v8963_v46 }
 0x5bb   : > { %v15080_v22 = vpop.permute.xlu1 %8990  ;;  %v6722_v53 = vsel %vm4443_vm8, %v6690_v11, %v8982_v3  ;;  %v6723_v52 = vsel %vm4443_vm8, %v6691_v41, %v8983_v51  ;;  %v6660_v3 = vsel %vm4378_vm6, %v6628_v44, %v8912_v16  ;;  %v8933_v41 = vunpack.i.h.bf16 %v15035_v39 }
 0x5bc   : > { %v6754_v9 = vsel %vm2310_vm13, %v6722_v53, %v8907_v8  ;;  %v6755_v42 = vsel %vm2310_vm13, %v6723_v52, %v8908_v20  ;;  %v15088_v1 = vpop.permute.xlu0 %8985  ;;  %v6661_v20 = vsel %vm4378_vm6, %v6629_v48, %v8913_v21  ;;  %v8932_v11 = vunpack.i.l.bf16 %v15035_v39  ;;  %v9262_v52 = vld [vmem:[#allocation3 + $0x128] sm:$0xff] }
 0x5bd   : > { %v6786_v43 = vsel %vm4508_vm9, %v6754_v9, %v8937_v56  ;;  %v6787_v59 = vsel %vm4508_vm9, %v6755_v42, %v8938_v17  ;;  %v8948_v53 = vunpack.i.h.bf16 %v15049_v0  ;;  %v6599_v17 = vsel %vm2698_vm14, %v9262_v52, %v8928_v25 }
 0x5be   : > { %v6818_v26 = vsel %vm4541_vm11, %v6786_v43, %v8942_v32  ;;  %v6819_v57 = vsel %vm4541_vm11, %v6787_v59, %v8943_v54  ;;  %v6598_v56 = vsel %vm2698_vm14, %v9263_v62, %v8927_v38  ;;  %v8953_v9 = vunpack.i.h.bf16 %v15057_v61 }
 0x5bf   : > { %v15090_v15 = vpop.permute.xlu1 %8995  ;;  %v6841_v37 = vpack.c.bf16 %v6819_v57, %v6818_v26  ;;  %v8952_v42 = vunpack.i.l.bf16 %v15057_v61  ;;  %v6692_v32 = vsel %vm2175_vm10, %v6660_v3, %v8947_v2  ;;  %v6693_v43 = vsel %vm2175_vm10, %v6661_v20, %v8948_v53 }
 0x5c0   : > { %v15096_v10 = vpop.permute.xlu0 %9000  ;;  %v8998_v39 = vunpack.i.h.bf16 %v15090_v15  ;;  %v8997_v59 = vunpack.i.l.bf16 %v15090_v15  ;;  %v6630_v28 = vsel %vm2076_vm7, %v6598_v56, %v8932_v11  ;;  %v6631_v61 = vsel %vm2076_vm7, %v6599_v17, %v8933_v41 }
 0x5c1   : > { %7214 = vmatprep.subr.msk.bf16.mxu0 %vm4618_vm12, %v6841_v37  ;;  %v9003_v0 = vunpack.i.h.bf16 %v15096_v10  ;;  %v9002_v26 = vunpack.i.l.bf16 %v15096_v10  ;;  %v8988_v13 = vunpack.i.h.bf16 %v15088_v1  ;;  %v6724_v15 = vsel %vm4443_vm8, %v6692_v32, %v8952_v42 }
 0x5c2   : > { %7119 = vmatpush3.bf16.xpose.msra.mxu0 %v6857_v29  ;;  %v16174_v29 = vld [vmem:[#allocation23_spill] sm:$0xff]  ;;  %v6725_v55 = vsel %vm4443_vm8, %v6693_v43, %v8953_v9  ;;  %v6756_v31 = vsel %vm2310_vm13, %v6724_v15, %v8997_v59  ;;  %v8987_v2 = vunpack.i.l.bf16 %v15088_v1 }
 0x5c3   : > { %v15103_v5 = vpop.permute.xlu1 %9025  ;;  %v16176_v60 = vpack.c.bf16 %v16174_v29, %v16175_v34  ;;  %v6757_v4 = vsel %vm2310_vm13, %v6725_v55, %v8998_v39  ;;  %v6663_v25 = vsel %vm4378_vm6, %v6631_v61, %v9003_v0  ;;  %v6662_v38 = vsel %vm4378_vm6, %v6630_v28, %v9002_v26  ;;  %v9265_v55 = vld [vmem:[#allocation3 + $0x140] sm:$0xff] }
 0x5c4   : > { %v15105_v49 = vpop.permute.xlu0 %9005 }
 0x5c5   : > { %v6860_v46 = vsel %vm4618_vm12, %v16176_v60, 0 }
 0x5c7   : > { %v15107_v30 = vpop.permute.xlu1 %9030 }
 0x5c8   : > { %v15109_v19 = vpop.permute.xlu0 %9010 }
 0x5cb   : > { %v15111_v63 = vpop.permute.xlu1 %9035 }
 0x5cc   : > { %v15115_v58 = vpop.permute.xlu0 %9015  ;;  %v9038_v61 = vunpack.i.h.bf16 %v15111_v63 }
 0x5cd   : > { %v9018_v9 = vunpack.i.h.bf16 %v15115_v58  ;;  %v9017_v42 = vunpack.i.l.bf16 %v15115_v58 }
 0x5cf   : > { %v15123_v51 = vpop.permute.xlu1 %9040 }
 0x5d0   : > { %v15127_v8 = vpop.permute.xlu0 %9020  ;;  %v9043_v34 = vunpack.i.h.bf16 %v15123_v51 }
 0x5d1   : > { %v9023_v43 = vunpack.i.h.bf16 %v15127_v8  ;;  %v9022_v39 = vunpack.i.l.bf16 %v15127_v8  ;;  %v9037_v8 = vunpack.i.l.bf16 %v15111_v63  ;;  %v6863_v63 = vsel %vm4618_vm12, %v6835_v7, 0 }
 0x5d2   : > { %v9028_v7 = vunpack.i.h.bf16 %v15103_v5 }
 0x5d3   : > { %v9046_v54 = vpop.permute.xlu1 %9045 }
 0x5d4   : > { %v9048_v57 = vunpack.i.h.bf16 %v9046_v54  ;;  %v9047_v37 = vunpack.i.l.bf16 %v9046_v54  ;;  %v9056_v6 = vpop.permute.xlu0 %9055 }
 0x5d5   : > { %v9058_v18 = vunpack.i.h.bf16 %v9056_v6  ;;  %v9057_v10 = vunpack.i.l.bf16 %v9056_v6 }
 0x5d6   : > { %v6789_v21 = vsel %vm4508_vm9, %v6757_v4, %v9048_v57  ;;  %v6788_v16 = vsel %vm4508_vm9, %v6756_v31, %v9047_v37  ;;  %v8993_v31 = vunpack.i.h.bf16 %v15080_v22 }
 0x5d7   : > { %v9051_v33 = vpop.permute.xlu1 %9050  ;;  %v6695_v52 = vsel %vm2175_vm10, %v6663_v25, %v9058_v18  ;;  %v6694_v17 = vsel %vm2175_vm10, %v6662_v38, %v9057_v10  ;;  %v6601_v18 = vsel %vm2698_vm14, %v9265_v55, %v9038_v61  ;;  %v9027_v25 = vunpack.i.l.bf16 %v15103_v5 }
 0x5d8   : > { %v9053_v44 = vunpack.i.h.bf16 %v9051_v33  ;;  %v9052_v48 = vunpack.i.l.bf16 %v9051_v33  ;;  %v9061_v3 = vpop.permute.xlu0 %9060  ;;  %v6633_v4 = vsel %vm2076_vm7, %v6601_v18, %v9043_v34  ;;  %v9008_v38 = vunpack.i.h.bf16 %v15105_v49 }
 0x5d9   : > { %v9063_v11 = vunpack.i.h.bf16 %v9061_v3  ;;  %v9062_v53 = vunpack.i.l.bf16 %v9061_v3  ;;  %v6665_v12 = vsel %vm4378_vm6, %v6633_v4, %v8993_v31  ;;  %v9032_v3 = vunpack.i.l.bf16 %v15107_v30 }
 0x5da   : > { %v6820_v20 = vsel %vm4541_vm11, %v6788_v16, %v9052_v48  ;;  %v6821_v41 = vsel %vm4541_vm11, %v6789_v21, %v9053_v44  ;;  %v9007_v21 = vunpack.i.l.bf16 %v15105_v49  ;;  %v9013_v16 = vunpack.i.h.bf16 %v15109_v19 }
 0x5db   : > { %v6842_v62 = vpack.c.bf16 %v6821_v41, %v6820_v20  ;;  %v15163_v56 = vpop.permute.xlu1 %9070  ;;  %v6726_v54 = vsel %vm4443_vm8, %v6694_v17, %v9062_v53  ;;  %v6727_v32 = vsel %vm4443_vm8, %v6695_v52, %v9063_v11  ;;  %v6697_v11 = vsel %vm2175_vm10, %v6665_v12, %v9028_v7  ;;  %v9266_v52 = vld [vmem:[#allocation3 + $0x158] sm:$0xff] }
 0x5dc   : > { %v6758_v1 = vsel %vm2310_vm13, %v6726_v54, %v8987_v2  ;;  %v6759_v59 = vsel %vm2310_vm13, %v6727_v32, %v8988_v13  ;;  %v15173_v0 = vpop.permute.xlu0 %9065  ;;  %v9042_v13 = vunpack.i.l.bf16 %v15123_v51  ;;  %v8992_v51 = vunpack.i.l.bf16 %v15080_v22 }
 0x5dd   : > { %7215 = vmatprep.subr.msk.bf16.mxu0 %vm4618_vm12, %v6842_v62  ;;  %v6790_v26 = vsel %vm4508_vm9, %v6758_v1, %v9017_v42  ;;  %v6791_v58 = vsel %vm4508_vm9, %v6759_v59, %v9018_v9  ;;  %v9012_v22 = vunpack.i.l.bf16 %v15109_v19  ;;  %v6603_v17 = vsel %vm2698_vm14, %v9266_v52, %v9008_v38  ;;  %v9267_v62 = vld [vmem:[#allocation3 + $0x150] sm:$0xff] }
 0x5de   : > { %7121 = vmatpush3.bf16.xpose.msra.mxu0 %v6860_v46  ;;  %v6822_v37 = vsel %vm4541_vm11, %v6790_v26, %v9022_v39  ;;  %v6823_v6 = vsel %vm4541_vm11, %v6791_v58, %v9023_v43  ;;  %v9264_v46 = vld [vmem:[#allocation3 + $0x138] sm:$0xff]  ;;  %v6602_v5 = vsel %vm2698_vm14, %v9267_v62, %v9007_v21  ;;  %v9033_v9 = vunpack.i.h.bf16 %v15107_v30 }
 0x5df   : > { %v9076_v57 = vpop.permute.xlu1 %9075  ;;  %v6843_v28 = vpack.c.bf16 %v6823_v6, %v6822_v37  ;;  %v6600_v15 = vsel %vm2698_vm14, %v9264_v46, %v9037_v8  ;;  %v6634_v54 = vsel %vm2076_vm7, %v6602_v5, %v9012_v22  ;;  %v6635_v32 = vsel %vm2076_vm7, %v6603_v17, %v9013_v16  ;;  %v9269_v5 = vld [vmem:[#allocation3 + $0x168] sm:$0xff] }
 0x5e0   : > { %v9081_v29 = vpop.permute.xlu0 %9080  ;;  %v6632_v10 = vsel %vm2076_vm7, %v6600_v15, %v9042_v13  ;;  %v9078_v53 = vunpack.i.h.bf16 %v9076_v57  ;;  %v9077_v49 = vunpack.i.l.bf16 %v9076_v57  ;;  %v9068_v39 = vunpack.i.h.bf16 %v15173_v0 }
 0x5e1   : > { %7216 = vmatprep.subr.msk.bf16.mxu0 %vm4618_vm12, %v6843_v28  ;;  %v6664_v48 = vsel %vm4378_vm6, %v6632_v10, %v8992_v51  ;;  %v9083_v2 = vunpack.i.h.bf16 %v9081_v29  ;;  %v9082_v19 = vunpack.i.l.bf16 %v9081_v29  ;;  %v6729_v1 = vsel %vm4443_vm8, %v6697_v11, %v9033_v9 }
 0x5e2   : > { %v6696_v20 = vsel %vm2175_vm10, %v6664_v48, %v9027_v25  ;;  %v9067_v57 = vunpack.i.l.bf16 %v15173_v0  ;;  %v6761_v37 = vsel %vm2310_vm13, %v6729_v1, %v9078_v53  ;;  %v9073_v52 = vunpack.i.h.bf16 %v15163_v56 }
 0x5e3   : > { %v15185_v60 = vpop.permute.xlu1 %9095  ;;  %v6728_v43 = vsel %vm4443_vm8, %v6696_v20, %v9032_v3  ;;  %v6667_v6 = vsel %vm4378_vm6, %v6635_v32, %v9083_v2  ;;  %v6666_v8 = vsel %vm4378_vm6, %v6634_v54, %v9082_v19  ;;  %v6866_v17 = vsel %vm4618_vm12, %v6836_v47, 0 }
 0x5e4   : > { %v15190_v33 = vpop.permute.xlu0 %9085  ;;  %v6760_v30 = vsel %vm2310_vm13, %v6728_v43, %v9077_v49  ;;  %v9072_v47 = vunpack.i.l.bf16 %v15163_v56 }
 0x5e5   : > { %v9088_v28 = vunpack.i.h.bf16 %v15190_v33  ;;  %v9087_v34 = vunpack.i.l.bf16 %v15190_v33 }
 0x5e6   : > { %7123 = vmatpush3.bf16.xpose.msra.mxu0 %v6863_v63 }
 0x5e7   : > { %v15199_v44 = vpop.permute.xlu1 %9100 }
 0x5e8   : > { %v15206_v24 = vpop.permute.xlu0 %9090  ;;  %v9103_v46 = vunpack.i.h.bf16 %v15199_v44  ;;  %v9102_v0 = vunpack.i.l.bf16 %v15199_v44 }
 0x5e9   : > { %v9093_v18 = vunpack.i.h.bf16 %v15206_v24  ;;  %v9092_v20 = vunpack.i.l.bf16 %v15206_v24 }
 0x5ea   : > { %v6604_v9 = vsel %vm2698_vm14, %v9269_v5, %v9102_v0 }
 0x5eb   : > { %v15213_v41 = vpop.permute.xlu1 %9105 }
 0x5ec   : > { %v9126_v42 = vpop.permute.xlu0 %9125  ;;  %v9108_v7 = vunpack.i.h.bf16 %v15213_v41  ;;  %v9107_v16 = vunpack.i.l.bf16 %v15213_v41  ;;  %v9268_v41 = vld [vmem:[#allocation3 + $0x170] sm:$0xff] }
 0x5ed   : > { %v9128_v59 = vunpack.i.h.bf16 %v9126_v42  ;;  %v9127_v26 = vunpack.i.l.bf16 %v9126_v42  ;;  %v6605_v62 = vsel %vm2698_vm14, %v9268_v41, %v9103_v46 }
 0x5ee   : > { %v6636_v54 = vsel %vm2076_vm7, %v6604_v9, %v9107_v16  ;;  %v6637_v32 = vsel %vm2076_vm7, %v6605_v62, %v9108_v7 }
 0x5ef   : > { %v9111_v58 = vpop.permute.xlu1 %9110  ;;  %v6699_v10 = vsel %vm2175_vm10, %v6667_v6, %v9128_v59  ;;  %v6698_v63 = vsel %vm2175_vm10, %v6666_v8, %v9127_v26  ;;  %v9098_v26 = vunpack.i.h.bf16 %v15185_v60 }
 0x5f0   : > { %v9113_v61 = vunpack.i.h.bf16 %v9111_v58  ;;  %v9112_v13 = vunpack.i.l.bf16 %v9111_v58  ;;  %v9097_v58 = vunpack.i.l.bf16 %v15185_v60 }
 0x5f2   : > { %v9131_v29 = vpop.permute.xlu0 %9130  ;;  %v6793_v33 = vsel %vm4508_vm9, %v6761_v37, %v9113_v61  ;;  %v6792_v38 = vsel %vm4508_vm9, %v6760_v30, %v9112_v13  ;;  %v6669_v37 = vsel %vm4378_vm6, %v6637_v32, %v9073_v52 }
 0x5f3   : > { %v9133_v15 = vunpack.i.h.bf16 %v9131_v29  ;;  %v9132_v55 = vunpack.i.l.bf16 %v9131_v29 }
 0x5f4   : > { %v9116_v51 = vpop.permute.xlu1 %9115 }
 0x5f5   : > { %v6730_v4 = vsel %vm4443_vm8, %v6698_v63, %v9132_v55  ;;  %v6731_v31 = vsel %vm4443_vm8, %v6699_v10, %v9133_v15  ;;  %v9118_v48 = vunpack.i.h.bf16 %v9116_v51  ;;  %v9117_v25 = vunpack.i.l.bf16 %v9116_v51 }
 0x5f6   : > { %v6762_v21 = vsel %vm2310_vm13, %v6730_v4, %v9067_v57  ;;  %v6763_v44 = vsel %vm2310_vm13, %v6731_v31, %v9068_v39  ;;  %v9136_v12 = vpop.permute.xlu0 %9135  ;;  %v6668_v57 = vsel %vm4378_vm6, %v6636_v54, %v9072_v47  ;;  %v6701_v51 = vsel %vm2175_vm10, %v6669_v37, %v9098_v26 }
 0x5f7   : > { %v6824_v22 = vsel %vm4541_vm11, %v6792_v38, %v9117_v25  ;;  %v6825_v3 = vsel %vm4541_vm11, %v6793_v33, %v9118_v48  ;;  %v6794_v49 = vsel %vm4508_vm9, %v6762_v21, %v9087_v34  ;;  %v6795_v2 = vsel %vm4508_vm9, %v6763_v44, %v9088_v28 }
 0x5f8   : > { %v6844_v11 = vpack.c.bf16 %v6825_v3, %v6824_v22  ;;  %v9121_v53 = vpop.permute.xlu1 %9120  ;;  %v6826_v19 = vsel %vm4541_vm11, %v6794_v49, %v9092_v20  ;;  %v6827_v42 = vsel %vm4541_vm11, %v6795_v2, %v9093_v18  ;;  %v9138_v40 = vunpack.i.h.bf16 %v9136_v12 }
 0x5f9   : > { %v9137_v35 = vunpack.i.l.bf16 %v9136_v12  ;;  %v6845_v59 = vpack.c.bf16 %v6827_v42, %v6826_v19  ;;  %v9123_v61 = vunpack.i.h.bf16 %v9121_v53  ;;  %v9122_v13 = vunpack.i.l.bf16 %v9121_v53 }
 0x5fa   : > { %v9146_v24 = vpop.permute.xlu0 %9145  ;;  %7217 = vmatprep.subr.msk.bf16.mxu0 %vm4618_vm12, %v6844_v11  ;;  %v6749_v6 = vsel %vm2310_vm13, %v15011_v14, %v9138_v40  ;;  %v6700_v63 = vsel %vm2175_vm10, %v6668_v57, %v9097_v58 }
 0x5fb   : > { %7125 = vmatpush3.bf16.xpose.msra.mxu0 %v6866_v17  ;;  %v9148_v43 = vunpack.i.h.bf16 %v9146_v24  ;;  %v9147_v39 = vunpack.i.l.bf16 %v9146_v24  ;;  %v6748_v56 = vsel %vm2310_vm13, %v15008_v27, %v9137_v35  ;;  %v6869_v27 = vsel %vm4618_vm12, %v6837_v45, 0 }
 0x5fc   : > { %v9141_v1 = vpop.permute.xlu1 %9140  ;;  %7218 = vmatprep.subr.msk.bf16.mxu0 %vm4618_vm12, %v6845_v59  ;;  %v6732_v4 = vsel %vm4443_vm8, %v6700_v63, %v9122_v13  ;;  %v6733_v31 = vsel %vm4443_vm8, %v6701_v51, %v9123_v61 }
 0x5fd   : > { %v6780_v29 = vsel %vm4508_vm9, %v6748_v56, %v9147_v39  ;;  %v6781_v60 = vsel %vm4508_vm9, %v6749_v6, %v9148_v43  ;;  %v9143_v46 = vunpack.i.h.bf16 %v9141_v1  ;;  %v9142_v15 = vunpack.i.l.bf16 %v9141_v1 }
 0x5fe   : > { %v9156_v30 = vpop.permute.xlu0 %9155 }
 0x5ff   : > { %v9158_v8 = vunpack.i.h.bf16 %v9156_v30  ;;  %v9157_v28 = vunpack.i.l.bf16 %v9156_v30  ;;  %v6764_v25 = vsel %vm2310_vm13, %v6732_v4, %v9142_v15  ;;  %v6765_v33 = vsel %vm2310_vm13, %v6733_v31, %v9143_v46 }
 0x600   : > { %v9151_v34 = vpop.permute.xlu1 %9150 }
 0x601   : > { %v6812_v55 = vsel %vm4541_vm11, %v6780_v29, %v9157_v28  ;;  %v6813_v0 = vsel %vm4541_vm11, %v6781_v60, %v9158_v8  ;;  %v9153_v18 = vunpack.i.h.bf16 %v9151_v34  ;;  %v9152_v14 = vunpack.i.l.bf16 %v9151_v34 }
 0x602   : > { %v6838_v10 = vpack.c.bf16 %v6813_v0, %v6812_v55 }
 0x603   : > { %7127 = vmatpush3.bf16.xpose.msra.mxu0 %v6869_v27  ;;  %v6796_v23 = vsel %vm4508_vm9, %v6764_v25, %v9152_v14  ;;  %v6797_v50 = vsel %vm4508_vm9, %v6765_v33, %v9153_v18 }
 0x604   : > { %v9161_v48 = vpop.permute.xlu1 %9160  ;;  %v6872_v7 = vsel %vm4618_vm12, %v6838_v10, 0 }
 0x605   : > { %v9163_v38 = vunpack.i.h.bf16 %v9161_v48  ;;  %v9162_v21 = vunpack.i.l.bf16 %v9161_v48 }
 0x607   : > { %v6828_v45 = vsel %vm4541_vm11, %v6796_v23, %v9162_v21  ;;  %v6829_v44 = vsel %vm4541_vm11, %v6797_v50, %v9163_v38 }
 0x608   : > { %v6846_v12 = vpack.c.bf16 %v6829_v44, %v6828_v45 }
 0x60a   : > { %7219 = vmatprep.subr.msk.bf16.mxu0 %vm4618_vm12, %v6846_v12 }
 0x60b   : > { %7129 = vmatpush3.bf16.xpose.msra.mxu0 %v6872_v7 }
 0x612   : > { %7131 = vmatmul.mubr.msk.bf16.vlgmr.msra.gmra.mrb[32].mxu0 %vm4618_vm12, %v14949_v36 }
 0x615   : > { %v6943_v16 = vpop.permute.xlu0 %6942  ;;  %v6951_v3 = vpop.permute.xlu1 %6950 }
 0x6e5   : > { %v6932_v22 = vpop.f32.mrb[32].mxu0 }
 0x6e6   : > { %v6945_v20 = vmul.f32 %v6943_v16, %v6932_v22  ;;  %v6934_v11 = vpop.f32.mrb[33].mxu0 }
 0x6e7   : > { %v6946_v53 = vmul.f32 %v6943_v16, %v6934_v11  ;;  %v6936_v49 = vpop.f32.mrb[34].mxu0 }
 0x6e8   : > { %v6953_v2 = vadd.f32 %v6951_v3, %v6945_v20  ;;  %v6937_v52 = vpop.f32.mrb[35].mxu0 }
 0x6e9   : > { %v6954_v17 = vadd.f32 %v6951_v3, %v6946_v53 }
 0x6ea   : > { %vm6955_vm3 = vcmp.ge.f32.partialorder %v6953_v2, 0.0  ;;  %v6957_v41 = vmul.f32 0.1, %v6953_v2 }
 0x6eb   : > { %vm6956_vm4 = vcmp.ge.f32.partialorder %v6954_v17, 0.0  ;;  %v6958_v62 = vmul.f32 0.1, %v6954_v17 }
 0x6ec   : > { %v6959_v36 = vsel %vm6955_vm3, %v6953_v2, %v6957_v41 }
 0x6ed   : > { %v6960_v5 = vsel %vm6956_vm4, %v6954_v17, %v6958_v62  ;;  %6961 = vst [vmem:[%s359_s11] sm:$0xff] %v6959_v36 }
 0x6ee   : > { %6962 = vst [vmem:[%s359_s11 + $0x8] sm:$0xff] %v6960_v5 }
 0x6ef PF: > { %s20_s13 = sadd.s32 1, %s9276_s13  }
 0x6f0   : > { %p17_p4 = scmp.ge.s32.totalorder %s20_s13, 4  }
 0x6f2   :  { %19 = sbr.rel (!%p17_p4) target bundleno = 1 (0x1), region = 96 }

</bundles_post_ra>
